<compile_context>
chip_gen: v7x
topology: tpu7x:2x2x1
jax: 0.10.0
libtpu: 0.0.40
codegen_flags: <defaults>
</compile_context>

<pallas_src>
import functools
import math

import jax
import jax.numpy as jnp
from jax.experimental import pallas as pl
from jax.experimental.pallas import tpu as pltpu


# --------------------------- in-kernel building blocks ---------------------------

def _layernorm(x, gamma, beta, eps=1e-5):
    # x: (L, E); gamma/beta: (1, E)
    mean = jnp.mean(x, axis=-1, keepdims=True)
    xc = x - mean
    var = jnp.mean(xc * xc, axis=-1, keepdims=True)
    return xc * jax.lax.rsqrt(var + eps) * gamma + beta


def _mha_core(q, k, v, wo, num_heads, mask, scale):
    """Multi-head attention core on 2D single-sequence operands.

    q: (Lq, E), k/v: (Lk, E), wo: (E, E).  Returns (Lq, E) == concat-heads @ wo
    (computed as sum_h o_h @ wo[h*dh:(h+1)*dh], avoiding in-kernel concatenation).
    The caller adds the output-projection bias.
    """
    E = q.shape[-1]
    dh = E // num_heads
    out = None
    for h in range(num_heads):
        qh = q[:, h * dh:(h + 1) * dh]
        kh = k[:, h * dh:(h + 1) * dh]
        vh = v[:, h * dh:(h + 1) * dh]
        # scores = qh @ kh^T  (contraction on the head dim, no explicit transpose op)
        s = jax.lax.dot_general(qh, kh, (((1,), (1,)), ((), ())),
                                preferred_element_type=jnp.float32) * scale
        if mask is not None:
            s = s + mask
        m = jnp.max(s, axis=-1, keepdims=True)
        p = jnp.exp(s - m)
        denom = jnp.sum(p, axis=-1, keepdims=True)
        p = p * pl.reciprocal(denom, approx=True)          # EUP slot, ~free
        oh = jnp.dot(p, vh, preferred_element_type=jnp.float32)
        contrib = jnp.dot(oh, wo[h * dh:(h + 1) * dh, :],
                          preferred_element_type=jnp.float32)
        out = contrib if out is None else out + contrib
    return out


def _decoder_layer(x, mask, mem_k, mem_v, W, num_heads, scale):
    """Post-norm TransformerDecoderLayer on a single (L, E) sequence (eval mode)."""
    E = x.shape[-1]
    # self-attention (fused QKV projection)
    qkv = jnp.dot(x, W["sa_wqkv"], preferred_element_type=jnp.float32) + W["sa_bqkv"]
    sa = _mha_core(qkv[:, :E], qkv[:, E:2 * E], qkv[:, 2 * E:], W["sa_wo"],
                   num_heads, mask, scale) + W["sa_bo"]
    x = _layernorm(x + sa, W["n1g"], W["n1b"])
    # cross-attention (K/V of memory precomputed & passed in)
    q = jnp.dot(x, W["ca_wq"], preferred_element_type=jnp.float32) + W["ca_bq"]
    ca = _mha_core(q, mem_k, mem_v, W["ca_wo"], num_heads, None, scale) + W["ca_bo"]
    x = _layernorm(x + ca, W["n2g"], W["n2b"])
    # feed-forward
    h = jnp.maximum(jnp.dot(x, W["w1"], preferred_element_type=jnp.float32) + W["b1"], 0.0)
    ff = jnp.dot(h, W["w2"], preferred_element_type=jnp.float32) + W["b2"]
    x = _layernorm(x + ff, W["n3g"], W["n3b"])
    return x


# ------------------------------- fused kernels -----------------------------------

def _encoder_answer_kernel(img_ref, qemb_ref, cls_ref, pos_ref,
                           wimg_ref, bimg_ref,
                           wqkv_ref, bqkv_ref, wo_ref, bo_ref,
                           w1_ref, b1_ref, w2_ref, b2_ref,
                           g1_ref, be1_ref, g2_ref, be2_ref,
                           aw1_ref, ab1_ref, aw2_ref, ab2_ref,
                           mem_ref, ans_ref, asm_ref,
                           *, num_heads, batch, num_img_tokens, q_len):
    B, T, Lq = batch, num_img_tokens, q_len
    S = 1 + T + Lq
    E = cls_ref.shape[1]
    dh = E // num_heads
    scale = 1.0 / math.sqrt(dh)

    wimg = wimg_ref[...]; bimg = bimg_ref[...]
    wqkv = wqkv_ref[...]; bqkv = bqkv_ref[...]
    wo = wo_ref[...]; bo = bo_ref[...]
    w1 = w1_ref[...]; b1 = b1_ref[...]
    w2 = w2_ref[...]; b2 = b2_ref[...]
    g1 = g1_ref[...]; be1 = be1_ref[...]
    g2 = g2_ref[...]; be2 = be2_ref[...]
    aw1 = aw1_ref[...]; ab1 = ab1_ref[...]
    aw2 = aw2_ref[...]; ab2 = ab2_ref[...]
    pos = pos_ref[...]
    cls = cls_ref[...]

    for b in range(B):
        # assemble [CLS; proj(image); question_emb] + positional encoding for batch b
        imgb = img_ref[b * T:(b + 1) * T, :]
        asm_ref[0:1, :] = cls + pos[0:1, :]
        asm_ref[1:1 + T, :] = (jnp.dot(imgb, wimg, preferred_element_type=jnp.float32)
                               + bimg + pos[1:1 + T, :])
        asm_ref[1 + T:S, :] = qemb_ref[b * Lq:(b + 1) * Lq, :] + pos[1 + T:S, :]
        x = asm_ref[...]                                      # (S, E) f32

        # --- one post-norm TransformerEncoderLayer (dropout == identity) ---
        qkv = jnp.dot(x, wqkv, preferred_element_type=jnp.float32) + bqkv
        sa = _mha_core(qkv[:, :E], qkv[:, E:2 * E], qkv[:, 2 * E:], wo,
                       num_heads, None, scale) + bo
        x = _layernorm(x + sa, g1, be1)
        h = jnp.maximum(jnp.dot(x, w1, preferred_element_type=jnp.float32) + b1, 0.0)
        ff = jnp.dot(h, w2, preferred_element_type=jnp.float32) + b2
        x = _layernorm(x + ff, g2, be2)
        mem_ref[b * S:(b + 1) * S, :] = x

        # --- answer classifier on the CLS position ---
        clsb = x[0:1, :]
        hb = jnp.maximum(jnp.dot(clsb, aw1, preferred_element_type=jnp.float32) + ab1, 0.0)
        ans_ref[b:b + 1, :] = jnp.dot(hb, aw2, preferred_element_type=jnp.float32) + ab2


def _decoder_generate_kernel(mem_ref, emb_ref, pos_ref, mask_ref,
                             sa_wqkv_ref, sa_bqkv_ref, sa_wo_ref, sa_bo_ref,
                             ca_wq_ref, ca_bq_ref, ca_wkv_ref, ca_bkv_ref,
                             ca_wo_ref, ca_bo_ref,
                             w1_ref, b1_ref, w2_ref, b2_ref,
                             n1g_ref, n1b_ref, n2g_ref, n2b_ref, n3g_ref, n3b_ref,
                             pw_ref, pb_ref,
                             out_ref,
                             *, num_heads, num_layers, batch, mem_len, buf_len,
                             seq_len, special_token_id):
    B, S, L = batch, mem_len, buf_len
    PV, E = emb_ref.shape
    dh = E // num_heads
    scale = 1.0 / math.sqrt(dh)

    emb = emb_ref[...]
    pos = pos_ref[...]
    mask = mask_ref[...]
    pw = pw_ref[...]
    pb = pb_ref[...]

    # Per-layer weights: loaded once, VMEM/vreg-resident for the whole generation.
    Wl = []
    for l in range(num_layers):
        Wl.append(dict(
            sa_wqkv=sa_wqkv_ref[l], sa_bqkv=sa_bqkv_ref[l],
            sa_wo=sa_wo_ref[l], sa_bo=sa_bo_ref[l],
            ca_wq=ca_wq_ref[l], ca_bq=ca_bq_ref[l],
            ca_wo=ca_wo_ref[l], ca_bo=ca_bo_ref[l],
            w1=w1_ref[l], b1=b1_ref[l], w2=w2_ref[l], b2=b2_ref[l],
            n1g=n1g_ref[l], n1b=n1b_ref[l], n2g=n2g_ref[l], n2b=n2b_ref[l],
            n3g=n3g_ref[l], n3b=n3b_ref[l]))

    # Cross-attention K/V of the fixed encoder memory: computed ONCE per layer/batch
    # (hoisted out of the decode loop), then reused by every decode step.
    mem_kv = []
    for l in range(num_layers):
        wkv = ca_wkv_ref[l]
        bkv = ca_bkv_ref[l]
        per_b = []
        for b in range(B):
            mb = mem_ref[b * S:(b + 1) * S, :]
            kv = jnp.dot(mb, wkv, preferred_element_type=jnp.float32) + bkv
            per_b.append((kv[:, :E], kv[:, E:]))
        mem_kv.append(per_b)

    row_oh = jax.lax.broadcasted_iota(jnp.int32, (B * L, PV), 0)
    col_oh = jax.lax.broadcasted_iota(jnp.int32, (B * L, PV), 1)
    prow = jax.lax.broadcasted_iota(jnp.int32, (B, seq_len), 0)
    pcol = jax.lax.broadcasted_iota(jnp.int32, (B, seq_len), 1)
    pos_iota = jax.lax.broadcasted_iota(jnp.int32, (L, 1), 0)
    lane_pv = jax.lax.broadcasted_iota(jnp.int32, (1, PV), 1)
    lane_pv_f = lane_pv.astype(jnp.float32)

    # One-hot token buffer: row b*L + p holds the one-hot of the token at position p.
    # Position 0 = SOS; un-generated positions stay all-zero (== padding embedding,
    # and they are causally masked anyway so they never influence the read position).
    onehot0 = jnp.zeros((B * L, PV), jnp.float32)
    for b in range(B):
        onehot0 = onehot0 + ((row_oh == b * L) &
                             (col_oh == special_token_id)).astype(jnp.float32)
    ids0 = jnp.zeros((B, seq_len), jnp.int32)

    def step(t, carry):
        onehot, ids = carry
        for b in range(B):
            oh_b = onehot[b * L:(b + 1) * L, :]
            # embedding lookup as a one-hot matmul (no gather needed in-kernel)
            x = jnp.dot(oh_b, emb, preferred_element_type=jnp.float32) + pos
            for l in range(num_layers):
                mk, mv = mem_kv[l][b]
                x = _decoder_layer(x, mask, mk, mv, Wl[l], num_heads, scale)
            # read the decoder output at position t (the current last valid position)
            sel = (pos_iota == t).astype(jnp.float32)             # (L, 1)
            x_last = jnp.sum(x * sel, axis=0, keepdims=True)      # (1, E)
            logits = jnp.dot(x_last, pw, preferred_element_type=jnp.float32) + pb
            # greedy argmax (first occurrence on ties, like torch.max)
            m = jnp.max(logits, axis=-1, keepdims=True)
            cand = jnp.where(logits == m, lane_pv_f, float(PV))
            idx = jnp.min(cand, axis=-1, keepdims=True).astype(jnp.int32)   # (1, 1)
            # append the new token at buffer position t+1 and record it in the output ids
            onehot = onehot + ((row_oh == (b * L + t + 1)) &
                               (col_oh == idx)).astype(jnp.float32)
            ids = ids + idx * ((prow == b) & (pcol == t)).astype(jnp.int32)
        return onehot, ids

    _, ids = jax.lax.fori_loop(0, seq_len, step, (onehot0, ids0))
    out_ref[...] = ids


# ------------------------------- model glue --------------------------------------

def positional_encoding_table(max_len, d_model):
    position = jnp.arange(max_len, dtype=jnp.float32)[:, None]
    div_term = jnp.exp(
        jnp.arange(0, d_model, 2, dtype=jnp.float32) * (-math.log(10000.0) / d_model))
    pe = jnp.zeros((max_len, d_model), jnp.float32)
    pe = pe.at[:, 0::2].set(jnp.sin(position * div_term))
    pe = pe.at[:, 1::2].set(jnp.cos(position * div_term))
    return pe[:, None, :]  # (max_len, 1, d_model)


def causal_mask_additive(sz, neg=-1e9):
    # same semantics as generate_square_subsequent_mask (0 on/below diag, -inf above);
    # a large negative finite value is used for numerical robustness.
    i = jnp.arange(sz)[:, None]
    j = jnp.arange(sz)[None, :]
    return jnp.where(j <= i, 0.0, neg).astype(jnp.float32)


def vqa_forward(params, image_features, questions, cfg):
    B, T, F = image_features.shape
    E = cfg["embedding_dim"]
    H = cfg["num_heads"]
    C = cfg["num_classes"]
    Lq = questions.shape[1]
    S = 1 + T + Lq
    seq_len = cfg["program_seq_len"]
    Lbuf = seq_len + 1

    vmem = pl.BlockSpec(memory_space=pltpu.MemorySpace.VMEM)

    # ---------------- plain-JAX glue: gather + weight fusion/stacking ----------------
    qemb = jnp.take(params["embedding"], questions, axis=0).reshape(B * Lq, E)
    img_flat = image_features.reshape(B * T, F)
    cls2 = params["cls_token"].reshape(1, E)
    pos_enc = params["pos_enc_pe"][:S, 0, :]                       # (S, E)

    enc = params["encoder"][0]        # spec: nn.TransformerEncoder(num_layers=1)
    ea = enc["self_attn"]
    enc_wqkv = jnp.concatenate([ea["wq"], ea["wk"], ea["wv"]], axis=1)   # (E, 3E)
    enc_bqkv = jnp.concatenate([ea["bq"], ea["bk"], ea["bv"]], axis=1)   # (1, 3E)

    enc_inputs = [
        img_flat, qemb, cls2, pos_enc,
        params["image_proj_w"], params["image_proj_b"],
        enc_wqkv, enc_bqkv, ea["wo"], ea["bo"],
        enc["lin1_w"], enc["lin1_b"], enc["lin2_w"], enc["lin2_b"],
        enc["norm1"]["gamma"], enc["norm1"]["beta"],
        enc["norm2"]["gamma"], enc["norm2"]["beta"],
        params["ans_w1"], params["ans_b1"], params["ans_w2"], params["ans_b2"],
    ]

    memory, answer = pl.pallas_call(
        functools.partial(_encoder_answer_kernel, num_heads=H, batch=B,
                          num_img_tokens=T, q_len=Lq),
        out_shape=(jax.ShapeDtypeStruct((B * S, E), jnp.float32),
                   jax.ShapeDtypeStruct((B, C), jnp.float32)),
        in_specs=[vmem] * len(enc_inputs),
        out_specs=(vmem, vmem),
        scratch_shapes=[pltpu.VMEM((S, E), jnp.float32)],
    )(*enc_inputs)

    # ---------------- fused greedy program generation (one kernel) -------------------
    dec = params["decoder"]
    st = lambda f: jnp.stack([f(lp) for lp in dec], axis=0)
    sa_wqkv = st(lambda lp: jnp.concatenate(
        [lp["self_attn"]["wq"], lp["self_attn"]["wk"], lp["self_attn"]["wv"]], axis=1))
    sa_bqkv = st(lambda lp: jnp.concatenate(
        [lp["self_attn"]["bq"], lp["self_attn"]["bk"], lp["self_attn"]["bv"]], axis=1))
    sa_wo = st(lambda lp: lp["self_attn"]["wo"])
    sa_bo = st(lambda lp: lp["self_attn"]["bo"])
    ca_wq = st(lambda lp: lp["cross_attn"]["wq"])
    ca_bq = st(lambda lp: lp["cross_attn"]["bq"])
    ca_wkv = st(lambda lp: jnp.concatenate(
        [lp["cross_attn"]["wk"], lp["cross_attn"]["wv"]], axis=1))
    ca_bkv = st(lambda lp: jnp.concatenate(
        [lp["cross_attn"]["bk"], lp["cross_attn"]["bv"]], axis=1))
    ca_wo = st(lambda lp: lp["cross_attn"]["wo"])
    ca_bo = st(lambda lp: lp["cross_attn"]["bo"])
    d_w1 = st(lambda lp: lp["lin1_w"]); d_b1 = st(lambda lp: lp["lin1_b"])
    d_w2 = st(lambda lp: lp["lin2_w"]); d_b2 = st(lambda lp: lp["lin2_b"])
    n1g = st(lambda lp: lp["norm1"]["gamma"]); n1b = st(lambda lp: lp["norm1"]["beta"])
    n2g = st(lambda lp: lp["norm2"]["gamma"]); n2b = st(lambda lp: lp["norm2"]["beta"])
    n3g = st(lambda lp: lp["norm3"]["gamma"]); n3b = st(lambda lp: lp["norm3"]["beta"])

    pos_dec = params["pos_dec_pe"][:Lbuf, 0, :]                    # (Lbuf, E)
    tgt_mask = causal_mask_additive(Lbuf)

    dec_inputs = [
        memory, params["prog_embedding"], pos_dec, tgt_mask,
        sa_wqkv, sa_bqkv, sa_wo, sa_bo,
        ca_wq, ca_bq, ca_wkv, ca_bkv, ca_wo, ca_bo,
        d_w1, d_b1, d_w2, d_b2,
        n1g, n1b, n2g, n2b, n3g, n3b,
        params["prog_out_w"], params["prog_out_b"],
    ]

    program = pl.pallas_call(
        functools.partial(_decoder_generate_kernel, num_heads=H, num_layers=len(dec),
                          batch=B, mem_len=S, buf_len=Lbuf, seq_len=seq_len,
                          special_token_id=cfg["special_token_id"]),
        out_shape=jax.ShapeDtypeStruct((B, seq_len), jnp.int32),
        in_specs=[vmem] * len(dec_inputs),
        out_specs=vmem,
    )(*dec_inputs)

    return answer, program


# ------------------------------ parameter init -----------------------------------

def init_params(key, cfg):
    E = cfg["embedding_dim"]
    Hd = cfg["hidden_dim"]
    F = cfg["image_feature_dim"]
    V = cfg["vocab_size"]
    PV = cfg["program_vocab_size"]
    C = cfg["num_classes"]
    d_ff = cfg["dim_feedforward"]
    scale = 0.02
    keys = iter(jax.random.split(key, 64))

    def nrm(shape):
        return jax.random.normal(next(keys), shape, jnp.float32) * scale

    def mha():
        return dict(
            wq=nrm((E, E)), bq=jnp.zeros((1, E), jnp.float32),
            wk=nrm((E, E)), bk=jnp.zeros((1, E), jnp.float32),
            wv=nrm((E, E)), bv=jnp.zeros((1, E), jnp.float32),
            wo=nrm((E, E)), bo=jnp.zeros((1, E), jnp.float32),
        )

    def ln():
        return dict(gamma=jnp.ones((1, E), jnp.float32), beta=jnp.zeros((1, E), jnp.float32))

    def enc_layer():
        return dict(self_attn=mha(),
                    lin1_w=nrm((E, d_ff)), lin1_b=jnp.zeros((1, d_ff), jnp.float32),
                    lin2_w=nrm((d_ff, E)), lin2_b=jnp.zeros((1, E), jnp.float32),
                    norm1=ln(), norm2=ln())

    def dec_layer():
        return dict(self_attn=mha(), cross_attn=mha(),
                    lin1_w=nrm((E, d_ff)), lin1_b=jnp.zeros((1, d_ff), jnp.float32),
                    lin2_w=nrm((d_ff, E)), lin2_b=jnp.zeros((1, E), jnp.float32),
                    norm1=ln(), norm2=ln(), norm3=ln())

    emb = nrm((V, E)).at[0].set(0.0)      # padding_idx=0 row zeroed (as in nn.Embedding)
    pemb = nrm((PV, E)).at[0].set(0.0)

    return dict(
        image_proj_w=nrm((F, E)), image_proj_b=jnp.zeros((1, E), jnp.float32),
        embedding=emb,
        cls_token=nrm((1, 1, E)),
        pos_enc_pe=positional_encoding_table(
            cfg["num_image_tokens"] + cfg["max_question_len"] + 1, E),
        encoder=[enc_layer()],                       # num_layers=1
        ans_w1=nrm((E, Hd)), ans_b1=jnp.zeros((1, Hd), jnp.float32),
        ans_w2=nrm((Hd, C)), ans_b2=jnp.zeros((1, C), jnp.float32),
        prog_embedding=pemb,
        pos_dec_pe=positional_encoding_table(cfg["program_seq_len"] + 1, E),
        decoder=[dec_layer(), dec_layer()],          # num_layers=2
        prog_out_w=nrm((E, PV)), prog_out_b=jnp.zeros((1, PV), jnp.float32),
    )


# ----------------------------------- main -----------------------------------------

if __name__ == "__main__":
    cfg = dict(
        embedding_dim=32, hidden_dim=32, image_feature_dim=64,
        vocab_size=50, program_vocab_size=20, num_classes=10,
        num_image_tokens=8, max_question_len=7, program_seq_len=5,
        num_heads=4, dim_feedforward=64, special_token_id=1,
    )
    key = jax.random.PRNGKey(0)
    pkey, ikey, qkey = jax.random.split(key, 3)
    params = init_params(pkey, cfg)

    B = 2
    image_features = jax.random.normal(
        ikey, (B, cfg["num_image_tokens"], cfg["image_feature_dim"]), jnp.float32)
    questions = jax.random.randint(
        qkey, (B, cfg["max_question_len"]), 0, cfg["vocab_size"], dtype=jnp.int32)

    fwd = jax.jit(functools.partial(vqa_forward, cfg=cfg))
    answer, program = fwd(params, image_features, questions)
    jax.block_until_ready((answer, program))

    assert answer.shape == (B, cfg["num_classes"])
    assert program.shape == (B, cfg["program_seq_len"])
    assert program.dtype == jnp.int32
    # TODO(synk): dropout layers (pos-enc, attention, FFN, classifier) are stochastic in
    # train mode; implemented here as identity (eval/inference semantics).
    print("KERNEL_OK")
</pallas_src>

<mosaic_0001>
module attributes {stable_mosaic.version = 11 : i64} {
  func.func @_encoder_answer_kernel(%arg0: memref<16x64xf32, #tpu.memory_space<vmem>>, %arg1: memref<14x32xf32, #tpu.memory_space<vmem>>, %arg2: memref<1x32xf32, #tpu.memory_space<vmem>>, %arg3: memref<16x32xf32, #tpu.memory_space<vmem>>, %arg4: memref<64x32xf32, #tpu.memory_space<vmem>>, %arg5: memref<1x32xf32, #tpu.memory_space<vmem>>, %arg6: memref<32x96xf32, #tpu.memory_space<vmem>>, %arg7: memref<1x96xf32, #tpu.memory_space<vmem>>, %arg8: memref<32x32xf32, #tpu.memory_space<vmem>>, %arg9: memref<1x32xf32, #tpu.memory_space<vmem>>, %arg10: memref<32x64xf32, #tpu.memory_space<vmem>>, %arg11: memref<1x64xf32, #tpu.memory_space<vmem>>, %arg12: memref<64x32xf32, #tpu.memory_space<vmem>>, %arg13: memref<1x32xf32, #tpu.memory_space<vmem>>, %arg14: memref<1x32xf32, #tpu.memory_space<vmem>>, %arg15: memref<1x32xf32, #tpu.memory_space<vmem>>, %arg16: memref<1x32xf32, #tpu.memory_space<vmem>>, %arg17: memref<1x32xf32, #tpu.memory_space<vmem>>, %arg18: memref<32x32xf32, #tpu.memory_space<vmem>>, %arg19: memref<1x32xf32, #tpu.memory_space<vmem>>, %arg20: memref<32x10xf32, #tpu.memory_space<vmem>>, %arg21: memref<1x10xf32, #tpu.memory_space<vmem>>, %arg22: memref<32x32xf32, #tpu.memory_space<vmem>>, %arg23: memref<2x10xf32, #tpu.memory_space<vmem>>, %arg24: memref<16x32xf32, #tpu.memory_space<vmem>>) attributes {dimension_semantics = [], scalar_prefetch = 0 : i64, scratch_operands = 1 : i64, tpu.core_type = #tpu.core_type<tc>} {
    %c0 = arith.constant 0 : index
    %c0_0 = arith.constant 0 : index
    %0 = vector.load %arg4[%c0, %c0_0] : memref<64x32xf32, #tpu.memory_space<vmem>>, vector<64x32xf32>
    %c0_1 = arith.constant 0 : index
    %c0_2 = arith.constant 0 : index
    %1 = vector.load %arg5[%c0_1, %c0_2] : memref<1x32xf32, #tpu.memory_space<vmem>>, vector<1x32xf32>
    %c0_3 = arith.constant 0 : index
    %c0_4 = arith.constant 0 : index
    %2 = vector.load %arg6[%c0_3, %c0_4] : memref<32x96xf32, #tpu.memory_space<vmem>>, vector<32x96xf32>
    %c0_5 = arith.constant 0 : index
    %c0_6 = arith.constant 0 : index
    %3 = vector.load %arg7[%c0_5, %c0_6] : memref<1x96xf32, #tpu.memory_space<vmem>>, vector<1x96xf32>
    %c0_7 = arith.constant 0 : index
    %c0_8 = arith.constant 0 : index
    %4 = vector.load %arg8[%c0_7, %c0_8] : memref<32x32xf32, #tpu.memory_space<vmem>>, vector<32x32xf32>
    %c0_9 = arith.constant 0 : index
    %c0_10 = arith.constant 0 : index
    %5 = vector.load %arg9[%c0_9, %c0_10] : memref<1x32xf32, #tpu.memory_space<vmem>>, vector<1x32xf32>
    %c0_11 = arith.constant 0 : index
    %c0_12 = arith.constant 0 : index
    %6 = vector.load %arg10[%c0_11, %c0_12] : memref<32x64xf32, #tpu.memory_space<vmem>>, vector<32x64xf32>
    %c0_13 = arith.constant 0 : index
    %c0_14 = arith.constant 0 : index
    %7 = vector.load %arg11[%c0_13, %c0_14] : memref<1x64xf32, #tpu.memory_space<vmem>>, vector<1x64xf32>
    %c0_15 = arith.constant 0 : index
    %c0_16 = arith.constant 0 : index
    %8 = vector.load %arg12[%c0_15, %c0_16] : memref<64x32xf32, #tpu.memory_space<vmem>>, vector<64x32xf32>
    %c0_17 = arith.constant 0 : index
    %c0_18 = arith.constant 0 : index
    %9 = vector.load %arg13[%c0_17, %c0_18] : memref<1x32xf32, #tpu.memory_space<vmem>>, vector<1x32xf32>
    %c0_19 = arith.constant 0 : index
    %c0_20 = arith.constant 0 : index
    %10 = vector.load %arg14[%c0_19, %c0_20] : memref<1x32xf32, #tpu.memory_space<vmem>>, vector<1x32xf32>
    %c0_21 = arith.constant 0 : index
    %c0_22 = arith.constant 0 : index
    %11 = vector.load %arg15[%c0_21, %c0_22] : memref<1x32xf32, #tpu.memory_space<vmem>>, vector<1x32xf32>
    %c0_23 = arith.constant 0 : index
    %c0_24 = arith.constant 0 : index
    %12 = vector.load %arg16[%c0_23, %c0_24] : memref<1x32xf32, #tpu.memory_space<vmem>>, vector<1x32xf32>
    %c0_25 = arith.constant 0 : index
    %c0_26 = arith.constant 0 : index
    %13 = vector.load %arg17[%c0_25, %c0_26] : memref<1x32xf32, #tpu.memory_space<vmem>>, vector<1x32xf32>
    %c0_27 = arith.constant 0 : index
    %c0_28 = arith.constant 0 : index
    %14 = vector.load %arg18[%c0_27, %c0_28] : memref<32x32xf32, #tpu.memory_space<vmem>>, vector<32x32xf32>
    %c0_29 = arith.constant 0 : index
    %c0_30 = arith.constant 0 : index
    %15 = vector.load %arg19[%c0_29, %c0_30] : memref<1x32xf32, #tpu.memory_space<vmem>>, vector<1x32xf32>
    %c0_31 = arith.constant 0 : index
    %c0_32 = arith.constant 0 : index
    %16 = vector.load %arg20[%c0_31, %c0_32] : memref<32x10xf32, #tpu.memory_space<vmem>>, vector<32x10xf32>
    %c0_33 = arith.constant 0 : index
    %c0_34 = arith.constant 0 : index
    %17 = vector.load %arg21[%c0_33, %c0_34] : memref<1x10xf32, #tpu.memory_space<vmem>>, vector<1x10xf32>
    %c0_35 = arith.constant 0 : index
    %c0_36 = arith.constant 0 : index
    %18 = vector.load %arg3[%c0_35, %c0_36] : memref<16x32xf32, #tpu.memory_space<vmem>>, vector<16x32xf32>
    %c0_37 = arith.constant 0 : index
    %c0_38 = arith.constant 0 : index
    %19 = vector.load %arg2[%c0_37, %c0_38] : memref<1x32xf32, #tpu.memory_space<vmem>>, vector<1x32xf32>
    %c0_39 = arith.constant 0 : index
    %c0_40 = arith.constant 0 : index
    %20 = vector.load %arg0[%c0_39, %c0_40] : memref<16x64xf32, #tpu.memory_space<vmem>>, vector<8x64xf32>
    %21 = vector.extract_strided_slice %18 {offsets = [0, 0], sizes = [1, 32], strides = [1, 1]} : vector<16x32xf32> to vector<1x32xf32>
    %22 = arith.addf %19, %21 : vector<1x32xf32>
    %c0_41 = arith.constant 0 : index
    %c0_42 = arith.constant 0 : index
    %23 = vector.load %arg24[%c0_41, %c0_42] : memref<16x32xf32, #tpu.memory_space<vmem>>, vector<1x32xf32>
    tpu.vector_store %arg24[%c0_41, %c0_42], %22 {strides = array<i32>} : memref<16x32xf32, #tpu.memory_space<vmem>>, vector<1x32xf32>,
    %cst = arith.constant dense<0.000000e+00> : vector<8x32xf32>
    %24 = tpu.matmul %20, %0, %cst {dimension_numbers = #tpu.dot_dimension_numbers<[1], [0], [0], [1], [0, 0, 1, 1], [], []>} : vector<8x64xf32>, vector<64x32xf32>, vector<8x32xf32> -> vector<8x32xf32>
    %25 = vector.broadcast %1 : vector<1x32xf32> to vector<8x32xf32>
    %26 = arith.addf %24, %25 : vector<8x32xf32>
    %27 = vector.extract_strided_slice %18 {offsets = [1, 0], sizes = [8, 32], strides = [1, 1]} : vector<16x32xf32> to vector<8x32xf32>
    %28 = arith.addf %26, %27 : vector<8x32xf32>
    %c1 = arith.constant 1 : index
    %c0_43 = arith.constant 0 : index
    %29 = vector.load %arg24[%c1, %c0_43] : memref<16x32xf32, #tpu.memory_space<vmem>>, vector<8x32xf32>
    tpu.vector_store %arg24[%c1, %c0_43], %28 {strides = array<i32>} : memref<16x32xf32, #tpu.memory_space<vmem>>, vector<8x32xf32>,
    %c0_44 = arith.constant 0 : index
    %c0_45 = arith.constant 0 : index
    %30 = vector.load %arg1[%c0_44, %c0_45] : memref<14x32xf32, #tpu.memory_space<vmem>>, vector<7x32xf32>
    %31 = vector.extract_strided_slice %18 {offsets = [9, 0], sizes = [7, 32], strides = [1, 1]} : vector<16x32xf32> to vector<7x32xf32>
    %32 = arith.addf %30, %31 : vector<7x32xf32>
    %c9 = arith.constant 9 : index
    %c0_46 = arith.constant 0 : index
    %33 = vector.load %arg24[%c9, %c0_46] : memref<16x32xf32, #tpu.memory_space<vmem>>, vector<7x32xf32>
    tpu.vector_store %arg24[%c9, %c0_46], %32 {strides = array<i32>} : memref<16x32xf32, #tpu.memory_space<vmem>>, vector<7x32xf32>,
    %c0_47 = arith.constant 0 : index
    %c0_48 = arith.constant 0 : index
    %34 = vector.load %arg24[%c0_47, %c0_48] : memref<16x32xf32, #tpu.memory_space<vmem>>, vector<16x32xf32>
    %cst_49 = arith.constant dense<0.000000e+00> : vector<16x96xf32>
    %35 = tpu.matmul %34, %2, %cst_49 {dimension_numbers = #tpu.dot_dimension_numbers<[1], [0], [0], [1], [0, 0, 1, 1], [], []>} : vector<16x32xf32>, vector<32x96xf32>, vector<16x96xf32> -> vector<16x96xf32>
    %36 = vector.broadcast %3 : vector<1x96xf32> to vector<16x96xf32>
    %37 = arith.addf %35, %36 : vector<16x96xf32>
    %38 = vector.extract_strided_slice %37 {offsets = [0, 0], sizes = [16, 32], strides = [1, 1]} : vector<16x96xf32> to vector<16x32xf32>
    %39 = vector.extract_strided_slice %37 {offsets = [0, 32], sizes = [16, 32], strides = [1, 1]} : vector<16x96xf32> to vector<16x32xf32>
    %40 = vector.extract_strided_slice %37 {offsets = [0, 64], sizes = [16, 32], strides = [1, 1]} : vector<16x96xf32> to vector<16x32xf32>
    %41 = vector.extract_strided_slice %38 {offsets = [0, 0], sizes = [16, 8], strides = [1, 1]} : vector<16x32xf32> to vector<16x8xf32>
    %42 = vector.extract_strided_slice %39 {offsets = [0, 0], sizes = [16, 8], strides = [1, 1]} : vector<16x32xf32> to vector<16x8xf32>
    %43 = vector.extract_strided_slice %40 {offsets = [0, 0], sizes = [16, 8], strides = [1, 1]} : vector<16x32xf32> to vector<16x8xf32>
    %cst_50 = arith.constant dense<0.000000e+00> : vector<16x16xf32>
    %44 = tpu.matmul %41, %42, %cst_50 {dimension_numbers = #tpu.dot_dimension_numbers<[1], [1], [0], [0], [0, 0, 1, 0], [], []>} : vector<16x8xf32>, vector<16x8xf32>, vector<16x16xf32> -> vector<16x16xf32>
    %cst_51 = arith.constant 0.353553385 : f32
    %45 = vector.broadcast %cst_51 : f32 to vector<16x16xf32>
    %46 = arith.mulf %44, %45 : vector<16x16xf32>
    %cst_52 = arith.constant dense<0xFF800000> : vector<16xf32>
    %47 = vector.multi_reduction <maximumf>, %46, %cst_52 [1] : vector<16x16xf32> to vector<16xf32>
    %48 = vector.shape_cast %47 : vector<16xf32> to vector<16x1xf32>
    %49 = vector.broadcast %48 : vector<16x1xf32> to vector<16x16xf32>
    %50 = arith.subf %46, %49 : vector<16x16xf32>
    %51 = math.exp %50 : vector<16x16xf32>
    %cst_53 = arith.constant dense<0.000000e+00> : vector<16xf32>
    %52 = vector.multi_reduction <add>, %51, %cst_53 [1] : vector<16x16xf32> to vector<16xf32>
    %53 = vector.shape_cast %52 : vector<16xf32> to vector<16x1xf32>
    %54 = tpu.reciprocal %53 {approx = true} : vector<16x1xf32> -> vector<16x1xf32>
    %55 = vector.broadcast %54 : vector<16x1xf32> to vector<16x16xf32>
    %56 = arith.mulf %51, %55 : vector<16x16xf32>
    %cst_54 = arith.constant dense<0.000000e+00> : vector<16x8xf32>
    %57 = tpu.matmul %56, %43, %cst_54 {dimension_numbers = #tpu.dot_dimension_numbers<[1], [0], [0], [1], [0, 0, 1, 1], [], []>} : vector<16x16xf32>, vector<16x8xf32>, vector<16x8xf32> -> vector<16x8xf32>
    %58 = vector.extract_strided_slice %4 {offsets = [0, 0], sizes = [8, 32], strides = [1, 1]} : vector<32x32xf32> to vector<8x32xf32>
    %cst_55 = arith.constant dense<0.000000e+00> : vector<16x32xf32>
    %59 = tpu.matmul %57, %58, %cst_55 {dimension_numbers = #tpu.dot_dimension_numbers<[1], [0], [0], [1], [0, 0, 1, 1], [], []>} : vector<16x8xf32>, vector<8x32xf32>, vector<16x32xf32> -> vector<16x32xf32>
    %60 = vector.extract_strided_slice %38 {offsets = [0, 8], sizes = [16, 8], strides = [1, 1]} : vector<16x32xf32> to vector<16x8xf32>
    %61 = vector.extract_strided_slice %39 {offsets = [0, 8], sizes = [16, 8], strides = [1, 1]} : vector<16x32xf32> to vector<16x8xf32>
    %62 = vector.extract_strided_slice %40 {offsets = [0, 8], sizes = [16, 8], strides = [1, 1]} : vector<16x32xf32> to vector<16x8xf32>
    %cst_56 = arith.constant dense<0.000000e+00> : vector<16x16xf32>
    %63 = tpu.matmul %60, %61, %cst_56 {dimension_numbers = #tpu.dot_dimension_numbers<[1], [1], [0], [0], [0, 0, 1, 0], [], []>} : vector<16x8xf32>, vector<16x8xf32>, vector<16x16xf32> -> vector<16x16xf32>
    %cst_57 = arith.constant 0.353553385 : f32
    %64 = vector.broadcast %cst_57 : f32 to vector<16x16xf32>
    %65 = arith.mulf %63, %64 : vector<16x16xf32>
    %cst_58 = arith.constant dense<0xFF800000> : vector<16xf32>
    %66 = vector.multi_reduction <maximumf>, %65, %cst_58 [1] : vector<16x16xf32> to vector<16xf32>
    %67 = vector.shape_cast %66 : vector<16xf32> to vector<16x1xf32>
    %68 = vector.broadcast %67 : vector<16x1xf32> to vector<16x16xf32>
    %69 = arith.subf %65, %68 : vector<16x16xf32>
    %70 = math.exp %69 : vector<16x16xf32>
    %cst_59 = arith.constant dense<0.000000e+00> : vector<16xf32>
    %71 = vector.multi_reduction <add>, %70, %cst_59 [1] : vector<16x16xf32> to vector<16xf32>
    %72 = vector.shape_cast %71 : vector<16xf32> to vector<16x1xf32>
    %73 = tpu.reciprocal %72 {approx = true} : vector<16x1xf32> -> vector<16x1xf32>
    %74 = vector.broadcast %73 : vector<16x1xf32> to vector<16x16xf32>
    %75 = arith.mulf %70, %74 : vector<16x16xf32>
    %cst_60 = arith.constant dense<0.000000e+00> : vector<16x8xf32>
    %76 = tpu.matmul %75, %62, %cst_60 {dimension_numbers = #tpu.dot_dimension_numbers<[1], [0], [0], [1], [0, 0, 1, 1], [], []>} : vector<16x16xf32>, vector<16x8xf32>, vector<16x8xf32> -> vector<16x8xf32>
    %77 = vector.extract_strided_slice %4 {offsets = [8, 0], sizes = [8, 32], strides = [1, 1]} : vector<32x32xf32> to vector<8x32xf32>
    %cst_61 = arith.constant dense<0.000000e+00> : vector<16x32xf32>
    %78 = tpu.matmul %76, %77, %cst_61 {dimension_numbers = #tpu.dot_dimension_numbers<[1], [0], [0], [1], [0, 0, 1, 1], [], []>} : vector<16x8xf32>, vector<8x32xf32>, vector<16x32xf32> -> vector<16x32xf32>
    %79 = arith.addf %59, %78 : vector<16x32xf32>
    %80 = vector.extract_strided_slice %38 {offsets = [0, 16], sizes = [16, 8], strides = [1, 1]} : vector<16x32xf32> to vector<16x8xf32>
    %81 = vector.extract_strided_slice %39 {offsets = [0, 16], sizes = [16, 8], strides = [1, 1]} : vector<16x32xf32> to vector<16x8xf32>
    %82 = vector.extract_strided_slice %40 {offsets = [0, 16], sizes = [16, 8], strides = [1, 1]} : vector<16x32xf32> to vector<16x8xf32>
    %cst_62 = arith.constant dense<0.000000e+00> : vector<16x16xf32>
    %83 = tpu.matmul %80, %81, %cst_62 {dimension_numbers = #tpu.dot_dimension_numbers<[1], [1], [0], [0], [0, 0, 1, 0], [], []>} : vector<16x8xf32>, vector<16x8xf32>, vector<16x16xf32> -> vector<16x16xf32>
    %cst_63 = arith.constant 0.353553385 : f32
    %84 = vector.broadcast %cst_63 : f32 to vector<16x16xf32>
    %85 = arith.mulf %83, %84 : vector<16x16xf32>
    %cst_64 = arith.constant dense<0xFF800000> : vector<16xf32>
    %86 = vector.multi_reduction <maximumf>, %85, %cst_64 [1] : vector<16x16xf32> to vector<16xf32>
    %87 = vector.shape_cast %86 : vector<16xf32> to vector<16x1xf32>
    %88 = vector.broadcast %87 : vector<16x1xf32> to vector<16x16xf32>
    %89 = arith.subf %85, %88 : vector<16x16xf32>
    %90 = math.exp %89 : vector<16x16xf32>
    %cst_65 = arith.constant dense<0.000000e+00> : vector<16xf32>
    %91 = vector.multi_reduction <add>, %90, %cst_65 [1] : vector<16x16xf32> to vector<16xf32>
    %92 = vector.shape_cast %91 : vector<16xf32> to vector<16x1xf32>
    %93 = tpu.reciprocal %92 {approx = true} : vector<16x1xf32> -> vector<16x1xf32>
    %94 = vector.broadcast %93 : vector<16x1xf32> to vector<16x16xf32>
    %95 = arith.mulf %90, %94 : vector<16x16xf32>
    %cst_66 = arith.constant dense<0.000000e+00> : vector<16x8xf32>
    %96 = tpu.matmul %95, %82, %cst_66 {dimension_numbers = #tpu.dot_dimension_numbers<[1], [0], [0], [1], [0, 0, 1, 1], [], []>} : vector<16x16xf32>, vector<16x8xf32>, vector<16x8xf32> -> vector<16x8xf32>
    %97 = vector.extract_strided_slice %4 {offsets = [16, 0], sizes = [8, 32], strides = [1, 1]} : vector<32x32xf32> to vector<8x32xf32>
    %cst_67 = arith.constant dense<0.000000e+00> : vector<16x32xf32>
    %98 = tpu.matmul %96, %97, %cst_67 {dimension_numbers = #tpu.dot_dimension_numbers<[1], [0], [0], [1], [0, 0, 1, 1], [], []>} : vector<16x8xf32>, vector<8x32xf32>, vector<16x32xf32> -> vector<16x32xf32>
    %99 = arith.addf %79, %98 : vector<16x32xf32>
    %100 = vector.extract_strided_slice %38 {offsets = [0, 24], sizes = [16, 8], strides = [1, 1]} : vector<16x32xf32> to vector<16x8xf32>
    %101 = vector.extract_strided_slice %39 {offsets = [0, 24], sizes = [16, 8], strides = [1, 1]} : vector<16x32xf32> to vector<16x8xf32>
    %102 = vector.extract_strided_slice %40 {offsets = [0, 24], sizes = [16, 8], strides = [1, 1]} : vector<16x32xf32> to vector<16x8xf32>
    %cst_68 = arith.constant dense<0.000000e+00> : vector<16x16xf32>
    %103 = tpu.matmul %100, %101, %cst_68 {dimension_numbers = #tpu.dot_dimension_numbers<[1], [1], [0], [0], [0, 0, 1, 0], [], []>} : vector<16x8xf32>, vector<16x8xf32>, vector<16x16xf32> -> vector<16x16xf32>
    %cst_69 = arith.constant 0.353553385 : f32
    %104 = vector.broadcast %cst_69 : f32 to vector<16x16xf32>
    %105 = arith.mulf %103, %104 : vector<16x16xf32>
    %cst_70 = arith.constant dense<0xFF800000> : vector<16xf32>
    %106 = vector.multi_reduction <maximumf>, %105, %cst_70 [1] : vector<16x16xf32> to vector<16xf32>
    %107 = vector.shape_cast %106 : vector<16xf32> to vector<16x1xf32>
    %108 = vector.broadcast %107 : vector<16x1xf32> to vector<16x16xf32>
    %109 = arith.subf %105, %108 : vector<16x16xf32>
    %110 = math.exp %109 : vector<16x16xf32>
    %cst_71 = arith.constant dense<0.000000e+00> : vector<16xf32>
    %111 = vector.multi_reduction <add>, %110, %cst_71 [1] : vector<16x16xf32> to vector<16xf32>
    %112 = vector.shape_cast %111 : vector<16xf32> to vector<16x1xf32>
    %113 = tpu.reciprocal %112 {approx = true} : vector<16x1xf32> -> vector<16x1xf32>
    %114 = vector.broadcast %113 : vector<16x1xf32> to vector<16x16xf32>
    %115 = arith.mulf %110, %114 : vector<16x16xf32>
    %cst_72 = arith.constant dense<0.000000e+00> : vector<16x8xf32>
    %116 = tpu.matmul %115, %102, %cst_72 {dimension_numbers = #tpu.dot_dimension_numbers<[1], [0], [0], [1], [0, 0, 1, 1], [], []>} : vector<16x16xf32>, vector<16x8xf32>, vector<16x8xf32> -> vector<16x8xf32>
    %117 = vector.extract_strided_slice %4 {offsets = [24, 0], sizes = [8, 32], strides = [1, 1]} : vector<32x32xf32> to vector<8x32xf32>
    %cst_73 = arith.constant dense<0.000000e+00> : vector<16x32xf32>
    %118 = tpu.matmul %116, %117, %cst_73 {dimension_numbers = #tpu.dot_dimension_numbers<[1], [0], [0], [1], [0, 0, 1, 1], [], []>} : vector<16x8xf32>, vector<8x32xf32>, vector<16x32xf32> -> vector<16x32xf32>
    %119 = arith.addf %99, %118 : vector<16x32xf32>
    %120 = vector.broadcast %5 : vector<1x32xf32> to vector<16x32xf32>
    %121 = arith.addf %119, %120 : vector<16x32xf32>
    %122 = arith.addf %34, %121 : vector<16x32xf32>
    %cst_74 = arith.constant dense<0.000000e+00> : vector<16xf32>
    %123 = vector.multi_reduction <add>, %122, %cst_74 [1] : vector<16x32xf32> to vector<16xf32>
    %124 = vector.shape_cast %123 : vector<16xf32> to vector<16x1xf32>
    %cst_75 = arith.constant 3.200000e+01 : f32
    %125 = vector.broadcast %cst_75 : f32 to vector<16x1xf32>
    %126 = arith.divf %124, %125 : vector<16x1xf32>
    %127 = vector.broadcast %126 : vector<16x1xf32> to vector<16x32xf32>
    %128 = arith.subf %122, %127 : vector<16x32xf32>
    %129 = arith.mulf %128, %128 : vector<16x32xf32>
    %cst_76 = arith.constant dense<0.000000e+00> : vector<16xf32>
    %130 = vector.multi_reduction <add>, %129, %cst_76 [1] : vector<16x32xf32> to vector<16xf32>
    %131 = vector.shape_cast %130 : vector<16xf32> to vector<16x1xf32>
    %cst_77 = arith.constant 3.200000e+01 : f32
    %132 = vector.broadcast %cst_77 : f32 to vector<16x1xf32>
    %133 = arith.divf %131, %132 : vector<16x1xf32>
    %cst_78 = arith.constant 9.99999974E-6 : f32
    %134 = vector.broadcast %cst_78 : f32 to vector<16x1xf32>
    %135 = arith.addf %133, %134 : vector<16x1xf32>
    %136 = math.rsqrt %135 : vector<16x1xf32>
    %137 = vector.broadcast %136 : vector<16x1xf32> to vector<16x32xf32>
    %138 = arith.mulf %128, %137 : vector<16x32xf32>
    %139 = vector.broadcast %10 : vector<1x32xf32> to vector<16x32xf32>
    %140 = arith.mulf %138, %139 : vector<16x32xf32>
    %141 = vector.broadcast %11 : vector<1x32xf32> to vector<16x32xf32>
    %142 = arith.addf %140, %141 : vector<16x32xf32>
    %cst_79 = arith.constant dense<0.000000e+00> : vector<16x64xf32>
    %143 = tpu.matmul %142, %6, %cst_79 {dimension_numbers = #tpu.dot_dimension_numbers<[1], [0], [0], [1], [0, 0, 1, 1], [], []>} : vector<16x32xf32>, vector<32x64xf32>, vector<16x64xf32> -> vector<16x64xf32>
    %144 = vector.broadcast %7 : vector<1x64xf32> to vector<16x64xf32>
    %145 = arith.addf %143, %144 : vector<16x64xf32>
    %cst_80 = arith.constant 0.000000e+00 : f32
    %146 = vector.broadcast %cst_80 : f32 to vector<16x64xf32>
    %147 = arith.maximumf %145, %146 : vector<16x64xf32>
    %cst_81 = arith.constant dense<0.000000e+00> : vector<16x32xf32>
    %148 = tpu.matmul %147, %8, %cst_81 {dimension_numbers = #tpu.dot_dimension_numbers<[1], [0], [0], [1], [0, 0, 1, 1], [], []>} : vector<16x64xf32>, vector<64x32xf32>, vector<16x32xf32> -> vector<16x32xf32>
    %149 = vector.broadcast %9 : vector<1x32xf32> to vector<16x32xf32>
    %150 = arith.addf %148, %149 : vector<16x32xf32>
    %151 = arith.addf %142, %150 : vector<16x32xf32>
    %cst_82 = arith.constant dense<0.000000e+00> : vector<16xf32>
    %152 = vector.multi_reduction <add>, %151, %cst_82 [1] : vector<16x32xf32> to vector<16xf32>
    %153 = vector.shape_cast %152 : vector<16xf32> to vector<16x1xf32>
    %cst_83 = arith.constant 3.200000e+01 : f32
    %154 = vector.broadcast %cst_83 : f32 to vector<16x1xf32>
    %155 = arith.divf %153, %154 : vector<16x1xf32>
    %156 = vector.broadcast %155 : vector<16x1xf32> to vector<16x32xf32>
    %157 = arith.subf %151, %156 : vector<16x32xf32>
    %158 = arith.mulf %157, %157 : vector<16x32xf32>
    %cst_84 = arith.constant dense<0.000000e+00> : vector<16xf32>
    %159 = vector.multi_reduction <add>, %158, %cst_84 [1] : vector<16x32xf32> to vector<16xf32>
    %160 = vector.shape_cast %159 : vector<16xf32> to vector<16x1xf32>
    %cst_85 = arith.constant 3.200000e+01 : f32
    %161 = vector.broadcast %cst_85 : f32 to vector<16x1xf32>
    %162 = arith.divf %160, %161 : vector<16x1xf32>
    %cst_86 = arith.constant 9.99999974E-6 : f32
    %163 = vector.broadcast %cst_86 : f32 to vector<16x1xf32>
    %164 = arith.addf %162, %163 : vector<16x1xf32>
    %165 = math.rsqrt %164 : vector<16x1xf32>
    %166 = vector.broadcast %165 : vector<16x1xf32> to vector<16x32xf32>
    %167 = arith.mulf %157, %166 : vector<16x32xf32>
    %168 = vector.broadcast %12 : vector<1x32xf32> to vector<16x32xf32>
    %169 = arith.mulf %167, %168 : vector<16x32xf32>
    %170 = vector.broadcast %13 : vector<1x32xf32> to vector<16x32xf32>
    %171 = arith.addf %169, %170 : vector<16x32xf32>
    %c0_87 = arith.constant 0 : index
    %c0_88 = arith.constant 0 : index
    %172 = vector.load %arg22[%c0_87, %c0_88] : memref<32x32xf32, #tpu.memory_space<vmem>>, vector<16x32xf32>
    tpu.vector_store %arg22[%c0_87, %c0_88], %171 {strides = array<i32>} : memref<32x32xf32, #tpu.memory_space<vmem>>, vector<16x32xf32>,
    %173 = vector.extract_strided_slice %171 {offsets = [0, 0], sizes = [1, 32], strides = [1, 1]} : vector<16x32xf32> to vector<1x32xf32>
    %cst_89 = arith.constant dense<0.000000e+00> : vector<1x32xf32>
    %174 = tpu.matmul %173, %14, %cst_89 {dimension_numbers = #tpu.dot_dimension_numbers<[1], [0], [0], [1], [0, 0, 1, 1], [], []>} : vector<1x32xf32>, vector<32x32xf32>, vector<1x32xf32> -> vector<1x32xf32>
    %175 = arith.addf %174, %15 : vector<1x32xf32>
    %cst_90 = arith.constant 0.000000e+00 : f32
    %176 = vector.broadcast %cst_90 : f32 to vector<1x32xf32>
    %177 = arith.maximumf %175, %176 : vector<1x32xf32>
    %cst_91 = arith.constant dense<0.000000e+00> : vector<1x10xf32>
    %178 = tpu.matmul %177, %16, %cst_91 {dimension_numbers = #tpu.dot_dimension_numbers<[1], [0], [0], [1], [0, 0, 1, 1], [], []>} : vector<1x32xf32>, vector<32x10xf32>, vector<1x10xf32> -> vector<1x10xf32>
    %179 = arith.addf %178, %17 : vector<1x10xf32>
    %c0_92 = arith.constant 0 : index
    %c0_93 = arith.constant 0 : index
    %180 = vector.load %arg23[%c0_92, %c0_93] : memref<2x10xf32, #tpu.memory_space<vmem>>, vector<1x10xf32>
    tpu.vector_store %arg23[%c0_92, %c0_93], %179 {strides = array<i32>} : memref<2x10xf32, #tpu.memory_space<vmem>>, vector<1x10xf32>,
    %c8 = arith.constant 8 : index
    %c0_94 = arith.constant 0 : index
    %181 = vector.load %arg0[%c8, %c0_94] : memref<16x64xf32, #tpu.memory_space<vmem>>, vector<8x64xf32>
    %182 = vector.extract_strided_slice %18 {offsets = [0, 0], sizes = [1, 32], strides = [1, 1]} : vector<16x32xf32> to vector<1x32xf32>
    %183 = arith.addf %19, %182 : vector<1x32xf32>
    %c0_95 = arith.constant 0 : index
    %c0_96 = arith.constant 0 : index
    %184 = vector.load %arg24[%c0_95, %c0_96] : memref<16x32xf32, #tpu.memory_space<vmem>>, vector<1x32xf32>
    tpu.vector_store %arg24[%c0_95, %c0_96], %183 {strides = array<i32>} : memref<16x32xf32, #tpu.memory_space<vmem>>, vector<1x32xf32>,
    %cst_97 = arith.constant dense<0.000000e+00> : vector<8x32xf32>
    %185 = tpu.matmul %181, %0, %cst_97 {dimension_numbers = #tpu.dot_dimension_numbers<[1], [0], [0], [1], [0, 0, 1, 1], [], []>} : vector<8x64xf32>, vector<64x32xf32>, vector<8x32xf32> -> vector<8x32xf32>
    %186 = vector.broadcast %1 : vector<1x32xf32> to vector<8x32xf32>
    %187 = arith.addf %185, %186 : vector<8x32xf32>
    %188 = vector.extract_strided_slice %18 {offsets = [1, 0], sizes = [8, 32], strides = [1, 1]} : vector<16x32xf32> to vector<8x32xf32>
    %189 = arith.addf %187, %188 : vector<8x32xf32>
    %c1_98 = arith.constant 1 : index
    %c0_99 = arith.constant 0 : index
    %190 = vector.load %arg24[%c1_98, %c0_99] : memref<16x32xf32, #tpu.memory_space<vmem>>, vector<8x32xf32>
    tpu.vector_store %arg24[%c1_98, %c0_99], %189 {strides = array<i32>} : memref<16x32xf32, #tpu.memory_space<vmem>>, vector<8x32xf32>,
    %c7 = arith.constant 7 : index
    %c0_100 = arith.constant 0 : index
    %191 = vector.load %arg1[%c7, %c0_100] : memref<14x32xf32, #tpu.memory_space<vmem>>, vector<7x32xf32>
    %192 = vector.extract_strided_slice %18 {offsets = [9, 0], sizes = [7, 32], strides = [1, 1]} : vector<16x32xf32> to vector<7x32xf32>
    %193 = arith.addf %191, %192 : vector<7x32xf32>
    %c9_101 = arith.constant 9 : index
    %c0_102 = arith.constant 0 : index
    %194 = vector.load %arg24[%c9_101, %c0_102] : memref<16x32xf32, #tpu.memory_space<vmem>>, vector<7x32xf32>
    tpu.vector_store %arg24[%c9_101, %c0_102], %193 {strides = array<i32>} : memref<16x32xf32, #tpu.memory_space<vmem>>, vector<7x32xf32>,
    %c0_103 = arith.constant 0 : index
    %c0_104 = arith.constant 0 : index
    %195 = vector.load %arg24[%c0_103, %c0_104] : memref<16x32xf32, #tpu.memory_space<vmem>>, vector<16x32xf32>
    %cst_105 = arith.constant dense<0.000000e+00> : vector<16x96xf32>
    %196 = tpu.matmul %195, %2, %cst_105 {dimension_numbers = #tpu.dot_dimension_numbers<[1], [0], [0], [1], [0, 0, 1, 1], [], []>} : vector<16x32xf32>, vector<32x96xf32>, vector<16x96xf32> -> vector<16x96xf32>
    %197 = vector.broadcast %3 : vector<1x96xf32> to vector<16x96xf32>
    %198 = arith.addf %196, %197 : vector<16x96xf32>
    %199 = vector.extract_strided_slice %198 {offsets = [0, 0], sizes = [16, 32], strides = [1, 1]} : vector<16x96xf32> to vector<16x32xf32>
    %200 = vector.extract_strided_slice %198 {offsets = [0, 32], sizes = [16, 32], strides = [1, 1]} : vector<16x96xf32> to vector<16x32xf32>
    %201 = vector.extract_strided_slice %198 {offsets = [0, 64], sizes = [16, 32], strides = [1, 1]} : vector<16x96xf32> to vector<16x32xf32>
    %202 = vector.extract_strided_slice %199 {offsets = [0, 0], sizes = [16, 8], strides = [1, 1]} : vector<16x32xf32> to vector<16x8xf32>
    %203 = vector.extract_strided_slice %200 {offsets = [0, 0], sizes = [16, 8], strides = [1, 1]} : vector<16x32xf32> to vector<16x8xf32>
    %204 = vector.extract_strided_slice %201 {offsets = [0, 0], sizes = [16, 8], strides = [1, 1]} : vector<16x32xf32> to vector<16x8xf32>
    %cst_106 = arith.constant dense<0.000000e+00> : vector<16x16xf32>
    %205 = tpu.matmul %202, %203, %cst_106 {dimension_numbers = #tpu.dot_dimension_numbers<[1], [1], [0], [0], [0, 0, 1, 0], [], []>} : vector<16x8xf32>, vector<16x8xf32>, vector<16x16xf32> -> vector<16x16xf32>
    %cst_107 = arith.constant 0.353553385 : f32
    %206 = vector.broadcast %cst_107 : f32 to vector<16x16xf32>
    %207 = arith.mulf %205, %206 : vector<16x16xf32>
    %cst_108 = arith.constant dense<0xFF800000> : vector<16xf32>
    %208 = vector.multi_reduction <maximumf>, %207, %cst_108 [1] : vector<16x16xf32> to vector<16xf32>
    %209 = vector.shape_cast %208 : vector<16xf32> to vector<16x1xf32>
    %210 = vector.broadcast %209 : vector<16x1xf32> to vector<16x16xf32>
    %211 = arith.subf %207, %210 : vector<16x16xf32>
    %212 = math.exp %211 : vector<16x16xf32>
    %cst_109 = arith.constant dense<0.000000e+00> : vector<16xf32>
    %213 = vector.multi_reduction <add>, %212, %cst_109 [1] : vector<16x16xf32> to vector<16xf32>
    %214 = vector.shape_cast %213 : vector<16xf32> to vector<16x1xf32>
    %215 = tpu.reciprocal %214 {approx = true} : vector<16x1xf32> -> vector<16x1xf32>
    %216 = vector.broadcast %215 : vector<16x1xf32> to vector<16x16xf32>
    %217 = arith.mulf %212, %216 : vector<16x16xf32>
    %cst_110 = arith.constant dense<0.000000e+00> : vector<16x8xf32>
    %218 = tpu.matmul %217, %204, %cst_110 {dimension_numbers = #tpu.dot_dimension_numbers<[1], [0], [0], [1], [0, 0, 1, 1], [], []>} : vector<16x16xf32>, vector<16x8xf32>, vector<16x8xf32> -> vector<16x8xf32>
    %219 = vector.extract_strided_slice %4 {offsets = [0, 0], sizes = [8, 32], strides = [1, 1]} : vector<32x32xf32> to vector<8x32xf32>
    %cst_111 = arith.constant dense<0.000000e+00> : vector<16x32xf32>
    %220 = tpu.matmul %218, %219, %cst_111 {dimension_numbers = #tpu.dot_dimension_numbers<[1], [0], [0], [1], [0, 0, 1, 1], [], []>} : vector<16x8xf32>, vector<8x32xf32>, vector<16x32xf32> -> vector<16x32xf32>
    %221 = vector.extract_strided_slice %199 {offsets = [0, 8], sizes = [16, 8], strides = [1, 1]} : vector<16x32xf32> to vector<16x8xf32>
    %222 = vector.extract_strided_slice %200 {offsets = [0, 8], sizes = [16, 8], strides = [1, 1]} : vector<16x32xf32> to vector<16x8xf32>
    %223 = vector.extract_strided_slice %201 {offsets = [0, 8], sizes = [16, 8], strides = [1, 1]} : vector<16x32xf32> to vector<16x8xf32>
    %cst_112 = arith.constant dense<0.000000e+00> : vector<16x16xf32>
    %224 = tpu.matmul %221, %222, %cst_112 {dimension_numbers = #tpu.dot_dimension_numbers<[1], [1], [0], [0], [0, 0, 1, 0], [], []>} : vector<16x8xf32>, vector<16x8xf32>, vector<16x16xf32> -> vector<16x16xf32>
    %cst_113 = arith.constant 0.353553385 : f32
    %225 = vector.broadcast %cst_113 : f32 to vector<16x16xf32>
    %226 = arith.mulf %224, %225 : vector<16x16xf32>
    %cst_114 = arith.constant dense<0xFF800000> : vector<16xf32>
    %227 = vector.multi_reduction <maximumf>, %226, %cst_114 [1] : vector<16x16xf32> to vector<16xf32>
    %228 = vector.shape_cast %227 : vector<16xf32> to vector<16x1xf32>
    %229 = vector.broadcast %228 : vector<16x1xf32> to vector<16x16xf32>
    %230 = arith.subf %226, %229 : vector<16x16xf32>
    %231 = math.exp %230 : vector<16x16xf32>
    %cst_115 = arith.constant dense<0.000000e+00> : vector<16xf32>
    %232 = vector.multi_reduction <add>, %231, %cst_115 [1] : vector<16x16xf32> to vector<16xf32>
    %233 = vector.shape_cast %232 : vector<16xf32> to vector<16x1xf32>
    %234 = tpu.reciprocal %233 {approx = true} : vector<16x1xf32> -> vector<16x1xf32>
    %235 = vector.broadcast %234 : vector<16x1xf32> to vector<16x16xf32>
    %236 = arith.mulf %231, %235 : vector<16x16xf32>
    %cst_116 = arith.constant dense<0.000000e+00> : vector<16x8xf32>
    %237 = tpu.matmul %236, %223, %cst_116 {dimension_numbers = #tpu.dot_dimension_numbers<[1], [0], [0], [1], [0, 0, 1, 1], [], []>} : vector<16x16xf32>, vector<16x8xf32>, vector<16x8xf32> -> vector<16x8xf32>
    %238 = vector.extract_strided_slice %4 {offsets = [8, 0], sizes = [8, 32], strides = [1, 1]} : vector<32x32xf32> to vector<8x32xf32>
    %cst_117 = arith.constant dense<0.000000e+00> : vector<16x32xf32>
    %239 = tpu.matmul %237, %238, %cst_117 {dimension_numbers = #tpu.dot_dimension_numbers<[1], [0], [0], [1], [0, 0, 1, 1], [], []>} : vector<16x8xf32>, vector<8x32xf32>, vector<16x32xf32> -> vector<16x32xf32>
    %240 = arith.addf %220, %239 : vector<16x32xf32>
    %241 = vector.extract_strided_slice %199 {offsets = [0, 16], sizes = [16, 8], strides = [1, 1]} : vector<16x32xf32> to vector<16x8xf32>
    %242 = vector.extract_strided_slice %200 {offsets = [0, 16], sizes = [16, 8], strides = [1, 1]} : vector<16x32xf32> to vector<16x8xf32>
    %243 = vector.extract_strided_slice %201 {offsets = [0, 16], sizes = [16, 8], strides = [1, 1]} : vector<16x32xf32> to vector<16x8xf32>
    %cst_118 = arith.constant dense<0.000000e+00> : vector<16x16xf32>
    %244 = tpu.matmul %241, %242, %cst_118 {dimension_numbers = #tpu.dot_dimension_numbers<[1], [1], [0], [0], [0, 0, 1, 0], [], []>} : vector<16x8xf32>, vector<16x8xf32>, vector<16x16xf32> -> vector<16x16xf32>
    %cst_119 = arith.constant 0.353553385 : f32
    %245 = vector.broadcast %cst_119 : f32 to vector<16x16xf32>
    %246 = arith.mulf %244, %245 : vector<16x16xf32>
    %cst_120 = arith.constant dense<0xFF800000> : vector<16xf32>
    %247 = vector.multi_reduction <maximumf>, %246, %cst_120 [1] : vector<16x16xf32> to vector<16xf32>
    %248 = vector.shape_cast %247 : vector<16xf32> to vector<16x1xf32>
    %249 = vector.broadcast %248 : vector<16x1xf32> to vector<16x16xf32>
    %250 = arith.subf %246, %249 : vector<16x16xf32>
    %251 = math.exp %250 : vector<16x16xf32>
    %cst_121 = arith.constant dense<0.000000e+00> : vector<16xf32>
    %252 = vector.multi_reduction <add>, %251, %cst_121 [1] : vector<16x16xf32> to vector<16xf32>
    %253 = vector.shape_cast %252 : vector<16xf32> to vector<16x1xf32>
    %254 = tpu.reciprocal %253 {approx = true} : vector<16x1xf32> -> vector<16x1xf32>
    %255 = vector.broadcast %254 : vector<16x1xf32> to vector<16x16xf32>
    %256 = arith.mulf %251, %255 : vector<16x16xf32>
    %cst_122 = arith.constant dense<0.000000e+00> : vector<16x8xf32>
    %257 = tpu.matmul %256, %243, %cst_122 {dimension_numbers = #tpu.dot_dimension_numbers<[1], [0], [0], [1], [0, 0, 1, 1], [], []>} : vector<16x16xf32>, vector<16x8xf32>, vector<16x8xf32> -> vector<16x8xf32>
    %258 = vector.extract_strided_slice %4 {offsets = [16, 0], sizes = [8, 32], strides = [1, 1]} : vector<32x32xf32> to vector<8x32xf32>
    %cst_123 = arith.constant dense<0.000000e+00> : vector<16x32xf32>
    %259 = tpu.matmul %257, %258, %cst_123 {dimension_numbers = #tpu.dot_dimension_numbers<[1], [0], [0], [1], [0, 0, 1, 1], [], []>} : vector<16x8xf32>, vector<8x32xf32>, vector<16x32xf32> -> vector<16x32xf32>
    %260 = arith.addf %240, %259 : vector<16x32xf32>
    %261 = vector.extract_strided_slice %199 {offsets = [0, 24], sizes = [16, 8], strides = [1, 1]} : vector<16x32xf32> to vector<16x8xf32>
    %262 = vector.extract_strided_slice %200 {offsets = [0, 24], sizes = [16, 8], strides = [1, 1]} : vector<16x32xf32> to vector<16x8xf32>
    %263 = vector.extract_strided_slice %201 {offsets = [0, 24], sizes = [16, 8], strides = [1, 1]} : vector<16x32xf32> to vector<16x8xf32>
    %cst_124 = arith.constant dense<0.000000e+00> : vector<16x16xf32>
    %264 = tpu.matmul %261, %262, %cst_124 {dimension_numbers = #tpu.dot_dimension_numbers<[1], [1], [0], [0], [0, 0, 1, 0], [], []>} : vector<16x8xf32>, vector<16x8xf32>, vector<16x16xf32> -> vector<16x16xf32>
    %cst_125 = arith.constant 0.353553385 : f32
    %265 = vector.broadcast %cst_125 : f32 to vector<16x16xf32>
    %266 = arith.mulf %264, %265 : vector<16x16xf32>
    %cst_126 = arith.constant dense<0xFF800000> : vector<16xf32>
    %267 = vector.multi_reduction <maximumf>, %266, %cst_126 [1] : vector<16x16xf32> to vector<16xf32>
    %268 = vector.shape_cast %267 : vector<16xf32> to vector<16x1xf32>
    %269 = vector.broadcast %268 : vector<16x1xf32> to vector<16x16xf32>
    %270 = arith.subf %266, %269 : vector<16x16xf32>
    %271 = math.exp %270 : vector<16x16xf32>
    %cst_127 = arith.constant dense<0.000000e+00> : vector<16xf32>
    %272 = vector.multi_reduction <add>, %271, %cst_127 [1] : vector<16x16xf32> to vector<16xf32>
    %273 = vector.shape_cast %272 : vector<16xf32> to vector<16x1xf32>
    %274 = tpu.reciprocal %273 {approx = true} : vector<16x1xf32> -> vector<16x1xf32>
    %275 = vector.broadcast %274 : vector<16x1xf32> to vector<16x16xf32>
    %276 = arith.mulf %271, %275 : vector<16x16xf32>
    %cst_128 = arith.constant dense<0.000000e+00> : vector<16x8xf32>
    %277 = tpu.matmul %276, %263, %cst_128 {dimension_numbers = #tpu.dot_dimension_numbers<[1], [0], [0], [1], [0, 0, 1, 1], [], []>} : vector<16x16xf32>, vector<16x8xf32>, vector<16x8xf32> -> vector<16x8xf32>
    %278 = vector.extract_strided_slice %4 {offsets = [24, 0], sizes = [8, 32], strides = [1, 1]} : vector<32x32xf32> to vector<8x32xf32>
    %cst_129 = arith.constant dense<0.000000e+00> : vector<16x32xf32>
    %279 = tpu.matmul %277, %278, %cst_129 {dimension_numbers = #tpu.dot_dimension_numbers<[1], [0], [0], [1], [0, 0, 1, 1], [], []>} : vector<16x8xf32>, vector<8x32xf32>, vector<16x32xf32> -> vector<16x32xf32>
    %280 = arith.addf %260, %279 : vector<16x32xf32>
    %281 = vector.broadcast %5 : vector<1x32xf32> to vector<16x32xf32>
    %282 = arith.addf %280, %281 : vector<16x32xf32>
    %283 = arith.addf %195, %282 : vector<16x32xf32>
    %cst_130 = arith.constant dense<0.000000e+00> : vector<16xf32>
    %284 = vector.multi_reduction <add>, %283, %cst_130 [1] : vector<16x32xf32> to vector<16xf32>
    %285 = vector.shape_cast %284 : vector<16xf32> to vector<16x1xf32>
    %cst_131 = arith.constant 3.200000e+01 : f32
    %286 = vector.broadcast %cst_131 : f32 to vector<16x1xf32>
    %287 = arith.divf %285, %286 : vector<16x1xf32>
    %288 = vector.broadcast %287 : vector<16x1xf32> to vector<16x32xf32>
    %289 = arith.subf %283, %288 : vector<16x32xf32>
    %290 = arith.mulf %289, %289 : vector<16x32xf32>
    %cst_132 = arith.constant dense<0.000000e+00> : vector<16xf32>
    %291 = vector.multi_reduction <add>, %290, %cst_132 [1] : vector<16x32xf32> to vector<16xf32>
    %292 = vector.shape_cast %291 : vector<16xf32> to vector<16x1xf32>
    %cst_133 = arith.constant 3.200000e+01 : f32
    %293 = vector.broadcast %cst_133 : f32 to vector<16x1xf32>
    %294 = arith.divf %292, %293 : vector<16x1xf32>
    %cst_134 = arith.constant 9.99999974E-6 : f32
    %295 = vector.broadcast %cst_134 : f32 to vector<16x1xf32>
    %296 = arith.addf %294, %295 : vector<16x1xf32>
    %297 = math.rsqrt %296 : vector<16x1xf32>
    %298 = vector.broadcast %297 : vector<16x1xf32> to vector<16x32xf32>
    %299 = arith.mulf %289, %298 : vector<16x32xf32>
    %300 = vector.broadcast %10 : vector<1x32xf32> to vector<16x32xf32>
    %301 = arith.mulf %299, %300 : vector<16x32xf32>
    %302 = vector.broadcast %11 : vector<1x32xf32> to vector<16x32xf32>
    %303 = arith.addf %301, %302 : vector<16x32xf32>
    %cst_135 = arith.constant dense<0.000000e+00> : vector<16x64xf32>
    %304 = tpu.matmul %303, %6, %cst_135 {dimension_numbers = #tpu.dot_dimension_numbers<[1], [0], [0], [1], [0, 0, 1, 1], [], []>} : vector<16x32xf32>, vector<32x64xf32>, vector<16x64xf32> -> vector<16x64xf32>
    %305 = vector.broadcast %7 : vector<1x64xf32> to vector<16x64xf32>
    %306 = arith.addf %304, %305 : vector<16x64xf32>
    %cst_136 = arith.constant 0.000000e+00 : f32
    %307 = vector.broadcast %cst_136 : f32 to vector<16x64xf32>
    %308 = arith.maximumf %306, %307 : vector<16x64xf32>
    %cst_137 = arith.constant dense<0.000000e+00> : vector<16x32xf32>
    %309 = tpu.matmul %308, %8, %cst_137 {dimension_numbers = #tpu.dot_dimension_numbers<[1], [0], [0], [1], [0, 0, 1, 1], [], []>} : vector<16x64xf32>, vector<64x32xf32>, vector<16x32xf32> -> vector<16x32xf32>
    %310 = vector.broadcast %9 : vector<1x32xf32> to vector<16x32xf32>
    %311 = arith.addf %309, %310 : vector<16x32xf32>
    %312 = arith.addf %303, %311 : vector<16x32xf32>
    %cst_138 = arith.constant dense<0.000000e+00> : vector<16xf32>
    %313 = vector.multi_reduction <add>, %312, %cst_138 [1] : vector<16x32xf32> to vector<16xf32>
    %314 = vector.shape_cast %313 : vector<16xf32> to vector<16x1xf32>
    %cst_139 = arith.constant 3.200000e+01 : f32
    %315 = vector.broadcast %cst_139 : f32 to vector<16x1xf32>
    %316 = arith.divf %314, %315 : vector<16x1xf32>
    %317 = vector.broadcast %316 : vector<16x1xf32> to vector<16x32xf32>
    %318 = arith.subf %312, %317 : vector<16x32xf32>
    %319 = arith.mulf %318, %318 : vector<16x32xf32>
    %cst_140 = arith.constant dense<0.000000e+00> : vector<16xf32>
    %320 = vector.multi_reduction <add>, %319, %cst_140 [1] : vector<16x32xf32> to vector<16xf32>
    %321 = vector.shape_cast %320 : vector<16xf32> to vector<16x1xf32>
    %cst_141 = arith.constant 3.200000e+01 : f32
    %322 = vector.broadcast %cst_141 : f32 to vector<16x1xf32>
    %323 = arith.divf %321, %322 : vector<16x1xf32>
    %cst_142 = arith.constant 9.99999974E-6 : f32
    %324 = vector.broadcast %cst_142 : f32 to vector<16x1xf32>
    %325 = arith.addf %323, %324 : vector<16x1xf32>
    %326 = math.rsqrt %325 : vector<16x1xf32>
    %327 = vector.broadcast %326 : vector<16x1xf32> to vector<16x32xf32>
    %328 = arith.mulf %318, %327 : vector<16x32xf32>
    %329 = vector.broadcast %12 : vector<1x32xf32> to vector<16x32xf32>
    %330 = arith.mulf %328, %329 : vector<16x32xf32>
    %331 = vector.broadcast %13 : vector<1x32xf32> to vector<16x32xf32>
    %332 = arith.addf %330, %331 : vector<16x32xf32>
    %c16 = arith.constant 16 : index
    %c0_143 = arith.constant 0 : index
    %333 = vector.load %arg22[%c16, %c0_143] : memref<32x32xf32, #tpu.memory_space<vmem>>, vector<16x32xf32>
    tpu.vector_store %arg22[%c16, %c0_143], %332 {strides = array<i32>} : memref<32x32xf32, #tpu.memory_space<vmem>>, vector<16x32xf32>,
    %334 = vector.extract_strided_slice %332 {offsets = [0, 0], sizes = [1, 32], strides = [1, 1]} : vector<16x32xf32> to vector<1x32xf32>
    %cst_144 = arith.constant dense<0.000000e+00> : vector<1x32xf32>
    %335 = tpu.matmul %334, %14, %cst_144 {dimension_numbers = #tpu.dot_dimension_numbers<[1], [0], [0], [1], [0, 0, 1, 1], [], []>} : vector<1x32xf32>, vector<32x32xf32>, vector<1x32xf32> -> vector<1x32xf32>
    %336 = arith.addf %335, %15 : vector<1x32xf32>
    %cst_145 = arith.constant 0.000000e+00 : f32
    %337 = vector.broadcast %cst_145 : f32 to vector<1x32xf32>
    %338 = arith.maximumf %336, %337 : vector<1x32xf32>
    %cst_146 = arith.constant dense<0.000000e+00> : vector<1x10xf32>
    %339 = tpu.matmul %338, %16, %cst_146 {dimension_numbers = #tpu.dot_dimension_numbers<[1], [0], [0], [1], [0, 0, 1, 1], [], []>} : vector<1x32xf32>, vector<32x10xf32>, vector<1x10xf32> -> vector<1x10xf32>
    %340 = arith.addf %339, %17 : vector<1x10xf32>
    %c1_147 = arith.constant 1 : index
    %c0_148 = arith.constant 0 : index
    %341 = vector.load %arg23[%c1_147, %c0_148] : memref<2x10xf32, #tpu.memory_space<vmem>>, vector<1x10xf32>
    tpu.vector_store %arg23[%c1_147, %c0_148], %340 {strides = array<i32>} : memref<2x10xf32, #tpu.memory_space<vmem>>, vector<1x10xf32>,
    return
  }
}

module attributes {stable_mosaic.version = 11 : i64} {
  func.func @_decoder_generate_kernel(%arg0: memref<32x32xf32, #tpu.memory_space<vmem>>, %arg1: memref<20x32xf32, #tpu.memory_space<vmem>>, %arg2: memref<6x32xf32, #tpu.memory_space<vmem>>, %arg3: memref<6x6xf32, #tpu.memory_space<vmem>>, %arg4: memref<2x32x96xf32, #tpu.memory_space<vmem>>, %arg5: memref<2x1x96xf32, #tpu.memory_space<vmem>>, %arg6: memref<2x32x32xf32, #tpu.memory_space<vmem>>, %arg7: memref<2x1x32xf32, #tpu.memory_space<vmem>>, %arg8: memref<2x32x32xf32, #tpu.memory_space<vmem>>, %arg9: memref<2x1x32xf32, #tpu.memory_space<vmem>>, %arg10: memref<2x32x64xf32, #tpu.memory_space<vmem>>, %arg11: memref<2x1x64xf32, #tpu.memory_space<vmem>>, %arg12: memref<2x32x32xf32, #tpu.memory_space<vmem>>, %arg13: memref<2x1x32xf32, #tpu.memory_space<vmem>>, %arg14: memref<2x32x64xf32, #tpu.memory_space<vmem>>, %arg15: memref<2x1x64xf32, #tpu.memory_space<vmem>>, %arg16: memref<2x64x32xf32, #tpu.memory_space<vmem>>, %arg17: memref<2x1x32xf32, #tpu.memory_space<vmem>>, %arg18: memref<2x1x32xf32, #tpu.memory_space<vmem>>, %arg19: memref<2x1x32xf32, #tpu.memory_space<vmem>>, %arg20: memref<2x1x32xf32, #tpu.memory_space<vmem>>, %arg21: memref<2x1x32xf32, #tpu.memory_space<vmem>>, %arg22: memref<2x1x32xf32, #tpu.memory_space<vmem>>, %arg23: memref<2x1x32xf32, #tpu.memory_space<vmem>>, %arg24: memref<32x20xf32, #tpu.memory_space<vmem>>, %arg25: memref<1x20xf32, #tpu.memory_space<vmem>>, %arg26: memref<2x5xi32, #tpu.memory_space<vmem>>) attributes {dimension_semantics = [], scalar_prefetch = 0 : i64, scratch_operands = 0 : i64, tpu.core_type = #tpu.core_type<tc>} {
    %c0 = arith.constant 0 : index
    %c0_0 = arith.constant 0 : index
    %0 = vector.load %arg1[%c0, %c0_0] : memref<20x32xf32, #tpu.memory_space<vmem>>, vector<20x32xf32>
    %c0_1 = arith.constant 0 : index
    %c0_2 = arith.constant 0 : index
    %1 = vector.load %arg2[%c0_1, %c0_2] : memref<6x32xf32, #tpu.memory_space<vmem>>, vector<6x32xf32>
    %c0_3 = arith.constant 0 : index
    %c0_4 = arith.constant 0 : index
    %2 = vector.load %arg3[%c0_3, %c0_4] : memref<6x6xf32, #tpu.memory_space<vmem>>, vector<6x6xf32>
    %c0_5 = arith.constant 0 : index
    %c0_6 = arith.constant 0 : index
    %3 = vector.load %arg24[%c0_5, %c0_6] : memref<32x20xf32, #tpu.memory_space<vmem>>, vector<32x20xf32>
    %c0_7 = arith.constant 0 : index
    %c0_8 = arith.constant 0 : index
    %4 = vector.load %arg25[%c0_7, %c0_8] : memref<1x20xf32, #tpu.memory_space<vmem>>, vector<1x20xf32>
    %c0_9 = arith.constant 0 : index
    %c0_10 = arith.constant 0 : index
    %c0_11 = arith.constant 0 : index
    %5 = vector.load %arg4[%c0_9, %c0_10, %c0_11] : memref<2x32x96xf32, #tpu.memory_space<vmem>>, vector<1x32x96xf32>
    %6 = vector.shape_cast %5 : vector<1x32x96xf32> to vector<32x96xf32>
    %c0_12 = arith.constant 0 : index
    %c0_13 = arith.constant 0 : index
    %c0_14 = arith.constant 0 : index
    %7 = vector.load %arg5[%c0_12, %c0_13, %c0_14] : memref<2x1x96xf32, #tpu.memory_space<vmem>>, vector<1x1x96xf32>
    %8 = vector.shape_cast %7 : vector<1x1x96xf32> to vector<1x96xf32>
    %c0_15 = arith.constant 0 : index
    %c0_16 = arith.constant 0 : index
    %c0_17 = arith.constant 0 : index
    %9 = vector.load %arg6[%c0_15, %c0_16, %c0_17] : memref<2x32x32xf32, #tpu.memory_space<vmem>>, vector<1x32x32xf32>
    %10 = vector.shape_cast %9 : vector<1x32x32xf32> to vector<32x32xf32>
    %c0_18 = arith.constant 0 : index
    %c0_19 = arith.constant 0 : index
    %c0_20 = arith.constant 0 : index
    %11 = vector.load %arg7[%c0_18, %c0_19, %c0_20] : memref<2x1x32xf32, #tpu.memory_space<vmem>>, vector<1x1x32xf32>
    %12 = vector.shape_cast %11 : vector<1x1x32xf32> to vector<1x32xf32>
    %c0_21 = arith.constant 0 : index
    %c0_22 = arith.constant 0 : index
    %c0_23 = arith.constant 0 : index
    %13 = vector.load %arg8[%c0_21, %c0_22, %c0_23] : memref<2x32x32xf32, #tpu.memory_space<vmem>>, vector<1x32x32xf32>
    %14 = vector.shape_cast %13 : vector<1x32x32xf32> to vector<32x32xf32>
    %c0_24 = arith.constant 0 : index
    %c0_25 = arith.constant 0 : index
    %c0_26 = arith.constant 0 : index
    %15 = vector.load %arg9[%c0_24, %c0_25, %c0_26] : memref<2x1x32xf32, #tpu.memory_space<vmem>>, vector<1x1x32xf32>
    %16 = vector.shape_cast %15 : vector<1x1x32xf32> to vector<1x32xf32>
    %c0_27 = arith.constant 0 : index
    %c0_28 = arith.constant 0 : index
    %c0_29 = arith.constant 0 : index
    %17 = vector.load %arg12[%c0_27, %c0_28, %c0_29] : memref<2x32x32xf32, #tpu.memory_space<vmem>>, vector<1x32x32xf32>
    %18 = vector.shape_cast %17 : vector<1x32x32xf32> to vector<32x32xf32>
    %c0_30 = arith.constant 0 : index
    %c0_31 = arith.constant 0 : index
    %c0_32 = arith.constant 0 : index
    %19 = vector.load %arg13[%c0_30, %c0_31, %c0_32] : memref<2x1x32xf32, #tpu.memory_space<vmem>>, vector<1x1x32xf32>
    %20 = vector.shape_cast %19 : vector<1x1x32xf32> to vector<1x32xf32>
    %c0_33 = arith.constant 0 : index
    %c0_34 = arith.constant 0 : index
    %c0_35 = arith.constant 0 : index
    %21 = vector.load %arg14[%c0_33, %c0_34, %c0_35] : memref<2x32x64xf32, #tpu.memory_space<vmem>>, vector<1x32x64xf32>
    %22 = vector.shape_cast %21 : vector<1x32x64xf32> to vector<32x64xf32>
    %c0_36 = arith.constant 0 : index
    %c0_37 = arith.constant 0 : index
    %c0_38 = arith.constant 0 : index
    %23 = vector.load %arg15[%c0_36, %c0_37, %c0_38] : memref<2x1x64xf32, #tpu.memory_space<vmem>>, vector<1x1x64xf32>
    %24 = vector.shape_cast %23 : vector<1x1x64xf32> to vector<1x64xf32>
    %c0_39 = arith.constant 0 : index
    %c0_40 = arith.constant 0 : index
    %c0_41 = arith.constant 0 : index
    %25 = vector.load %arg16[%c0_39, %c0_40, %c0_41] : memref<2x64x32xf32, #tpu.memory_space<vmem>>, vector<1x64x32xf32>
    %26 = vector.shape_cast %25 : vector<1x64x32xf32> to vector<64x32xf32>
    %c0_42 = arith.constant 0 : index
    %c0_43 = arith.constant 0 : index
    %c0_44 = arith.constant 0 : index
    %27 = vector.load %arg17[%c0_42, %c0_43, %c0_44] : memref<2x1x32xf32, #tpu.memory_space<vmem>>, vector<1x1x32xf32>
    %28 = vector.shape_cast %27 : vector<1x1x32xf32> to vector<1x32xf32>
    %c0_45 = arith.constant 0 : index
    %c0_46 = arith.constant 0 : index
    %c0_47 = arith.constant 0 : index
    %29 = vector.load %arg18[%c0_45, %c0_46, %c0_47] : memref<2x1x32xf32, #tpu.memory_space<vmem>>, vector<1x1x32xf32>
    %30 = vector.shape_cast %29 : vector<1x1x32xf32> to vector<1x32xf32>
    %c0_48 = arith.constant 0 : index
    %c0_49 = arith.constant 0 : index
    %c0_50 = arith.constant 0 : index
    %31 = vector.load %arg19[%c0_48, %c0_49, %c0_50] : memref<2x1x32xf32, #tpu.memory_space<vmem>>, vector<1x1x32xf32>
    %32 = vector.shape_cast %31 : vector<1x1x32xf32> to vector<1x32xf32>
    %c0_51 = arith.constant 0 : index
    %c0_52 = arith.constant 0 : index
    %c0_53 = arith.constant 0 : index
    %33 = vector.load %arg20[%c0_51, %c0_52, %c0_53] : memref<2x1x32xf32, #tpu.memory_space<vmem>>, vector<1x1x32xf32>
    %34 = vector.shape_cast %33 : vector<1x1x32xf32> to vector<1x32xf32>
    %c0_54 = arith.constant 0 : index
    %c0_55 = arith.constant 0 : index
    %c0_56 = arith.constant 0 : index
    %35 = vector.load %arg21[%c0_54, %c0_55, %c0_56] : memref<2x1x32xf32, #tpu.memory_space<vmem>>, vector<1x1x32xf32>
    %36 = vector.shape_cast %35 : vector<1x1x32xf32> to vector<1x32xf32>
    %c0_57 = arith.constant 0 : index
    %c0_58 = arith.constant 0 : index
    %c0_59 = arith.constant 0 : index
    %37 = vector.load %arg22[%c0_57, %c0_58, %c0_59] : memref<2x1x32xf32, #tpu.memory_space<vmem>>, vector<1x1x32xf32>
    %38 = vector.shape_cast %37 : vector<1x1x32xf32> to vector<1x32xf32>
    %c0_60 = arith.constant 0 : index
    %c0_61 = arith.constant 0 : index
    %c0_62 = arith.constant 0 : index
    %39 = vector.load %arg23[%c0_60, %c0_61, %c0_62] : memref<2x1x32xf32, #tpu.memory_space<vmem>>, vector<1x1x32xf32>
    %40 = vector.shape_cast %39 : vector<1x1x32xf32> to vector<1x32xf32>
    %c1 = arith.constant 1 : index
    %c0_63 = arith.constant 0 : index
    %c0_64 = arith.constant 0 : index
    %41 = vector.load %arg4[%c1, %c0_63, %c0_64] : memref<2x32x96xf32, #tpu.memory_space<vmem>>, vector<1x32x96xf32>
    %42 = vector.shape_cast %41 : vector<1x32x96xf32> to vector<32x96xf32>
    %c1_65 = arith.constant 1 : index
    %c0_66 = arith.constant 0 : index
    %c0_67 = arith.constant 0 : index
    %43 = vector.load %arg5[%c1_65, %c0_66, %c0_67] : memref<2x1x96xf32, #tpu.memory_space<vmem>>, vector<1x1x96xf32>
    %44 = vector.shape_cast %43 : vector<1x1x96xf32> to vector<1x96xf32>
    %c1_68 = arith.constant 1 : index
    %c0_69 = arith.constant 0 : index
    %c0_70 = arith.constant 0 : index
    %45 = vector.load %arg6[%c1_68, %c0_69, %c0_70] : memref<2x32x32xf32, #tpu.memory_space<vmem>>, vector<1x32x32xf32>
    %46 = vector.shape_cast %45 : vector<1x32x32xf32> to vector<32x32xf32>
    %c1_71 = arith.constant 1 : index
    %c0_72 = arith.constant 0 : index
    %c0_73 = arith.constant 0 : index
    %47 = vector.load %arg7[%c1_71, %c0_72, %c0_73] : memref<2x1x32xf32, #tpu.memory_space<vmem>>, vector<1x1x32xf32>
    %48 = vector.shape_cast %47 : vector<1x1x32xf32> to vector<1x32xf32>
    %c1_74 = arith.constant 1 : index
    %c0_75 = arith.constant 0 : index
    %c0_76 = arith.constant 0 : index
    %49 = vector.load %arg8[%c1_74, %c0_75, %c0_76] : memref<2x32x32xf32, #tpu.memory_space<vmem>>, vector<1x32x32xf32>
    %50 = vector.shape_cast %49 : vector<1x32x32xf32> to vector<32x32xf32>
    %c1_77 = arith.constant 1 : index
    %c0_78 = arith.constant 0 : index
    %c0_79 = arith.constant 0 : index
    %51 = vector.load %arg9[%c1_77, %c0_78, %c0_79] : memref<2x1x32xf32, #tpu.memory_space<vmem>>, vector<1x1x32xf32>
    %52 = vector.shape_cast %51 : vector<1x1x32xf32> to vector<1x32xf32>
    %c1_80 = arith.constant 1 : index
    %c0_81 = arith.constant 0 : index
    %c0_82 = arith.constant 0 : index
    %53 = vector.load %arg12[%c1_80, %c0_81, %c0_82] : memref<2x32x32xf32, #tpu.memory_space<vmem>>, vector<1x32x32xf32>
    %54 = vector.shape_cast %53 : vector<1x32x32xf32> to vector<32x32xf32>
    %c1_83 = arith.constant 1 : index
    %c0_84 = arith.constant 0 : index
    %c0_85 = arith.constant 0 : index
    %55 = vector.load %arg13[%c1_83, %c0_84, %c0_85] : memref<2x1x32xf32, #tpu.memory_space<vmem>>, vector<1x1x32xf32>
    %56 = vector.shape_cast %55 : vector<1x1x32xf32> to vector<1x32xf32>
    %c1_86 = arith.constant 1 : index
    %c0_87 = arith.constant 0 : index
    %c0_88 = arith.constant 0 : index
    %57 = vector.load %arg14[%c1_86, %c0_87, %c0_88] : memref<2x32x64xf32, #tpu.memory_space<vmem>>, vector<1x32x64xf32>
    %58 = vector.shape_cast %57 : vector<1x32x64xf32> to vector<32x64xf32>
    %c1_89 = arith.constant 1 : index
    %c0_90 = arith.constant 0 : index
    %c0_91 = arith.constant 0 : index
    %59 = vector.load %arg15[%c1_89, %c0_90, %c0_91] : memref<2x1x64xf32, #tpu.memory_space<vmem>>, vector<1x1x64xf32>
    %60 = vector.shape_cast %59 : vector<1x1x64xf32> to vector<1x64xf32>
    %c1_92 = arith.constant 1 : index
    %c0_93 = arith.constant 0 : index
    %c0_94 = arith.constant 0 : index
    %61 = vector.load %arg16[%c1_92, %c0_93, %c0_94] : memref<2x64x32xf32, #tpu.memory_space<vmem>>, vector<1x64x32xf32>
    %62 = vector.shape_cast %61 : vector<1x64x32xf32> to vector<64x32xf32>
    %c1_95 = arith.constant 1 : index
    %c0_96 = arith.constant 0 : index
    %c0_97 = arith.constant 0 : index
    %63 = vector.load %arg17[%c1_95, %c0_96, %c0_97] : memref<2x1x32xf32, #tpu.memory_space<vmem>>, vector<1x1x32xf32>
    %64 = vector.shape_cast %63 : vector<1x1x32xf32> to vector<1x32xf32>
    %c1_98 = arith.constant 1 : index
    %c0_99 = arith.constant 0 : index
    %c0_100 = arith.constant 0 : index
    %65 = vector.load %arg18[%c1_98, %c0_99, %c0_100] : memref<2x1x32xf32, #tpu.memory_space<vmem>>, vector<1x1x32xf32>
    %66 = vector.shape_cast %65 : vector<1x1x32xf32> to vector<1x32xf32>
    %c1_101 = arith.constant 1 : index
    %c0_102 = arith.constant 0 : index
    %c0_103 = arith.constant 0 : index
    %67 = vector.load %arg19[%c1_101, %c0_102, %c0_103] : memref<2x1x32xf32, #tpu.memory_space<vmem>>, vector<1x1x32xf32>
    %68 = vector.shape_cast %67 : vector<1x1x32xf32> to vector<1x32xf32>
    %c1_104 = arith.constant 1 : index
    %c0_105 = arith.constant 0 : index
    %c0_106 = arith.constant 0 : index
    %69 = vector.load %arg20[%c1_104, %c0_105, %c0_106] : memref<2x1x32xf32, #tpu.memory_space<vmem>>, vector<1x1x32xf32>
    %70 = vector.shape_cast %69 : vector<1x1x32xf32> to vector<1x32xf32>
    %c1_107 = arith.constant 1 : index
    %c0_108 = arith.constant 0 : index
    %c0_109 = arith.constant 0 : index
    %71 = vector.load %arg21[%c1_107, %c0_108, %c0_109] : memref<2x1x32xf32, #tpu.memory_space<vmem>>, vector<1x1x32xf32>
    %72 = vector.shape_cast %71 : vector<1x1x32xf32> to vector<1x32xf32>
    %c1_110 = arith.constant 1 : index
    %c0_111 = arith.constant 0 : index
    %c0_112 = arith.constant 0 : index
    %73 = vector.load %arg22[%c1_110, %c0_111, %c0_112] : memref<2x1x32xf32, #tpu.memory_space<vmem>>, vector<1x1x32xf32>
    %74 = vector.shape_cast %73 : vector<1x1x32xf32> to vector<1x32xf32>
    %c1_113 = arith.constant 1 : index
    %c0_114 = arith.constant 0 : index
    %c0_115 = arith.constant 0 : index
    %75 = vector.load %arg23[%c1_113, %c0_114, %c0_115] : memref<2x1x32xf32, #tpu.memory_space<vmem>>, vector<1x1x32xf32>
    %76 = vector.shape_cast %75 : vector<1x1x32xf32> to vector<1x32xf32>
    %c0_116 = arith.constant 0 : index
    %c0_117 = arith.constant 0 : index
    %c0_118 = arith.constant 0 : index
    %77 = vector.load %arg10[%c0_116, %c0_117, %c0_118] : memref<2x32x64xf32, #tpu.memory_space<vmem>>, vector<1x32x64xf32>
    %78 = vector.shape_cast %77 : vector<1x32x64xf32> to vector<32x64xf32>
    %c0_119 = arith.constant 0 : index
    %c0_120 = arith.constant 0 : index
    %c0_121 = arith.constant 0 : index
    %79 = vector.load %arg11[%c0_119, %c0_120, %c0_121] : memref<2x1x64xf32, #tpu.memory_space<vmem>>, vector<1x1x64xf32>
    %80 = vector.shape_cast %79 : vector<1x1x64xf32> to vector<1x64xf32>
    %c0_122 = arith.constant 0 : index
    %c0_123 = arith.constant 0 : index
    %81 = vector.load %arg0[%c0_122, %c0_123] : memref<32x32xf32, #tpu.memory_space<vmem>>, vector<16x32xf32>
    %cst = arith.constant dense<0.000000e+00> : vector<16x64xf32>
    %82 = tpu.matmul %81, %78, %cst {dimension_numbers = #tpu.dot_dimension_numbers<[1], [0], [0], [1], [0, 0, 1, 1], [], []>} : vector<16x32xf32>, vector<32x64xf32>, vector<16x64xf32> -> vector<16x64xf32>
    %83 = vector.broadcast %80 : vector<1x64xf32> to vector<16x64xf32>
    %84 = arith.addf %82, %83 : vector<16x64xf32>
    %85 = vector.extract_strided_slice %84 {offsets = [0, 0], sizes = [16, 32], strides = [1, 1]} : vector<16x64xf32> to vector<16x32xf32>
    %86 = vector.extract_strided_slice %84 {offsets = [0, 32], sizes = [16, 32], strides = [1, 1]} : vector<16x64xf32> to vector<16x32xf32>
    %c16 = arith.constant 16 : index
    %c0_124 = arith.constant 0 : index
    %87 = vector.load %arg0[%c16, %c0_124] : memref<32x32xf32, #tpu.memory_space<vmem>>, vector<16x32xf32>
    %cst_125 = arith.constant dense<0.000000e+00> : vector<16x64xf32>
    %88 = tpu.matmul %87, %78, %cst_125 {dimension_numbers = #tpu.dot_dimension_numbers<[1], [0], [0], [1], [0, 0, 1, 1], [], []>} : vector<16x32xf32>, vector<32x64xf32>, vector<16x64xf32> -> vector<16x64xf32>
    %89 = vector.broadcast %80 : vector<1x64xf32> to vector<16x64xf32>
    %90 = arith.addf %88, %89 : vector<16x64xf32>
    %91 = vector.extract_strided_slice %90 {offsets = [0, 0], sizes = [16, 32], strides = [1, 1]} : vector<16x64xf32> to vector<16x32xf32>
    %92 = vector.extract_strided_slice %90 {offsets = [0, 32], sizes = [16, 32], strides = [1, 1]} : vector<16x64xf32> to vector<16x32xf32>
    %c1_126 = arith.constant 1 : index
    %c0_127 = arith.constant 0 : index
    %c0_128 = arith.constant 0 : index
    %93 = vector.load %arg10[%c1_126, %c0_127, %c0_128] : memref<2x32x64xf32, #tpu.memory_space<vmem>>, vector<1x32x64xf32>
    %94 = vector.shape_cast %93 : vector<1x32x64xf32> to vector<32x64xf32>
    %c1_129 = arith.constant 1 : index
    %c0_130 = arith.constant 0 : index
    %c0_131 = arith.constant 0 : index
    %95 = vector.load %arg11[%c1_129, %c0_130, %c0_131] : memref<2x1x64xf32, #tpu.memory_space<vmem>>, vector<1x1x64xf32>
    %96 = vector.shape_cast %95 : vector<1x1x64xf32> to vector<1x64xf32>
    %c0_132 = arith.constant 0 : index
    %c0_133 = arith.constant 0 : index
    %97 = vector.load %arg0[%c0_132, %c0_133] : memref<32x32xf32, #tpu.memory_space<vmem>>, vector<16x32xf32>
    %cst_134 = arith.constant dense<0.000000e+00> : vector<16x64xf32>
    %98 = tpu.matmul %97, %94, %cst_134 {dimension_numbers = #tpu.dot_dimension_numbers<[1], [0], [0], [1], [0, 0, 1, 1], [], []>} : vector<16x32xf32>, vector<32x64xf32>, vector<16x64xf32> -> vector<16x64xf32>
    %99 = vector.broadcast %96 : vector<1x64xf32> to vector<16x64xf32>
    %100 = arith.addf %98, %99 : vector<16x64xf32>
    %101 = vector.extract_strided_slice %100 {offsets = [0, 0], sizes = [16, 32], strides = [1, 1]} : vector<16x64xf32> to vector<16x32xf32>
    %102 = vector.extract_strided_slice %100 {offsets = [0, 32], sizes = [16, 32], strides = [1, 1]} : vector<16x64xf32> to vector<16x32xf32>
    %c16_135 = arith.constant 16 : index
    %c0_136 = arith.constant 0 : index
    %103 = vector.load %arg0[%c16_135, %c0_136] : memref<32x32xf32, #tpu.memory_space<vmem>>, vector<16x32xf32>
    %cst_137 = arith.constant dense<0.000000e+00> : vector<16x64xf32>
    %104 = tpu.matmul %103, %94, %cst_137 {dimension_numbers = #tpu.dot_dimension_numbers<[1], [0], [0], [1], [0, 0, 1, 1], [], []>} : vector<16x32xf32>, vector<32x64xf32>, vector<16x64xf32> -> vector<16x64xf32>
    %105 = vector.broadcast %96 : vector<1x64xf32> to vector<16x64xf32>
    %106 = arith.addf %104, %105 : vector<16x64xf32>
    %107 = vector.extract_strided_slice %106 {offsets = [0, 0], sizes = [16, 32], strides = [1, 1]} : vector<16x64xf32> to vector<16x32xf32>
    %108 = vector.extract_strided_slice %106 {offsets = [0, 32], sizes = [16, 32], strides = [1, 1]} : vector<16x64xf32> to vector<16x32xf32>
    %109 = tpu.iota {dimensions = array<i32: 0>} : vector<12x20xi32>
    %110 = tpu.iota {dimensions = array<i32: 1>} : vector<12x20xi32>
    %111 = tpu.iota {dimensions = array<i32: 0>} : vector<2x5xi32>
    %112 = tpu.iota {dimensions = array<i32: 1>} : vector<2x5xi32>
    %113 = tpu.iota {dimensions = array<i32: 0>} : vector<6x1xi32>
    %114 = tpu.iota {dimensions = array<i32: 1>} : vector<1x20xi32>
    %115 = arith.sitofp %114 : vector<1x20xi32> to vector<1x20xf32>
    %cst_138 = arith.constant 0.000000e+00 : f32
    %116 = vector.broadcast %cst_138 : f32 to vector<12x20xf32>
    %c0_i32 = arith.constant 0 : i32
    %117 = vector.broadcast %c0_i32 : i32 to vector<12x20xi32>
    %118 = arith.cmpi eq, %109, %117 : vector<12x20xi32>
    %c1_i32 = arith.constant 1 : i32
    %119 = vector.broadcast %c1_i32 : i32 to vector<12x20xi32>
    %120 = arith.cmpi eq, %110, %119 : vector<12x20xi32>
    %121 = arith.andi %118, %120 : vector<12x20xi1>
    %122 = arith.extui %121 : vector<12x20xi1> to vector<12x20xi32>
    %123 = arith.sitofp %122 : vector<12x20xi32> to vector<12x20xf32>
    %124 = arith.addf %116, %123 : vector<12x20xf32>
    %c6_i32 = arith.constant 6 : i32
    %125 = vector.broadcast %c6_i32 : i32 to vector<12x20xi32>
    %126 = arith.cmpi eq, %109, %125 : vector<12x20xi32>
    %c1_i32_139 = arith.constant 1 : i32
    %127 = vector.broadcast %c1_i32_139 : i32 to vector<12x20xi32>
    %128 = arith.cmpi eq, %110, %127 : vector<12x20xi32>
    %129 = arith.andi %126, %128 : vector<12x20xi1>
    %130 = arith.extui %129 : vector<12x20xi1> to vector<12x20xi32>
    %131 = arith.sitofp %130 : vector<12x20xi32> to vector<12x20xf32>
    %132 = arith.addf %124, %131 : vector<12x20xf32>
    %c0_i32_140 = arith.constant 0 : i32
    %133 = vector.broadcast %c0_i32_140 : i32 to vector<2x5xi32>
    %c0_i32_141 = arith.constant 0 : i32
    %c5_i32 = arith.constant 5 : i32
    %134 = arith.addi %c0_i32_141, %c5_i32 : i32
    %c1_i32_142 = arith.constant 1 : i32
    %135:2 = scf.for %arg27 = %c0_i32_141 to %134 step %c1_i32_142 iter_args(%arg28 = %132, %arg29 = %133) -> (vector<12x20xf32>, vector<2x5xi32>)  : i32 {
      %137 = vector.extract_strided_slice %arg28 {offsets = [0, 0], sizes = [6, 20], strides = [1, 1]} : vector<12x20xf32> to vector<6x20xf32>
      %cst_146 = arith.constant dense<0.000000e+00> : vector<6x32xf32>
      %138 = tpu.matmul %137, %0, %cst_146 {dimension_numbers = #tpu.dot_dimension_numbers<[1], [0], [0], [1], [0, 0, 1, 1], [], []>} : vector<6x20xf32>, vector<20x32xf32>, vector<6x32xf32> -> vector<6x32xf32>
      %139 = arith.addf %138, %1 : vector<6x32xf32>
      %cst_147 = arith.constant dense<0.000000e+00> : vector<6x96xf32>
      %140 = tpu.matmul %139, %6, %cst_147 {dimension_numbers = #tpu.dot_dimension_numbers<[1], [0], [0], [1], [0, 0, 1, 1], [], []>} : vector<6x32xf32>, vector<32x96xf32>, vector<6x96xf32> -> vector<6x96xf32>
      %141 = vector.broadcast %8 : vector<1x96xf32> to vector<6x96xf32>
      %142 = arith.addf %140, %141 : vector<6x96xf32>
      %143 = vector.extract_strided_slice %142 {offsets = [0, 0], sizes = [6, 32], strides = [1, 1]} : vector<6x96xf32> to vector<6x32xf32>
      %144 = vector.extract_strided_slice %142 {offsets = [0, 32], sizes = [6, 32], strides = [1, 1]} : vector<6x96xf32> to vector<6x32xf32>
      %145 = vector.extract_strided_slice %142 {offsets = [0, 64], sizes = [6, 32], strides = [1, 1]} : vector<6x96xf32> to vector<6x32xf32>
      %146 = vector.extract_strided_slice %143 {offsets = [0, 0], sizes = [6, 8], strides = [1, 1]} : vector<6x32xf32> to vector<6x8xf32>
      %147 = vector.extract_strided_slice %144 {offsets = [0, 0], sizes = [6, 8], strides = [1, 1]} : vector<6x32xf32> to vector<6x8xf32>
      %148 = vector.extract_strided_slice %145 {offsets = [0, 0], sizes = [6, 8], strides = [1, 1]} : vector<6x32xf32> to vector<6x8xf32>
      %cst_148 = arith.constant dense<0.000000e+00> : vector<6x6xf32>
      %149 = tpu.matmul %146, %147, %cst_148 {dimension_numbers = #tpu.dot_dimension_numbers<[1], [1], [0], [0], [0, 0, 1, 0], [], []>} : vector<6x8xf32>, vector<6x8xf32>, vector<6x6xf32> -> vector<6x6xf32>
      %cst_149 = arith.constant 0.353553385 : f32
      %150 = vector.broadcast %cst_149 : f32 to vector<6x6xf32>
      %151 = arith.mulf %149, %150 : vector<6x6xf32>
      %152 = arith.addf %151, %2 : vector<6x6xf32>
      %cst_150 = arith.constant dense<0xFF800000> : vector<6xf32>
      %153 = vector.multi_reduction <maximumf>, %152, %cst_150 [1] : vector<6x6xf32> to vector<6xf32>
      %154 = vector.shape_cast %153 : vector<6xf32> to vector<6x1xf32>
      %155 = vector.broadcast %154 : vector<6x1xf32> to vector<6x6xf32>
      %156 = arith.subf %152, %155 : vector<6x6xf32>
      %157 = math.exp %156 : vector<6x6xf32>
      %cst_151 = arith.constant dense<0.000000e+00> : vector<6xf32>
      %158 = vector.multi_reduction <add>, %157, %cst_151 [1] : vector<6x6xf32> to vector<6xf32>
      %159 = vector.shape_cast %158 : vector<6xf32> to vector<6x1xf32>
      %160 = tpu.reciprocal %159 {approx = true} : vector<6x1xf32> -> vector<6x1xf32>
      %161 = vector.broadcast %160 : vector<6x1xf32> to vector<6x6xf32>
      %162 = arith.mulf %157, %161 : vector<6x6xf32>
      %cst_152 = arith.constant dense<0.000000e+00> : vector<6x8xf32>
      %163 = tpu.matmul %162, %148, %cst_152 {dimension_numbers = #tpu.dot_dimension_numbers<[1], [0], [0], [1], [0, 0, 1, 1], [], []>} : vector<6x6xf32>, vector<6x8xf32>, vector<6x8xf32> -> vector<6x8xf32>
      %164 = vector.extract_strided_slice %10 {offsets = [0, 0], sizes = [8, 32], strides = [1, 1]} : vector<32x32xf32> to vector<8x32xf32>
      %cst_153 = arith.constant dense<0.000000e+00> : vector<6x32xf32>
      %165 = tpu.matmul %163, %164, %cst_153 {dimension_numbers = #tpu.dot_dimension_numbers<[1], [0], [0], [1], [0, 0, 1, 1], [], []>} : vector<6x8xf32>, vector<8x32xf32>, vector<6x32xf32> -> vector<6x32xf32>
      %166 = vector.extract_strided_slice %143 {offsets = [0, 8], sizes = [6, 8], strides = [1, 1]} : vector<6x32xf32> to vector<6x8xf32>
      %167 = vector.extract_strided_slice %144 {offsets = [0, 8], sizes = [6, 8], strides = [1, 1]} : vector<6x32xf32> to vector<6x8xf32>
      %168 = vector.extract_strided_slice %145 {offsets = [0, 8], sizes = [6, 8], strides = [1, 1]} : vector<6x32xf32> to vector<6x8xf32>
      %cst_154 = arith.constant dense<0.000000e+00> : vector<6x6xf32>
      %169 = tpu.matmul %166, %167, %cst_154 {dimension_numbers = #tpu.dot_dimension_numbers<[1], [1], [0], [0], [0, 0, 1, 0], [], []>} : vector<6x8xf32>, vector<6x8xf32>, vector<6x6xf32> -> vector<6x6xf32>
      %cst_155 = arith.constant 0.353553385 : f32
      %170 = vector.broadcast %cst_155 : f32 to vector<6x6xf32>
      %171 = arith.mulf %169, %170 : vector<6x6xf32>
      %172 = arith.addf %171, %2 : vector<6x6xf32>
      %cst_156 = arith.constant dense<0xFF800000> : vector<6xf32>
      %173 = vector.multi_reduction <maximumf>, %172, %cst_156 [1] : vector<6x6xf32> to vector<6xf32>
      %174 = vector.shape_cast %173 : vector<6xf32> to vector<6x1xf32>
      %175 = vector.broadcast %174 : vector<6x1xf32> to vector<6x6xf32>
      %176 = arith.subf %172, %175 : vector<6x6xf32>
      %177 = math.exp %176 : vector<6x6xf32>
      %cst_157 = arith.constant dense<0.000000e+00> : vector<6xf32>
      %178 = vector.multi_reduction <add>, %177, %cst_157 [1] : vector<6x6xf32> to vector<6xf32>
      %179 = vector.shape_cast %178 : vector<6xf32> to vector<6x1xf32>
      %180 = tpu.reciprocal %179 {approx = true} : vector<6x1xf32> -> vector<6x1xf32>
      %181 = vector.broadcast %180 : vector<6x1xf32> to vector<6x6xf32>
      %182 = arith.mulf %177, %181 : vector<6x6xf32>
      %cst_158 = arith.constant dense<0.000000e+00> : vector<6x8xf32>
      %183 = tpu.matmul %182, %168, %cst_158 {dimension_numbers = #tpu.dot_dimension_numbers<[1], [0], [0], [1], [0, 0, 1, 1], [], []>} : vector<6x6xf32>, vector<6x8xf32>, vector<6x8xf32> -> vector<6x8xf32>
      %184 = vector.extract_strided_slice %10 {offsets = [8, 0], sizes = [8, 32], strides = [1, 1]} : vector<32x32xf32> to vector<8x32xf32>
      %cst_159 = arith.constant dense<0.000000e+00> : vector<6x32xf32>
      %185 = tpu.matmul %183, %184, %cst_159 {dimension_numbers = #tpu.dot_dimension_numbers<[1], [0], [0], [1], [0, 0, 1, 1], [], []>} : vector<6x8xf32>, vector<8x32xf32>, vector<6x32xf32> -> vector<6x32xf32>
      %186 = arith.addf %165, %185 : vector<6x32xf32>
      %187 = vector.extract_strided_slice %143 {offsets = [0, 16], sizes = [6, 8], strides = [1, 1]} : vector<6x32xf32> to vector<6x8xf32>
      %188 = vector.extract_strided_slice %144 {offsets = [0, 16], sizes = [6, 8], strides = [1, 1]} : vector<6x32xf32> to vector<6x8xf32>
      %189 = vector.extract_strided_slice %145 {offsets = [0, 16], sizes = [6, 8], strides = [1, 1]} : vector<6x32xf32> to vector<6x8xf32>
      %cst_160 = arith.constant dense<0.000000e+00> : vector<6x6xf32>
      %190 = tpu.matmul %187, %188, %cst_160 {dimension_numbers = #tpu.dot_dimension_numbers<[1], [1], [0], [0], [0, 0, 1, 0], [], []>} : vector<6x8xf32>, vector<6x8xf32>, vector<6x6xf32> -> vector<6x6xf32>
      %cst_161 = arith.constant 0.353553385 : f32
      %191 = vector.broadcast %cst_161 : f32 to vector<6x6xf32>
      %192 = arith.mulf %190, %191 : vector<6x6xf32>
      %193 = arith.addf %192, %2 : vector<6x6xf32>
      %cst_162 = arith.constant dense<0xFF800000> : vector<6xf32>
      %194 = vector.multi_reduction <maximumf>, %193, %cst_162 [1] : vector<6x6xf32> to vector<6xf32>
      %195 = vector.shape_cast %194 : vector<6xf32> to vector<6x1xf32>
      %196 = vector.broadcast %195 : vector<6x1xf32> to vector<6x6xf32>
      %197 = arith.subf %193, %196 : vector<6x6xf32>
      %198 = math.exp %197 : vector<6x6xf32>
      %cst_163 = arith.constant dense<0.000000e+00> : vector<6xf32>
      %199 = vector.multi_reduction <add>, %198, %cst_163 [1] : vector<6x6xf32> to vector<6xf32>
      %200 = vector.shape_cast %199 : vector<6xf32> to vector<6x1xf32>
      %201 = tpu.reciprocal %200 {approx = true} : vector<6x1xf32> -> vector<6x1xf32>
      %202 = vector.broadcast %201 : vector<6x1xf32> to vector<6x6xf32>
      %203 = arith.mulf %198, %202 : vector<6x6xf32>
      %cst_164 = arith.constant dense<0.000000e+00> : vector<6x8xf32>
      %204 = tpu.matmul %203, %189, %cst_164 {dimension_numbers = #tpu.dot_dimension_numbers<[1], [0], [0], [1], [0, 0, 1, 1], [], []>} : vector<6x6xf32>, vector<6x8xf32>, vector<6x8xf32> -> vector<6x8xf32>
      %205 = vector.extract_strided_slice %10 {offsets = [16, 0], sizes = [8, 32], strides = [1, 1]} : vector<32x32xf32> to vector<8x32xf32>
      %cst_165 = arith.constant dense<0.000000e+00> : vector<6x32xf32>
      %206 = tpu.matmul %204, %205, %cst_165 {dimension_numbers = #tpu.dot_dimension_numbers<[1], [0], [0], [1], [0, 0, 1, 1], [], []>} : vector<6x8xf32>, vector<8x32xf32>, vector<6x32xf32> -> vector<6x32xf32>
      %207 = arith.addf %186, %206 : vector<6x32xf32>
      %208 = vector.extract_strided_slice %143 {offsets = [0, 24], sizes = [6, 8], strides = [1, 1]} : vector<6x32xf32> to vector<6x8xf32>
      %209 = vector.extract_strided_slice %144 {offsets = [0, 24], sizes = [6, 8], strides = [1, 1]} : vector<6x32xf32> to vector<6x8xf32>
      %210 = vector.extract_strided_slice %145 {offsets = [0, 24], sizes = [6, 8], strides = [1, 1]} : vector<6x32xf32> to vector<6x8xf32>
      %cst_166 = arith.constant dense<0.000000e+00> : vector<6x6xf32>
      %211 = tpu.matmul %208, %209, %cst_166 {dimension_numbers = #tpu.dot_dimension_numbers<[1], [1], [0], [0], [0, 0, 1, 0], [], []>} : vector<6x8xf32>, vector<6x8xf32>, vector<6x6xf32> -> vector<6x6xf32>
      %cst_167 = arith.constant 0.353553385 : f32
      %212 = vector.broadcast %cst_167 : f32 to vector<6x6xf32>
      %213 = arith.mulf %211, %212 : vector<6x6xf32>
      %214 = arith.addf %213, %2 : vector<6x6xf32>
      %cst_168 = arith.constant dense<0xFF800000> : vector<6xf32>
      %215 = vector.multi_reduction <maximumf>, %214, %cst_168 [1] : vector<6x6xf32> to vector<6xf32>
      %216 = vector.shape_cast %215 : vector<6xf32> to vector<6x1xf32>
      %217 = vector.broadcast %216 : vector<6x1xf32> to vector<6x6xf32>
      %218 = arith.subf %214, %217 : vector<6x6xf32>
      %219 = math.exp %218 : vector<6x6xf32>
      %cst_169 = arith.constant dense<0.000000e+00> : vector<6xf32>
      %220 = vector.multi_reduction <add>, %219, %cst_169 [1] : vector<6x6xf32> to vector<6xf32>
      %221 = vector.shape_cast %220 : vector<6xf32> to vector<6x1xf32>
      %222 = tpu.reciprocal %221 {approx = true} : vector<6x1xf32> -> vector<6x1xf32>
      %223 = vector.broadcast %222 : vector<6x1xf32> to vector<6x6xf32>
      %224 = arith.mulf %219, %223 : vector<6x6xf32>
      %cst_170 = arith.constant dense<0.000000e+00> : vector<6x8xf32>
      %225 = tpu.matmul %224, %210, %cst_170 {dimension_numbers = #tpu.dot_dimension_numbers<[1], [0], [0], [1], [0, 0, 1, 1], [], []>} : vector<6x6xf32>, vector<6x8xf32>, vector<6x8xf32> -> vector<6x8xf32>
      %226 = vector.extract_strided_slice %10 {offsets = [24, 0], sizes = [8, 32], strides = [1, 1]} : vector<32x32xf32> to vector<8x32xf32>
      %cst_171 = arith.constant dense<0.000000e+00> : vector<6x32xf32>
      %227 = tpu.matmul %225, %226, %cst_171 {dimension_numbers = #tpu.dot_dimension_numbers<[1], [0], [0], [1], [0, 0, 1, 1], [], []>} : vector<6x8xf32>, vector<8x32xf32>, vector<6x32xf32> -> vector<6x32xf32>
      %228 = arith.addf %207, %227 : vector<6x32xf32>
      %229 = vector.broadcast %12 : vector<1x32xf32> to vector<6x32xf32>
      %230 = arith.addf %228, %229 : vector<6x32xf32>
      %231 = arith.addf %139, %230 : vector<6x32xf32>
      %cst_172 = arith.constant dense<0.000000e+00> : vector<6xf32>
      %232 = vector.multi_reduction <add>, %231, %cst_172 [1] : vector<6x32xf32> to vector<6xf32>
      %233 = vector.shape_cast %232 : vector<6xf32> to vector<6x1xf32>
      %cst_173 = arith.constant 3.200000e+01 : f32
      %234 = vector.broadcast %cst_173 : f32 to vector<6x1xf32>
      %235 = arith.divf %233, %234 : vector<6x1xf32>
      %236 = vector.broadcast %235 : vector<6x1xf32> to vector<6x32xf32>
      %237 = arith.subf %231, %236 : vector<6x32xf32>
      %238 = arith.mulf %237, %237 : vector<6x32xf32>
      %cst_174 = arith.constant dense<0.000000e+00> : vector<6xf32>
      %239 = vector.multi_reduction <add>, %238, %cst_174 [1] : vector<6x32xf32> to vector<6xf32>
      %240 = vector.shape_cast %239 : vector<6xf32> to vector<6x1xf32>
      %cst_175 = arith.constant 3.200000e+01 : f32
      %241 = vector.broadcast %cst_175 : f32 to vector<6x1xf32>
      %242 = arith.divf %240, %241 : vector<6x1xf32>
      %cst_176 = arith.constant 9.99999974E-6 : f32
      %243 = vector.broadcast %cst_176 : f32 to vector<6x1xf32>
      %244 = arith.addf %242, %243 : vector<6x1xf32>
      %245 = math.rsqrt %244 : vector<6x1xf32>
      %246 = vector.broadcast %245 : vector<6x1xf32> to vector<6x32xf32>
      %247 = arith.mulf %237, %246 : vector<6x32xf32>
      %248 = vector.broadcast %30 : vector<1x32xf32> to vector<6x32xf32>
      %249 = arith.mulf %247, %248 : vector<6x32xf32>
      %250 = vector.broadcast %32 : vector<1x32xf32> to vector<6x32xf32>
      %251 = arith.addf %249, %250 : vector<6x32xf32>
      %cst_177 = arith.constant dense<0.000000e+00> : vector<6x32xf32>
      %252 = tpu.matmul %251, %14, %cst_177 {dimension_numbers = #tpu.dot_dimension_numbers<[1], [0], [0], [1], [0, 0, 1, 1], [], []>} : vector<6x32xf32>, vector<32x32xf32>, vector<6x32xf32> -> vector<6x32xf32>
      %253 = vector.broadcast %16 : vector<1x32xf32> to vector<6x32xf32>
      %254 = arith.addf %252, %253 : vector<6x32xf32>
      %255 = vector.extract_strided_slice %254 {offsets = [0, 0], sizes = [6, 8], strides = [1, 1]} : vector<6x32xf32> to vector<6x8xf32>
      %256 = vector.extract_strided_slice %85 {offsets = [0, 0], sizes = [16, 8], strides = [1, 1]} : vector<16x32xf32> to vector<16x8xf32>
      %257 = vector.extract_strided_slice %86 {offsets = [0, 0], sizes = [16, 8], strides = [1, 1]} : vector<16x32xf32> to vector<16x8xf32>
      %cst_178 = arith.constant dense<0.000000e+00> : vector<6x16xf32>
      %258 = tpu.matmul %255, %256, %cst_178 {dimension_numbers = #tpu.dot_dimension_numbers<[1], [1], [0], [0], [0, 0, 1, 0], [], []>} : vector<6x8xf32>, vector<16x8xf32>, vector<6x16xf32> -> vector<6x16xf32>
      %cst_179 = arith.constant 0.353553385 : f32
      %259 = vector.broadcast %cst_179 : f32 to vector<6x16xf32>
      %260 = arith.mulf %258, %259 : vector<6x16xf32>
      %cst_180 = arith.constant dense<0xFF800000> : vector<6xf32>
      %261 = vector.multi_reduction <maximumf>, %260, %cst_180 [1] : vector<6x16xf32> to vector<6xf32>
      %262 = vector.shape_cast %261 : vector<6xf32> to vector<6x1xf32>
      %263 = vector.broadcast %262 : vector<6x1xf32> to vector<6x16xf32>
      %264 = arith.subf %260, %263 : vector<6x16xf32>
      %265 = math.exp %264 : vector<6x16xf32>
      %cst_181 = arith.constant dense<0.000000e+00> : vector<6xf32>
      %266 = vector.multi_reduction <add>, %265, %cst_181 [1] : vector<6x16xf32> to vector<6xf32>
      %267 = vector.shape_cast %266 : vector<6xf32> to vector<6x1xf32>
      %268 = tpu.reciprocal %267 {approx = true} : vector<6x1xf32> -> vector<6x1xf32>
      %269 = vector.broadcast %268 : vector<6x1xf32> to vector<6x16xf32>
      %270 = arith.mulf %265, %269 : vector<6x16xf32>
      %cst_182 = arith.constant dense<0.000000e+00> : vector<6x8xf32>
      %271 = tpu.matmul %270, %257, %cst_182 {dimension_numbers = #tpu.dot_dimension_numbers<[1], [0], [0], [1], [0, 0, 1, 1], [], []>} : vector<6x16xf32>, vector<16x8xf32>, vector<6x8xf32> -> vector<6x8xf32>
      %272 = vector.extract_strided_slice %18 {offsets = [0, 0], sizes = [8, 32], strides = [1, 1]} : vector<32x32xf32> to vector<8x32xf32>
      %cst_183 = arith.constant dense<0.000000e+00> : vector<6x32xf32>
      %273 = tpu.matmul %271, %272, %cst_183 {dimension_numbers = #tpu.dot_dimension_numbers<[1], [0], [0], [1], [0, 0, 1, 1], [], []>} : vector<6x8xf32>, vector<8x32xf32>, vector<6x32xf32> -> vector<6x32xf32>
      %274 = vector.extract_strided_slice %254 {offsets = [0, 8], sizes = [6, 8], strides = [1, 1]} : vector<6x32xf32> to vector<6x8xf32>
      %275 = vector.extract_strided_slice %85 {offsets = [0, 8], sizes = [16, 8], strides = [1, 1]} : vector<16x32xf32> to vector<16x8xf32>
      %276 = vector.extract_strided_slice %86 {offsets = [0, 8], sizes = [16, 8], strides = [1, 1]} : vector<16x32xf32> to vector<16x8xf32>
      %cst_184 = arith.constant dense<0.000000e+00> : vector<6x16xf32>
      %277 = tpu.matmul %274, %275, %cst_184 {dimension_numbers = #tpu.dot_dimension_numbers<[1], [1], [0], [0], [0, 0, 1, 0], [], []>} : vector<6x8xf32>, vector<16x8xf32>, vector<6x16xf32> -> vector<6x16xf32>
      %cst_185 = arith.constant 0.353553385 : f32
      %278 = vector.broadcast %cst_185 : f32 to vector<6x16xf32>
      %279 = arith.mulf %277, %278 : vector<6x16xf32>
      %cst_186 = arith.constant dense<0xFF800000> : vector<6xf32>
      %280 = vector.multi_reduction <maximumf>, %279, %cst_186 [1] : vector<6x16xf32> to vector<6xf32>
      %281 = vector.shape_cast %280 : vector<6xf32> to vector<6x1xf32>
      %282 = vector.broadcast %281 : vector<6x1xf32> to vector<6x16xf32>
      %283 = arith.subf %279, %282 : vector<6x16xf32>
      %284 = math.exp %283 : vector<6x16xf32>
      %cst_187 = arith.constant dense<0.000000e+00> : vector<6xf32>
      %285 = vector.multi_reduction <add>, %284, %cst_187 [1] : vector<6x16xf32> to vector<6xf32>
      %286 = vector.shape_cast %285 : vector<6xf32> to vector<6x1xf32>
      %287 = tpu.reciprocal %286 {approx = true} : vector<6x1xf32> -> vector<6x1xf32>
      %288 = vector.broadcast %287 : vector<6x1xf32> to vector<6x16xf32>
      %289 = arith.mulf %284, %288 : vector<6x16xf32>
      %cst_188 = arith.constant dense<0.000000e+00> : vector<6x8xf32>
      %290 = tpu.matmul %289, %276, %cst_188 {dimension_numbers = #tpu.dot_dimension_numbers<[1], [0], [0], [1], [0, 0, 1, 1], [], []>} : vector<6x16xf32>, vector<16x8xf32>, vector<6x8xf32> -> vector<6x8xf32>
      %291 = vector.extract_strided_slice %18 {offsets = [8, 0], sizes = [8, 32], strides = [1, 1]} : vector<32x32xf32> to vector<8x32xf32>
      %cst_189 = arith.constant dense<0.000000e+00> : vector<6x32xf32>
      %292 = tpu.matmul %290, %291, %cst_189 {dimension_numbers = #tpu.dot_dimension_numbers<[1], [0], [0], [1], [0, 0, 1, 1], [], []>} : vector<6x8xf32>, vector<8x32xf32>, vector<6x32xf32> -> vector<6x32xf32>
      %293 = arith.addf %273, %292 : vector<6x32xf32>
      %294 = vector.extract_strided_slice %254 {offsets = [0, 16], sizes = [6, 8], strides = [1, 1]} : vector<6x32xf32> to vector<6x8xf32>
      %295 = vector.extract_strided_slice %85 {offsets = [0, 16], sizes = [16, 8], strides = [1, 1]} : vector<16x32xf32> to vector<16x8xf32>
      %296 = vector.extract_strided_slice %86 {offsets = [0, 16], sizes = [16, 8], strides = [1, 1]} : vector<16x32xf32> to vector<16x8xf32>
      %cst_190 = arith.constant dense<0.000000e+00> : vector<6x16xf32>
      %297 = tpu.matmul %294, %295, %cst_190 {dimension_numbers = #tpu.dot_dimension_numbers<[1], [1], [0], [0], [0, 0, 1, 0], [], []>} : vector<6x8xf32>, vector<16x8xf32>, vector<6x16xf32> -> vector<6x16xf32>
      %cst_191 = arith.constant 0.353553385 : f32
      %298 = vector.broadcast %cst_191 : f32 to vector<6x16xf32>
      %299 = arith.mulf %297, %298 : vector<6x16xf32>
      %cst_192 = arith.constant dense<0xFF800000> : vector<6xf32>
      %300 = vector.multi_reduction <maximumf>, %299, %cst_192 [1] : vector<6x16xf32> to vector<6xf32>
      %301 = vector.shape_cast %300 : vector<6xf32> to vector<6x1xf32>
      %302 = vector.broadcast %301 : vector<6x1xf32> to vector<6x16xf32>
      %303 = arith.subf %299, %302 : vector<6x16xf32>
      %304 = math.exp %303 : vector<6x16xf32>
      %cst_193 = arith.constant dense<0.000000e+00> : vector<6xf32>
      %305 = vector.multi_reduction <add>, %304, %cst_193 [1] : vector<6x16xf32> to vector<6xf32>
      %306 = vector.shape_cast %305 : vector<6xf32> to vector<6x1xf32>
      %307 = tpu.reciprocal %306 {approx = true} : vector<6x1xf32> -> vector<6x1xf32>
      %308 = vector.broadcast %307 : vector<6x1xf32> to vector<6x16xf32>
      %309 = arith.mulf %304, %308 : vector<6x16xf32>
      %cst_194 = arith.constant dense<0.000000e+00> : vector<6x8xf32>
      %310 = tpu.matmul %309, %296, %cst_194 {dimension_numbers = #tpu.dot_dimension_numbers<[1], [0], [0], [1], [0, 0, 1, 1], [], []>} : vector<6x16xf32>, vector<16x8xf32>, vector<6x8xf32> -> vector<6x8xf32>
      %311 = vector.extract_strided_slice %18 {offsets = [16, 0], sizes = [8, 32], strides = [1, 1]} : vector<32x32xf32> to vector<8x32xf32>
      %cst_195 = arith.constant dense<0.000000e+00> : vector<6x32xf32>
      %312 = tpu.matmul %310, %311, %cst_195 {dimension_numbers = #tpu.dot_dimension_numbers<[1], [0], [0], [1], [0, 0, 1, 1], [], []>} : vector<6x8xf32>, vector<8x32xf32>, vector<6x32xf32> -> vector<6x32xf32>
      %313 = arith.addf %293, %312 : vector<6x32xf32>
      %314 = vector.extract_strided_slice %254 {offsets = [0, 24], sizes = [6, 8], strides = [1, 1]} : vector<6x32xf32> to vector<6x8xf32>
      %315 = vector.extract_strided_slice %85 {offsets = [0, 24], sizes = [16, 8], strides = [1, 1]} : vector<16x32xf32> to vector<16x8xf32>
      %316 = vector.extract_strided_slice %86 {offsets = [0, 24], sizes = [16, 8], strides = [1, 1]} : vector<16x32xf32> to vector<16x8xf32>
      %cst_196 = arith.constant dense<0.000000e+00> : vector<6x16xf32>
      %317 = tpu.matmul %314, %315, %cst_196 {dimension_numbers = #tpu.dot_dimension_numbers<[1], [1], [0], [0], [0, 0, 1, 0], [], []>} : vector<6x8xf32>, vector<16x8xf32>, vector<6x16xf32> -> vector<6x16xf32>
      %cst_197 = arith.constant 0.353553385 : f32
      %318 = vector.broadcast %cst_197 : f32 to vector<6x16xf32>
      %319 = arith.mulf %317, %318 : vector<6x16xf32>
      %cst_198 = arith.constant dense<0xFF800000> : vector<6xf32>
      %320 = vector.multi_reduction <maximumf>, %319, %cst_198 [1] : vector<6x16xf32> to vector<6xf32>
      %321 = vector.shape_cast %320 : vector<6xf32> to vector<6x1xf32>
      %322 = vector.broadcast %321 : vector<6x1xf32> to vector<6x16xf32>
      %323 = arith.subf %319, %322 : vector<6x16xf32>
      %324 = math.exp %323 : vector<6x16xf32>
      %cst_199 = arith.constant dense<0.000000e+00> : vector<6xf32>
      %325 = vector.multi_reduction <add>, %324, %cst_199 [1] : vector<6x16xf32> to vector<6xf32>
      %326 = vector.shape_cast %325 : vector<6xf32> to vector<6x1xf32>
      %327 = tpu.reciprocal %326 {approx = true} : vector<6x1xf32> -> vector<6x1xf32>
      %328 = vector.broadcast %327 : vector<6x1xf32> to vector<6x16xf32>
      %329 = arith.mulf %324, %328 : vector<6x16xf32>
      %cst_200 = arith.constant dense<0.000000e+00> : vector<6x8xf32>
      %330 = tpu.matmul %329, %316, %cst_200 {dimension_numbers = #tpu.dot_dimension_numbers<[1], [0], [0], [1], [0, 0, 1, 1], [], []>} : vector<6x16xf32>, vector<16x8xf32>, vector<6x8xf32> -> vector<6x8xf32>
      %331 = vector.extract_strided_slice %18 {offsets = [24, 0], sizes = [8, 32], strides = [1, 1]} : vector<32x32xf32> to vector<8x32xf32>
      %cst_201 = arith.constant dense<0.000000e+00> : vector<6x32xf32>
      %332 = tpu.matmul %330, %331, %cst_201 {dimension_numbers = #tpu.dot_dimension_numbers<[1], [0], [0], [1], [0, 0, 1, 1], [], []>} : vector<6x8xf32>, vector<8x32xf32>, vector<6x32xf32> -> vector<6x32xf32>
      %333 = arith.addf %313, %332 : vector<6x32xf32>
      %334 = vector.broadcast %20 : vector<1x32xf32> to vector<6x32xf32>
      %335 = arith.addf %333, %334 : vector<6x32xf32>
      %336 = arith.addf %251, %335 : vector<6x32xf32>
      %cst_202 = arith.constant dense<0.000000e+00> : vector<6xf32>
      %337 = vector.multi_reduction <add>, %336, %cst_202 [1] : vector<6x32xf32> to vector<6xf32>
      %338 = vector.shape_cast %337 : vector<6xf32> to vector<6x1xf32>
      %cst_203 = arith.constant 3.200000e+01 : f32
      %339 = vector.broadcast %cst_203 : f32 to vector<6x1xf32>
      %340 = arith.divf %338, %339 : vector<6x1xf32>
      %341 = vector.broadcast %340 : vector<6x1xf32> to vector<6x32xf32>
      %342 = arith.subf %336, %341 : vector<6x32xf32>
      %343 = arith.mulf %342, %342 : vector<6x32xf32>
      %cst_204 = arith.constant dense<0.000000e+00> : vector<6xf32>
      %344 = vector.multi_reduction <add>, %343, %cst_204 [1] : vector<6x32xf32> to vector<6xf32>
      %345 = vector.shape_cast %344 : vector<6xf32> to vector<6x1xf32>
      %cst_205 = arith.constant 3.200000e+01 : f32
      %346 = vector.broadcast %cst_205 : f32 to vector<6x1xf32>
      %347 = arith.divf %345, %346 : vector<6x1xf32>
      %cst_206 = arith.constant 9.99999974E-6 : f32
      %348 = vector.broadcast %cst_206 : f32 to vector<6x1xf32>
      %349 = arith.addf %347, %348 : vector<6x1xf32>
      %350 = math.rsqrt %349 : vector<6x1xf32>
      %351 = vector.broadcast %350 : vector<6x1xf32> to vector<6x32xf32>
      %352 = arith.mulf %342, %351 : vector<6x32xf32>
      %353 = vector.broadcast %34 : vector<1x32xf32> to vector<6x32xf32>
      %354 = arith.mulf %352, %353 : vector<6x32xf32>
      %355 = vector.broadcast %36 : vector<1x32xf32> to vector<6x32xf32>
      %356 = arith.addf %354, %355 : vector<6x32xf32>
      %cst_207 = arith.constant dense<0.000000e+00> : vector<6x64xf32>
      %357 = tpu.matmul %356, %22, %cst_207 {dimension_numbers = #tpu.dot_dimension_numbers<[1], [0], [0], [1], [0, 0, 1, 1], [], []>} : vector<6x32xf32>, vector<32x64xf32>, vector<6x64xf32> -> vector<6x64xf32>
      %358 = vector.broadcast %24 : vector<1x64xf32> to vector<6x64xf32>
      %359 = arith.addf %357, %358 : vector<6x64xf32>
      %cst_208 = arith.constant 0.000000e+00 : f32
      %360 = vector.broadcast %cst_208 : f32 to vector<6x64xf32>
      %361 = arith.maximumf %359, %360 : vector<6x64xf32>
      %cst_209 = arith.constant dense<0.000000e+00> : vector<6x32xf32>
      %362 = tpu.matmul %361, %26, %cst_209 {dimension_numbers = #tpu.dot_dimension_numbers<[1], [0], [0], [1], [0, 0, 1, 1], [], []>} : vector<6x64xf32>, vector<64x32xf32>, vector<6x32xf32> -> vector<6x32xf32>
      %363 = vector.broadcast %28 : vector<1x32xf32> to vector<6x32xf32>
      %364 = arith.addf %362, %363 : vector<6x32xf32>
      %365 = arith.addf %356, %364 : vector<6x32xf32>
      %cst_210 = arith.constant dense<0.000000e+00> : vector<6xf32>
      %366 = vector.multi_reduction <add>, %365, %cst_210 [1] : vector<6x32xf32> to vector<6xf32>
      %367 = vector.shape_cast %366 : vector<6xf32> to vector<6x1xf32>
      %cst_211 = arith.constant 3.200000e+01 : f32
      %368 = vector.broadcast %cst_211 : f32 to vector<6x1xf32>
      %369 = arith.divf %367, %368 : vector<6x1xf32>
      %370 = vector.broadcast %369 : vector<6x1xf32> to vector<6x32xf32>
      %371 = arith.subf %365, %370 : vector<6x32xf32>
      %372 = arith.mulf %371, %371 : vector<6x32xf32>
      %cst_212 = arith.constant dense<0.000000e+00> : vector<6xf32>
      %373 = vector.multi_reduction <add>, %372, %cst_212 [1] : vector<6x32xf32> to vector<6xf32>
      %374 = vector.shape_cast %373 : vector<6xf32> to vector<6x1xf32>
      %cst_213 = arith.constant 3.200000e+01 : f32
      %375 = vector.broadcast %cst_213 : f32 to vector<6x1xf32>
      %376 = arith.divf %374, %375 : vector<6x1xf32>
      %cst_214 = arith.constant 9.99999974E-6 : f32
      %377 = vector.broadcast %cst_214 : f32 to vector<6x1xf32>
      %378 = arith.addf %376, %377 : vector<6x1xf32>
      %379 = math.rsqrt %378 : vector<6x1xf32>
      %380 = vector.broadcast %379 : vector<6x1xf32> to vector<6x32xf32>
      %381 = arith.mulf %371, %380 : vector<6x32xf32>
      %382 = vector.broadcast %38 : vector<1x32xf32> to vector<6x32xf32>
      %383 = arith.mulf %381, %382 : vector<6x32xf32>
      %384 = vector.broadcast %40 : vector<1x32xf32> to vector<6x32xf32>
      %385 = arith.addf %383, %384 : vector<6x32xf32>
      %cst_215 = arith.constant dense<0.000000e+00> : vector<6x96xf32>
      %386 = tpu.matmul %385, %42, %cst_215 {dimension_numbers = #tpu.dot_dimension_numbers<[1], [0], [0], [1], [0, 0, 1, 1], [], []>} : vector<6x32xf32>, vector<32x96xf32>, vector<6x96xf32> -> vector<6x96xf32>
      %387 = vector.broadcast %44 : vector<1x96xf32> to vector<6x96xf32>
      %388 = arith.addf %386, %387 : vector<6x96xf32>
      %389 = vector.extract_strided_slice %388 {offsets = [0, 0], sizes = [6, 32], strides = [1, 1]} : vector<6x96xf32> to vector<6x32xf32>
      %390 = vector.extract_strided_slice %388 {offsets = [0, 32], sizes = [6, 32], strides = [1, 1]} : vector<6x96xf32> to vector<6x32xf32>
      %391 = vector.extract_strided_slice %388 {offsets = [0, 64], sizes = [6, 32], strides = [1, 1]} : vector<6x96xf32> to vector<6x32xf32>
      %392 = vector.extract_strided_slice %389 {offsets = [0, 0], sizes = [6, 8], strides = [1, 1]} : vector<6x32xf32> to vector<6x8xf32>
      %393 = vector.extract_strided_slice %390 {offsets = [0, 0], sizes = [6, 8], strides = [1, 1]} : vector<6x32xf32> to vector<6x8xf32>
      %394 = vector.extract_strided_slice %391 {offsets = [0, 0], sizes = [6, 8], strides = [1, 1]} : vector<6x32xf32> to vector<6x8xf32>
      %cst_216 = arith.constant dense<0.000000e+00> : vector<6x6xf32>
      %395 = tpu.matmul %392, %393, %cst_216 {dimension_numbers = #tpu.dot_dimension_numbers<[1], [1], [0], [0], [0, 0, 1, 0], [], []>} : vector<6x8xf32>, vector<6x8xf32>, vector<6x6xf32> -> vector<6x6xf32>
      %cst_217 = arith.constant 0.353553385 : f32
      %396 = vector.broadcast %cst_217 : f32 to vector<6x6xf32>
      %397 = arith.mulf %395, %396 : vector<6x6xf32>
      %398 = arith.addf %397, %2 : vector<6x6xf32>
      %cst_218 = arith.constant dense<0xFF800000> : vector<6xf32>
      %399 = vector.multi_reduction <maximumf>, %398, %cst_218 [1] : vector<6x6xf32> to vector<6xf32>
      %400 = vector.shape_cast %399 : vector<6xf32> to vector<6x1xf32>
      %401 = vector.broadcast %400 : vector<6x1xf32> to vector<6x6xf32>
      %402 = arith.subf %398, %401 : vector<6x6xf32>
      %403 = math.exp %402 : vector<6x6xf32>
      %cst_219 = arith.constant dense<0.000000e+00> : vector<6xf32>
      %404 = vector.multi_reduction <add>, %403, %cst_219 [1] : vector<6x6xf32> to vector<6xf32>
      %405 = vector.shape_cast %404 : vector<6xf32> to vector<6x1xf32>
      %406 = tpu.reciprocal %405 {approx = true} : vector<6x1xf32> -> vector<6x1xf32>
      %407 = vector.broadcast %406 : vector<6x1xf32> to vector<6x6xf32>
      %408 = arith.mulf %403, %407 : vector<6x6xf32>
      %cst_220 = arith.constant dense<0.000000e+00> : vector<6x8xf32>
      %409 = tpu.matmul %408, %394, %cst_220 {dimension_numbers = #tpu.dot_dimension_numbers<[1], [0], [0], [1], [0, 0, 1, 1], [], []>} : vector<6x6xf32>, vector<6x8xf32>, vector<6x8xf32> -> vector<6x8xf32>
      %410 = vector.extract_strided_slice %46 {offsets = [0, 0], sizes = [8, 32], strides = [1, 1]} : vector<32x32xf32> to vector<8x32xf32>
      %cst_221 = arith.constant dense<0.000000e+00> : vector<6x32xf32>
      %411 = tpu.matmul %409, %410, %cst_221 {dimension_numbers = #tpu.dot_dimension_numbers<[1], [0], [0], [1], [0, 0, 1, 1], [], []>} : vector<6x8xf32>, vector<8x32xf32>, vector<6x32xf32> -> vector<6x32xf32>
      %412 = vector.extract_strided_slice %389 {offsets = [0, 8], sizes = [6, 8], strides = [1, 1]} : vector<6x32xf32> to vector<6x8xf32>
      %413 = vector.extract_strided_slice %390 {offsets = [0, 8], sizes = [6, 8], strides = [1, 1]} : vector<6x32xf32> to vector<6x8xf32>
      %414 = vector.extract_strided_slice %391 {offsets = [0, 8], sizes = [6, 8], strides = [1, 1]} : vector<6x32xf32> to vector<6x8xf32>
      %cst_222 = arith.constant dense<0.000000e+00> : vector<6x6xf32>
      %415 = tpu.matmul %412, %413, %cst_222 {dimension_numbers = #tpu.dot_dimension_numbers<[1], [1], [0], [0], [0, 0, 1, 0], [], []>} : vector<6x8xf32>, vector<6x8xf32>, vector<6x6xf32> -> vector<6x6xf32>
      %cst_223 = arith.constant 0.353553385 : f32
      %416 = vector.broadcast %cst_223 : f32 to vector<6x6xf32>
      %417 = arith.mulf %415, %416 : vector<6x6xf32>
      %418 = arith.addf %417, %2 : vector<6x6xf32>
      %cst_224 = arith.constant dense<0xFF800000> : vector<6xf32>
      %419 = vector.multi_reduction <maximumf>, %418, %cst_224 [1] : vector<6x6xf32> to vector<6xf32>
      %420 = vector.shape_cast %419 : vector<6xf32> to vector<6x1xf32>
      %421 = vector.broadcast %420 : vector<6x1xf32> to vector<6x6xf32>
      %422 = arith.subf %418, %421 : vector<6x6xf32>
      %423 = math.exp %422 : vector<6x6xf32>
      %cst_225 = arith.constant dense<0.000000e+00> : vector<6xf32>
      %424 = vector.multi_reduction <add>, %423, %cst_225 [1] : vector<6x6xf32> to vector<6xf32>
      %425 = vector.shape_cast %424 : vector<6xf32> to vector<6x1xf32>
      %426 = tpu.reciprocal %425 {approx = true} : vector<6x1xf32> -> vector<6x1xf32>
      %427 = vector.broadcast %426 : vector<6x1xf32> to vector<6x6xf32>
      %428 = arith.mulf %423, %427 : vector<6x6xf32>
      %cst_226 = arith.constant dense<0.000000e+00> : vector<6x8xf32>
      %429 = tpu.matmul %428, %414, %cst_226 {dimension_numbers = #tpu.dot_dimension_numbers<[1], [0], [0], [1], [0, 0, 1, 1], [], []>} : vector<6x6xf32>, vector<6x8xf32>, vector<6x8xf32> -> vector<6x8xf32>
      %430 = vector.extract_strided_slice %46 {offsets = [8, 0], sizes = [8, 32], strides = [1, 1]} : vector<32x32xf32> to vector<8x32xf32>
      %cst_227 = arith.constant dense<0.000000e+00> : vector<6x32xf32>
      %431 = tpu.matmul %429, %430, %cst_227 {dimension_numbers = #tpu.dot_dimension_numbers<[1], [0], [0], [1], [0, 0, 1, 1], [], []>} : vector<6x8xf32>, vector<8x32xf32>, vector<6x32xf32> -> vector<6x32xf32>
      %432 = arith.addf %411, %431 : vector<6x32xf32>
      %433 = vector.extract_strided_slice %389 {offsets = [0, 16], sizes = [6, 8], strides = [1, 1]} : vector<6x32xf32> to vector<6x8xf32>
      %434 = vector.extract_strided_slice %390 {offsets = [0, 16], sizes = [6, 8], strides = [1, 1]} : vector<6x32xf32> to vector<6x8xf32>
      %435 = vector.extract_strided_slice %391 {offsets = [0, 16], sizes = [6, 8], strides = [1, 1]} : vector<6x32xf32> to vector<6x8xf32>
      %cst_228 = arith.constant dense<0.000000e+00> : vector<6x6xf32>
      %436 = tpu.matmul %433, %434, %cst_228 {dimension_numbers = #tpu.dot_dimension_numbers<[1], [1], [0], [0], [0, 0, 1, 0], [], []>} : vector<6x8xf32>, vector<6x8xf32>, vector<6x6xf32> -> vector<6x6xf32>
      %cst_229 = arith.constant 0.353553385 : f32
      %437 = vector.broadcast %cst_229 : f32 to vector<6x6xf32>
      %438 = arith.mulf %436, %437 : vector<6x6xf32>
      %439 = arith.addf %438, %2 : vector<6x6xf32>
      %cst_230 = arith.constant dense<0xFF800000> : vector<6xf32>
      %440 = vector.multi_reduction <maximumf>, %439, %cst_230 [1] : vector<6x6xf32> to vector<6xf32>
      %441 = vector.shape_cast %440 : vector<6xf32> to vector<6x1xf32>
      %442 = vector.broadcast %441 : vector<6x1xf32> to vector<6x6xf32>
      %443 = arith.subf %439, %442 : vector<6x6xf32>
      %444 = math.exp %443 : vector<6x6xf32>
      %cst_231 = arith.constant dense<0.000000e+00> : vector<6xf32>
      %445 = vector.multi_reduction <add>, %444, %cst_231 [1] : vector<6x6xf32> to vector<6xf32>
      %446 = vector.shape_cast %445 : vector<6xf32> to vector<6x1xf32>
      %447 = tpu.reciprocal %446 {approx = true} : vector<6x1xf32> -> vector<6x1xf32>
      %448 = vector.broadcast %447 : vector<6x1xf32> to vector<6x6xf32>
      %449 = arith.mulf %444, %448 : vector<6x6xf32>
      %cst_232 = arith.constant dense<0.000000e+00> : vector<6x8xf32>
      %450 = tpu.matmul %449, %435, %cst_232 {dimension_numbers = #tpu.dot_dimension_numbers<[1], [0], [0], [1], [0, 0, 1, 1], [], []>} : vector<6x6xf32>, vector<6x8xf32>, vector<6x8xf32> -> vector<6x8xf32>
      %451 = vector.extract_strided_slice %46 {offsets = [16, 0], sizes = [8, 32], strides = [1, 1]} : vector<32x32xf32> to vector<8x32xf32>
      %cst_233 = arith.constant dense<0.000000e+00> : vector<6x32xf32>
      %452 = tpu.matmul %450, %451, %cst_233 {dimension_numbers = #tpu.dot_dimension_numbers<[1], [0], [0], [1], [0, 0, 1, 1], [], []>} : vector<6x8xf32>, vector<8x32xf32>, vector<6x32xf32> -> vector<6x32xf32>
      %453 = arith.addf %432, %452 : vector<6x32xf32>
      %454 = vector.extract_strided_slice %389 {offsets = [0, 24], sizes = [6, 8], strides = [1, 1]} : vector<6x32xf32> to vector<6x8xf32>
      %455 = vector.extract_strided_slice %390 {offsets = [0, 24], sizes = [6, 8], strides = [1, 1]} : vector<6x32xf32> to vector<6x8xf32>
      %456 = vector.extract_strided_slice %391 {offsets = [0, 24], sizes = [6, 8], strides = [1, 1]} : vector<6x32xf32> to vector<6x8xf32>
      %cst_234 = arith.constant dense<0.000000e+00> : vector<6x6xf32>
      %457 = tpu.matmul %454, %455, %cst_234 {dimension_numbers = #tpu.dot_dimension_numbers<[1], [1], [0], [0], [0, 0, 1, 0], [], []>} : vector<6x8xf32>, vector<6x8xf32>, vector<6x6xf32> -> vector<6x6xf32>
      %cst_235 = arith.constant 0.353553385 : f32
      %458 = vector.broadcast %cst_235 : f32 to vector<6x6xf32>
      %459 = arith.mulf %457, %458 : vector<6x6xf32>
      %460 = arith.addf %459, %2 : vector<6x6xf32>
      %cst_236 = arith.constant dense<0xFF800000> : vector<6xf32>
      %461 = vector.multi_reduction <maximumf>, %460, %cst_236 [1] : vector<6x6xf32> to vector<6xf32>
      %462 = vector.shape_cast %461 : vector<6xf32> to vector<6x1xf32>
      %463 = vector.broadcast %462 : vector<6x1xf32> to vector<6x6xf32>
      %464 = arith.subf %460, %463 : vector<6x6xf32>
      %465 = math.exp %464 : vector<6x6xf32>
      %cst_237 = arith.constant dense<0.000000e+00> : vector<6xf32>
      %466 = vector.multi_reduction <add>, %465, %cst_237 [1] : vector<6x6xf32> to vector<6xf32>
      %467 = vector.shape_cast %466 : vector<6xf32> to vector<6x1xf32>
      %468 = tpu.reciprocal %467 {approx = true} : vector<6x1xf32> -> vector<6x1xf32>
      %469 = vector.broadcast %468 : vector<6x1xf32> to vector<6x6xf32>
      %470 = arith.mulf %465, %469 : vector<6x6xf32>
      %cst_238 = arith.constant dense<0.000000e+00> : vector<6x8xf32>
      %471 = tpu.matmul %470, %456, %cst_238 {dimension_numbers = #tpu.dot_dimension_numbers<[1], [0], [0], [1], [0, 0, 1, 1], [], []>} : vector<6x6xf32>, vector<6x8xf32>, vector<6x8xf32> -> vector<6x8xf32>
      %472 = vector.extract_strided_slice %46 {offsets = [24, 0], sizes = [8, 32], strides = [1, 1]} : vector<32x32xf32> to vector<8x32xf32>
      %cst_239 = arith.constant dense<0.000000e+00> : vector<6x32xf32>
      %473 = tpu.matmul %471, %472, %cst_239 {dimension_numbers = #tpu.dot_dimension_numbers<[1], [0], [0], [1], [0, 0, 1, 1], [], []>} : vector<6x8xf32>, vector<8x32xf32>, vector<6x32xf32> -> vector<6x32xf32>
      %474 = arith.addf %453, %473 : vector<6x32xf32>
      %475 = vector.broadcast %48 : vector<1x32xf32> to vector<6x32xf32>
      %476 = arith.addf %474, %475 : vector<6x32xf32>
      %477 = arith.addf %385, %476 : vector<6x32xf32>
      %cst_240 = arith.constant dense<0.000000e+00> : vector<6xf32>
      %478 = vector.multi_reduction <add>, %477, %cst_240 [1] : vector<6x32xf32> to vector<6xf32>
      %479 = vector.shape_cast %478 : vector<6xf32> to vector<6x1xf32>
      %cst_241 = arith.constant 3.200000e+01 : f32
      %480 = vector.broadcast %cst_241 : f32 to vector<6x1xf32>
      %481 = arith.divf %479, %480 : vector<6x1xf32>
      %482 = vector.broadcast %481 : vector<6x1xf32> to vector<6x32xf32>
      %483 = arith.subf %477, %482 : vector<6x32xf32>
      %484 = arith.mulf %483, %483 : vector<6x32xf32>
      %cst_242 = arith.constant dense<0.000000e+00> : vector<6xf32>
      %485 = vector.multi_reduction <add>, %484, %cst_242 [1] : vector<6x32xf32> to vector<6xf32>
      %486 = vector.shape_cast %485 : vector<6xf32> to vector<6x1xf32>
      %cst_243 = arith.constant 3.200000e+01 : f32
      %487 = vector.broadcast %cst_243 : f32 to vector<6x1xf32>
      %488 = arith.divf %486, %487 : vector<6x1xf32>
      %cst_244 = arith.constant 9.99999974E-6 : f32
      %489 = vector.broadcast %cst_244 : f32 to vector<6x1xf32>
      %490 = arith.addf %488, %489 : vector<6x1xf32>
      %491 = math.rsqrt %490 : vector<6x1xf32>
      %492 = vector.broadcast %491 : vector<6x1xf32> to vector<6x32xf32>
      %493 = arith.mulf %483, %492 : vector<6x32xf32>
      %494 = vector.broadcast %66 : vector<1x32xf32> to vector<6x32xf32>
      %495 = arith.mulf %493, %494 : vector<6x32xf32>
      %496 = vector.broadcast %68 : vector<1x32xf32> to vector<6x32xf32>
      %497 = arith.addf %495, %496 : vector<6x32xf32>
      %cst_245 = arith.constant dense<0.000000e+00> : vector<6x32xf32>
      %498 = tpu.matmul %497, %50, %cst_245 {dimension_numbers = #tpu.dot_dimension_numbers<[1], [0], [0], [1], [0, 0, 1, 1], [], []>} : vector<6x32xf32>, vector<32x32xf32>, vector<6x32xf32> -> vector<6x32xf32>
      %499 = vector.broadcast %52 : vector<1x32xf32> to vector<6x32xf32>
      %500 = arith.addf %498, %499 : vector<6x32xf32>
      %501 = vector.extract_strided_slice %500 {offsets = [0, 0], sizes = [6, 8], strides = [1, 1]} : vector<6x32xf32> to vector<6x8xf32>
      %502 = vector.extract_strided_slice %101 {offsets = [0, 0], sizes = [16, 8], strides = [1, 1]} : vector<16x32xf32> to vector<16x8xf32>
      %503 = vector.extract_strided_slice %102 {offsets = [0, 0], sizes = [16, 8], strides = [1, 1]} : vector<16x32xf32> to vector<16x8xf32>
      %cst_246 = arith.constant dense<0.000000e+00> : vector<6x16xf32>
      %504 = tpu.matmul %501, %502, %cst_246 {dimension_numbers = #tpu.dot_dimension_numbers<[1], [1], [0], [0], [0, 0, 1, 0], [], []>} : vector<6x8xf32>, vector<16x8xf32>, vector<6x16xf32> -> vector<6x16xf32>
      %cst_247 = arith.constant 0.353553385 : f32
      %505 = vector.broadcast %cst_247 : f32 to vector<6x16xf32>
      %506 = arith.mulf %504, %505 : vector<6x16xf32>
      %cst_248 = arith.constant dense<0xFF800000> : vector<6xf32>
      %507 = vector.multi_reduction <maximumf>, %506, %cst_248 [1] : vector<6x16xf32> to vector<6xf32>
      %508 = vector.shape_cast %507 : vector<6xf32> to vector<6x1xf32>
      %509 = vector.broadcast %508 : vector<6x1xf32> to vector<6x16xf32>
      %510 = arith.subf %506, %509 : vector<6x16xf32>
      %511 = math.exp %510 : vector<6x16xf32>
      %cst_249 = arith.constant dense<0.000000e+00> : vector<6xf32>
      %512 = vector.multi_reduction <add>, %511, %cst_249 [1] : vector<6x16xf32> to vector<6xf32>
      %513 = vector.shape_cast %512 : vector<6xf32> to vector<6x1xf32>
      %514 = tpu.reciprocal %513 {approx = true} : vector<6x1xf32> -> vector<6x1xf32>
      %515 = vector.broadcast %514 : vector<6x1xf32> to vector<6x16xf32>
      %516 = arith.mulf %511, %515 : vector<6x16xf32>
      %cst_250 = arith.constant dense<0.000000e+00> : vector<6x8xf32>
      %517 = tpu.matmul %516, %503, %cst_250 {dimension_numbers = #tpu.dot_dimension_numbers<[1], [0], [0], [1], [0, 0, 1, 1], [], []>} : vector<6x16xf32>, vector<16x8xf32>, vector<6x8xf32> -> vector<6x8xf32>
      %518 = vector.extract_strided_slice %54 {offsets = [0, 0], sizes = [8, 32], strides = [1, 1]} : vector<32x32xf32> to vector<8x32xf32>
      %cst_251 = arith.constant dense<0.000000e+00> : vector<6x32xf32>
      %519 = tpu.matmul %517, %518, %cst_251 {dimension_numbers = #tpu.dot_dimension_numbers<[1], [0], [0], [1], [0, 0, 1, 1], [], []>} : vector<6x8xf32>, vector<8x32xf32>, vector<6x32xf32> -> vector<6x32xf32>
      %520 = vector.extract_strided_slice %500 {offsets = [0, 8], sizes = [6, 8], strides = [1, 1]} : vector<6x32xf32> to vector<6x8xf32>
      %521 = vector.extract_strided_slice %101 {offsets = [0, 8], sizes = [16, 8], strides = [1, 1]} : vector<16x32xf32> to vector<16x8xf32>
      %522 = vector.extract_strided_slice %102 {offsets = [0, 8], sizes = [16, 8], strides = [1, 1]} : vector<16x32xf32> to vector<16x8xf32>
      %cst_252 = arith.constant dense<0.000000e+00> : vector<6x16xf32>
      %523 = tpu.matmul %520, %521, %cst_252 {dimension_numbers = #tpu.dot_dimension_numbers<[1], [1], [0], [0], [0, 0, 1, 0], [], []>} : vector<6x8xf32>, vector<16x8xf32>, vector<6x16xf32> -> vector<6x16xf32>
      %cst_253 = arith.constant 0.353553385 : f32
      %524 = vector.broadcast %cst_253 : f32 to vector<6x16xf32>
      %525 = arith.mulf %523, %524 : vector<6x16xf32>
      %cst_254 = arith.constant dense<0xFF800000> : vector<6xf32>
      %526 = vector.multi_reduction <maximumf>, %525, %cst_254 [1] : vector<6x16xf32> to vector<6xf32>
      %527 = vector.shape_cast %526 : vector<6xf32> to vector<6x1xf32>
      %528 = vector.broadcast %527 : vector<6x1xf32> to vector<6x16xf32>
      %529 = arith.subf %525, %528 : vector<6x16xf32>
      %530 = math.exp %529 : vector<6x16xf32>
      %cst_255 = arith.constant dense<0.000000e+00> : vector<6xf32>
      %531 = vector.multi_reduction <add>, %530, %cst_255 [1] : vector<6x16xf32> to vector<6xf32>
      %532 = vector.shape_cast %531 : vector<6xf32> to vector<6x1xf32>
      %533 = tpu.reciprocal %532 {approx = true} : vector<6x1xf32> -> vector<6x1xf32>
      %534 = vector.broadcast %533 : vector<6x1xf32> to vector<6x16xf32>
      %535 = arith.mulf %530, %534 : vector<6x16xf32>
      %cst_256 = arith.constant dense<0.000000e+00> : vector<6x8xf32>
      %536 = tpu.matmul %535, %522, %cst_256 {dimension_numbers = #tpu.dot_dimension_numbers<[1], [0], [0], [1], [0, 0, 1, 1], [], []>} : vector<6x16xf32>, vector<16x8xf32>, vector<6x8xf32> -> vector<6x8xf32>
      %537 = vector.extract_strided_slice %54 {offsets = [8, 0], sizes = [8, 32], strides = [1, 1]} : vector<32x32xf32> to vector<8x32xf32>
      %cst_257 = arith.constant dense<0.000000e+00> : vector<6x32xf32>
      %538 = tpu.matmul %536, %537, %cst_257 {dimension_numbers = #tpu.dot_dimension_numbers<[1], [0], [0], [1], [0, 0, 1, 1], [], []>} : vector<6x8xf32>, vector<8x32xf32>, vector<6x32xf32> -> vector<6x32xf32>
      %539 = arith.addf %519, %538 : vector<6x32xf32>
      %540 = vector.extract_strided_slice %500 {offsets = [0, 16], sizes = [6, 8], strides = [1, 1]} : vector<6x32xf32> to vector<6x8xf32>
      %541 = vector.extract_strided_slice %101 {offsets = [0, 16], sizes = [16, 8], strides = [1, 1]} : vector<16x32xf32> to vector<16x8xf32>
      %542 = vector.extract_strided_slice %102 {offsets = [0, 16], sizes = [16, 8], strides = [1, 1]} : vector<16x32xf32> to vector<16x8xf32>
      %cst_258 = arith.constant dense<0.000000e+00> : vector<6x16xf32>
      %543 = tpu.matmul %540, %541, %cst_258 {dimension_numbers = #tpu.dot_dimension_numbers<[1], [1], [0], [0], [0, 0, 1, 0], [], []>} : vector<6x8xf32>, vector<16x8xf32>, vector<6x16xf32> -> vector<6x16xf32>
      %cst_259 = arith.constant 0.353553385 : f32
      %544 = vector.broadcast %cst_259 : f32 to vector<6x16xf32>
      %545 = arith.mulf %543, %544 : vector<6x16xf32>
      %cst_260 = arith.constant dense<0xFF800000> : vector<6xf32>
      %546 = vector.multi_reduction <maximumf>, %545, %cst_260 [1] : vector<6x16xf32> to vector<6xf32>
      %547 = vector.shape_cast %546 : vector<6xf32> to vector<6x1xf32>
      %548 = vector.broadcast %547 : vector<6x1xf32> to vector<6x16xf32>
      %549 = arith.subf %545, %548 : vector<6x16xf32>
      %550 = math.exp %549 : vector<6x16xf32>
      %cst_261 = arith.constant dense<0.000000e+00> : vector<6xf32>
      %551 = vector.multi_reduction <add>, %550, %cst_261 [1] : vector<6x16xf32> to vector<6xf32>
      %552 = vector.shape_cast %551 : vector<6xf32> to vector<6x1xf32>
      %553 = tpu.reciprocal %552 {approx = true} : vector<6x1xf32> -> vector<6x1xf32>
      %554 = vector.broadcast %553 : vector<6x1xf32> to vector<6x16xf32>
      %555 = arith.mulf %550, %554 : vector<6x16xf32>
      %cst_262 = arith.constant dense<0.000000e+00> : vector<6x8xf32>
      %556 = tpu.matmul %555, %542, %cst_262 {dimension_numbers = #tpu.dot_dimension_numbers<[1], [0], [0], [1], [0, 0, 1, 1], [], []>} : vector<6x16xf32>, vector<16x8xf32>, vector<6x8xf32> -> vector<6x8xf32>
      %557 = vector.extract_strided_slice %54 {offsets = [16, 0], sizes = [8, 32], strides = [1, 1]} : vector<32x32xf32> to vector<8x32xf32>
      %cst_263 = arith.constant dense<0.000000e+00> : vector<6x32xf32>
      %558 = tpu.matmul %556, %557, %cst_263 {dimension_numbers = #tpu.dot_dimension_numbers<[1], [0], [0], [1], [0, 0, 1, 1], [], []>} : vector<6x8xf32>, vector<8x32xf32>, vector<6x32xf32> -> vector<6x32xf32>
      %559 = arith.addf %539, %558 : vector<6x32xf32>
      %560 = vector.extract_strided_slice %500 {offsets = [0, 24], sizes = [6, 8], strides = [1, 1]} : vector<6x32xf32> to vector<6x8xf32>
      %561 = vector.extract_strided_slice %101 {offsets = [0, 24], sizes = [16, 8], strides = [1, 1]} : vector<16x32xf32> to vector<16x8xf32>
      %562 = vector.extract_strided_slice %102 {offsets = [0, 24], sizes = [16, 8], strides = [1, 1]} : vector<16x32xf32> to vector<16x8xf32>
      %cst_264 = arith.constant dense<0.000000e+00> : vector<6x16xf32>
      %563 = tpu.matmul %560, %561, %cst_264 {dimension_numbers = #tpu.dot_dimension_numbers<[1], [1], [0], [0], [0, 0, 1, 0], [], []>} : vector<6x8xf32>, vector<16x8xf32>, vector<6x16xf32> -> vector<6x16xf32>
      %cst_265 = arith.constant 0.353553385 : f32
      %564 = vector.broadcast %cst_265 : f32 to vector<6x16xf32>
      %565 = arith.mulf %563, %564 : vector<6x16xf32>
      %cst_266 = arith.constant dense<0xFF800000> : vector<6xf32>
      %566 = vector.multi_reduction <maximumf>, %565, %cst_266 [1] : vector<6x16xf32> to vector<6xf32>
      %567 = vector.shape_cast %566 : vector<6xf32> to vector<6x1xf32>
      %568 = vector.broadcast %567 : vector<6x1xf32> to vector<6x16xf32>
      %569 = arith.subf %565, %568 : vector<6x16xf32>
      %570 = math.exp %569 : vector<6x16xf32>
      %cst_267 = arith.constant dense<0.000000e+00> : vector<6xf32>
      %571 = vector.multi_reduction <add>, %570, %cst_267 [1] : vector<6x16xf32> to vector<6xf32>
      %572 = vector.shape_cast %571 : vector<6xf32> to vector<6x1xf32>
      %573 = tpu.reciprocal %572 {approx = true} : vector<6x1xf32> -> vector<6x1xf32>
      %574 = vector.broadcast %573 : vector<6x1xf32> to vector<6x16xf32>
      %575 = arith.mulf %570, %574 : vector<6x16xf32>
      %cst_268 = arith.constant dense<0.000000e+00> : vector<6x8xf32>
      %576 = tpu.matmul %575, %562, %cst_268 {dimension_numbers = #tpu.dot_dimension_numbers<[1], [0], [0], [1], [0, 0, 1, 1], [], []>} : vector<6x16xf32>, vector<16x8xf32>, vector<6x8xf32> -> vector<6x8xf32>
      %577 = vector.extract_strided_slice %54 {offsets = [24, 0], sizes = [8, 32], strides = [1, 1]} : vector<32x32xf32> to vector<8x32xf32>
      %cst_269 = arith.constant dense<0.000000e+00> : vector<6x32xf32>
      %578 = tpu.matmul %576, %577, %cst_269 {dimension_numbers = #tpu.dot_dimension_numbers<[1], [0], [0], [1], [0, 0, 1, 1], [], []>} : vector<6x8xf32>, vector<8x32xf32>, vector<6x32xf32> -> vector<6x32xf32>
      %579 = arith.addf %559, %578 : vector<6x32xf32>
      %580 = vector.broadcast %56 : vector<1x32xf32> to vector<6x32xf32>
      %581 = arith.addf %579, %580 : vector<6x32xf32>
      %582 = arith.addf %497, %581 : vector<6x32xf32>
      %cst_270 = arith.constant dense<0.000000e+00> : vector<6xf32>
      %583 = vector.multi_reduction <add>, %582, %cst_270 [1] : vector<6x32xf32> to vector<6xf32>
      %584 = vector.shape_cast %583 : vector<6xf32> to vector<6x1xf32>
      %cst_271 = arith.constant 3.200000e+01 : f32
      %585 = vector.broadcast %cst_271 : f32 to vector<6x1xf32>
      %586 = arith.divf %584, %585 : vector<6x1xf32>
      %587 = vector.broadcast %586 : vector<6x1xf32> to vector<6x32xf32>
      %588 = arith.subf %582, %587 : vector<6x32xf32>
      %589 = arith.mulf %588, %588 : vector<6x32xf32>
      %cst_272 = arith.constant dense<0.000000e+00> : vector<6xf32>
      %590 = vector.multi_reduction <add>, %589, %cst_272 [1] : vector<6x32xf32> to vector<6xf32>
      %591 = vector.shape_cast %590 : vector<6xf32> to vector<6x1xf32>
      %cst_273 = arith.constant 3.200000e+01 : f32
      %592 = vector.broadcast %cst_273 : f32 to vector<6x1xf32>
      %593 = arith.divf %591, %592 : vector<6x1xf32>
      %cst_274 = arith.constant 9.99999974E-6 : f32
      %594 = vector.broadcast %cst_274 : f32 to vector<6x1xf32>
      %595 = arith.addf %593, %594 : vector<6x1xf32>
      %596 = math.rsqrt %595 : vector<6x1xf32>
      %597 = vector.broadcast %596 : vector<6x1xf32> to vector<6x32xf32>
      %598 = arith.mulf %588, %597 : vector<6x32xf32>
      %599 = vector.broadcast %70 : vector<1x32xf32> to vector<6x32xf32>
      %600 = arith.mulf %598, %599 : vector<6x32xf32>
      %601 = vector.broadcast %72 : vector<1x32xf32> to vector<6x32xf32>
      %602 = arith.addf %600, %601 : vector<6x32xf32>
      %cst_275 = arith.constant dense<0.000000e+00> : vector<6x64xf32>
      %603 = tpu.matmul %602, %58, %cst_275 {dimension_numbers = #tpu.dot_dimension_numbers<[1], [0], [0], [1], [0, 0, 1, 1], [], []>} : vector<6x32xf32>, vector<32x64xf32>, vector<6x64xf32> -> vector<6x64xf32>
      %604 = vector.broadcast %60 : vector<1x64xf32> to vector<6x64xf32>
      %605 = arith.addf %603, %604 : vector<6x64xf32>
      %cst_276 = arith.constant 0.000000e+00 : f32
      %606 = vector.broadcast %cst_276 : f32 to vector<6x64xf32>
      %607 = arith.maximumf %605, %606 : vector<6x64xf32>
      %cst_277 = arith.constant dense<0.000000e+00> : vector<6x32xf32>
      %608 = tpu.matmul %607, %62, %cst_277 {dimension_numbers = #tpu.dot_dimension_numbers<[1], [0], [0], [1], [0, 0, 1, 1], [], []>} : vector<6x64xf32>, vector<64x32xf32>, vector<6x32xf32> -> vector<6x32xf32>
      %609 = vector.broadcast %64 : vector<1x32xf32> to vector<6x32xf32>
      %610 = arith.addf %608, %609 : vector<6x32xf32>
      %611 = arith.addf %602, %610 : vector<6x32xf32>
      %cst_278 = arith.constant dense<0.000000e+00> : vector<6xf32>
      %612 = vector.multi_reduction <add>, %611, %cst_278 [1] : vector<6x32xf32> to vector<6xf32>
      %613 = vector.shape_cast %612 : vector<6xf32> to vector<6x1xf32>
      %cst_279 = arith.constant 3.200000e+01 : f32
      %614 = vector.broadcast %cst_279 : f32 to vector<6x1xf32>
      %615 = arith.divf %613, %614 : vector<6x1xf32>
      %616 = vector.broadcast %615 : vector<6x1xf32> to vector<6x32xf32>
      %617 = arith.subf %611, %616 : vector<6x32xf32>
      %618 = arith.mulf %617, %617 : vector<6x32xf32>
      %cst_280 = arith.constant dense<0.000000e+00> : vector<6xf32>
      %619 = vector.multi_reduction <add>, %618, %cst_280 [1] : vector<6x32xf32> to vector<6xf32>
      %620 = vector.shape_cast %619 : vector<6xf32> to vector<6x1xf32>
      %cst_281 = arith.constant 3.200000e+01 : f32
      %621 = vector.broadcast %cst_281 : f32 to vector<6x1xf32>
      %622 = arith.divf %620, %621 : vector<6x1xf32>
      %cst_282 = arith.constant 9.99999974E-6 : f32
      %623 = vector.broadcast %cst_282 : f32 to vector<6x1xf32>
      %624 = arith.addf %622, %623 : vector<6x1xf32>
      %625 = math.rsqrt %624 : vector<6x1xf32>
      %626 = vector.broadcast %625 : vector<6x1xf32> to vector<6x32xf32>
      %627 = arith.mulf %617, %626 : vector<6x32xf32>
      %628 = vector.broadcast %74 : vector<1x32xf32> to vector<6x32xf32>
      %629 = arith.mulf %627, %628 : vector<6x32xf32>
      %630 = vector.broadcast %76 : vector<1x32xf32> to vector<6x32xf32>
      %631 = arith.addf %629, %630 : vector<6x32xf32>
      %632 = vector.broadcast %arg27 : i32 to vector<6x1xi32>
      %633 = arith.cmpi eq, %113, %632 : vector<6x1xi32>
      %634 = arith.extui %633 : vector<6x1xi1> to vector<6x1xi32>
      %635 = arith.sitofp %634 : vector<6x1xi32> to vector<6x1xf32>
      %636 = vector.broadcast %635 : vector<6x1xf32> to vector<6x32xf32>
      %637 = arith.mulf %631, %636 : vector<6x32xf32>
      %cst_283 = arith.constant dense<0.000000e+00> : vector<32xf32>
      %638 = vector.multi_reduction <add>, %637, %cst_283 [0] : vector<6x32xf32> to vector<32xf32>
      %639 = vector.shape_cast %638 : vector<32xf32> to vector<1x32xf32>
      %cst_284 = arith.constant dense<0.000000e+00> : vector<1x20xf32>
      %640 = tpu.matmul %639, %3, %cst_284 {dimension_numbers = #tpu.dot_dimension_numbers<[1], [0], [0], [1], [0, 0, 1, 1], [], []>} : vector<1x32xf32>, vector<32x20xf32>, vector<1x20xf32> -> vector<1x20xf32>
      %641 = arith.addf %640, %4 : vector<1x20xf32>
      %cst_285 = arith.constant dense<0xFF800000> : vector<1xf32>
      %642 = vector.multi_reduction <maximumf>, %641, %cst_285 [1] : vector<1x20xf32> to vector<1xf32>
      %643 = vector.shape_cast %642 : vector<1xf32> to vector<1x1xf32>
      %644 = vector.broadcast %643 : vector<1x1xf32> to vector<1x20xf32>
      %645 = arith.cmpf oeq, %641, %644 : vector<1x20xf32>
      %cst_286 = arith.constant 2.000000e+01 : f32
      %646 = vector.broadcast %cst_286 : f32 to vector<1x20xf32>
      %647 = arith.select %645, %115, %646 : vector<1x20xi1>, vector<1x20xf32>
      %cst_287 = arith.constant dense<0x7F800000> : vector<1xf32>
      %648 = vector.multi_reduction <minimumf>, %647, %cst_287 [1] : vector<1x20xf32> to vector<1xf32>
      %649 = vector.shape_cast %648 : vector<1xf32> to vector<1x1xf32>
      %650 = arith.fptosi %649 : vector<1x1xf32> to vector<1x1xi32>
      %c0_i32_288 = arith.constant 0 : i32
      %651 = arith.addi %c0_i32_288, %arg27 : i32
      %c1_i32_289 = arith.constant 1 : i32
      %652 = arith.addi %651, %c1_i32_289 : i32
      %653 = vector.broadcast %652 : i32 to vector<12x20xi32>
      %654 = arith.cmpi eq, %109, %653 : vector<12x20xi32>
      %655 = vector.broadcast %650 : vector<1x1xi32> to vector<12x20xi32>
      %656 = arith.cmpi eq, %110, %655 : vector<12x20xi32>
      %657 = arith.andi %654, %656 : vector<12x20xi1>
      %658 = arith.extui %657 : vector<12x20xi1> to vector<12x20xi32>
      %659 = arith.sitofp %658 : vector<12x20xi32> to vector<12x20xf32>
      %660 = arith.addf %arg28, %659 : vector<12x20xf32>
      %c0_i32_290 = arith.constant 0 : i32
      %661 = vector.broadcast %c0_i32_290 : i32 to vector<2x5xi32>
      %662 = arith.cmpi eq, %111, %661 : vector<2x5xi32>
      %663 = vector.broadcast %arg27 : i32 to vector<2x5xi32>
      %664 = arith.cmpi eq, %112, %663 : vector<2x5xi32>
      %665 = arith.andi %662, %664 : vector<2x5xi1>
      %666 = arith.extui %665 : vector<2x5xi1> to vector<2x5xi32>
      %667 = vector.broadcast %650 : vector<1x1xi32> to vector<2x5xi32>
      %668 = arith.muli %667, %666 : vector<2x5xi32>
      %669 = arith.addi %arg29, %668 : vector<2x5xi32>
      %670 = vector.extract_strided_slice %660 {offsets = [6, 0], sizes = [6, 20], strides = [1, 1]} : vector<12x20xf32> to vector<6x20xf32>
      %cst_291 = arith.constant dense<0.000000e+00> : vector<6x32xf32>
      %671 = tpu.matmul %670, %0, %cst_291 {dimension_numbers = #tpu.dot_dimension_numbers<[1], [0], [0], [1], [0, 0, 1, 1], [], []>} : vector<6x20xf32>, vector<20x32xf32>, vector<6x32xf32> -> vector<6x32xf32>
      %672 = arith.addf %671, %1 : vector<6x32xf32>
      %cst_292 = arith.constant dense<0.000000e+00> : vector<6x96xf32>
      %673 = tpu.matmul %672, %6, %cst_292 {dimension_numbers = #tpu.dot_dimension_numbers<[1], [0], [0], [1], [0, 0, 1, 1], [], []>} : vector<6x32xf32>, vector<32x96xf32>, vector<6x96xf32> -> vector<6x96xf32>
      %674 = vector.broadcast %8 : vector<1x96xf32> to vector<6x96xf32>
      %675 = arith.addf %673, %674 : vector<6x96xf32>
      %676 = vector.extract_strided_slice %675 {offsets = [0, 0], sizes = [6, 32], strides = [1, 1]} : vector<6x96xf32> to vector<6x32xf32>
      %677 = vector.extract_strided_slice %675 {offsets = [0, 32], sizes = [6, 32], strides = [1, 1]} : vector<6x96xf32> to vector<6x32xf32>
      %678 = vector.extract_strided_slice %675 {offsets = [0, 64], sizes = [6, 32], strides = [1, 1]} : vector<6x96xf32> to vector<6x32xf32>
      %679 = vector.extract_strided_slice %676 {offsets = [0, 0], sizes = [6, 8], strides = [1, 1]} : vector<6x32xf32> to vector<6x8xf32>
      %680 = vector.extract_strided_slice %677 {offsets = [0, 0], sizes = [6, 8], strides = [1, 1]} : vector<6x32xf32> to vector<6x8xf32>
      %681 = vector.extract_strided_slice %678 {offsets = [0, 0], sizes = [6, 8], strides = [1, 1]} : vector<6x32xf32> to vector<6x8xf32>
      %cst_293 = arith.constant dense<0.000000e+00> : vector<6x6xf32>
      %682 = tpu.matmul %679, %680, %cst_293 {dimension_numbers = #tpu.dot_dimension_numbers<[1], [1], [0], [0], [0, 0, 1, 0], [], []>} : vector<6x8xf32>, vector<6x8xf32>, vector<6x6xf32> -> vector<6x6xf32>
      %cst_294 = arith.constant 0.353553385 : f32
      %683 = vector.broadcast %cst_294 : f32 to vector<6x6xf32>
      %684 = arith.mulf %682, %683 : vector<6x6xf32>
      %685 = arith.addf %684, %2 : vector<6x6xf32>
      %cst_295 = arith.constant dense<0xFF800000> : vector<6xf32>
      %686 = vector.multi_reduction <maximumf>, %685, %cst_295 [1] : vector<6x6xf32> to vector<6xf32>
      %687 = vector.shape_cast %686 : vector<6xf32> to vector<6x1xf32>
      %688 = vector.broadcast %687 : vector<6x1xf32> to vector<6x6xf32>
      %689 = arith.subf %685, %688 : vector<6x6xf32>
      %690 = math.exp %689 : vector<6x6xf32>
      %cst_296 = arith.constant dense<0.000000e+00> : vector<6xf32>
      %691 = vector.multi_reduction <add>, %690, %cst_296 [1] : vector<6x6xf32> to vector<6xf32>
      %692 = vector.shape_cast %691 : vector<6xf32> to vector<6x1xf32>
      %693 = tpu.reciprocal %692 {approx = true} : vector<6x1xf32> -> vector<6x1xf32>
      %694 = vector.broadcast %693 : vector<6x1xf32> to vector<6x6xf32>
      %695 = arith.mulf %690, %694 : vector<6x6xf32>
      %cst_297 = arith.constant dense<0.000000e+00> : vector<6x8xf32>
      %696 = tpu.matmul %695, %681, %cst_297 {dimension_numbers = #tpu.dot_dimension_numbers<[1], [0], [0], [1], [0, 0, 1, 1], [], []>} : vector<6x6xf32>, vector<6x8xf32>, vector<6x8xf32> -> vector<6x8xf32>
      %697 = vector.extract_strided_slice %10 {offsets = [0, 0], sizes = [8, 32], strides = [1, 1]} : vector<32x32xf32> to vector<8x32xf32>
      %cst_298 = arith.constant dense<0.000000e+00> : vector<6x32xf32>
      %698 = tpu.matmul %696, %697, %cst_298 {dimension_numbers = #tpu.dot_dimension_numbers<[1], [0], [0], [1], [0, 0, 1, 1], [], []>} : vector<6x8xf32>, vector<8x32xf32>, vector<6x32xf32> -> vector<6x32xf32>
      %699 = vector.extract_strided_slice %676 {offsets = [0, 8], sizes = [6, 8], strides = [1, 1]} : vector<6x32xf32> to vector<6x8xf32>
      %700 = vector.extract_strided_slice %677 {offsets = [0, 8], sizes = [6, 8], strides = [1, 1]} : vector<6x32xf32> to vector<6x8xf32>
      %701 = vector.extract_strided_slice %678 {offsets = [0, 8], sizes = [6, 8], strides = [1, 1]} : vector<6x32xf32> to vector<6x8xf32>
      %cst_299 = arith.constant dense<0.000000e+00> : vector<6x6xf32>
      %702 = tpu.matmul %699, %700, %cst_299 {dimension_numbers = #tpu.dot_dimension_numbers<[1], [1], [0], [0], [0, 0, 1, 0], [], []>} : vector<6x8xf32>, vector<6x8xf32>, vector<6x6xf32> -> vector<6x6xf32>
      %cst_300 = arith.constant 0.353553385 : f32
      %703 = vector.broadcast %cst_300 : f32 to vector<6x6xf32>
      %704 = arith.mulf %702, %703 : vector<6x6xf32>
      %705 = arith.addf %704, %2 : vector<6x6xf32>
      %cst_301 = arith.constant dense<0xFF800000> : vector<6xf32>
      %706 = vector.multi_reduction <maximumf>, %705, %cst_301 [1] : vector<6x6xf32> to vector<6xf32>
      %707 = vector.shape_cast %706 : vector<6xf32> to vector<6x1xf32>
      %708 = vector.broadcast %707 : vector<6x1xf32> to vector<6x6xf32>
      %709 = arith.subf %705, %708 : vector<6x6xf32>
      %710 = math.exp %709 : vector<6x6xf32>
      %cst_302 = arith.constant dense<0.000000e+00> : vector<6xf32>
      %711 = vector.multi_reduction <add>, %710, %cst_302 [1] : vector<6x6xf32> to vector<6xf32>
      %712 = vector.shape_cast %711 : vector<6xf32> to vector<6x1xf32>
      %713 = tpu.reciprocal %712 {approx = true} : vector<6x1xf32> -> vector<6x1xf32>
      %714 = vector.broadcast %713 : vector<6x1xf32> to vector<6x6xf32>
      %715 = arith.mulf %710, %714 : vector<6x6xf32>
      %cst_303 = arith.constant dense<0.000000e+00> : vector<6x8xf32>
      %716 = tpu.matmul %715, %701, %cst_303 {dimension_numbers = #tpu.dot_dimension_numbers<[1], [0], [0], [1], [0, 0, 1, 1], [], []>} : vector<6x6xf32>, vector<6x8xf32>, vector<6x8xf32> -> vector<6x8xf32>
      %717 = vector.extract_strided_slice %10 {offsets = [8, 0], sizes = [8, 32], strides = [1, 1]} : vector<32x32xf32> to vector<8x32xf32>
      %cst_304 = arith.constant dense<0.000000e+00> : vector<6x32xf32>
      %718 = tpu.matmul %716, %717, %cst_304 {dimension_numbers = #tpu.dot_dimension_numbers<[1], [0], [0], [1], [0, 0, 1, 1], [], []>} : vector<6x8xf32>, vector<8x32xf32>, vector<6x32xf32> -> vector<6x32xf32>
      %719 = arith.addf %698, %718 : vector<6x32xf32>
      %720 = vector.extract_strided_slice %676 {offsets = [0, 16], sizes = [6, 8], strides = [1, 1]} : vector<6x32xf32> to vector<6x8xf32>
      %721 = vector.extract_strided_slice %677 {offsets = [0, 16], sizes = [6, 8], strides = [1, 1]} : vector<6x32xf32> to vector<6x8xf32>
      %722 = vector.extract_strided_slice %678 {offsets = [0, 16], sizes = [6, 8], strides = [1, 1]} : vector<6x32xf32> to vector<6x8xf32>
      %cst_305 = arith.constant dense<0.000000e+00> : vector<6x6xf32>
      %723 = tpu.matmul %720, %721, %cst_305 {dimension_numbers = #tpu.dot_dimension_numbers<[1], [1], [0], [0], [0, 0, 1, 0], [], []>} : vector<6x8xf32>, vector<6x8xf32>, vector<6x6xf32> -> vector<6x6xf32>
      %cst_306 = arith.constant 0.353553385 : f32
      %724 = vector.broadcast %cst_306 : f32 to vector<6x6xf32>
      %725 = arith.mulf %723, %724 : vector<6x6xf32>
      %726 = arith.addf %725, %2 : vector<6x6xf32>
      %cst_307 = arith.constant dense<0xFF800000> : vector<6xf32>
      %727 = vector.multi_reduction <maximumf>, %726, %cst_307 [1] : vector<6x6xf32> to vector<6xf32>
      %728 = vector.shape_cast %727 : vector<6xf32> to vector<6x1xf32>
      %729 = vector.broadcast %728 : vector<6x1xf32> to vector<6x6xf32>
      %730 = arith.subf %726, %729 : vector<6x6xf32>
      %731 = math.exp %730 : vector<6x6xf32>
      %cst_308 = arith.constant dense<0.000000e+00> : vector<6xf32>
      %732 = vector.multi_reduction <add>, %731, %cst_308 [1] : vector<6x6xf32> to vector<6xf32>
      %733 = vector.shape_cast %732 : vector<6xf32> to vector<6x1xf32>
      %734 = tpu.reciprocal %733 {approx = true} : vector<6x1xf32> -> vector<6x1xf32>
      %735 = vector.broadcast %734 : vector<6x1xf32> to vector<6x6xf32>
      %736 = arith.mulf %731, %735 : vector<6x6xf32>
      %cst_309 = arith.constant dense<0.000000e+00> : vector<6x8xf32>
      %737 = tpu.matmul %736, %722, %cst_309 {dimension_numbers = #tpu.dot_dimension_numbers<[1], [0], [0], [1], [0, 0, 1, 1], [], []>} : vector<6x6xf32>, vector<6x8xf32>, vector<6x8xf32> -> vector<6x8xf32>
      %738 = vector.extract_strided_slice %10 {offsets = [16, 0], sizes = [8, 32], strides = [1, 1]} : vector<32x32xf32> to vector<8x32xf32>
      %cst_310 = arith.constant dense<0.000000e+00> : vector<6x32xf32>
      %739 = tpu.matmul %737, %738, %cst_310 {dimension_numbers = #tpu.dot_dimension_numbers<[1], [0], [0], [1], [0, 0, 1, 1], [], []>} : vector<6x8xf32>, vector<8x32xf32>, vector<6x32xf32> -> vector<6x32xf32>
      %740 = arith.addf %719, %739 : vector<6x32xf32>
      %741 = vector.extract_strided_slice %676 {offsets = [0, 24], sizes = [6, 8], strides = [1, 1]} : vector<6x32xf32> to vector<6x8xf32>
      %742 = vector.extract_strided_slice %677 {offsets = [0, 24], sizes = [6, 8], strides = [1, 1]} : vector<6x32xf32> to vector<6x8xf32>
      %743 = vector.extract_strided_slice %678 {offsets = [0, 24], sizes = [6, 8], strides = [1, 1]} : vector<6x32xf32> to vector<6x8xf32>
      %cst_311 = arith.constant dense<0.000000e+00> : vector<6x6xf32>
      %744 = tpu.matmul %741, %742, %cst_311 {dimension_numbers = #tpu.dot_dimension_numbers<[1], [1], [0], [0], [0, 0, 1, 0], [], []>} : vector<6x8xf32>, vector<6x8xf32>, vector<6x6xf32> -> vector<6x6xf32>
      %cst_312 = arith.constant 0.353553385 : f32
      %745 = vector.broadcast %cst_312 : f32 to vector<6x6xf32>
      %746 = arith.mulf %744, %745 : vector<6x6xf32>
      %747 = arith.addf %746, %2 : vector<6x6xf32>
      %cst_313 = arith.constant dense<0xFF800000> : vector<6xf32>
      %748 = vector.multi_reduction <maximumf>, %747, %cst_313 [1] : vector<6x6xf32> to vector<6xf32>
      %749 = vector.shape_cast %748 : vector<6xf32> to vector<6x1xf32>
      %750 = vector.broadcast %749 : vector<6x1xf32> to vector<6x6xf32>
      %751 = arith.subf %747, %750 : vector<6x6xf32>
      %752 = math.exp %751 : vector<6x6xf32>
      %cst_314 = arith.constant dense<0.000000e+00> : vector<6xf32>
      %753 = vector.multi_reduction <add>, %752, %cst_314 [1] : vector<6x6xf32> to vector<6xf32>
      %754 = vector.shape_cast %753 : vector<6xf32> to vector<6x1xf32>
      %755 = tpu.reciprocal %754 {approx = true} : vector<6x1xf32> -> vector<6x1xf32>
      %756 = vector.broadcast %755 : vector<6x1xf32> to vector<6x6xf32>
      %757 = arith.mulf %752, %756 : vector<6x6xf32>
      %cst_315 = arith.constant dense<0.000000e+00> : vector<6x8xf32>
      %758 = tpu.matmul %757, %743, %cst_315 {dimension_numbers = #tpu.dot_dimension_numbers<[1], [0], [0], [1], [0, 0, 1, 1], [], []>} : vector<6x6xf32>, vector<6x8xf32>, vector<6x8xf32> -> vector<6x8xf32>
      %759 = vector.extract_strided_slice %10 {offsets = [24, 0], sizes = [8, 32], strides = [1, 1]} : vector<32x32xf32> to vector<8x32xf32>
      %cst_316 = arith.constant dense<0.000000e+00> : vector<6x32xf32>
      %760 = tpu.matmul %758, %759, %cst_316 {dimension_numbers = #tpu.dot_dimension_numbers<[1], [0], [0], [1], [0, 0, 1, 1], [], []>} : vector<6x8xf32>, vector<8x32xf32>, vector<6x32xf32> -> vector<6x32xf32>
      %761 = arith.addf %740, %760 : vector<6x32xf32>
      %762 = vector.broadcast %12 : vector<1x32xf32> to vector<6x32xf32>
      %763 = arith.addf %761, %762 : vector<6x32xf32>
      %764 = arith.addf %672, %763 : vector<6x32xf32>
      %cst_317 = arith.constant dense<0.000000e+00> : vector<6xf32>
      %765 = vector.multi_reduction <add>, %764, %cst_317 [1] : vector<6x32xf32> to vector<6xf32>
      %766 = vector.shape_cast %765 : vector<6xf32> to vector<6x1xf32>
      %cst_318 = arith.constant 3.200000e+01 : f32
      %767 = vector.broadcast %cst_318 : f32 to vector<6x1xf32>
      %768 = arith.divf %766, %767 : vector<6x1xf32>
      %769 = vector.broadcast %768 : vector<6x1xf32> to vector<6x32xf32>
      %770 = arith.subf %764, %769 : vector<6x32xf32>
      %771 = arith.mulf %770, %770 : vector<6x32xf32>
      %cst_319 = arith.constant dense<0.000000e+00> : vector<6xf32>
      %772 = vector.multi_reduction <add>, %771, %cst_319 [1] : vector<6x32xf32> to vector<6xf32>
      %773 = vector.shape_cast %772 : vector<6xf32> to vector<6x1xf32>
      %cst_320 = arith.constant 3.200000e+01 : f32
      %774 = vector.broadcast %cst_320 : f32 to vector<6x1xf32>
      %775 = arith.divf %773, %774 : vector<6x1xf32>
      %cst_321 = arith.constant 9.99999974E-6 : f32
      %776 = vector.broadcast %cst_321 : f32 to vector<6x1xf32>
      %777 = arith.addf %775, %776 : vector<6x1xf32>
      %778 = math.rsqrt %777 : vector<6x1xf32>
      %779 = vector.broadcast %778 : vector<6x1xf32> to vector<6x32xf32>
      %780 = arith.mulf %770, %779 : vector<6x32xf32>
      %781 = vector.broadcast %30 : vector<1x32xf32> to vector<6x32xf32>
      %782 = arith.mulf %780, %781 : vector<6x32xf32>
      %783 = vector.broadcast %32 : vector<1x32xf32> to vector<6x32xf32>
      %784 = arith.addf %782, %783 : vector<6x32xf32>
      %cst_322 = arith.constant dense<0.000000e+00> : vector<6x32xf32>
      %785 = tpu.matmul %784, %14, %cst_322 {dimension_numbers = #tpu.dot_dimension_numbers<[1], [0], [0], [1], [0, 0, 1, 1], [], []>} : vector<6x32xf32>, vector<32x32xf32>, vector<6x32xf32> -> vector<6x32xf32>
      %786 = vector.broadcast %16 : vector<1x32xf32> to vector<6x32xf32>
      %787 = arith.addf %785, %786 : vector<6x32xf32>
      %788 = vector.extract_strided_slice %787 {offsets = [0, 0], sizes = [6, 8], strides = [1, 1]} : vector<6x32xf32> to vector<6x8xf32>
      %789 = vector.extract_strided_slice %91 {offsets = [0, 0], sizes = [16, 8], strides = [1, 1]} : vector<16x32xf32> to vector<16x8xf32>
      %790 = vector.extract_strided_slice %92 {offsets = [0, 0], sizes = [16, 8], strides = [1, 1]} : vector<16x32xf32> to vector<16x8xf32>
      %cst_323 = arith.constant dense<0.000000e+00> : vector<6x16xf32>
      %791 = tpu.matmul %788, %789, %cst_323 {dimension_numbers = #tpu.dot_dimension_numbers<[1], [1], [0], [0], [0, 0, 1, 0], [], []>} : vector<6x8xf32>, vector<16x8xf32>, vector<6x16xf32> -> vector<6x16xf32>
      %cst_324 = arith.constant 0.353553385 : f32
      %792 = vector.broadcast %cst_324 : f32 to vector<6x16xf32>
      %793 = arith.mulf %791, %792 : vector<6x16xf32>
      %cst_325 = arith.constant dense<0xFF800000> : vector<6xf32>
      %794 = vector.multi_reduction <maximumf>, %793, %cst_325 [1] : vector<6x16xf32> to vector<6xf32>
      %795 = vector.shape_cast %794 : vector<6xf32> to vector<6x1xf32>
      %796 = vector.broadcast %795 : vector<6x1xf32> to vector<6x16xf32>
      %797 = arith.subf %793, %796 : vector<6x16xf32>
      %798 = math.exp %797 : vector<6x16xf32>
      %cst_326 = arith.constant dense<0.000000e+00> : vector<6xf32>
      %799 = vector.multi_reduction <add>, %798, %cst_326 [1] : vector<6x16xf32> to vector<6xf32>
      %800 = vector.shape_cast %799 : vector<6xf32> to vector<6x1xf32>
      %801 = tpu.reciprocal %800 {approx = true} : vector<6x1xf32> -> vector<6x1xf32>
      %802 = vector.broadcast %801 : vector<6x1xf32> to vector<6x16xf32>
      %803 = arith.mulf %798, %802 : vector<6x16xf32>
      %cst_327 = arith.constant dense<0.000000e+00> : vector<6x8xf32>
      %804 = tpu.matmul %803, %790, %cst_327 {dimension_numbers = #tpu.dot_dimension_numbers<[1], [0], [0], [1], [0, 0, 1, 1], [], []>} : vector<6x16xf32>, vector<16x8xf32>, vector<6x8xf32> -> vector<6x8xf32>
      %805 = vector.extract_strided_slice %18 {offsets = [0, 0], sizes = [8, 32], strides = [1, 1]} : vector<32x32xf32> to vector<8x32xf32>
      %cst_328 = arith.constant dense<0.000000e+00> : vector<6x32xf32>
      %806 = tpu.matmul %804, %805, %cst_328 {dimension_numbers = #tpu.dot_dimension_numbers<[1], [0], [0], [1], [0, 0, 1, 1], [], []>} : vector<6x8xf32>, vector<8x32xf32>, vector<6x32xf32> -> vector<6x32xf32>
      %807 = vector.extract_strided_slice %787 {offsets = [0, 8], sizes = [6, 8], strides = [1, 1]} : vector<6x32xf32> to vector<6x8xf32>
      %808 = vector.extract_strided_slice %91 {offsets = [0, 8], sizes = [16, 8], strides = [1, 1]} : vector<16x32xf32> to vector<16x8xf32>
      %809 = vector.extract_strided_slice %92 {offsets = [0, 8], sizes = [16, 8], strides = [1, 1]} : vector<16x32xf32> to vector<16x8xf32>
      %cst_329 = arith.constant dense<0.000000e+00> : vector<6x16xf32>
      %810 = tpu.matmul %807, %808, %cst_329 {dimension_numbers = #tpu.dot_dimension_numbers<[1], [1], [0], [0], [0, 0, 1, 0], [], []>} : vector<6x8xf32>, vector<16x8xf32>, vector<6x16xf32> -> vector<6x16xf32>
      %cst_330 = arith.constant 0.353553385 : f32
      %811 = vector.broadcast %cst_330 : f32 to vector<6x16xf32>
      %812 = arith.mulf %810, %811 : vector<6x16xf32>
      %cst_331 = arith.constant dense<0xFF800000> : vector<6xf32>
      %813 = vector.multi_reduction <maximumf>, %812, %cst_331 [1] : vector<6x16xf32> to vector<6xf32>
      %814 = vector.shape_cast %813 : vector<6xf32> to vector<6x1xf32>
      %815 = vector.broadcast %814 : vector<6x1xf32> to vector<6x16xf32>
      %816 = arith.subf %812, %815 : vector<6x16xf32>
      %817 = math.exp %816 : vector<6x16xf32>
      %cst_332 = arith.constant dense<0.000000e+00> : vector<6xf32>
      %818 = vector.multi_reduction <add>, %817, %cst_332 [1] : vector<6x16xf32> to vector<6xf32>
      %819 = vector.shape_cast %818 : vector<6xf32> to vector<6x1xf32>
      %820 = tpu.reciprocal %819 {approx = true} : vector<6x1xf32> -> vector<6x1xf32>
      %821 = vector.broadcast %820 : vector<6x1xf32> to vector<6x16xf32>
      %822 = arith.mulf %817, %821 : vector<6x16xf32>
      %cst_333 = arith.constant dense<0.000000e+00> : vector<6x8xf32>
      %823 = tpu.matmul %822, %809, %cst_333 {dimension_numbers = #tpu.dot_dimension_numbers<[1], [0], [0], [1], [0, 0, 1, 1], [], []>} : vector<6x16xf32>, vector<16x8xf32>, vector<6x8xf32> -> vector<6x8xf32>
      %824 = vector.extract_strided_slice %18 {offsets = [8, 0], sizes = [8, 32], strides = [1, 1]} : vector<32x32xf32> to vector<8x32xf32>
      %cst_334 = arith.constant dense<0.000000e+00> : vector<6x32xf32>
      %825 = tpu.matmul %823, %824, %cst_334 {dimension_numbers = #tpu.dot_dimension_numbers<[1], [0], [0], [1], [0, 0, 1, 1], [], []>} : vector<6x8xf32>, vector<8x32xf32>, vector<6x32xf32> -> vector<6x32xf32>
      %826 = arith.addf %806, %825 : vector<6x32xf32>
      %827 = vector.extract_strided_slice %787 {offsets = [0, 16], sizes = [6, 8], strides = [1, 1]} : vector<6x32xf32> to vector<6x8xf32>
      %828 = vector.extract_strided_slice %91 {offsets = [0, 16], sizes = [16, 8], strides = [1, 1]} : vector<16x32xf32> to vector<16x8xf32>
      %829 = vector.extract_strided_slice %92 {offsets = [0, 16], sizes = [16, 8], strides = [1, 1]} : vector<16x32xf32> to vector<16x8xf32>
      %cst_335 = arith.constant dense<0.000000e+00> : vector<6x16xf32>
      %830 = tpu.matmul %827, %828, %cst_335 {dimension_numbers = #tpu.dot_dimension_numbers<[1], [1], [0], [0], [0, 0, 1, 0], [], []>} : vector<6x8xf32>, vector<16x8xf32>, vector<6x16xf32> -> vector<6x16xf32>
      %cst_336 = arith.constant 0.353553385 : f32
      %831 = vector.broadcast %cst_336 : f32 to vector<6x16xf32>
      %832 = arith.mulf %830, %831 : vector<6x16xf32>
      %cst_337 = arith.constant dense<0xFF800000> : vector<6xf32>
      %833 = vector.multi_reduction <maximumf>, %832, %cst_337 [1] : vector<6x16xf32> to vector<6xf32>
      %834 = vector.shape_cast %833 : vector<6xf32> to vector<6x1xf32>
      %835 = vector.broadcast %834 : vector<6x1xf32> to vector<6x16xf32>
      %836 = arith.subf %832, %835 : vector<6x16xf32>
      %837 = math.exp %836 : vector<6x16xf32>
      %cst_338 = arith.constant dense<0.000000e+00> : vector<6xf32>
      %838 = vector.multi_reduction <add>, %837, %cst_338 [1] : vector<6x16xf32> to vector<6xf32>
      %839 = vector.shape_cast %838 : vector<6xf32> to vector<6x1xf32>
      %840 = tpu.reciprocal %839 {approx = true} : vector<6x1xf32> -> vector<6x1xf32>
      %841 = vector.broadcast %840 : vector<6x1xf32> to vector<6x16xf32>
      %842 = arith.mulf %837, %841 : vector<6x16xf32>
      %cst_339 = arith.constant dense<0.000000e+00> : vector<6x8xf32>
      %843 = tpu.matmul %842, %829, %cst_339 {dimension_numbers = #tpu.dot_dimension_numbers<[1], [0], [0], [1], [0, 0, 1, 1], [], []>} : vector<6x16xf32>, vector<16x8xf32>, vector<6x8xf32> -> vector<6x8xf32>
      %844 = vector.extract_strided_slice %18 {offsets = [16, 0], sizes = [8, 32], strides = [1, 1]} : vector<32x32xf32> to vector<8x32xf32>
      %cst_340 = arith.constant dense<0.000000e+00> : vector<6x32xf32>
      %845 = tpu.matmul %843, %844, %cst_340 {dimension_numbers = #tpu.dot_dimension_numbers<[1], [0], [0], [1], [0, 0, 1, 1], [], []>} : vector<6x8xf32>, vector<8x32xf32>, vector<6x32xf32> -> vector<6x32xf32>
      %846 = arith.addf %826, %845 : vector<6x32xf32>
      %847 = vector.extract_strided_slice %787 {offsets = [0, 24], sizes = [6, 8], strides = [1, 1]} : vector<6x32xf32> to vector<6x8xf32>
      %848 = vector.extract_strided_slice %91 {offsets = [0, 24], sizes = [16, 8], strides = [1, 1]} : vector<16x32xf32> to vector<16x8xf32>
      %849 = vector.extract_strided_slice %92 {offsets = [0, 24], sizes = [16, 8], strides = [1, 1]} : vector<16x32xf32> to vector<16x8xf32>
      %cst_341 = arith.constant dense<0.000000e+00> : vector<6x16xf32>
      %850 = tpu.matmul %847, %848, %cst_341 {dimension_numbers = #tpu.dot_dimension_numbers<[1], [1], [0], [0], [0, 0, 1, 0], [], []>} : vector<6x8xf32>, vector<16x8xf32>, vector<6x16xf32> -> vector<6x16xf32>
      %cst_342 = arith.constant 0.353553385 : f32
      %851 = vector.broadcast %cst_342 : f32 to vector<6x16xf32>
      %852 = arith.mulf %850, %851 : vector<6x16xf32>
      %cst_343 = arith.constant dense<0xFF800000> : vector<6xf32>
      %853 = vector.multi_reduction <maximumf>, %852, %cst_343 [1] : vector<6x16xf32> to vector<6xf32>
      %854 = vector.shape_cast %853 : vector<6xf32> to vector<6x1xf32>
      %855 = vector.broadcast %854 : vector<6x1xf32> to vector<6x16xf32>
      %856 = arith.subf %852, %855 : vector<6x16xf32>
      %857 = math.exp %856 : vector<6x16xf32>
      %cst_344 = arith.constant dense<0.000000e+00> : vector<6xf32>
      %858 = vector.multi_reduction <add>, %857, %cst_344 [1] : vector<6x16xf32> to vector<6xf32>
      %859 = vector.shape_cast %858 : vector<6xf32> to vector<6x1xf32>
      %860 = tpu.reciprocal %859 {approx = true} : vector<6x1xf32> -> vector<6x1xf32>
      %861 = vector.broadcast %860 : vector<6x1xf32> to vector<6x16xf32>
      %862 = arith.mulf %857, %861 : vector<6x16xf32>
      %cst_345 = arith.constant dense<0.000000e+00> : vector<6x8xf32>
      %863 = tpu.matmul %862, %849, %cst_345 {dimension_numbers = #tpu.dot_dimension_numbers<[1], [0], [0], [1], [0, 0, 1, 1], [], []>} : vector<6x16xf32>, vector<16x8xf32>, vector<6x8xf32> -> vector<6x8xf32>
      %864 = vector.extract_strided_slice %18 {offsets = [24, 0], sizes = [8, 32], strides = [1, 1]} : vector<32x32xf32> to vector<8x32xf32>
      %cst_346 = arith.constant dense<0.000000e+00> : vector<6x32xf32>
      %865 = tpu.matmul %863, %864, %cst_346 {dimension_numbers = #tpu.dot_dimension_numbers<[1], [0], [0], [1], [0, 0, 1, 1], [], []>} : vector<6x8xf32>, vector<8x32xf32>, vector<6x32xf32> -> vector<6x32xf32>
      %866 = arith.addf %846, %865 : vector<6x32xf32>
      %867 = vector.broadcast %20 : vector<1x32xf32> to vector<6x32xf32>
      %868 = arith.addf %866, %867 : vector<6x32xf32>
      %869 = arith.addf %784, %868 : vector<6x32xf32>
      %cst_347 = arith.constant dense<0.000000e+00> : vector<6xf32>
      %870 = vector.multi_reduction <add>, %869, %cst_347 [1] : vector<6x32xf32> to vector<6xf32>
      %871 = vector.shape_cast %870 : vector<6xf32> to vector<6x1xf32>
      %cst_348 = arith.constant 3.200000e+01 : f32
      %872 = vector.broadcast %cst_348 : f32 to vector<6x1xf32>
      %873 = arith.divf %871, %872 : vector<6x1xf32>
      %874 = vector.broadcast %873 : vector<6x1xf32> to vector<6x32xf32>
      %875 = arith.subf %869, %874 : vector<6x32xf32>
      %876 = arith.mulf %875, %875 : vector<6x32xf32>
      %cst_349 = arith.constant dense<0.000000e+00> : vector<6xf32>
      %877 = vector.multi_reduction <add>, %876, %cst_349 [1] : vector<6x32xf32> to vector<6xf32>
      %878 = vector.shape_cast %877 : vector<6xf32> to vector<6x1xf32>
      %cst_350 = arith.constant 3.200000e+01 : f32
      %879 = vector.broadcast %cst_350 : f32 to vector<6x1xf32>
      %880 = arith.divf %878, %879 : vector<6x1xf32>
      %cst_351 = arith.constant 9.99999974E-6 : f32
      %881 = vector.broadcast %cst_351 : f32 to vector<6x1xf32>
      %882 = arith.addf %880, %881 : vector<6x1xf32>
      %883 = math.rsqrt %882 : vector<6x1xf32>
      %884 = vector.broadcast %883 : vector<6x1xf32> to vector<6x32xf32>
      %885 = arith.mulf %875, %884 : vector<6x32xf32>
      %886 = vector.broadcast %34 : vector<1x32xf32> to vector<6x32xf32>
      %887 = arith.mulf %885, %886 : vector<6x32xf32>
      %888 = vector.broadcast %36 : vector<1x32xf32> to vector<6x32xf32>
      %889 = arith.addf %887, %888 : vector<6x32xf32>
      %cst_352 = arith.constant dense<0.000000e+00> : vector<6x64xf32>
      %890 = tpu.matmul %889, %22, %cst_352 {dimension_numbers = #tpu.dot_dimension_numbers<[1], [0], [0], [1], [0, 0, 1, 1], [], []>} : vector<6x32xf32>, vector<32x64xf32>, vector<6x64xf32> -> vector<6x64xf32>
      %891 = vector.broadcast %24 : vector<1x64xf32> to vector<6x64xf32>
      %892 = arith.addf %890, %891 : vector<6x64xf32>
      %cst_353 = arith.constant 0.000000e+00 : f32
      %893 = vector.broadcast %cst_353 : f32 to vector<6x64xf32>
      %894 = arith.maximumf %892, %893 : vector<6x64xf32>
      %cst_354 = arith.constant dense<0.000000e+00> : vector<6x32xf32>
      %895 = tpu.matmul %894, %26, %cst_354 {dimension_numbers = #tpu.dot_dimension_numbers<[1], [0], [0], [1], [0, 0, 1, 1], [], []>} : vector<6x64xf32>, vector<64x32xf32>, vector<6x32xf32> -> vector<6x32xf32>
      %896 = vector.broadcast %28 : vector<1x32xf32> to vector<6x32xf32>
      %897 = arith.addf %895, %896 : vector<6x32xf32>
      %898 = arith.addf %889, %897 : vector<6x32xf32>
      %cst_355 = arith.constant dense<0.000000e+00> : vector<6xf32>
      %899 = vector.multi_reduction <add>, %898, %cst_355 [1] : vector<6x32xf32> to vector<6xf32>
      %900 = vector.shape_cast %899 : vector<6xf32> to vector<6x1xf32>
      %cst_356 = arith.constant 3.200000e+01 : f32
      %901 = vector.broadcast %cst_356 : f32 to vector<6x1xf32>
      %902 = arith.divf %900, %901 : vector<6x1xf32>
      %903 = vector.broadcast %902 : vector<6x1xf32> to vector<6x32xf32>
      %904 = arith.subf %898, %903 : vector<6x32xf32>
      %905 = arith.mulf %904, %904 : vector<6x32xf32>
      %cst_357 = arith.constant dense<0.000000e+00> : vector<6xf32>
      %906 = vector.multi_reduction <add>, %905, %cst_357 [1] : vector<6x32xf32> to vector<6xf32>
      %907 = vector.shape_cast %906 : vector<6xf32> to vector<6x1xf32>
      %cst_358 = arith.constant 3.200000e+01 : f32
      %908 = vector.broadcast %cst_358 : f32 to vector<6x1xf32>
      %909 = arith.divf %907, %908 : vector<6x1xf32>
      %cst_359 = arith.constant 9.99999974E-6 : f32
      %910 = vector.broadcast %cst_359 : f32 to vector<6x1xf32>
      %911 = arith.addf %909, %910 : vector<6x1xf32>
      %912 = math.rsqrt %911 : vector<6x1xf32>
      %913 = vector.broadcast %912 : vector<6x1xf32> to vector<6x32xf32>
      %914 = arith.mulf %904, %913 : vector<6x32xf32>
      %915 = vector.broadcast %38 : vector<1x32xf32> to vector<6x32xf32>
      %916 = arith.mulf %914, %915 : vector<6x32xf32>
      %917 = vector.broadcast %40 : vector<1x32xf32> to vector<6x32xf32>
      %918 = arith.addf %916, %917 : vector<6x32xf32>
      %cst_360 = arith.constant dense<0.000000e+00> : vector<6x96xf32>
      %919 = tpu.matmul %918, %42, %cst_360 {dimension_numbers = #tpu.dot_dimension_numbers<[1], [0], [0], [1], [0, 0, 1, 1], [], []>} : vector<6x32xf32>, vector<32x96xf32>, vector<6x96xf32> -> vector<6x96xf32>
      %920 = vector.broadcast %44 : vector<1x96xf32> to vector<6x96xf32>
      %921 = arith.addf %919, %920 : vector<6x96xf32>
      %922 = vector.extract_strided_slice %921 {offsets = [0, 0], sizes = [6, 32], strides = [1, 1]} : vector<6x96xf32> to vector<6x32xf32>
      %923 = vector.extract_strided_slice %921 {offsets = [0, 32], sizes = [6, 32], strides = [1, 1]} : vector<6x96xf32> to vector<6x32xf32>
      %924 = vector.extract_strided_slice %921 {offsets = [0, 64], sizes = [6, 32], strides = [1, 1]} : vector<6x96xf32> to vector<6x32xf32>
      %925 = vector.extract_strided_slice %922 {offsets = [0, 0], sizes = [6, 8], strides = [1, 1]} : vector<6x32xf32> to vector<6x8xf32>
      %926 = vector.extract_strided_slice %923 {offsets = [0, 0], sizes = [6, 8], strides = [1, 1]} : vector<6x32xf32> to vector<6x8xf32>
      %927 = vector.extract_strided_slice %924 {offsets = [0, 0], sizes = [6, 8], strides = [1, 1]} : vector<6x32xf32> to vector<6x8xf32>
      %cst_361 = arith.constant dense<0.000000e+00> : vector<6x6xf32>
      %928 = tpu.matmul %925, %926, %cst_361 {dimension_numbers = #tpu.dot_dimension_numbers<[1], [1], [0], [0], [0, 0, 1, 0], [], []>} : vector<6x8xf32>, vector<6x8xf32>, vector<6x6xf32> -> vector<6x6xf32>
      %cst_362 = arith.constant 0.353553385 : f32
      %929 = vector.broadcast %cst_362 : f32 to vector<6x6xf32>
      %930 = arith.mulf %928, %929 : vector<6x6xf32>
      %931 = arith.addf %930, %2 : vector<6x6xf32>
      %cst_363 = arith.constant dense<0xFF800000> : vector<6xf32>
      %932 = vector.multi_reduction <maximumf>, %931, %cst_363 [1] : vector<6x6xf32> to vector<6xf32>
      %933 = vector.shape_cast %932 : vector<6xf32> to vector<6x1xf32>
      %934 = vector.broadcast %933 : vector<6x1xf32> to vector<6x6xf32>
      %935 = arith.subf %931, %934 : vector<6x6xf32>
      %936 = math.exp %935 : vector<6x6xf32>
      %cst_364 = arith.constant dense<0.000000e+00> : vector<6xf32>
      %937 = vector.multi_reduction <add>, %936, %cst_364 [1] : vector<6x6xf32> to vector<6xf32>
      %938 = vector.shape_cast %937 : vector<6xf32> to vector<6x1xf32>
      %939 = tpu.reciprocal %938 {approx = true} : vector<6x1xf32> -> vector<6x1xf32>
      %940 = vector.broadcast %939 : vector<6x1xf32> to vector<6x6xf32>
      %941 = arith.mulf %936, %940 : vector<6x6xf32>
      %cst_365 = arith.constant dense<0.000000e+00> : vector<6x8xf32>
      %942 = tpu.matmul %941, %927, %cst_365 {dimension_numbers = #tpu.dot_dimension_numbers<[1], [0], [0], [1], [0, 0, 1, 1], [], []>} : vector<6x6xf32>, vector<6x8xf32>, vector<6x8xf32> -> vector<6x8xf32>
      %943 = vector.extract_strided_slice %46 {offsets = [0, 0], sizes = [8, 32], strides = [1, 1]} : vector<32x32xf32> to vector<8x32xf32>
      %cst_366 = arith.constant dense<0.000000e+00> : vector<6x32xf32>
      %944 = tpu.matmul %942, %943, %cst_366 {dimension_numbers = #tpu.dot_dimension_numbers<[1], [0], [0], [1], [0, 0, 1, 1], [], []>} : vector<6x8xf32>, vector<8x32xf32>, vector<6x32xf32> -> vector<6x32xf32>
      %945 = vector.extract_strided_slice %922 {offsets = [0, 8], sizes = [6, 8], strides = [1, 1]} : vector<6x32xf32> to vector<6x8xf32>
      %946 = vector.extract_strided_slice %923 {offsets = [0, 8], sizes = [6, 8], strides = [1, 1]} : vector<6x32xf32> to vector<6x8xf32>
      %947 = vector.extract_strided_slice %924 {offsets = [0, 8], sizes = [6, 8], strides = [1, 1]} : vector<6x32xf32> to vector<6x8xf32>
      %cst_367 = arith.constant dense<0.000000e+00> : vector<6x6xf32>
      %948 = tpu.matmul %945, %946, %cst_367 {dimension_numbers = #tpu.dot_dimension_numbers<[1], [1], [0], [0], [0, 0, 1, 0], [], []>} : vector<6x8xf32>, vector<6x8xf32>, vector<6x6xf32> -> vector<6x6xf32>
      %cst_368 = arith.constant 0.353553385 : f32
      %949 = vector.broadcast %cst_368 : f32 to vector<6x6xf32>
      %950 = arith.mulf %948, %949 : vector<6x6xf32>
      %951 = arith.addf %950, %2 : vector<6x6xf32>
      %cst_369 = arith.constant dense<0xFF800000> : vector<6xf32>
      %952 = vector.multi_reduction <maximumf>, %951, %cst_369 [1] : vector<6x6xf32> to vector<6xf32>
      %953 = vector.shape_cast %952 : vector<6xf32> to vector<6x1xf32>
      %954 = vector.broadcast %953 : vector<6x1xf32> to vector<6x6xf32>
      %955 = arith.subf %951, %954 : vector<6x6xf32>
      %956 = math.exp %955 : vector<6x6xf32>
      %cst_370 = arith.constant dense<0.000000e+00> : vector<6xf32>
      %957 = vector.multi_reduction <add>, %956, %cst_370 [1] : vector<6x6xf32> to vector<6xf32>
      %958 = vector.shape_cast %957 : vector<6xf32> to vector<6x1xf32>
      %959 = tpu.reciprocal %958 {approx = true} : vector<6x1xf32> -> vector<6x1xf32>
      %960 = vector.broadcast %959 : vector<6x1xf32> to vector<6x6xf32>
      %961 = arith.mulf %956, %960 : vector<6x6xf32>
      %cst_371 = arith.constant dense<0.000000e+00> : vector<6x8xf32>
      %962 = tpu.matmul %961, %947, %cst_371 {dimension_numbers = #tpu.dot_dimension_numbers<[1], [0], [0], [1], [0, 0, 1, 1], [], []>} : vector<6x6xf32>, vector<6x8xf32>, vector<6x8xf32> -> vector<6x8xf32>
      %963 = vector.extract_strided_slice %46 {offsets = [8, 0], sizes = [8, 32], strides = [1, 1]} : vector<32x32xf32> to vector<8x32xf32>
      %cst_372 = arith.constant dense<0.000000e+00> : vector<6x32xf32>
      %964 = tpu.matmul %962, %963, %cst_372 {dimension_numbers = #tpu.dot_dimension_numbers<[1], [0], [0], [1], [0, 0, 1, 1], [], []>} : vector<6x8xf32>, vector<8x32xf32>, vector<6x32xf32> -> vector<6x32xf32>
      %965 = arith.addf %944, %964 : vector<6x32xf32>
      %966 = vector.extract_strided_slice %922 {offsets = [0, 16], sizes = [6, 8], strides = [1, 1]} : vector<6x32xf32> to vector<6x8xf32>
      %967 = vector.extract_strided_slice %923 {offsets = [0, 16], sizes = [6, 8], strides = [1, 1]} : vector<6x32xf32> to vector<6x8xf32>
      %968 = vector.extract_strided_slice %924 {offsets = [0, 16], sizes = [6, 8], strides = [1, 1]} : vector<6x32xf32> to vector<6x8xf32>
      %cst_373 = arith.constant dense<0.000000e+00> : vector<6x6xf32>
      %969 = tpu.matmul %966, %967, %cst_373 {dimension_numbers = #tpu.dot_dimension_numbers<[1], [1], [0], [0], [0, 0, 1, 0], [], []>} : vector<6x8xf32>, vector<6x8xf32>, vector<6x6xf32> -> vector<6x6xf32>
      %cst_374 = arith.constant 0.353553385 : f32
      %970 = vector.broadcast %cst_374 : f32 to vector<6x6xf32>
      %971 = arith.mulf %969, %970 : vector<6x6xf32>
      %972 = arith.addf %971, %2 : vector<6x6xf32>
      %cst_375 = arith.constant dense<0xFF800000> : vector<6xf32>
      %973 = vector.multi_reduction <maximumf>, %972, %cst_375 [1] : vector<6x6xf32> to vector<6xf32>
      %974 = vector.shape_cast %973 : vector<6xf32> to vector<6x1xf32>
      %975 = vector.broadcast %974 : vector<6x1xf32> to vector<6x6xf32>
      %976 = arith.subf %972, %975 : vector<6x6xf32>
      %977 = math.exp %976 : vector<6x6xf32>
      %cst_376 = arith.constant dense<0.000000e+00> : vector<6xf32>
      %978 = vector.multi_reduction <add>, %977, %cst_376 [1] : vector<6x6xf32> to vector<6xf32>
      %979 = vector.shape_cast %978 : vector<6xf32> to vector<6x1xf32>
      %980 = tpu.reciprocal %979 {approx = true} : vector<6x1xf32> -> vector<6x1xf32>
      %981 = vector.broadcast %980 : vector<6x1xf32> to vector<6x6xf32>
      %982 = arith.mulf %977, %981 : vector<6x6xf32>
      %cst_377 = arith.constant dense<0.000000e+00> : vector<6x8xf32>
      %983 = tpu.matmul %982, %968, %cst_377 {dimension_numbers = #tpu.dot_dimension_numbers<[1], [0], [0], [1], [0, 0, 1, 1], [], []>} : vector<6x6xf32>, vector<6x8xf32>, vector<6x8xf32> -> vector<6x8xf32>
      %984 = vector.extract_strided_slice %46 {offsets = [16, 0], sizes = [8, 32], strides = [1, 1]} : vector<32x32xf32> to vector<8x32xf32>
      %cst_378 = arith.constant dense<0.000000e+00> : vector<6x32xf32>
      %985 = tpu.matmul %983, %984, %cst_378 {dimension_numbers = #tpu.dot_dimension_numbers<[1], [0], [0], [1], [0, 0, 1, 1], [], []>} : vector<6x8xf32>, vector<8x32xf32>, vector<6x32xf32> -> vector<6x32xf32>
      %986 = arith.addf %965, %985 : vector<6x32xf32>
      %987 = vector.extract_strided_slice %922 {offsets = [0, 24], sizes = [6, 8], strides = [1, 1]} : vector<6x32xf32> to vector<6x8xf32>
      %988 = vector.extract_strided_slice %923 {offsets = [0, 24], sizes = [6, 8], strides = [1, 1]} : vector<6x32xf32> to vector<6x8xf32>
      %989 = vector.extract_strided_slice %924 {offsets = [0, 24], sizes = [6, 8], strides = [1, 1]} : vector<6x32xf32> to vector<6x8xf32>
      %cst_379 = arith.constant dense<0.000000e+00> : vector<6x6xf32>
      %990 = tpu.matmul %987, %988, %cst_379 {dimension_numbers = #tpu.dot_dimension_numbers<[1], [1], [0], [0], [0, 0, 1, 0], [], []>} : vector<6x8xf32>, vector<6x8xf32>, vector<6x6xf32> -> vector<6x6xf32>
      %cst_380 = arith.constant 0.353553385 : f32
      %991 = vector.broadcast %cst_380 : f32 to vector<6x6xf32>
      %992 = arith.mulf %990, %991 : vector<6x6xf32>
      %993 = arith.addf %992, %2 : vector<6x6xf32>
      %cst_381 = arith.constant dense<0xFF800000> : vector<6xf32>
      %994 = vector.multi_reduction <maximumf>, %993, %cst_381 [1] : vector<6x6xf32> to vector<6xf32>
      %995 = vector.shape_cast %994 : vector<6xf32> to vector<6x1xf32>
      %996 = vector.broadcast %995 : vector<6x1xf32> to vector<6x6xf32>
      %997 = arith.subf %993, %996 : vector<6x6xf32>
      %998 = math.exp %997 : vector<6x6xf32>
      %cst_382 = arith.constant dense<0.000000e+00> : vector<6xf32>
      %999 = vector.multi_reduction <add>, %998, %cst_382 [1] : vector<6x6xf32> to vector<6xf32>
      %1000 = vector.shape_cast %999 : vector<6xf32> to vector<6x1xf32>
      %1001 = tpu.reciprocal %1000 {approx = true} : vector<6x1xf32> -> vector<6x1xf32>
      %1002 = vector.broadcast %1001 : vector<6x1xf32> to vector<6x6xf32>
      %1003 = arith.mulf %998, %1002 : vector<6x6xf32>
      %cst_383 = arith.constant dense<0.000000e+00> : vector<6x8xf32>
      %1004 = tpu.matmul %1003, %989, %cst_383 {dimension_numbers = #tpu.dot_dimension_numbers<[1], [0], [0], [1], [0, 0, 1, 1], [], []>} : vector<6x6xf32>, vector<6x8xf32>, vector<6x8xf32> -> vector<6x8xf32>
      %1005 = vector.extract_strided_slice %46 {offsets = [24, 0], sizes = [8, 32], strides = [1, 1]} : vector<32x32xf32> to vector<8x32xf32>
      %cst_384 = arith.constant dense<0.000000e+00> : vector<6x32xf32>
      %1006 = tpu.matmul %1004, %1005, %cst_384 {dimension_numbers = #tpu.dot_dimension_numbers<[1], [0], [0], [1], [0, 0, 1, 1], [], []>} : vector<6x8xf32>, vector<8x32xf32>, vector<6x32xf32> -> vector<6x32xf32>
      %1007 = arith.addf %986, %1006 : vector<6x32xf32>
      %1008 = vector.broadcast %48 : vector<1x32xf32> to vector<6x32xf32>
      %1009 = arith.addf %1007, %1008 : vector<6x32xf32>
      %1010 = arith.addf %918, %1009 : vector<6x32xf32>
      %cst_385 = arith.constant dense<0.000000e+00> : vector<6xf32>
      %1011 = vector.multi_reduction <add>, %1010, %cst_385 [1] : vector<6x32xf32> to vector<6xf32>
      %1012 = vector.shape_cast %1011 : vector<6xf32> to vector<6x1xf32>
      %cst_386 = arith.constant 3.200000e+01 : f32
      %1013 = vector.broadcast %cst_386 : f32 to vector<6x1xf32>
      %1014 = arith.divf %1012, %1013 : vector<6x1xf32>
      %1015 = vector.broadcast %1014 : vector<6x1xf32> to vector<6x32xf32>
      %1016 = arith.subf %1010, %1015 : vector<6x32xf32>
      %1017 = arith.mulf %1016, %1016 : vector<6x32xf32>
      %cst_387 = arith.constant dense<0.000000e+00> : vector<6xf32>
      %1018 = vector.multi_reduction <add>, %1017, %cst_387 [1] : vector<6x32xf32> to vector<6xf32>
      %1019 = vector.shape_cast %1018 : vector<6xf32> to vector<6x1xf32>
      %cst_388 = arith.constant 3.200000e+01 : f32
      %1020 = vector.broadcast %cst_388 : f32 to vector<6x1xf32>
      %1021 = arith.divf %1019, %1020 : vector<6x1xf32>
      %cst_389 = arith.constant 9.99999974E-6 : f32
      %1022 = vector.broadcast %cst_389 : f32 to vector<6x1xf32>
      %1023 = arith.addf %1021, %1022 : vector<6x1xf32>
      %1024 = math.rsqrt %1023 : vector<6x1xf32>
      %1025 = vector.broadcast %1024 : vector<6x1xf32> to vector<6x32xf32>
      %1026 = arith.mulf %1016, %1025 : vector<6x32xf32>
      %1027 = vector.broadcast %66 : vector<1x32xf32> to vector<6x32xf32>
      %1028 = arith.mulf %1026, %1027 : vector<6x32xf32>
      %1029 = vector.broadcast %68 : vector<1x32xf32> to vector<6x32xf32>
      %1030 = arith.addf %1028, %1029 : vector<6x32xf32>
      %cst_390 = arith.constant dense<0.000000e+00> : vector<6x32xf32>
      %1031 = tpu.matmul %1030, %50, %cst_390 {dimension_numbers = #tpu.dot_dimension_numbers<[1], [0], [0], [1], [0, 0, 1, 1], [], []>} : vector<6x32xf32>, vector<32x32xf32>, vector<6x32xf32> -> vector<6x32xf32>
      %1032 = vector.broadcast %52 : vector<1x32xf32> to vector<6x32xf32>
      %1033 = arith.addf %1031, %1032 : vector<6x32xf32>
      %1034 = vector.extract_strided_slice %1033 {offsets = [0, 0], sizes = [6, 8], strides = [1, 1]} : vector<6x32xf32> to vector<6x8xf32>
      %1035 = vector.extract_strided_slice %107 {offsets = [0, 0], sizes = [16, 8], strides = [1, 1]} : vector<16x32xf32> to vector<16x8xf32>
      %1036 = vector.extract_strided_slice %108 {offsets = [0, 0], sizes = [16, 8], strides = [1, 1]} : vector<16x32xf32> to vector<16x8xf32>
      %cst_391 = arith.constant dense<0.000000e+00> : vector<6x16xf32>
      %1037 = tpu.matmul %1034, %1035, %cst_391 {dimension_numbers = #tpu.dot_dimension_numbers<[1], [1], [0], [0], [0, 0, 1, 0], [], []>} : vector<6x8xf32>, vector<16x8xf32>, vector<6x16xf32> -> vector<6x16xf32>
      %cst_392 = arith.constant 0.353553385 : f32
      %1038 = vector.broadcast %cst_392 : f32 to vector<6x16xf32>
      %1039 = arith.mulf %1037, %1038 : vector<6x16xf32>
      %cst_393 = arith.constant dense<0xFF800000> : vector<6xf32>
      %1040 = vector.multi_reduction <maximumf>, %1039, %cst_393 [1] : vector<6x16xf32> to vector<6xf32>
      %1041 = vector.shape_cast %1040 : vector<6xf32> to vector<6x1xf32>
      %1042 = vector.broadcast %1041 : vector<6x1xf32> to vector<6x16xf32>
      %1043 = arith.subf %1039, %1042 : vector<6x16xf32>
      %1044 = math.exp %1043 : vector<6x16xf32>
      %cst_394 = arith.constant dense<0.000000e+00> : vector<6xf32>
      %1045 = vector.multi_reduction <add>, %1044, %cst_394 [1] : vector<6x16xf32> to vector<6xf32>
      %1046 = vector.shape_cast %1045 : vector<6xf32> to vector<6x1xf32>
      %1047 = tpu.reciprocal %1046 {approx = true} : vector<6x1xf32> -> vector<6x1xf32>
      %1048 = vector.broadcast %1047 : vector<6x1xf32> to vector<6x16xf32>
      %1049 = arith.mulf %1044, %1048 : vector<6x16xf32>
      %cst_395 = arith.constant dense<0.000000e+00> : vector<6x8xf32>
      %1050 = tpu.matmul %1049, %1036, %cst_395 {dimension_numbers = #tpu.dot_dimension_numbers<[1], [0], [0], [1], [0, 0, 1, 1], [], []>} : vector<6x16xf32>, vector<16x8xf32>, vector<6x8xf32> -> vector<6x8xf32>
      %1051 = vector.extract_strided_slice %54 {offsets = [0, 0], sizes = [8, 32], strides = [1, 1]} : vector<32x32xf32> to vector<8x32xf32>
      %cst_396 = arith.constant dense<0.000000e+00> : vector<6x32xf32>
      %1052 = tpu.matmul %1050, %1051, %cst_396 {dimension_numbers = #tpu.dot_dimension_numbers<[1], [0], [0], [1], [0, 0, 1, 1], [], []>} : vector<6x8xf32>, vector<8x32xf32>, vector<6x32xf32> -> vector<6x32xf32>
      %1053 = vector.extract_strided_slice %1033 {offsets = [0, 8], sizes = [6, 8], strides = [1, 1]} : vector<6x32xf32> to vector<6x8xf32>
      %1054 = vector.extract_strided_slice %107 {offsets = [0, 8], sizes = [16, 8], strides = [1, 1]} : vector<16x32xf32> to vector<16x8xf32>
      %1055 = vector.extract_strided_slice %108 {offsets = [0, 8], sizes = [16, 8], strides = [1, 1]} : vector<16x32xf32> to vector<16x8xf32>
      %cst_397 = arith.constant dense<0.000000e+00> : vector<6x16xf32>
      %1056 = tpu.matmul %1053, %1054, %cst_397 {dimension_numbers = #tpu.dot_dimension_numbers<[1], [1], [0], [0], [0, 0, 1, 0], [], []>} : vector<6x8xf32>, vector<16x8xf32>, vector<6x16xf32> -> vector<6x16xf32>
      %cst_398 = arith.constant 0.353553385 : f32
      %1057 = vector.broadcast %cst_398 : f32 to vector<6x16xf32>
      %1058 = arith.mulf %1056, %1057 : vector<6x16xf32>
      %cst_399 = arith.constant dense<0xFF800000> : vector<6xf32>
      %1059 = vector.multi_reduction <maximumf>, %1058, %cst_399 [1] : vector<6x16xf32> to vector<6xf32>
      %1060 = vector.shape_cast %1059 : vector<6xf32> to vector<6x1xf32>
      %1061 = vector.broadcast %1060 : vector<6x1xf32> to vector<6x16xf32>
      %1062 = arith.subf %1058, %1061 : vector<6x16xf32>
      %1063 = math.exp %1062 : vector<6x16xf32>
      %cst_400 = arith.constant dense<0.000000e+00> : vector<6xf32>
      %1064 = vector.multi_reduction <add>, %1063, %cst_400 [1] : vector<6x16xf32> to vector<6xf32>
      %1065 = vector.shape_cast %1064 : vector<6xf32> to vector<6x1xf32>
      %1066 = tpu.reciprocal %1065 {approx = true} : vector<6x1xf32> -> vector<6x1xf32>
      %1067 = vector.broadcast %1066 : vector<6x1xf32> to vector<6x16xf32>
      %1068 = arith.mulf %1063, %1067 : vector<6x16xf32>
      %cst_401 = arith.constant dense<0.000000e+00> : vector<6x8xf32>
      %1069 = tpu.matmul %1068, %1055, %cst_401 {dimension_numbers = #tpu.dot_dimension_numbers<[1], [0], [0], [1], [0, 0, 1, 1], [], []>} : vector<6x16xf32>, vector<16x8xf32>, vector<6x8xf32> -> vector<6x8xf32>
      %1070 = vector.extract_strided_slice %54 {offsets = [8, 0], sizes = [8, 32], strides = [1, 1]} : vector<32x32xf32> to vector<8x32xf32>
      %cst_402 = arith.constant dense<0.000000e+00> : vector<6x32xf32>
      %1071 = tpu.matmul %1069, %1070, %cst_402 {dimension_numbers = #tpu.dot_dimension_numbers<[1], [0], [0], [1], [0, 0, 1, 1], [], []>} : vector<6x8xf32>, vector<8x32xf32>, vector<6x32xf32> -> vector<6x32xf32>
      %1072 = arith.addf %1052, %1071 : vector<6x32xf32>
      %1073 = vector.extract_strided_slice %1033 {offsets = [0, 16], sizes = [6, 8], strides = [1, 1]} : vector<6x32xf32> to vector<6x8xf32>
      %1074 = vector.extract_strided_slice %107 {offsets = [0, 16], sizes = [16, 8], strides = [1, 1]} : vector<16x32xf32> to vector<16x8xf32>
      %1075 = vector.extract_strided_slice %108 {offsets = [0, 16], sizes = [16, 8], strides = [1, 1]} : vector<16x32xf32> to vector<16x8xf32>
      %cst_403 = arith.constant dense<0.000000e+00> : vector<6x16xf32>
      %1076 = tpu.matmul %1073, %1074, %cst_403 {dimension_numbers = #tpu.dot_dimension_numbers<[1], [1], [0], [0], [0, 0, 1, 0], [], []>} : vector<6x8xf32>, vector<16x8xf32>, vector<6x16xf32> -> vector<6x16xf32>
      %cst_404 = arith.constant 0.353553385 : f32
      %1077 = vector.broadcast %cst_404 : f32 to vector<6x16xf32>
      %1078 = arith.mulf %1076, %1077 : vector<6x16xf32>
      %cst_405 = arith.constant dense<0xFF800000> : vector<6xf32>
      %1079 = vector.multi_reduction <maximumf>, %1078, %cst_405 [1] : vector<6x16xf32> to vector<6xf32>
      %1080 = vector.shape_cast %1079 : vector<6xf32> to vector<6x1xf32>
      %1081 = vector.broadcast %1080 : vector<6x1xf32> to vector<6x16xf32>
      %1082 = arith.subf %1078, %1081 : vector<6x16xf32>
      %1083 = math.exp %1082 : vector<6x16xf32>
      %cst_406 = arith.constant dense<0.000000e+00> : vector<6xf32>
      %1084 = vector.multi_reduction <add>, %1083, %cst_406 [1] : vector<6x16xf32> to vector<6xf32>
      %1085 = vector.shape_cast %1084 : vector<6xf32> to vector<6x1xf32>
      %1086 = tpu.reciprocal %1085 {approx = true} : vector<6x1xf32> -> vector<6x1xf32>
      %1087 = vector.broadcast %1086 : vector<6x1xf32> to vector<6x16xf32>
      %1088 = arith.mulf %1083, %1087 : vector<6x16xf32>
      %cst_407 = arith.constant dense<0.000000e+00> : vector<6x8xf32>
      %1089 = tpu.matmul %1088, %1075, %cst_407 {dimension_numbers = #tpu.dot_dimension_numbers<[1], [0], [0], [1], [0, 0, 1, 1], [], []>} : vector<6x16xf32>, vector<16x8xf32>, vector<6x8xf32> -> vector<6x8xf32>
      %1090 = vector.extract_strided_slice %54 {offsets = [16, 0], sizes = [8, 32], strides = [1, 1]} : vector<32x32xf32> to vector<8x32xf32>
      %cst_408 = arith.constant dense<0.000000e+00> : vector<6x32xf32>
      %1091 = tpu.matmul %1089, %1090, %cst_408 {dimension_numbers = #tpu.dot_dimension_numbers<[1], [0], [0], [1], [0, 0, 1, 1], [], []>} : vector<6x8xf32>, vector<8x32xf32>, vector<6x32xf32> -> vector<6x32xf32>
      %1092 = arith.addf %1072, %1091 : vector<6x32xf32>
      %1093 = vector.extract_strided_slice %1033 {offsets = [0, 24], sizes = [6, 8], strides = [1, 1]} : vector<6x32xf32> to vector<6x8xf32>
      %1094 = vector.extract_strided_slice %107 {offsets = [0, 24], sizes = [16, 8], strides = [1, 1]} : vector<16x32xf32> to vector<16x8xf32>
      %1095 = vector.extract_strided_slice %108 {offsets = [0, 24], sizes = [16, 8], strides = [1, 1]} : vector<16x32xf32> to vector<16x8xf32>
      %cst_409 = arith.constant dense<0.000000e+00> : vector<6x16xf32>
      %1096 = tpu.matmul %1093, %1094, %cst_409 {dimension_numbers = #tpu.dot_dimension_numbers<[1], [1], [0], [0], [0, 0, 1, 0], [], []>} : vector<6x8xf32>, vector<16x8xf32>, vector<6x16xf32> -> vector<6x16xf32>
      %cst_410 = arith.constant 0.353553385 : f32
      %1097 = vector.broadcast %cst_410 : f32 to vector<6x16xf32>
      %1098 = arith.mulf %1096, %1097 : vector<6x16xf32>
      %cst_411 = arith.constant dense<0xFF800000> : vector<6xf32>
      %1099 = vector.multi_reduction <maximumf>, %1098, %cst_411 [1] : vector<6x16xf32> to vector<6xf32>
      %1100 = vector.shape_cast %1099 : vector<6xf32> to vector<6x1xf32>
      %1101 = vector.broadcast %1100 : vector<6x1xf32> to vector<6x16xf32>
      %1102 = arith.subf %1098, %1101 : vector<6x16xf32>
      %1103 = math.exp %1102 : vector<6x16xf32>
      %cst_412 = arith.constant dense<0.000000e+00> : vector<6xf32>
      %1104 = vector.multi_reduction <add>, %1103, %cst_412 [1] : vector<6x16xf32> to vector<6xf32>
      %1105 = vector.shape_cast %1104 : vector<6xf32> to vector<6x1xf32>
      %1106 = tpu.reciprocal %1105 {approx = true} : vector<6x1xf32> -> vector<6x1xf32>
      %1107 = vector.broadcast %1106 : vector<6x1xf32> to vector<6x16xf32>
      %1108 = arith.mulf %1103, %1107 : vector<6x16xf32>
      %cst_413 = arith.constant dense<0.000000e+00> : vector<6x8xf32>
      %1109 = tpu.matmul %1108, %1095, %cst_413 {dimension_numbers = #tpu.dot_dimension_numbers<[1], [0], [0], [1], [0, 0, 1, 1], [], []>} : vector<6x16xf32>, vector<16x8xf32>, vector<6x8xf32> -> vector<6x8xf32>
      %1110 = vector.extract_strided_slice %54 {offsets = [24, 0], sizes = [8, 32], strides = [1, 1]} : vector<32x32xf32> to vector<8x32xf32>
      %cst_414 = arith.constant dense<0.000000e+00> : vector<6x32xf32>
      %1111 = tpu.matmul %1109, %1110, %cst_414 {dimension_numbers = #tpu.dot_dimension_numbers<[1], [0], [0], [1], [0, 0, 1, 1], [], []>} : vector<6x8xf32>, vector<8x32xf32>, vector<6x32xf32> -> vector<6x32xf32>
      %1112 = arith.addf %1092, %1111 : vector<6x32xf32>
      %1113 = vector.broadcast %56 : vector<1x32xf32> to vector<6x32xf32>
      %1114 = arith.addf %1112, %1113 : vector<6x32xf32>
      %1115 = arith.addf %1030, %1114 : vector<6x32xf32>
      %cst_415 = arith.constant dense<0.000000e+00> : vector<6xf32>
      %1116 = vector.multi_reduction <add>, %1115, %cst_415 [1] : vector<6x32xf32> to vector<6xf32>
      %1117 = vector.shape_cast %1116 : vector<6xf32> to vector<6x1xf32>
      %cst_416 = arith.constant 3.200000e+01 : f32
      %1118 = vector.broadcast %cst_416 : f32 to vector<6x1xf32>
      %1119 = arith.divf %1117, %1118 : vector<6x1xf32>
      %1120 = vector.broadcast %1119 : vector<6x1xf32> to vector<6x32xf32>
      %1121 = arith.subf %1115, %1120 : vector<6x32xf32>
      %1122 = arith.mulf %1121, %1121 : vector<6x32xf32>
      %cst_417 = arith.constant dense<0.000000e+00> : vector<6xf32>
      %1123 = vector.multi_reduction <add>, %1122, %cst_417 [1] : vector<6x32xf32> to vector<6xf32>
      %1124 = vector.shape_cast %1123 : vector<6xf32> to vector<6x1xf32>
      %cst_418 = arith.constant 3.200000e+01 : f32
      %1125 = vector.broadcast %cst_418 : f32 to vector<6x1xf32>
      %1126 = arith.divf %1124, %1125 : vector<6x1xf32>
      %cst_419 = arith.constant 9.99999974E-6 : f32
      %1127 = vector.broadcast %cst_419 : f32 to vector<6x1xf32>
      %1128 = arith.addf %1126, %1127 : vector<6x1xf32>
      %1129 = math.rsqrt %1128 : vector<6x1xf32>
      %1130 = vector.broadcast %1129 : vector<6x1xf32> to vector<6x32xf32>
      %1131 = arith.mulf %1121, %1130 : vector<6x32xf32>
      %1132 = vector.broadcast %70 : vector<1x32xf32> to vector<6x32xf32>
      %1133 = arith.mulf %1131, %1132 : vector<6x32xf32>
      %1134 = vector.broadcast %72 : vector<1x32xf32> to vector<6x32xf32>
      %1135 = arith.addf %1133, %1134 : vector<6x32xf32>
      %cst_420 = arith.constant dense<0.000000e+00> : vector<6x64xf32>
      %1136 = tpu.matmul %1135, %58, %cst_420 {dimension_numbers = #tpu.dot_dimension_numbers<[1], [0], [0], [1], [0, 0, 1, 1], [], []>} : vector<6x32xf32>, vector<32x64xf32>, vector<6x64xf32> -> vector<6x64xf32>
      %1137 = vector.broadcast %60 : vector<1x64xf32> to vector<6x64xf32>
      %1138 = arith.addf %1136, %1137 : vector<6x64xf32>
      %cst_421 = arith.constant 0.000000e+00 : f32
      %1139 = vector.broadcast %cst_421 : f32 to vector<6x64xf32>
      %1140 = arith.maximumf %1138, %1139 : vector<6x64xf32>
      %cst_422 = arith.constant dense<0.000000e+00> : vector<6x32xf32>
      %1141 = tpu.matmul %1140, %62, %cst_422 {dimension_numbers = #tpu.dot_dimension_numbers<[1], [0], [0], [1], [0, 0, 1, 1], [], []>} : vector<6x64xf32>, vector<64x32xf32>, vector<6x32xf32> -> vector<6x32xf32>
      %1142 = vector.broadcast %64 : vector<1x32xf32> to vector<6x32xf32>
      %1143 = arith.addf %1141, %1142 : vector<6x32xf32>
      %1144 = arith.addf %1135, %1143 : vector<6x32xf32>
      %cst_423 = arith.constant dense<0.000000e+00> : vector<6xf32>
      %1145 = vector.multi_reduction <add>, %1144, %cst_423 [1] : vector<6x32xf32> to vector<6xf32>
      %1146 = vector.shape_cast %1145 : vector<6xf32> to vector<6x1xf32>
      %cst_424 = arith.constant 3.200000e+01 : f32
      %1147 = vector.broadcast %cst_424 : f32 to vector<6x1xf32>
      %1148 = arith.divf %1146, %1147 : vector<6x1xf32>
      %1149 = vector.broadcast %1148 : vector<6x1xf32> to vector<6x32xf32>
      %1150 = arith.subf %1144, %1149 : vector<6x32xf32>
      %1151 = arith.mulf %1150, %1150 : vector<6x32xf32>
      %cst_425 = arith.constant dense<0.000000e+00> : vector<6xf32>
      %1152 = vector.multi_reduction <add>, %1151, %cst_425 [1] : vector<6x32xf32> to vector<6xf32>
      %1153 = vector.shape_cast %1152 : vector<6xf32> to vector<6x1xf32>
      %cst_426 = arith.constant 3.200000e+01 : f32
      %1154 = vector.broadcast %cst_426 : f32 to vector<6x1xf32>
      %1155 = arith.divf %1153, %1154 : vector<6x1xf32>
      %cst_427 = arith.constant 9.99999974E-6 : f32
      %1156 = vector.broadcast %cst_427 : f32 to vector<6x1xf32>
      %1157 = arith.addf %1155, %1156 : vector<6x1xf32>
      %1158 = math.rsqrt %1157 : vector<6x1xf32>
      %1159 = vector.broadcast %1158 : vector<6x1xf32> to vector<6x32xf32>
      %1160 = arith.mulf %1150, %1159 : vector<6x32xf32>
      %1161 = vector.broadcast %74 : vector<1x32xf32> to vector<6x32xf32>
      %1162 = arith.mulf %1160, %1161 : vector<6x32xf32>
      %1163 = vector.broadcast %76 : vector<1x32xf32> to vector<6x32xf32>
      %1164 = arith.addf %1162, %1163 : vector<6x32xf32>
      %1165 = vector.broadcast %arg27 : i32 to vector<6x1xi32>
      %1166 = arith.cmpi eq, %113, %1165 : vector<6x1xi32>
      %1167 = arith.extui %1166 : vector<6x1xi1> to vector<6x1xi32>
      %1168 = arith.sitofp %1167 : vector<6x1xi32> to vector<6x1xf32>
      %1169 = vector.broadcast %1168 : vector<6x1xf32> to vector<6x32xf32>
      %1170 = arith.mulf %1164, %1169 : vector<6x32xf32>
      %cst_428 = arith.constant dense<0.000000e+00> : vector<32xf32>
      %1171 = vector.multi_reduction <add>, %1170, %cst_428 [0] : vector<6x32xf32> to vector<32xf32>
      %1172 = vector.shape_cast %1171 : vector<32xf32> to vector<1x32xf32>
      %cst_429 = arith.constant dense<0.000000e+00> : vector<1x20xf32>
      %1173 = tpu.matmul %1172, %3, %cst_429 {dimension_numbers = #tpu.dot_dimension_numbers<[1], [0], [0], [1], [0, 0, 1, 1], [], []>} : vector<1x32xf32>, vector<32x20xf32>, vector<1x20xf32> -> vector<1x20xf32>
      %1174 = arith.addf %1173, %4 : vector<1x20xf32>
      %cst_430 = arith.constant dense<0xFF800000> : vector<1xf32>
      %1175 = vector.multi_reduction <maximumf>, %1174, %cst_430 [1] : vector<1x20xf32> to vector<1xf32>
      %1176 = vector.shape_cast %1175 : vector<1xf32> to vector<1x1xf32>
      %1177 = vector.broadcast %1176 : vector<1x1xf32> to vector<1x20xf32>
      %1178 = arith.cmpf oeq, %1174, %1177 : vector<1x20xf32>
      %cst_431 = arith.constant 2.000000e+01 : f32
      %1179 = vector.broadcast %cst_431 : f32 to vector<1x20xf32>
      %1180 = arith.select %1178, %115, %1179 : vector<1x20xi1>, vector<1x20xf32>
      %cst_432 = arith.constant dense<0x7F800000> : vector<1xf32>
      %1181 = vector.multi_reduction <minimumf>, %1180, %cst_432 [1] : vector<1x20xf32> to vector<1xf32>
      %1182 = vector.shape_cast %1181 : vector<1xf32> to vector<1x1xf32>
      %1183 = arith.fptosi %1182 : vector<1x1xf32> to vector<1x1xi32>
      %c6_i32_433 = arith.constant 6 : i32
      %1184 = arith.addi %c6_i32_433, %arg27 : i32
      %c1_i32_434 = arith.constant 1 : i32
      %1185 = arith.addi %1184, %c1_i32_434 : i32
      %1186 = vector.broadcast %1185 : i32 to vector<12x20xi32>
      %1187 = arith.cmpi eq, %109, %1186 : vector<12x20xi32>
      %1188 = vector.broadcast %1183 : vector<1x1xi32> to vector<12x20xi32>
      %1189 = arith.cmpi eq, %110, %1188 : vector<12x20xi32>
      %1190 = arith.andi %1187, %1189 : vector<12x20xi1>
      %1191 = arith.extui %1190 : vector<12x20xi1> to vector<12x20xi32>
      %1192 = arith.sitofp %1191 : vector<12x20xi32> to vector<12x20xf32>
      %1193 = arith.addf %660, %1192 : vector<12x20xf32>
      %c1_i32_435 = arith.constant 1 : i32
      %1194 = vector.broadcast %c1_i32_435 : i32 to vector<2x5xi32>
      %1195 = arith.cmpi eq, %111, %1194 : vector<2x5xi32>
      %1196 = vector.broadcast %arg27 : i32 to vector<2x5xi32>
      %1197 = arith.cmpi eq, %112, %1196 : vector<2x5xi32>
      %1198 = arith.andi %1195, %1197 : vector<2x5xi1>
      %1199 = arith.extui %1198 : vector<2x5xi1> to vector<2x5xi32>
      %1200 = vector.broadcast %1183 : vector<1x1xi32> to vector<2x5xi32>
      %1201 = arith.muli %1200, %1199 : vector<2x5xi32>
      %1202 = arith.addi %669, %1201 : vector<2x5xi32>
      scf.yield %1193, %1202 : vector<12x20xf32>, vector<2x5xi32>
    }
    %c5_i32_143 = arith.constant 5 : i32
    %c0_144 = arith.constant 0 : index
    %c0_145 = arith.constant 0 : index
    %136 = vector.load %arg26[%c0_144, %c0_145] : memref<2x5xi32, #tpu.memory_space<vmem>>, vector<2x5xi32>
    tpu.vector_store %arg26[%c0_144, %c0_145], %135#1 {strides = array<i32>} : memref<2x5xi32, #tpu.memory_space<vmem>>, vector<2x5xi32>,
    return
  }
}

</mosaic_0001>

<bundles_post_ra>
// kernel: vqa_forward.2
= control target key start
LH: loop header
LB: loop body
LE: loop exit
PB: predicated region body
PF: predicated region fallthrough
CT: control target
= control target key end

     0   :  { %s5331_s0 = inlined_call_operand.vmem [shape: f32[16,64], index: 0, kind: input, shape index: {}]   ;;  %s5332_s1 = inlined_call_operand.vmem [shape: f32[14,32], index: 1, kind: input, shape index: {}]   ;;  %s5333_s2 = inlined_call_operand.vmem [shape: f32[1,32], index: 2, kind: input, shape index: {}]   ;;  %s5334_s3 = inlined_call_operand.vmem [shape: f32[16,32], index: 3, kind: input, shape index: {}]   ;;  %s5335_s4 = inlined_call_operand.vmem [shape: f32[64,32], index: 4, kind: input, shape index: {}]   ;;  %s5336_s5 = inlined_call_operand.vmem [shape: f32[1,32], index: 5, kind: input, shape index: {}]   ;;  %s5337_s6 = inlined_call_operand.vmem [shape: f32[32,96], index: 6, kind: input, shape index: {}]   ;;  %s5338_s7 = inlined_call_operand.vmem [shape: f32[1,96], index: 7, kind: input, shape index: {}]   ;;  %s5339_s8 = inlined_call_operand.vmem [shape: f32[32,32], index: 8, kind: input, shape index: {}]   ;;  %s5340_s9 = inlined_call_operand.vmem [shape: f32[1,32], index: 9, kind: input, shape index: {}]   ;;  %s5341_s10 = inlined_call_operand.vmem [shape: f32[32,64], index: 10, kind: input, shape index: {}]   ;;  %s5342_s11 = inlined_call_operand.vmem [shape: f32[1,64], index: 11, kind: input, shape index: {}]   ;;  %s5343_s12 = inlined_call_operand.vmem [shape: f32[64,32], index: 12, kind: input, shape index: {}]   ;;  %s5344_s13 = inlined_call_operand.vmem [shape: f32[1,32], index: 13, kind: input, shape index: {}]   ;;  %s5345_s14 = inlined_call_operand.vmem [shape: f32[1,32], index: 14, kind: input, shape index: {}]   ;;  %s5346_s15 = inlined_call_operand.vmem [shape: f32[1,32], index: 15, kind: input, shape index: {}]   ;;  %s5347_s16 = inlined_call_operand.vmem [shape: f32[1,32], index: 16, kind: input, shape index: {}]   ;;  %s5348_s17 = inlined_call_operand.vmem [shape: f32[1,32], index: 17, kind: input, shape index: {}]   ;;  %s5349_s18 = inlined_call_operand.vmem [shape: f32[32,32], index: 18, kind: input, shape index: {}]   ;;  %s5350_s19 = inlined_call_operand.vmem [shape: f32[1,32], index: 19, kind: input, shape index: {}]   ;;  %s5351_s20 = inlined_call_operand.vmem [shape: f32[32,10], index: 20, kind: input, shape index: {}]   ;;  %s5352_s21 = inlined_call_operand.vmem [shape: f32[1,10], index: 21, kind: input, shape index: {}]   ;;  %s5353_s22 = inlined_call_operand.vmem [shape: f32[32,32], index: 22, kind: output, shape index: {0}]   ;;  %s5354_s23 = inlined_call_operand.hbm [shape: f32[2,10], index: 23, kind: output, shape index: {1}]  }
   0x1   :  { %5363 = sst [smem:[#allocation6_spill]] %s5331_s0 }
   0x2   :  { %5364 = sst [smem:[#allocation7_spill]] %s5332_s1 }
   0x3   :  { %5365 = sst [smem:[#allocation8_spill]] %s5333_s2 }
   0x4   :  { %5366 = sst [smem:[#allocation9_spill]] %s5334_s3 }
   0x5   :  { %5367 = sst [smem:[#allocation10_spill]] %s5335_s4 }
   0x6   :  { %5368 = sst [smem:[#allocation11_spill]] %s5336_s5 }
   0x7   :  { %5369 = sst [smem:[#allocation12_spill]] %s5337_s6 }
   0x8   :  { %5370 = sst [smem:[#allocation13_spill]] %s5338_s7 }
   0x9   :  { %s5371_s24 = sld [smem:[#allocation10_spill]]  ;;  %v4547_v3 = vmov 0.0|0.0   ;;  %vm4548_vm0 = vmmov 0   ;;  %v4549_v6 = vmov 0.0  }
   0xa   :  { %4144 = vmatprep.subr.bf16.mxu0 %v4547_v3  ;;  %3844 = vmatprep.mubr.msk.f32.mxu0 %vm4548_vm0, %v4549_v6 }
   0xf   :  { %v74_v0 = vld [vmem:[%s5371_s24] sm:$0xff]  ;;  %v75_v1 = vld [vmem:[%s5371_s24 + $0x8] sm:$0xff]  ;;  %v76_v2 = vld [vmem:[%s5371_s24 + $0x10] sm:$0xff] }
  0x10   :  { %v4692_v4 = vpack.c.bf16 %v75_v1, %v74_v0  ;;  %v77_v5 = vld [vmem:[%s5371_s24 + $0x18] sm:$0xff]  ;;  %v78_v8 = vld [vmem:[%s5371_s24 + $0x20] sm:$0xff]  ;;  %v79_v9 = vld [vmem:[%s5371_s24 + $0x28] sm:$0xff] }
  0x11   :  { %v4700_v7 = vpack.c.bf16 %v77_v5, %v76_v2 }
  0x12   :  { %4146 = vmatpush3.bf16.msra.mxu0 %v4692_v4 }
  0x13   :  { %4147 = vmatprep.subr.bf16.mxu0 %v4547_v3 }
  0x14   :  { %29 = vsyncpa [#allocation4], 0  ;;  %v4710_v10 = vpack.c.bf16 %v79_v9, %v78_v8  ;;  %v80_v11 = vld [vmem:[%s5371_s24 + $0x30] sm:$0xff]  ;;  %v81_v12 = vld [vmem:[%s5371_s24 + $0x38] sm:$0xff]  ;;  %s5372_s1 = sld [smem:[#allocation6_spill]]  ;;  %vm134_vm1 = vcmask 523264  }
  0x15   :  { %v4720_v13 = vpack.c.bf16 %v81_v12, %v80_v11  ;;  %s5373_s6 = sld [smem:[#allocation9_spill]]  ;;  %s5374_s7 = sld [smem:[#allocation8_spill]]  ;;  %vm126_vm2 = vcmask 253952   ;;  %vm221_vm3 = vcmask 260096   ;;  %vm210_vm4 = vcmask 1046528  }
  0x16   :  { %4149 = vmatpush3.bf16.msra.mxu0 %v4700_v7  ;;  %s5375_s4 = sld [smem:[#allocation7_spill]]  ;;  %s5376_s5 = sld [smem:[#allocation12_spill]]  ;;  %vm216_vm5 = vcmask 261120   ;;  %vm318_vm6 = vcmask 64512   ;;  %vm404_vm8 = vcmask 130048   ;;  %vm1870_vm9 = vcmask 73728  }
  0x17   :  { %4150 = vmatprep.subr.bf16.mxu0 %v4547_v3  ;;  %s5377_s3 = sld [smem:[#allocation11_spill]]  ;;  %s5378_s26 = sld [smem:[#allocation13_spill]]  ;;  %vm4818_vm7 = vmpackc.low %vm318_vm6, %vm318_vm6 }
  0x18   :  { %s4551_s2 = smov 96   ;;  %s4553_s24 = smov 112  }
  0x19   :  { %s4554_s27 = smov 80   ;;  %s4556_s28 = smov 72  }
  0x1a   :  { %4152 = vmatpush3.bf16.msra.mxu0 %v4710_v10  ;;  %v124_v14 = vld [vmem:[%s5372_s1] sm:$0xff]  ;;  %s4557_s29 = smov 64   ;;  %s5361_s0 = smov 48  }
  0x1b   :  { %4153 = vmatprep.subr.bf16.mxu0 %v4547_v3  ;;  %v122_v15 = vld [vmem:[%s5373_s6 + $0x8] sm:$0xff]  ;;  %v123_v16 = vld [vmem:[%s5374_s7] sm:$0x1]  ;;  %s5362_s7 = smov 56   ;;  %s5360_s30 = smov 40  }
  0x1c   :  { %v121_v17 = vld [vmem:[%s5373_s6] sm:$0xff]  ;;  %v212_v18 = vrot.slane %v122_v15, 1  ;;  %v84_v23 = vld [vmem:[%s5376_s5 + $0x8] sm:$0xff]  ;;  %v85_v25 = vld [vmem:[%s5376_s5 + $0x10] sm:$0xff]  ;;  %s4552_s6 = smov 88  }
  0x1d   :  { %v125_v19 = vadd.f32 %v123_v16, %v121_v17  ;;  %v218_v20 = vld [vmem:[%s5375_s4] sm:$0x7f]  ;;  %v86_v26 = vld [vmem:[%s5376_s5 + $0x18] sm:$0xff]  ;;  %v211_v28 = vrot.slane %v121_v17, 1  ;;  %v1949_v35 = vld [vmem:[%s5375_s4 + $0x7] sm:$0x7f] }
  0x1e   :  { %4155 = vmatpush3.bf16.msra.mxu0 %v4720_v13  ;;  %v220_v21 = vadd.f32 %v218_v20, %v212_v18  ;;  %v83_v22 = vld [vmem:[%s5376_s5] sm:$0xff]  ;;  %v4757_v27 = vpack.c.bf16 %v86_v26, %v85_v25  ;;  %v1950_v36 = vadd.f32 %v1949_v35, %v212_v18  ;;  %s4550_s4 = smov 120  }
  0x1f   :  { %v4746_v24 = vpack.c.bf16 %v84_v23, %v83_v22  ;;  %127 = vst.msk [vmem:[#allocation2] sm:$0x1] %vm126_vm2, %v125_v19  ;;  %v4765_v29 = vld [vmem:[%s5377_s3] ss:$0 sm:$0xff]  ;;  %v4767_v31 = vsel %vm210_vm4, %v211_v28, %v212_v18  ;;  %s4558_s3 = smov 104  }
  0x20   :  { %222 = vst.msk [vmem:[#allocation2 + $0x9] sm:$0x7f] %vm221_vm3, %v220_v21  ;;  %v4788_v39 = vld [vmem:[%s5378_s26] ss:$0 sm:$0xff] }
  0x21   :  { %3845 = vmatmul.mubr.msk.f32.vlgmr.msra.gmra.mrb[0].mxu0 %vm134_vm1, %v124_v14  ;;  %4157 = vmatprep.subr.bf16.mxu1 %v4746_v24 }
  0x22   :  { %4159 = vmatpush3.bf16.msra.mxu1 %v4746_v24 }
  0x23   :  { %4161 = vmatprep.subr.bf16.mxu1 %v4757_v27 }
  0x26   :  { %4163 = vmatpush3.bf16.msra.mxu1 %v4757_v27 }
  0xf4   :  { %v204_v30 = vpop.f32.mrb[0].mxu0 }
  0xf5   :  { %v205_v32 = vadd.f32 %v4765_v29, %v204_v30  ;;  %v3846_v33 = vpop.f32.mrb[1].mxu0 }
  0xf7   :  { %v215_v34 = vadd.f32 %v4767_v31, %v205_v32 }
  0xf9   :  { %217 = vst.msk [vmem:[#allocation2 + $0x1] sm:$0xff] %vm216_vm5, %v215_v34 }
 0x100   :  { %v4775_v37 = vld [vmem:[#allocation2] sm:$0xff]  ;;  %v4777_v38 = vld [vmem:[#allocation2 + $0x8] sm:$0xff] }
 0x101   :  { %3855 = vmatprep.mubr.msk.f32.mxu1 %vm216_vm5, %v4775_v37  ;;  %1873 = vst.msk [vmem:[#allocation2] sm:$0x1] %vm126_vm2, %v125_v19 }
 0x102   :  { %1951 = vst.msk [vmem:[#allocation2 + $0x9] sm:$0x7f] %vm221_vm3, %v1950_v36  ;;  %3856 = vmatmul.mubr.msk.f32.vlgmr.msra.gmra.mrb[0].mxu1 %vm216_vm5, %v4777_v38 }
 0x1d5   :  { %v3857_v40 = vpop.f32.mrb[0].mxu1 }
 0x1d6   :  { %v4791_v41 = vadd.f32 %v3857_v40, %v4788_v39  ;;  %v303_v42 = vpop.f32.mrb[1].mxu1 }
 0x1d7   :  { %v4794_v43 = vadd.f32 %v4788_v39, %v303_v42 }
 0x1d9   :  { %514 = vrot.lane.b32.xlu1 %v4794_v43, %s4550_s4  ;;  %3862 = vmatprep.mubr.msk.f32.mxu1 %vm318_vm6, %v4794_v43  ;;  %v4802_v44 = vpack.i.bf16 %v4791_v41, %v4794_v43 }
 0x1db   :  { %4364 = vrot.lane.b32.xlu0 %v4802_v44, %s4551_s2 }
 0x1dd   :  { %516 = vrot.lane.b32.xlu1 %v4791_v41, %s4550_s4 }
 0x1df   :  { %4369 = vrot.lane.b32.xlu0 %v4802_v44, %s4552_s6 }
 0x1e1   :  { %878 = vrot.lane.b32.xlu1 %v4794_v43, %s4553_s24 }
 0x1e3   :  { %4374 = vrot.lane.b32.xlu0 %v4802_v44, %s4554_s27 }
 0x1e7   :  { %880 = vrot.lane.b32.xlu0 %v4791_v41, %s4553_s24 }
 0x24b   :  { %v515_v55 = vpop.permute.xlu1 %514 }
 0x24d   :  { %v4365_v45 = vpop.permute.xlu0 %4364 }
 0x24e   :  { %v4367_v46 = vunpack.i.h.bf16 %v4365_v45  ;;  %v4366_v47 = vunpack.i.l.bf16 %v4365_v45 }
 0x24f   :  { %v517_v59 = vpop.permute.xlu1 %516 }
 0x250   :  { %v4164_v49 = vpack.c.bf16 %v4367_v46, %v4366_v47 }
 0x251   :  { %v4370_v50 = vpop.permute.xlu0 %4369 }
 0x252   :  { %v4372_v51 = vunpack.i.h.bf16 %v4370_v50  ;;  %v4371_v52 = vunpack.i.l.bf16 %v4370_v50  ;;  %4166 = vmatprep.subr.msk.bf16.mxu1 %vm4818_vm7, %v4164_v49 }
 0x253   :  { %4169 = vmatpush3.bf16.xpose.msk.msra.mxu1 %vm4818_vm7, %v4164_v49  ;;  %v879_v60 = vpop.permute.xlu1 %878 }
 0x254   :  { %v4174_v53 = vpack.c.bf16 %v4372_v51, %v4371_v52 }
 0x255   :  { %v4375_v54 = vpop.permute.xlu0 %4374 }
 0x256   :  { %v4377_v56 = vunpack.i.h.bf16 %v4375_v54  ;;  %v4376_v57 = vunpack.i.l.bf16 %v4375_v54  ;;  %4176 = vmatprep.subr.msk.bf16.mxu1 %vm4818_vm7, %v4174_v53 }
 0x258   :  { %v4184_v58 = vpack.c.bf16 %v4377_v56, %v4376_v57 }
 0x259   :  { %v881_v61 = vpop.permute.xlu0 %880 }
 0x25a   :  { %3863 = vmatmul.mubr.msk.f32.vlgmr.msra.gmra.mrb[2].mxu1 %vm318_vm6, %v4791_v41 }
 0x25b   :  { %4179 = vmatpush3.bf16.xpose.msk.msra.mxu1 %vm4818_vm7, %v4174_v53  ;;  %3876 = vmatprep.mubr.msk.f32.mxu1 %vm318_vm6, %v515_v55 }
 0x25c   :  { %4186 = vmatprep.subr.msk.bf16.mxu1 %vm4818_vm7, %v4184_v58 }
 0x262   :  { %3877 = vmatmul.mubr.msk.f32.vlgmr.msra.gmra.mrb[4].mxu1 %vm318_vm6, %v517_v59 }
 0x263   :  { %4189 = vmatpush3.bf16.xpose.msk.msra.mxu1 %vm4818_vm7, %v4184_v58  ;;  %3900 = vmatprep.mubr.msk.f32.mxu1 %vm318_vm6, %v879_v60 }
 0x26a   :  { %3901 = vmatmul.mubr.msk.f32.vlgmr.msra.gmra.mrb[6].mxu1 %vm318_vm6, %v881_v61 }
 0x32d   :  { %v3864_v62 = vpop.f32.mrb[2].mxu1 }
 0x32e   :  { %v403_v63 = vmul.f32 0.35355338, %v3864_v62  ;;  %v393_v0 = vpop.f32.mrb[3].mxu1 }
 0x32f   :  { %v402_v1 = vmul.f32 0.35355338, %v393_v0 }
 0x330   :  { %v408_v2 = vsel %vm404_vm8, %v403_v63, -inf }
 0x331   :  { %409 = vmax.xlane.f32.xlu0 %v408_v2  ;;  %v405_v5 = vsel %vm404_vm8, %v402_v1, -inf }
 0x332   :  { %406 = vmax.xlane.f32.xlu1 %v405_v5 }
 0x335   :  { %v3878_v8 = vpop.f32.mrb[4].mxu1 }
 0x336   :  { %v606_v9 = vmul.f32 0.35355338, %v3878_v8  ;;  %v596_v11 = vpop.f32.mrb[5].mxu1 }
 0x337   :  { %v605_v12 = vmul.f32 0.35355338, %v596_v11 }
 0x338   :  { %v610_v14 = vsel %vm404_vm8, %v606_v9, -inf }
 0x339   :  { %611 = vmax.xlane.f32.xlu1 %v610_v14  ;;  %v607_v15 = vsel %vm404_vm8, %v605_v12, -inf }
 0x33a   :  { %608 = vmax.xlane.f32.xlu0 %v607_v15 }
 0x33d   :  { %v3902_v16 = vpop.f32.mrb[6].mxu1 }
 0x33e   :  { %v960_v17 = vpop.f32.mrb[7].mxu1  ;;  %v970_v50 = vmul.f32 0.35355338, %v3902_v16 }
 0x33f   :  { %v969_v49 = vmul.f32 0.35355338, %v960_v17 }
 0x340   :  { %v974_v52 = vsel %vm404_vm8, %v970_v50, -inf }
 0x341   :  { %v971_v51 = vsel %vm404_vm8, %v969_v49, -inf }
 0x3be   :  { %v410_v18 = vpop.xlane.xlu0 %409 }
 0x3bf   :  { %v412_v19 = vsub.f32 %v403_v63, %v410_v18  ;;  %v407_v20 = vpop.xlane.xlu1 %406 }
 0x3c0   :  { %v411_v21 = vsub.f32 %v402_v1, %v407_v20 }
 0x3c1   :  { %v415_v22 = vmul.f32 1.442695, %v412_v19 }
 0x3c2   :  { %v413_v23 = vmul.f32 1.442695, %v411_v21 }
 0x3c3   :  { %4443 = vpow2.f32 %v415_v22 }
 0x3c4   :  { %4445 = vpow2.f32 %v413_v23 }
 0x3c6   :  { %v612_v25 = vpop.xlane.xlu1 %611 }
 0x3c7   :  { %v614_v26 = vsub.f32 %v606_v9, %v612_v25  ;;  %v609_v28 = vpop.xlane.xlu0 %608 }
 0x3c8   :  { %v613_v30 = vsub.f32 %v605_v12, %v609_v28 }
 0x3c9   :  { %v617_v32 = vmul.f32 1.442695, %v614_v26 }
 0x3ca   :  { %v615_v33 = vmul.f32 1.442695, %v613_v30 }
 0x3cb   :  { %4447 = vpow2.f32 %v617_v32  ;;  %v4883_v32 = vld [vmem:[%s5339_s8 + $0x8] sm:$0xff] }
 0x3cc   :  { %4449 = vpow2.f32 %v615_v33  ;;  %v4890_v33 = vld [vmem:[%s5339_s8] sm:$0xff] }
 0x3cd   :  { %v4444_v34 = vpop.eup %4443 }
 0x3ce   :  { %v4446_v35 = vpop.eup %4445  ;;  %v420_v36 = vsel %vm404_vm8, %v4444_v34, 0.0 }
 0x3cf   :  { %421 = vadd.xlane.f32.xlu1 %v420_v36  ;;  %v417_v40 = vsel %vm404_vm8, %v4446_v35, 0.0 }
 0x3d0   :  { %418 = vadd.xlane.f32.xlu0 %v417_v40 }
 0x3d5   :  { %v4846_v42 = vpop.eup %4447 }
 0x3d6   :  { %v4450_v45 = vpop.eup %4449  ;;  %v622_v46 = vsel %vm404_vm8, %v4846_v42, 0.0 }
 0x3d7   :  { %623 = vadd.xlane.f32.xlu1 %v622_v46  ;;  %v619_v47 = vsel %vm404_vm8, %v4450_v45, 0.0 }
 0x3d8   :  { %620 = vadd.xlane.f32.xlu0 %v619_v47 }
 0x3e8   :  { %4384 = vrot.lane.b32.xlu1 %v4802_v44, %s5362_s7  ;;  %s4561_s7 = smov [#allocation3]  }
 0x3ec   :  { %4389 = vrot.lane.b32.xlu1 %v4802_v44, %s4556_s28 }
 0x3ee   :  { %4379 = vrot.lane.b32.xlu0 %v4802_v44, %s4557_s29 }
 0x3f0   :  { %1165 = vrot.lane.b32.xlu1 %v4791_v41, %s4558_s3 }
 0x3f2   :  { %1163 = vrot.lane.b32.xlu0 %v4794_v43, %s4558_s3 }
 0x411   :  { %972 = vmax.xlane.f32.xlu0 %v971_v51 }
 0x414   :  { %975 = vmax.xlane.f32.xlu1 %v974_v52 }
 0x425   :  { %4394 = vrot.lane.b32.xlu1 %v4802_v44, %s5361_s0  ;;  %s3557_s0 = sshll.u32 %s4561_s7, 4  ;;  %s3558_s0 = int_to_ptr.vmem [resolvable:$true] %s3557_s0 }
 0x426   :  { %p4528_p1 = scmp.lt.s32.totalorder %s3558_s0, %s3558_s0 }
 0x429   :  { %4399 = vrot.lane.b32.xlu1 %v4802_v44, %s5360_s30 }
 0x45c   :  { %v422_v53 = vpop.xlane.xlu1 %421 }
 0x45d   :  { %v419_v41 = vpop.xlane.xlu0 %418 }
 0x45e   :  { %4451 = vrcp.f32 %v419_v41 }
 0x45f   :  { %4453 = vrcp.f32 %v422_v53 }
 0x464   :  { %v624_v43 = vpop.xlane.xlu1 %623 }
 0x465   :  { %v621_v54 = vpop.xlane.xlu0 %620 }
 0x466   :  { %4455 = vrcp.f32 %v621_v54 }
 0x467   :  { %4457 = vrcp.f32 %v624_v43 }
 0x468   :  { %v4452_v55 = vpop.eup %4451  ;;  %v4385_v56 = vpop.permute.xlu1 %4384 }
 0x469   :  { %v4380_v57 = vpop.permute.xlu0 %4379  ;;  %v425_v58 = vmul.f32 %v4452_v55, %v4446_v35  ;;  %v4387_v59 = vunpack.i.h.bf16 %v4385_v56  ;;  %v4386_v60 = vunpack.i.l.bf16 %v4385_v56  ;;  %v4454_v0 = vpop.eup %4453 }
 0x46a   :  { %v4382_v61 = vunpack.i.h.bf16 %v4380_v57  ;;  %v4381_v62 = vunpack.i.l.bf16 %v4380_v57  ;;  %v426_v12 = vmul.f32 %v4454_v0, %v4444_v34  ;;  %v4901_v57 = vld [vmem:[%s5339_s8 + $0x10] sm:$0xff] }
 0x46b   :  { %3869 = vmatprep.mubr.msk.f32.mxu0 %vm404_vm8, %v425_v58  ;;  %v4180_v8 = vpack.c.bf16 %v4387_v59, %v4386_v60 }
 0x46c   :  { %v4170_v63 = vpack.c.bf16 %v4382_v61, %v4381_v62  ;;  %v4390_v44 = vpop.permute.xlu1 %4389 }
 0x46d   :  { %v4392_v1 = vunpack.i.h.bf16 %v4390_v44  ;;  %v4391_v2 = vunpack.i.l.bf16 %v4390_v44  ;;  %v1164_v5 = vpop.permute.xlu0 %1163 }
 0x46e   :  { %4171 = vmatprep.subr.bf16.mxu0 %v4170_v63  ;;  %3919 = vmatprep.mubr.msk.f32.mxu1 %vm318_vm6, %v1164_v5 }
 0x46f   :  { %v4194_v9 = vpack.c.bf16 %v4392_v1, %v4391_v2  ;;  %4173 = vmatpush3.bf16.msra.mxu0 %v4170_v63 }
 0x470   :  { %v4456_v11 = vpop.eup %4455  ;;  %4181 = vmatprep.subr.bf16.mxu0 %v4180_v8  ;;  %v1166_v17 = vpop.permute.xlu1 %1165 }
 0x471   :  { %v4458_v14 = vpop.eup %4457  ;;  %4196 = vmatprep.subr.msk.bf16.mxu1 %vm4818_vm7, %v4194_v9  ;;  %v627_v15 = vmul.f32 %v4456_v11, %v4450_v45 }
 0x472   :  { %3870 = vmatmul.mubr.msk.f32.vlgmr.msra.gmra.mrb[2].mxu0 %vm404_vm8, %v426_v12  ;;  %4199 = vmatpush3.bf16.xpose.msk.msra.mxu1 %vm4818_vm7, %v4194_v9  ;;  %v628_v16 = vmul.f32 %v4458_v14, %v4846_v42 }
 0x473   :  { %4183 = vmatpush3.bf16.msra.mxu0 %v4180_v8  ;;  %3883 = vmatprep.mubr.msk.f32.mxu0 %vm404_vm8, %v627_v15 }
 0x474   :  { %3886 = vmatprep.subr.mxu0 %v4883_v32 }
 0x476   :  { %3884 = vmatmul.mubr.msk.f32.vlgmr.msra.gmra.mrb[4].mxu0 %vm404_vm8, %v628_v16 }
 0x477   :  { %3887 = vmatpush3.msra.mxu0 %v4883_v32 }
 0x478   :  { %3891 = vmatprep.subr.mxu0 %v4890_v33 }
 0x479   :  { %3920 = vmatmul.mubr.msk.f32.vlgmr.msra.gmra.mrb[8].mxu1 %vm318_vm6, %v1166_v17  ;;  %v4915_v17 = vld [vmem:[%s5339_s8 + $0x18] sm:$0xff] }
 0x49e   :  { %v973_v18 = vpop.xlane.xlu0 %972 }
 0x49f   :  { %v977_v19 = vsub.f32 %v969_v49, %v973_v18 }
 0x4a1   :  { %v979_v20 = vmul.f32 1.442695, %v977_v19  ;;  %v976_v21 = vpop.xlane.xlu1 %975 }
 0x4a2   :  { %v978_v22 = vsub.f32 %v970_v50, %v976_v21 }
 0x4a3   :  { %4459 = vpow2.f32 %v979_v20 }
 0x4a4   :  { %v981_v23 = vmul.f32 1.442695, %v978_v22 }
 0x4a5   :  { %v4395_v35 = vpop.permute.xlu1 %4394 }
 0x4a6   :  { %4461 = vpow2.f32 %v981_v23  ;;  %v4397_v45 = vunpack.i.h.bf16 %v4395_v35  ;;  %v4396_v46 = vunpack.i.l.bf16 %v4395_v35 }
 0x4a8   :  { %v4190_v50 = vpack.c.bf16 %v4397_v45, %v4396_v46 }
 0x4a9   :  { %v4400_v55 = vpop.permute.xlu1 %4399 }
 0x4aa   :  { %v4402_v58 = vunpack.i.h.bf16 %v4400_v55  ;;  %v4401_v59 = vunpack.i.l.bf16 %v4400_v55  ;;  %v94_v55 = vld [vmem:[%s5341_s10 + $0x8] sm:$0xff] }
 0x4ac   :  { %v4200_v63 = vpack.c.bf16 %v4402_v58, %v4401_v59  ;;  %v95_v58 = vld [vmem:[%s5341_s10 + $0x10] sm:$0xff]  ;;  %v96_v59 = vld [vmem:[%s5341_s10 + $0x18] sm:$0xff] }
 0x4ad   :  { %v4460_v25 = vpop.eup %4459 }
 0x4ae   :  { %v983_v26 = vsel %vm404_vm8, %v4460_v25, 0.0 }
 0x4af   :  { %984 = vadd.xlane.f32.xlu0 %v983_v26 }
 0x4b0   :  { %v4462_v28 = vpop.eup %4461 }
 0x4b1   :  { %v986_v30 = vsel %vm404_vm8, %v4462_v28, 0.0 }
 0x4b3   :  { %987 = vadd.xlane.f32.xlu0 %v986_v30 }
 0x53c   :  { %v985_v34 = vpop.xlane.xlu0 %984 }
 0x53d   :  { %4463 = vrcp.f32 %v985_v34 }
 0x540   :  { %v988_v40 = vpop.xlane.xlu0 %987 }
 0x541   :  { %4465 = vrcp.f32 %v988_v40 }
 0x545   :  { %v3871_v36 = vpop.f32.mrb[2].mxu0 }
 0x546   :  { %v505_v42 = vpop.f32.mrb[3].mxu0 }
 0x547   :  { %v4464_v54 = vpop.eup %4463 }
 0x548   :  { %v991_v61 = vmul.f32 %v4464_v54, %v4460_v25 }
 0x549   :  { %v3885_v47 = vpop.f32.mrb[4].mxu0 }
 0x54a   :  { %v707_v49 = vpop.f32.mrb[5].mxu0 }
 0x54b   :  { %3888 = vmatprep.mubr.msk.f32.mxu0 %vm318_vm6, %v707_v49  ;;  %v4466_v56 = vpop.eup %4465 }
 0x54c   :  { %3889 = vmatmul.mubr.msk.f32.vlgmr.msra.gmra.mrb[6].mxu0 %vm318_vm6, %v3885_v47  ;;  %v3921_v51 = vpop.f32.mrb[8].mxu1  ;;  %v992_v62 = vmul.f32 %v4466_v56, %v4462_v28  ;;  %v4927_v28 = vld [vmem:[%s5340_s9] ss:$0 sm:$0xff] }
 0x54d   :  { %3892 = vmatpush3.msra.mxu0 %v4890_v33  ;;  %3893 = vmatprep.mubr.msk.f32.mxu0 %vm318_vm6, %v505_v42  ;;  %v1245_v52 = vpop.f32.mrb[9].mxu1  ;;  %v1255_v53 = vmul.f32 0.35355338, %v3921_v51 }
 0x54e   :  { %4191 = vmatprep.subr.bf16.mxu0 %v4190_v50  ;;  %v1254_v41 = vmul.f32 0.35355338, %v1245_v52 }
 0x54f   :  { %v1259_v60 = vsel %vm404_vm8, %v1255_v53, -inf }
 0x550   :  { %v1256_v43 = vsel %vm404_vm8, %v1254_v41, -inf }
 0x551   :  { %1257 = vmax.xlane.f32.xlu0 %v1256_v43 }
 0x554   :  { %3894 = vmatmul.mubr.msk.f32.vlgmr.msra.gmra.mrb[6].mxu0 %vm318_vm6, %v3871_v36 }
 0x555   :  { %4193 = vmatpush3.bf16.msra.mxu0 %v4190_v50  ;;  %1260 = vmax.xlane.f32.xlu0 %v1259_v60  ;;  %v4953_v60 = vpack.c.bf16 %v96_v59, %v95_v58  ;;  %v112_v58 = vld [vmem:[%s5349_s18 + $0x8] sm:$0xff] }
 0x556   :  { %3907 = vmatprep.mubr.msk.f32.mxu0 %vm404_vm8, %v991_v61  ;;  %3910 = vmatprep.subr.mxu0 %v4901_v57  ;;  %v98_v61 = vld [vmem:[%s5343_s12] sm:$0xff] }
 0x558   :  { %3908 = vmatmul.mubr.msk.f32.vlgmr.msra.gmra.mrb[8].mxu0 %vm404_vm8, %v992_v62  ;;  %v99_v62 = vld [vmem:[%s5343_s12 + $0x8] sm:$0xff] }
 0x559   :  { %3911 = vmatpush3.msra.mxu0 %v4901_v57 }
 0x55a   :  { %4201 = vmatprep.subr.bf16.mxu0 %v4200_v63 }
 0x5de   :  { %v1258_v44 = vpop.xlane.xlu0 %1257 }
 0x5df   :  { %v1262_v0 = vsub.f32 %v1254_v41, %v1258_v44  ;;  %v4967_v44 = vpack.c.bf16 %v99_v62, %v98_v61  ;;  %v113_v61 = vld [vmem:[%s5349_s18 + $0x10] sm:$0xff]  ;;  %v114_v62 = vld [vmem:[%s5349_s18 + $0x18] sm:$0xff] }
 0x5e1   :  { %v1264_v1 = vmul.f32 1.442695, %v1262_v0  ;;  %v101_v0 = vld [vmem:[%s5343_s12 + $0x18] sm:$0xff] }
 0x5e2   :  { %v1261_v2 = vpop.xlane.xlu0 %1260 }
 0x5e3   :  { %4467 = vpow2.f32 %v1264_v1  ;;  %v1263_v5 = vsub.f32 %v1255_v53, %v1261_v2  ;;  %v102_v2 = vld [vmem:[%s5343_s12 + $0x20] sm:$0xff] }
 0x5e5   :  { %v1266_v8 = vmul.f32 1.442695, %v1263_v5  ;;  %v103_v5 = vld [vmem:[%s5343_s12 + $0x28] sm:$0xff] }
 0x5e7   :  { %4469 = vpow2.f32 %v1266_v8  ;;  %v4983_v8 = vpack.c.bf16 %v103_v5, %v102_v2 }
 0x5ed   :  { %v4468_v9 = vpop.eup %4467 }
 0x5ee   :  { %v1268_v11 = vsel %vm404_vm8, %v4468_v9, 0.0 }
 0x5ef   :  { %1269 = vadd.xlane.f32.xlu0 %v1268_v11 }
 0x5f1   :  { %v4470_v12 = vpop.eup %4469 }
 0x5f2   :  { %v1271_v14 = vsel %vm404_vm8, %v4470_v12, 0.0 }
 0x5f3   :  { %1272 = vadd.xlane.f32.xlu0 %v1271_v14 }
 0x62b   :  { %v3909_v15 = vpop.f32.mrb[8].mxu0 }
 0x62c   :  { %v1071_v16 = vpop.f32.mrb[9].mxu0 }
 0x62d   :  { %3912 = vmatprep.mubr.msk.f32.mxu0 %vm318_vm6, %v1071_v16 }
 0x62e   :  { %3913 = vmatmul.mubr.msk.f32.vlgmr.msra.gmra.mrb[6].mxu0 %vm318_vm6, %v3909_v15 }
 0x62f   :  { %4203 = vmatpush3.bf16.msra.mxu0 %v4200_v63  ;;  %v100_v63 = vld [vmem:[%s5343_s12 + $0x10] sm:$0xff] }
 0x630   :  { %3929 = vmatprep.subr.mxu0 %v4915_v17  ;;  %v4972_v1 = vpack.c.bf16 %v101_v0, %v100_v63  ;;  %v1872_v63 = vld [vmem:[%s5372_s1 + $0x8] sm:$0xff]  ;;  %v5066_v0 = vpack.c.bf16 %v114_v62, %v113_v61 }
 0x67c   :  { %v1270_v18 = vpop.xlane.xlu0 %1269 }
 0x67d   :  { %4471 = vrcp.f32 %v1270_v18 }
 0x680   :  { %v1273_v19 = vpop.xlane.xlu0 %1272 }
 0x681   :  { %4473 = vrcp.f32 %v1273_v19  ;;  %v4991_v19 = vld [vmem:[%s5345_s14] ss:$0 sm:$0xff] }
 0x687   :  { %v4472_v20 = vpop.eup %4471 }
 0x688   :  { %v1276_v21 = vmul.f32 %v4472_v20, %v4468_v9 }
 0x68a   :  { %3926 = vmatprep.mubr.msk.f32.mxu0 %vm404_vm8, %v1276_v21  ;;  %v4996_v21 = vld [vmem:[%s5346_s15] ss:$0 sm:$0xff] }
 0x68b   :  { %v4474_v22 = vpop.eup %4473 }
 0x68c   :  { %v1277_v23 = vmul.f32 %v4474_v22, %v4470_v12 }
 0x68e   :  { %3927 = vmatmul.mubr.msk.f32.vlgmr.msra.gmra.mrb[10].mxu0 %vm404_vm8, %v1277_v23 }
 0x68f   :  { %3930 = vmatpush3.msra.mxu0 %v4915_v17 }
 0x690   :  { %4213 = vmatprep.subr.bf16.mxu0 %v4967_v44 }
 0x761   :  { %v3928_v25 = vpop.f32.mrb[10].mxu0 }
 0x762   :  { %v1356_v26 = vpop.f32.mrb[11].mxu0 }
 0x763   :  { %3931 = vmatprep.mubr.msk.f32.mxu0 %vm318_vm6, %v1356_v26 }
 0x764   :  { %3932 = vmatmul.mubr.msk.f32.vlgmr.msra.gmra.mrb[6].mxu0 %vm318_vm6, %v3928_v25 }
 0x765   :  { %4215 = vmatpush3.bf16.msra.mxu0 %v4967_v44 }
 0x766   :  { %4217 = vmatprep.subr.bf16.mxu0 %v4972_v1 }
 0x769   :  { %4219 = vmatpush3.bf16.msra.mxu0 %v4972_v1 }
 0x76a   :  { %4221 = vmatprep.subr.bf16.mxu0 %v4983_v8 }
 0x76d   :  { %4223 = vmatpush3.bf16.msra.mxu0 %v4983_v8 }
 0x837   :  { %v3933_v30 = vpop.f32.mrb[6].mxu0 }
 0x838   :  { %v1455_v34 = vadd.f32 %v3933_v30, %v4927_v28  ;;  %v1437_v35 = vpop.f32.mrb[7].mxu0 }
 0x839   :  { %v1454_v36 = vadd.f32 %v4927_v28, %v1437_v35  ;;  %v104_v35 = vld [vmem:[%s5343_s12 + $0x30] sm:$0xff] }
 0x83a   :  { %v1457_v40 = vadd.f32 %v1455_v34, %v4777_v38 }
 0x83b   :  { %v1456_v42 = vadd.f32 %v1454_v36, %v4775_v37  ;;  %v93_v37 = vld [vmem:[%s5341_s10] sm:$0xff]  ;;  %v105_v36 = vld [vmem:[%s5343_s12 + $0x38] sm:$0xff] }
 0x83c   :  { %v1461_v45 = vsel %vm216_vm5, %v1457_v40, 0.0  ;;  %v4943_v56 = vpack.c.bf16 %v94_v55, %v93_v37  ;;  %v111_v55 = vld [vmem:[%s5349_s18] sm:$0xff]  ;;  %s4523_s18 = scalar_lea.vmem %s3558_s0, 32 }
 0x83d   :  { %1462 = vadd.xlane.f32.xlu1 %v1461_v45  ;;  %v1458_v46 = vsel %vm216_vm5, %v1456_v42, 0.0  ;;  %v5054_v59 = vpack.c.bf16 %v112_v58, %v111_v55  ;;  %p4524_p0 = scmp.ne.s32.totalorder %s3558_s0, %s4523_s18  ;;  %p4529_p2 = scmp.lt.s32.totalorder %s4523_s18, %s4523_s18 }
 0x83e   :  { %1459 = vadd.xlane.f32.xlu0 %v1458_v46  ;;  %4205 = vmatprep.subr.bf16.mxu1 %v4943_v56 }
 0x83f   :  { %4207 = vmatpush3.bf16.msra.mxu1 %v4943_v56  ;;  %p4530_p3 = por %p4529_p2, %p4528_p1 }
 0x840   :  { %4209 = vmatprep.subr.bf16.mxu1 %v4953_v60 }
 0x841   :  { %p4531_p4 = pnand %p4530_p3, %p4524_p0 }
 0x843   :  { %4211 = vmatpush3.bf16.msra.mxu1 %v4953_v60 }
 0x844   :  { %4228 = vmatprep.subr.bf16.mxu1 %v4547_v3 }
 0x8ca   :  { %v1463_v47 = vpop.xlane.xlu1 %1462 }
 0x8cb   :  { %v1466_v49 = vmul.f32 0.03125, %v1463_v47  ;;  %v1460_v50 = vpop.xlane.xlu0 %1459 }
 0x8cc   :  { %v1465_v51 = vmul.f32 0.03125, %v1460_v50 }
 0x8cd   :  { %v1468_v52 = vsub.f32 %v1457_v40, %v1466_v49  ;;  %v5015_v40 = vpack.c.bf16 %v105_v36, %v104_v35  ;;  %v118_v36 = vld [vmem:[%s5351_s20 + $0x10] sm:$0xff] }
 0x8ce   :  { %v1467_v41 = vsub.f32 %v1456_v42, %v1465_v51  ;;  %v5023_v42 = vld [vmem:[%s5342_s11] ss:$0 sm:$0xff] }
 0x8cf   :  { %v1470_v54 = vmul.f32 %v1468_v52, %v1468_v52  ;;  %4225 = vmatprep.subr.bf16.mxu0 %v5015_v40 }
 0x8d0   :  { %v1469_v53 = vmul.f32 %v1467_v41, %v1467_v41  ;;  %4227 = vmatpush3.bf16.msra.mxu0 %v5015_v40 }
 0x8d1   :  { %v1474_v38 = vsel %vm216_vm5, %v1470_v54, 0.0  ;;  %4240 = vmatprep.subr.bf16.mxu0 %v4547_v3 }
 0x8d2   :  { %v1471_v43 = vsel %vm216_vm5, %v1469_v53, 0.0 }
 0x8d3   :  { %1472 = vadd.xlane.f32.xlu0 %v1471_v43 }
 0x8d7   :  { %1475 = vadd.xlane.f32.xlu0 %v1474_v38 }
 0x960   :  { %v1473_v9 = vpop.xlane.xlu0 %1472 }
 0x961   :  { %v1477_v11 = vmul.f32 0.03125, %v1473_v9 }
 0x963   :  { %v1479_v12 = vadd.f32 1e-05, %v1477_v11 }
 0x964   :  { %v1476_v14 = vpop.xlane.xlu0 %1475 }
 0x965   :  { %4475 = vrsqrt.f32 %v1479_v12  ;;  %v1478_v15 = vmul.f32 0.03125, %v1476_v14  ;;  %v5075_v12 = vld [vmem:[%s5347_s16] ss:$0 sm:$0xff] }
 0x967   :  { %v1480_v16 = vadd.f32 1e-05, %v1478_v15  ;;  %v116_v15 = vld [vmem:[%s5351_s20] sm:$0xff] }
 0x969   :  { %4477 = vrsqrt.f32 %v1480_v16  ;;  %v117_v16 = vld [vmem:[%s5351_s20 + $0x8] sm:$0xff] }
 0x96f   :  { %v4476_v18 = vpop.eup %4475 }
 0x970   :  { %v1483_v20 = vmul.f32 %v4476_v18, %v1467_v41  ;;  %v5086_v18 = vld [vmem:[%s5348_s17] ss:$0 sm:$0xff] }
 0x972   :  { %v1491_v22 = vmul.f32 %v4991_v19, %v1483_v20 }
 0x973   :  { %v4478_v23 = vpop.eup %4477 }
 0x974   :  { %v1484_v25 = vmul.f32 %v4478_v23, %v1468_v52  ;;  %v1499_v26 = vadd.f32 %v4996_v21, %v1491_v22  ;;  %v5041_v52 = vld [vmem:[%s5344_s13] ss:$0 sm:$0xff]  ;;  %v5089_v22 = vpack.c.bf16 %v117_v16, %v116_v15 }
 0x976   :  { %3942 = vmatprep.mubr.msk.f32.mxu1 %vm216_vm5, %v1499_v26  ;;  %v1492_v30 = vmul.f32 %v4991_v19, %v1484_v25 }
 0x978   :  { %v5003_v34 = vadd.f32 %v4996_v21, %v1492_v30 }
 0x97a   :  { %3943 = vmatmul.mubr.msk.f32.vlgmr.msra.gmra.mrb[10].mxu1 %vm216_vm5, %v5003_v34 }
 0x97b   :  { %3972 = vmatprep.mubr.msk.f32.mxu1 %vm4548_vm0, %v4549_v6  ;;  %4230 = vmatpush3.bf16.msra.mxu1 %v5054_v59 }
 0x97c   :  { %4231 = vmatprep.subr.bf16.mxu1 %v4547_v3 }
 0x97f   :  { %4233 = vmatpush3.bf16.msra.mxu1 %v5066_v0 }
 0x980   :  { %4234 = vmatprep.subr.bf16.mxu1 %v4547_v3 }
 0xa4d   :  { %v3944_v45 = vpop.f32.mrb[10].mxu1 }
 0xa4e   :  { %v1585_v46 = vadd.f32 %v3944_v45, %v5023_v42  ;;  %v1579_v47 = vpop.f32.mrb[11].mxu1  ;;  %v119_v45 = vld [vmem:[%s5351_s20 + $0x18] sm:$0xff] }
 0xa4f   :  { %v1580_v49 = vadd.f32 %v5023_v42, %v1579_v47 }
 0xa50   :  { %v1589_v51 = vmax.f32 %v1585_v46, 0.0  ;;  %v5110_v46 = vpack.c.bf16 %v119_v45, %v118_v36 }
 0xa51   :  { %v1588_v50 = vmax.f32 %v1580_v49, 0.0 }
 0xa53   :  { %3961 = vmatprep.mubr.msk.f32.mxu0 %vm134_vm1, %v1588_v50 }
 0xa54   :  { %3962 = vmatmul.mubr.msk.f32.vlgmr.msra.gmra.mrb[12].mxu0 %vm134_vm1, %v1589_v51 }
 0xa55   :  { %4242 = vmatpush3.bf16.msra.mxu0 %v4692_v4  ;;  %4002 = vmatprep.mubr.msk.f32.mxu0 %vm4548_vm0, %v4549_v6 }
 0xa56   :  { %4243 = vmatprep.subr.bf16.mxu0 %v4547_v3 }
 0xa59   :  { %4245 = vmatpush3.bf16.msra.mxu0 %v4700_v7 }
 0xa5a   :  { %4246 = vmatprep.subr.bf16.mxu0 %v4547_v3 }
 0xa5d   :  { %4248 = vmatpush3.bf16.msra.mxu0 %v4710_v10 }
 0xa5e   :  { %4249 = vmatprep.subr.bf16.mxu0 %v4547_v3 }
 0xa61   :  { %4251 = vmatpush3.bf16.msra.mxu0 %v4720_v13 }
 0xa64   :  { %4003 = vmatmul.mubr.msk.f32.vlgmr.msra.gmra.mrb[14].mxu0 %vm134_vm1, %v1872_v63 }
 0xb27   :  { %v5043_v4 = vpop.f32.mrb[12].mxu0 }
 0xb28   :  { %v1668_v41 = vpop.f32.mrb[13].mxu0 }
 0xb29   :  { %v1669_v53 = vadd.f32 %v5041_v52, %v1668_v41 }
 0xb2b   :  { %v1677_v43 = vadd.f32 %v1669_v53, %v1499_v26  ;;  %v5135_v53 = vld [vmem:[%s5352_s21] sm:$0x1]  ;;  %s5381_s21 = smov 56  }
 0xb2d   :  { %v1679_v7 = vsel %vm216_vm5, %v1677_v43, 0.0 }
 0xb2e   :  { %1680 = vadd.xlane.f32.xlu0 %v1679_v7 }
 0xb37   :  { %v1943_v25 = vpop.f32.mrb[14].mxu0 }
 0xb38   :  { %v1944_v26 = vadd.f32 %v4765_v29, %v1943_v25  ;;  %v4004_v30 = vpop.f32.mrb[15].mxu0  ;;  %v5117_v29 = vld [vmem:[%s5350_s19] sm:$0x1] }
 0xb3a   :  { %v1947_v35 = vadd.f32 %v1944_v26, %v4767_v31 }
 0xb3c   :  { %1948 = vst.msk [vmem:[#allocation2 + $0x1] sm:$0xff] %vm216_vm5, %v1947_v35 }
 0xb43   :  { %v5120_v51 = vld [vmem:[#allocation2] sm:$0xff]  ;;  %v5128_v41 = vld [vmem:[#allocation2 + $0x8] sm:$0xff] }
 0xbbb   :  { %v1681_v54 = vpop.xlane.xlu0 %1680 }
 0xbbc   :  { %v1685_v10 = vmul.f32 0.03125, %v1681_v54 }
 0xbbe   :  { %v1687_v38 = vsub.f32 %v1677_v43, %v1685_v10 }
 0xbc0   :  { %v1689_v37 = vmul.f32 %v1687_v38, %v1687_v38 }
 0xbc2   :  { %v1691_v13 = vsel %vm216_vm5, %v1689_v37, 0.0 }
 0xbc3   :  { %1692 = vadd.xlane.f32.xlu0 %v1691_v13 }
 0xc50   :  { %v1693_v2 = vpop.xlane.xlu0 %1692 }
 0xc51   :  { %v1697_v5 = vmul.f32 0.03125, %v1693_v2 }
 0xc53   :  { %v1699_v9 = vadd.f32 1e-05, %v1697_v5 }
 0xc55   :  { %4479 = vrsqrt.f32 %v1699_v9 }
 0xc5f   :  { %v4480_v11 = vpop.eup %4479 }
 0xc60   :  { %v1703_v14 = vmul.f32 %v4480_v11, %v1687_v38 }
 0xc62   :  { %v1711_v20 = vmul.f32 %v5075_v12, %v1703_v14 }
 0xc64   :  { %v1719_v23 = vadd.f32 %v5086_v18, %v1711_v20 }
 0xc66   :  { %1721 = vst.msk [vmem:[%s5353_s22] sm:$0xff] %vm216_vm5, %v1719_v23  ;;  %3973 = vmatmul.mubr.msk.f32.vlgmr.msra.gmra.mrb[12].mxu1 %vm216_vm5, %v1719_v23 }
 0xc67   :  { %4236 = vmatpush3.bf16.msra.mxu1 %v5089_v22  ;;  %3983 = vmatprep.mubr.msk.f32.mxu1 %vm4548_vm0, %v4549_v6 }
 0xc68   :  { %4237 = vmatprep.subr.bf16.mxu1 %v4547_v3 }
 0xc6b   :  { %4239 = vmatpush3.bf16.msra.mxu1 %v5110_v46 }
 0xc6c   :  { %4253 = vmatprep.subr.bf16.mxu1 %v4746_v24 }
 0xd39   :  { %v1792_v31 = vpop.f32.mrb[12].mxu1 }
 0xd3a   :  { %v1793_v47 = vadd.f32 %v1792_v31, %v5117_v29  ;;  %v3974_v49 = vpop.f32.mrb[13].mxu1 }
 0xd3c   :  { %v1796_v50 = vmax.f32 %v1793_v47, 0.0 }
 0xd3e   :  { %3984 = vmatmul.mubr.msk.f32.vlgmr.msra.gmra.mrb[14].mxu1 %vm216_vm5, %v1796_v50 }
 0xd3f   :  { %4255 = vmatpush3.bf16.msra.mxu1 %v4746_v24  ;;  %4013 = vmatprep.mubr.msk.f32.mxu1 %vm216_vm5, %v5120_v51 }
 0xd40   :  { %4257 = vmatprep.subr.bf16.mxu1 %v4757_v27 }
 0xd43   :  { %4259 = vmatpush3.bf16.msra.mxu1 %v4757_v27 }
 0xd46   :  { %4014 = vmatmul.mubr.msk.f32.vlgmr.msra.gmra.mrb[16].mxu1 %vm216_vm5, %v5128_v41 }
 0xe11   :  { %v1866_v43 = vpop.f32.mrb[14].mxu1 }
 0xe12   :  { %v1867_v24 = vadd.f32 %v1866_v43, %v5135_v53  ;;  %v3985_v7 = vpop.f32.mrb[15].mxu1 }
 0xe14   :  { %1871 = vst.msk [vmem:[#allocation3] sm:$0x1] %vm1870_vm9, %v1867_v24 }
 0xe19   :  { %v4015_v54 = vpop.f32.mrb[16].mxu1 }
 0xe1a   :  { %v5140_v27 = vadd.f32 %v4015_v54, %v4788_v39  ;;  %v2026_v10 = vpop.f32.mrb[17].mxu1 }
 0xe1b   :  { %v5143_v38 = vadd.f32 %v4788_v39, %v2026_v10 }
 0xe1d   :  { %4020 = vmatprep.mubr.msk.f32.mxu1 %vm318_vm6, %v5143_v38  ;;  %v5149_v37 = vpack.i.bf16 %v5140_v27, %v5143_v38 }
 0xe1f   :  { %4409 = vrot.lane.b32.xlu1 %v5149_v37, %s4552_s6  ;;  %4404 = vrot.lane.b32.xlu0 %v5149_v37, %s4551_s2  ;;  %s5383_s2 = smov 40  }
 0xe23   :  { %2601 = vrot.lane.b32.xlu1 %v5140_v27, %s4553_s24  ;;  %2235 = vrot.lane.b32.xlu0 %v5143_v38, %s4550_s4 }
 0xe27   :  { %2237 = vrot.lane.b32.xlu0 %v5140_v27, %s4550_s4  ;;  %s5382_s4 = smov 48  }
 0xe2b   :  { %4414 = vrot.lane.b32.xlu0 %v5149_v37, %s4554_s27 }
 0xe2f   :  { %2599 = vrot.lane.b32.xlu0 %v5143_v38, %s4553_s24 }
 0xe91   :  { %v4410_v39 = vpop.permute.xlu1 %4409  ;;  %v4405_v13 = vpop.permute.xlu0 %4404 }
 0xe92   :  { %v4412_v55 = vunpack.i.h.bf16 %v4410_v39  ;;  %v4411_v58 = vunpack.i.l.bf16 %v4410_v39  ;;  %v4407_v61 = vunpack.i.h.bf16 %v4405_v13  ;;  %v4406_v62 = vunpack.i.l.bf16 %v4405_v13 }
 0xe94   :  { %v4260_v63 = vpack.c.bf16 %v4407_v61, %v4406_v62  ;;  %v4270_v5 = vpack.c.bf16 %v4412_v55, %v4411_v58 }
 0xe95   :  { %v2236_v2 = vpop.permute.xlu0 %2235  ;;  %v2602_v23 = vpop.permute.xlu1 %2601 }
 0xe96   :  { %4262 = vmatprep.subr.msk.bf16.mxu1 %vm4818_vm7, %v4260_v63 }
 0xe97   :  { %4265 = vmatpush3.bf16.xpose.msk.msra.mxu1 %vm4818_vm7, %v4260_v63 }
 0xe98   :  { %4272 = vmatprep.subr.msk.bf16.mxu1 %vm4818_vm7, %v4270_v5 }
 0xe99   :  { %v2238_v9 = vpop.permute.xlu0 %2237 }
 0xe9d   :  { %v4415_v11 = vpop.permute.xlu0 %4414 }
 0xe9e   :  { %v4417_v14 = vunpack.i.h.bf16 %v4415_v11  ;;  %v4416_v15 = vunpack.i.l.bf16 %v4415_v11  ;;  %4021 = vmatmul.mubr.msk.f32.vlgmr.msra.gmra.mrb[18].mxu1 %vm318_vm6, %v5140_v27 }
 0xe9f   :  { %4275 = vmatpush3.bf16.xpose.msk.msra.mxu1 %vm4818_vm7, %v4270_v5  ;;  %4034 = vmatprep.mubr.msk.f32.mxu1 %vm318_vm6, %v2236_v2 }
 0xea0   :  { %v4280_v16 = vpack.c.bf16 %v4417_v14, %v4416_v15 }
 0xea1   :  { %v2600_v20 = vpop.permute.xlu0 %2599 }
 0xea2   :  { %4282 = vmatprep.subr.msk.bf16.mxu1 %vm4818_vm7, %v4280_v16 }
 0xea6   :  { %4035 = vmatmul.mubr.msk.f32.vlgmr.msra.gmra.mrb[20].mxu1 %vm318_vm6, %v2238_v9 }
 0xea7   :  { %4285 = vmatpush3.bf16.xpose.msk.msra.mxu1 %vm4818_vm7, %v4280_v16  ;;  %4058 = vmatprep.mubr.msk.f32.mxu1 %vm318_vm6, %v2600_v20 }
 0xeae   :  { %4059 = vmatmul.mubr.msk.f32.vlgmr.msra.gmra.mrb[22].mxu1 %vm318_vm6, %v2602_v23 }
 0xf71   :  { %v4022_v25 = vpop.f32.mrb[18].mxu1 }
 0xf72   :  { %v2125_v26 = vmul.f32 0.35355338, %v4022_v25  ;;  %v2115_v30 = vpop.f32.mrb[19].mxu1 }
 0xf73   :  { %v2124_v35 = vmul.f32 0.35355338, %v2115_v30 }
 0xf74   :  { %v2129_v36 = vsel %vm404_vm8, %v2125_v26, -inf }
 0xf75   :  { %2130 = vmax.xlane.f32.xlu1 %v2129_v36  ;;  %v2126_v45 = vsel %vm404_vm8, %v2124_v35, -inf }
 0xf76   :  { %2127 = vmax.xlane.f32.xlu0 %v2126_v45 }
 0xf79   :  { %v4036_v31 = vpop.f32.mrb[20].mxu1 }
 0xf7a   :  { %v2317_v47 = vpop.f32.mrb[21].mxu1  ;;  %v2327_v50 = vmul.f32 0.35355338, %v4036_v31 }
 0xf7b   :  { %v2326_v49 = vmul.f32 0.35355338, %v2317_v47 }
 0xf7c   :  { %v2331_v7 = vsel %vm404_vm8, %v2327_v50, -inf }
 0xf7d   :  { %v2328_v43 = vsel %vm404_vm8, %v2326_v49, -inf }
 0xf7e   :  { %2329 = vmax.xlane.f32.xlu0 %v2328_v43 }
 0xf81   :  { %v4060_v24 = vpop.f32.mrb[22].mxu1 }
 0xf82   :  { %v2681_v54 = vpop.f32.mrb[23].mxu1  ;;  %2332 = vmax.xlane.f32.xlu0 %v2331_v7 }
 0xf83   :  { %v2690_v36 = vmul.f32 0.35355338, %v2681_v54 }
 0xf85   :  { %v2692_v45 = vsel %vm404_vm8, %v2690_v36, -inf }
0x1002   :  { %v2131_v10 = vpop.xlane.xlu1 %2130 }
0x1003   :  { %v2133_v39 = vsub.f32 %v2125_v26, %v2131_v10  ;;  %v2128_v13 = vpop.xlane.xlu0 %2127 }
0x1004   :  { %v2132_v55 = vsub.f32 %v2124_v35, %v2128_v13  ;;  %v2691_v35 = vmul.f32 0.35355338, %v4060_v24 }
0x1005   :  { %v2136_v58 = vmul.f32 1.442695, %v2133_v39 }
0x1006   :  { %v2134_v61 = vmul.f32 1.442695, %v2132_v55  ;;  %v2695_v31 = vsel %vm404_vm8, %v2691_v35, -inf }
0x1007   :  { %4481 = vpow2.f32 %v2136_v58 }
0x1008   :  { %4483 = vpow2.f32 %v2134_v61 }
0x100b   :  { %v2330_v62 = vpop.xlane.xlu0 %2329 }
0x100c   :  { %v2334_v63 = vsub.f32 %v2326_v49, %v2330_v62 }
0x100e   :  { %v2336_v2 = vmul.f32 1.442695, %v2334_v63 }
0x100f   :  { %v2333_v5 = vpop.xlane.xlu0 %2332 }
0x1010   :  { %4485 = vpow2.f32 %v2336_v2  ;;  %v2335_v9 = vsub.f32 %v2327_v50, %v2333_v5 }
0x1011   :  { %v4482_v11 = vpop.eup %4481 }
0x1012   :  { %v4484_v14 = vpop.eup %4483  ;;  %v2338_v15 = vmul.f32 1.442695, %v2335_v9  ;;  %v2141_v16 = vsel %vm404_vm8, %v4482_v11, 0.0 }
0x1013   :  { %2142 = vadd.xlane.f32.xlu0 %v2141_v16  ;;  %v2138_v20 = vsel %vm404_vm8, %v4484_v14, 0.0 }
0x1014   :  { %4487 = vpow2.f32 %v2338_v15  ;;  %2139 = vadd.xlane.f32.xlu1 %v2138_v20 }
0x101a   :  { %v4486_v23 = vpop.eup %4485 }
0x101b   :  { %v2340_v25 = vsel %vm404_vm8, %v4486_v23, 0.0 }
0x101c   :  { %2341 = vadd.xlane.f32.xlu1 %v2340_v25 }
0x101e   :  { %v4488_v26 = vpop.eup %4487 }
0x101f   :  { %v2343_v30 = vsel %vm404_vm8, %v4488_v26, 0.0 }
0x1020   :  { %2344 = vadd.xlane.f32.xlu0 %v2343_v30 }
0x102d   :  { %4419 = vrot.lane.b32.xlu1 %v5149_v37, %s4557_s29 }
0x1031   :  { %4429 = vrot.lane.b32.xlu1 %v5149_v37, %s4556_s28 }
0x1035   :  { %2884 = vrot.lane.b32.xlu1 %v5143_v38, %s4558_s3 }
0x1036   :  { %4424 = vrot.lane.b32.xlu0 %v5149_v37, %s5381_s21 }
0x103a   :  { %2886 = vrot.lane.b32.xlu0 %v5140_v27, %s4558_s3 }
0x1059   :  { %2693 = vmax.xlane.f32.xlu1 %v2692_v45  ;;  %2696 = vmax.xlane.f32.xlu0 %v2695_v31 }
0x10a0   :  { %v2143_v49 = vpop.xlane.xlu0 %2142 }
0x10a1   :  { %v2140_v47 = vpop.xlane.xlu1 %2139 }
0x10a2   :  { %4489 = vrcp.f32 %v2140_v47 }
0x10a3   :  { %4491 = vrcp.f32 %v2143_v49 }
0x10a9   :  { %v2342_v50 = vpop.xlane.xlu1 %2341 }
0x10aa   :  { %4493 = vrcp.f32 %v2342_v50 }
0x10ac   :  { %v4490_v38 = vpop.eup %4489 }
0x10ad   :  { %v4420_v43 = vpop.permute.xlu1 %4419  ;;  %v2345_v7 = vpop.xlane.xlu0 %2344  ;;  %v2146_v10 = vmul.f32 %v4490_v38, %v4484_v14 }
0x10ae   :  { %v4422_v39 = vunpack.i.h.bf16 %v4420_v43  ;;  %v4421_v27 = vunpack.i.l.bf16 %v4420_v43  ;;  %4495 = vrcp.f32 %v2345_v7  ;;  %v4492_v54 = vpop.eup %4491 }
0x10af   :  { %4027 = vmatprep.mubr.msk.f32.mxu0 %vm404_vm8, %v2146_v10  ;;  %v2147_v5 = vmul.f32 %v4492_v54, %v4482_v11 }
0x10b0   :  { %v4266_v24 = vpack.c.bf16 %v4422_v39, %v4421_v27 }
0x10b1   :  { %v4430_v13 = vpop.permute.xlu1 %4429  ;;  %v4425_v55 = vpop.permute.xlu0 %4424 }
0x10b2   :  { %v4432_v58 = vunpack.i.h.bf16 %v4430_v13  ;;  %v4431_v61 = vunpack.i.l.bf16 %v4430_v13  ;;  %v4427_v62 = vunpack.i.h.bf16 %v4425_v55  ;;  %v4426_v63 = vunpack.i.l.bf16 %v4425_v55  ;;  %4267 = vmatprep.subr.bf16.mxu0 %v4266_v24 }
0x10b3   :  { %4269 = vmatpush3.bf16.msra.mxu0 %v4266_v24 }
0x10b4   :  { %v4494_v2 = vpop.eup %4493  ;;  %v4290_v9 = vpack.c.bf16 %v4432_v58, %v4431_v61  ;;  %v4276_v15 = vpack.c.bf16 %v4427_v62, %v4426_v63 }
0x10b5   :  { %v2885_v14 = vpop.permute.xlu1 %2884  ;;  %v2348_v16 = vmul.f32 %v4494_v2, %v4486_v23  ;;  %v2887_v11 = vpop.permute.xlu0 %2886 }
0x10b6   :  { %4028 = vmatmul.mubr.msk.f32.vlgmr.msra.gmra.mrb[16].mxu0 %vm404_vm8, %v2147_v5  ;;  %4277 = vmatprep.subr.bf16.mxu0 %v4276_v15 }
0x10b7   :  { %4292 = vmatprep.subr.msk.bf16.mxu1 %vm4818_vm7, %v4290_v9  ;;  %4077 = vmatprep.mubr.msk.f32.mxu1 %vm318_vm6, %v2885_v14 }
0x10b8   :  { %v4496_v20 = vpop.eup %4495  ;;  %4279 = vmatpush3.bf16.msra.mxu0 %v4276_v15  ;;  %4041 = vmatprep.mubr.msk.f32.mxu0 %vm404_vm8, %v2348_v16 }
0x10b9   :  { %v2349_v25 = vmul.f32 %v4496_v20, %v4488_v26  ;;  %4295 = vmatpush3.bf16.xpose.msk.msra.mxu1 %vm4818_vm7, %v4290_v9  ;;  %4044 = vmatprep.subr.mxu0 %v4883_v32 }
0x10ba   :  { %4301 = vmatprep.subr.bf16.mxu1 %v4943_v56 }
0x10bb   :  { %4042 = vmatmul.mubr.msk.f32.vlgmr.msra.gmra.mrb[18].mxu0 %vm404_vm8, %v2349_v25 }
0x10bc   :  { %4045 = vmatpush3.msra.mxu0 %v4883_v32 }
0x10bd   :  { %4049 = vmatprep.subr.mxu0 %v4890_v33 }
0x10c0   :  { %4078 = vmatmul.mubr.msk.f32.vlgmr.msra.gmra.mrb[24].mxu1 %vm318_vm6, %v2887_v11 }
0x10c1   :  { %4303 = vmatpush3.bf16.msra.mxu1 %v4943_v56 }
0x10c2   :  { %4305 = vmatprep.subr.bf16.mxu1 %v4953_v60 }
0x10c5   :  { %4307 = vmatpush3.bf16.msra.mxu1 %v4953_v60 }
0x10c6   :  { %4324 = vmatprep.subr.bf16.mxu1 %v4547_v3 }
0x10e6   :  { %v2694_v48 = vpop.xlane.xlu1 %2693  ;;  %v2697_v23 = vpop.xlane.xlu0 %2696 }
0x10e7   :  { %v2698_v26 = vsub.f32 %v2690_v36, %v2694_v48  ;;  %v2699_v30 = vsub.f32 %v2691_v35, %v2697_v23 }
0x10e9   :  { %v2700_v45 = vmul.f32 1.442695, %v2698_v26  ;;  %v2702_v31 = vmul.f32 1.442695, %v2699_v30 }
0x10eb   :  { %4497 = vpow2.f32 %v2700_v45 }
0x10ec   :  { %4499 = vpow2.f32 %v2702_v31 }
0x10f5   :  { %v4498_v32 = vpop.eup %4497 }
0x10f6   :  { %v4500_v47 = vpop.eup %4499  ;;  %v2704_v49 = vsel %vm404_vm8, %v4498_v32, 0.0 }
0x10f7   :  { %2705 = vadd.xlane.f32.xlu0 %v2704_v49  ;;  %v2707_v56 = vsel %vm404_vm8, %v4500_v47, 0.0 }
0x10f8   :  { %2708 = vadd.xlane.f32.xlu1 %v2707_v56 }
0x110d   :  { %4434 = vrot.lane.b32.xlu0 %v5149_v37, %s5382_s4 }
0x1184   :  { %v2706_v60 = vpop.xlane.xlu0 %2705 }
0x1185   :  { %v2709_v35 = vpop.xlane.xlu1 %2708  ;;  %4501 = vrcp.f32 %v2706_v60 }
0x1186   :  { %4503 = vrcp.f32 %v2709_v35 }
0x1188   :  { %v4435_v38 = vpop.permute.xlu0 %4434 }
0x1189   :  { %v4029_v50 = vpop.f32.mrb[16].mxu0  ;;  %v4437_v43 = vunpack.i.h.bf16 %v4435_v38  ;;  %v4436_v7 = vunpack.i.l.bf16 %v4435_v38 }
0x118a   :  { %v2226_v36 = vpop.f32.mrb[17].mxu0 }
0x118b   :  { %v4286_v27 = vpack.c.bf16 %v4437_v43, %v4436_v7 }
0x118e   :  { %v4043_v10 = vpop.f32.mrb[18].mxu0 }
0x118f   :  { %v2428_v39 = vpop.f32.mrb[19].mxu0  ;;  %v4502_v13 = vpop.eup %4501 }
0x1190   :  { %4046 = vmatprep.mubr.msk.f32.mxu0 %vm318_vm6, %v2428_v39  ;;  %v4504_v62 = vpop.eup %4503  ;;  %v2712_v63 = vmul.f32 %v4502_v13, %v4498_v32 }
0x1191   :  { %4047 = vmatmul.mubr.msk.f32.vlgmr.msra.gmra.mrb[20].mxu0 %vm318_vm6, %v4043_v10  ;;  %v2713_v2 = vmul.f32 %v4504_v62, %v4500_v47 }
0x1192   :  { %4050 = vmatpush3.msra.mxu0 %v4890_v33  ;;  %4051 = vmatprep.mubr.msk.f32.mxu0 %vm318_vm6, %v2226_v36 }
0x1193   :  { %v4079_v24 = vpop.f32.mrb[24].mxu1  ;;  %4287 = vmatprep.subr.bf16.mxu0 %v4286_v27 }
0x1194   :  { %v2966_v54 = vpop.f32.mrb[25].mxu1  ;;  %v2976_v58 = vmul.f32 0.35355338, %v4079_v24 }
0x1195   :  { %v2975_v55 = vmul.f32 0.35355338, %v2966_v54 }
0x1196   :  { %v2980_v33 = vsel %vm404_vm8, %v2976_v58, -inf }
0x1197   :  { %v2977_v61 = vsel %vm404_vm8, %v2975_v55, -inf }
0x1198   :  { %2978 = vmax.xlane.f32.xlu1 %v2977_v61 }
0x1199   :  { %4052 = vmatmul.mubr.msk.f32.vlgmr.msra.gmra.mrb[20].mxu0 %vm318_vm6, %v4029_v50 }
0x119a   :  { %4289 = vmatpush3.bf16.msra.mxu0 %v4286_v27  ;;  %4065 = vmatprep.mubr.msk.f32.mxu0 %vm404_vm8, %v2712_v63 }
0x119b   :  { %4068 = vmatprep.subr.mxu0 %v4901_v57 }
0x119c   :  { %2981 = vmax.xlane.f32.xlu1 %v2980_v33 }
0x119d   :  { %4066 = vmatmul.mubr.msk.f32.vlgmr.msra.gmra.mrb[22].mxu0 %vm404_vm8, %v2713_v2 }
0x119e   :  { %4069 = vmatpush3.msra.mxu0 %v4901_v57 }
0x1225   :  { %v2979_v5 = vpop.xlane.xlu1 %2978 }
0x1226   :  { %v2983_v9 = vsub.f32 %v2975_v55, %v2979_v5 }
0x1228   :  { %v2985_v16 = vmul.f32 1.442695, %v2983_v9 }
0x1229   :  { %v2982_v15 = vpop.xlane.xlu1 %2981 }
0x122a   :  { %v2984_v14 = vsub.f32 %v2976_v58, %v2982_v15 }
0x122c   :  { %v2987_v20 = vmul.f32 1.442695, %v2984_v14 }
0x122e   :  { %4505 = vpow2.f32 %v2987_v20 }
0x122f   :  { %4507 = vpow2.f32 %v2985_v16 }
0x1238   :  { %v4506_v25 = vpop.eup %4505 }
0x1239   :  { %v2992_v11 = vsel %vm404_vm8, %v4506_v25, 0.0  ;;  %v4508_v48 = vpop.eup %4507 }
0x123a   :  { %2993 = vadd.xlane.f32.xlu1 %v2992_v11  ;;  %v2989_v23 = vsel %vm404_vm8, %v4508_v48, 0.0 }
0x123e   :  { %2990 = vadd.xlane.f32.xlu1 %v2989_v23 }
0x124f   :  { %4439 = vrot.lane.b32.xlu1 %v5149_v37, %s5383_s2 }
0x1270   :  { %v4067_v57 = vpop.f32.mrb[22].mxu0 }
0x1271   :  { %v2792_v26 = vpop.f32.mrb[23].mxu0 }
0x1272   :  { %4070 = vmatprep.mubr.msk.f32.mxu0 %vm318_vm6, %v2792_v26 }
0x1273   :  { %4071 = vmatmul.mubr.msk.f32.vlgmr.msra.gmra.mrb[20].mxu0 %vm318_vm6, %v4067_v57 }
0x12c7   :  { %v2994_v30 = vpop.xlane.xlu1 %2993 }
0x12c8   :  { %4509 = vrcp.f32 %v2994_v30 }
0x12cb   :  { %v2991_v45 = vpop.xlane.xlu1 %2990 }
0x12cc   :  { %4511 = vrcp.f32 %v2991_v45 }
0x12cf   :  { %v4440_v31 = vpop.permute.xlu1 %4439 }
0x12d0   :  { %v4442_v32 = vunpack.i.h.bf16 %v4440_v31  ;;  %v4441_v47 = vunpack.i.l.bf16 %v4440_v31 }
0x12d2   :  { %v4296_v49 = vpack.c.bf16 %v4442_v32, %v4441_v47  ;;  %v4510_v56 = vpop.eup %4509 }
0x12d3   :  { %v2998_v50 = vmul.f32 %v4510_v56, %v4506_v25 }
0x12d4   :  { %4297 = vmatprep.subr.bf16.mxu0 %v4296_v49 }
0x12d5   :  { %4299 = vmatpush3.bf16.msra.mxu0 %v4296_v49 }
0x12d6   :  { %v4512_v60 = vpop.eup %4511  ;;  %4087 = vmatprep.subr.mxu0 %v4915_v17 }
0x12d7   :  { %v2997_v37 = vmul.f32 %v4512_v60, %v4508_v48 }
0x12d9   :  { %4084 = vmatprep.mubr.msk.f32.mxu0 %vm404_vm8, %v2997_v37 }
0x12da   :  { %4085 = vmatmul.mubr.msk.f32.vlgmr.msra.gmra.mrb[24].mxu0 %vm404_vm8, %v2998_v50 }
0x12db   :  { %4088 = vmatpush3.msra.mxu0 %v4915_v17 }
0x12dc   :  { %4309 = vmatprep.subr.bf16.mxu0 %v4967_v44 }
0x13ad   :  { %v4086_v38 = vpop.f32.mrb[24].mxu0 }
0x13ae   :  { %v3077_v36 = vpop.f32.mrb[25].mxu0 }
0x13af   :  { %4089 = vmatprep.mubr.msk.f32.mxu0 %vm318_vm6, %v3077_v36 }
0x13b0   :  { %4090 = vmatmul.mubr.msk.f32.vlgmr.msra.gmra.mrb[20].mxu0 %vm318_vm6, %v4086_v38  ;;  %v1674_v38 = vadd.f32 %v5043_v4, %v5041_v52 }
0x13b1   :  { %4311 = vmatpush3.bf16.msra.mxu0 %v4967_v44 }
0x13b2   :  { %4313 = vmatprep.subr.bf16.mxu0 %v4972_v1 }
0x13b5   :  { %4315 = vmatpush3.bf16.msra.mxu0 %v4972_v1 }
0x13b6   :  { %4317 = vmatprep.subr.bf16.mxu0 %v4983_v8 }
0x13b9   :  { %4319 = vmatpush3.bf16.msra.mxu0 %v4983_v8 }
0x13ba   :  { %4321 = vmatprep.subr.bf16.mxu0 %v5015_v40 }
0x13bd   :  { %4323 = vmatpush3.bf16.msra.mxu0 %v5015_v40 }
0x1483   :  { %v4091_v17 = vpop.f32.mrb[20].mxu0 }
0x1484   :  { %v3170_v35 = vadd.f32 %v4091_v17, %v4927_v28  ;;  %v3158_v43 = vpop.f32.mrb[21].mxu0 }
0x1485   :  { %v3169_v7 = vadd.f32 %v4927_v28, %v3158_v43 }
0x1486   :  { %v3172_v44 = vadd.f32 %v3170_v35, %v5128_v41 }
0x1487   :  { %v3171_v10 = vadd.f32 %v3169_v7, %v5120_v51 }
0x1488   :  { %v3176_v1 = vsel %vm216_vm5, %v3172_v44, 0.0 }
0x1489   :  { %3177 = vadd.xlane.f32.xlu1 %v3176_v1  ;;  %v3173_v39 = vsel %vm216_vm5, %v3171_v10, 0.0 }
0x148a   :  { %3174 = vadd.xlane.f32.xlu0 %v3173_v39 }
0x1516   :  { %v3178_v8 = vpop.xlane.xlu1 %3177 }
0x1517   :  { %v3180_v27 = vmul.f32 0.03125, %v3178_v8  ;;  %v3175_v24 = vpop.xlane.xlu0 %3174 }
0x1518   :  { %v3179_v40 = vmul.f32 0.03125, %v3175_v24 }
0x1519   :  { %v3182_v54 = vsub.f32 %v3172_v44, %v3180_v27  ;;  %v1678_v44 = vadd.f32 %v1674_v38, %v5003_v34 }
0x151a   :  { %v3181_v13 = vsub.f32 %v3171_v10, %v3179_v40 }
0x151b   :  { %v3184_v28 = vmul.f32 %v3182_v54, %v3182_v54  ;;  %v1682_v10 = vsel %vm216_vm5, %v1678_v44, 0.0 }
0x151c   :  { %v3183_v55 = vmul.f32 %v3181_v13, %v3181_v13 }
0x151d   :  { %v3188_v41 = vsel %vm216_vm5, %v3184_v28, 0.0 }
0x151e   :  { %v3185_v58 = vsel %vm216_vm5, %v3183_v55, 0.0 }
0x151f   :  { %3186 = vadd.xlane.f32.xlu0 %v3185_v58 }
0x1523   :  { %3189 = vadd.xlane.f32.xlu0 %v3188_v41 }
0x15ac   :  { %v3187_v51 = vpop.xlane.xlu0 %3186 }
0x15ad   :  { %v3191_v61 = vmul.f32 0.03125, %v3187_v51 }
0x15af   :  { %v3193_v62 = vadd.f32 1e-05, %v3191_v61 }
0x15b0   :  { %v3190_v63 = vpop.xlane.xlu0 %3189 }
0x15b1   :  { %4513 = vrsqrt.f32 %v3193_v62  ;;  %v3192_v2 = vmul.f32 0.03125, %v3190_v63 }
0x15b3   :  { %v3194_v33 = vadd.f32 1e-05, %v3192_v2 }
0x15b5   :  { %4515 = vrsqrt.f32 %v3194_v33 }
0x15bb   :  { %v4514_v5 = vpop.eup %4513 }
0x15bc   :  { %v3197_v9 = vmul.f32 %v4514_v5, %v3181_v13 }
0x15be   :  { %v3199_v15 = vmul.f32 %v4991_v19, %v3197_v9 }
0x15bf   :  { %v4516_v14 = vpop.eup %4515 }
0x15c0   :  { %v3198_v16 = vmul.f32 %v4516_v14, %v3182_v54  ;;  %v3201_v20 = vadd.f32 %v4996_v21, %v3199_v15 }
0x15c2   :  { %4100 = vmatprep.mubr.msk.f32.mxu1 %vm216_vm5, %v3201_v20  ;;  %v3200_v25 = vmul.f32 %v4991_v19, %v3198_v16 }
0x15c4   :  { %v3202_v11 = vadd.f32 %v4996_v21, %v3200_v25 }
0x15c6   :  { %4101 = vmatmul.mubr.msk.f32.vlgmr.msra.gmra.mrb[26].mxu1 %vm216_vm5, %v3202_v11 }
0x15c7   :  { %4326 = vmatpush3.bf16.msra.mxu1 %v5054_v59  ;;  %4130 = vmatprep.mubr.msk.f32.mxu1 %vm4548_vm0, %v4549_v6 }
0x15c8   :  { %4327 = vmatprep.subr.bf16.mxu1 %v4547_v3 }
0x15cb   :  { %4329 = vmatpush3.bf16.msra.mxu1 %v5066_v0 }
0x15cc   :  { %4330 = vmatprep.subr.bf16.mxu1 %v4547_v3 }
0x1699   :  { %v4102_v48 = vpop.f32.mrb[26].mxu1 }
0x169a   :  { %v3281_v23 = vadd.f32 %v4102_v48, %v5023_v42  ;;  %v3275_v57 = vpop.f32.mrb[27].mxu1 }
0x169b   :  { %v3276_v19 = vadd.f32 %v5023_v42, %v3275_v57 }
0x169c   :  { %v3285_v26 = vmax.f32 %v3281_v23, 0.0 }
0x169d   :  { %v3284_v21 = vmax.f32 %v3276_v19, 0.0 }
0x169f   :  { %4119 = vmatprep.mubr.msk.f32.mxu0 %vm134_vm1, %v3284_v21 }
0x16a0   :  { %4120 = vmatmul.mubr.msk.f32.vlgmr.msra.gmra.mrb[26].mxu0 %vm134_vm1, %v3285_v26 }
0x1773   :  { %v4121_v59 = vpop.f32.mrb[26].mxu0 }
0x1774   :  { %v3364_v30 = vadd.f32 %v4121_v59, %v5041_v52  ;;  %v3358_v45 = vpop.f32.mrb[27].mxu0 }
0x1775   :  { %v3359_v0 = vadd.f32 %v5041_v52, %v3358_v45 }
0x1776   :  { %v3368_v31 = vadd.f32 %v3364_v30, %v3202_v11 }
0x1777   :  { %v3367_v32 = vadd.f32 %v3359_v0, %v3201_v20 }
0x1778   :  { %v3372_v47 = vsel %vm216_vm5, %v3368_v31, 0.0 }
0x1779   :  { %3373 = vadd.xlane.f32.xlu1 %v3372_v47  ;;  %v3369_v49 = vsel %vm216_vm5, %v3367_v32, 0.0 }
0x177a   :  { %3370 = vadd.xlane.f32.xlu0 %v3369_v49 }
0x1806   :  { %v3374_v42 = vpop.xlane.xlu1 %3373 }
0x1807   :  { %v3376_v56 = vmul.f32 0.03125, %v3374_v42  ;;  %v3371_v60 = vpop.xlane.xlu0 %3370 }
0x1808   :  { %v3375_v37 = vmul.f32 0.03125, %v3371_v60 }
0x1809   :  { %v3378_v50 = vsub.f32 %v3368_v31, %v3376_v56 }
0x180a   :  { %v3377_v36 = vsub.f32 %v3367_v32, %v3375_v37 }
0x180b   :  { %v3380_v17 = vmul.f32 %v3378_v50, %v3378_v50 }
0x180c   :  { %v3379_v35 = vmul.f32 %v3377_v36, %v3377_v36 }
0x180d   :  { %v3384_v43 = vsel %vm216_vm5, %v3380_v17, 0.0 }
0x180e   :  { %3385 = vadd.xlane.f32.xlu1 %v3384_v43  ;;  %v3381_v7 = vsel %vm216_vm5, %v3379_v35, 0.0 }
0x180f   :  { %3382 = vadd.xlane.f32.xlu0 %v3381_v7 }
0x1813   :  { %1683 = vadd.xlane.f32.xlu0 %v1682_v10 }
0x189b   :  { %v3386_v1 = vpop.xlane.xlu1 %3385 }
0x189c   :  { %v3388_v39 = vmul.f32 0.03125, %v3386_v1  ;;  %v3383_v8 = vpop.xlane.xlu0 %3382 }
0x189d   :  { %v3387_v27 = vmul.f32 0.03125, %v3383_v8 }
0x189e   :  { %v3390_v24 = vadd.f32 1e-05, %v3388_v39 }
0x189f   :  { %v3389_v52 = vadd.f32 1e-05, %v3387_v27 }
0x18a0   :  { %4517 = vrsqrt.f32 %v3390_v24  ;;  %v1684_v4 = vpop.xlane.xlu0 %1683 }
0x18a1   :  { %4519 = vrsqrt.f32 %v3389_v52  ;;  %v1686_v40 = vmul.f32 0.03125, %v1684_v4 }
0x18a3   :  { %v1688_v54 = vsub.f32 %v1678_v44, %v1686_v40 }
0x18a5   :  { %v1690_v13 = vmul.f32 %v1688_v54, %v1688_v54 }
0x18a7   :  { %v1694_v55 = vsel %vm216_vm5, %v1690_v13, 0.0 }
0x18a8   :  { %1695 = vadd.xlane.f32.xlu0 %v1694_v55 }
0x18aa   :  { %v4518_v34 = vpop.eup %4517 }
0x18ab   :  { %v4520_v58 = vpop.eup %4519  ;;  %v3394_v28 = vmul.f32 %v4518_v34, %v3378_v50 }
0x18ac   :  { %v3393_v41 = vmul.f32 %v4520_v58, %v3377_v36 }
0x18ad   :  { %v3396_v51 = vmul.f32 %v5075_v12, %v3394_v28 }
0x18ae   :  { %v3395_v61 = vmul.f32 %v5075_v12, %v3393_v41 }
0x18af   :  { %v3398_v62 = vadd.f32 %v5086_v18, %v3396_v51 }
0x18b0   :  { %v3397_v63 = vadd.f32 %v5086_v18, %v3395_v61 }
0x18b1   :  { %3400 = vst.msk [vmem:[%s5353_s22 + $0x18] sm:$0xff] %vm216_vm5, %v3398_v62 }
0x18b2   :  { %3399 = vst.msk [vmem:[%s5353_s22 + $0x10] sm:$0xff] %vm216_vm5, %v3397_v63  ;;  %4131 = vmatmul.mubr.msk.f32.vlgmr.msra.gmra.mrb[28].mxu1 %vm216_vm5, %v3397_v63 }
0x18b3   :  { %4332 = vmatpush3.bf16.msra.mxu1 %v5089_v22  ;;  %4141 = vmatprep.mubr.msk.f32.mxu1 %vm4548_vm0, %v4549_v6 }
0x18b4   :  { %4333 = vmatprep.subr.bf16.mxu1 %v4547_v3 }
0x18b7   :  { %4335 = vmatpush3.bf16.msra.mxu1 %v5110_v46 }
0x1935   :  { %v1696_v2 = vpop.xlane.xlu0 %1695 }
0x1936   :  { %v1698_v33 = vmul.f32 0.03125, %v1696_v2 }
0x1938   :  { %v1700_v5 = vadd.f32 1e-05, %v1698_v33 }
0x193a   :  { %4521 = vrsqrt.f32 %v1700_v5 }
0x1944   :  { %v4522_v9 = vpop.eup %4521 }
0x1945   :  { %v1704_v15 = vmul.f32 %v4522_v9, %v1688_v54 }
0x1947   :  { %v1712_v14 = vmul.f32 %v5075_v12, %v1704_v15 }
0x1949   :  { %v1720_v16 = vadd.f32 %v5086_v18, %v1712_v14 }
0x194b   :  { %1722 = vst.msk [vmem:[%s5353_s22 + $0x8] sm:$0xff] %vm216_vm5, %v1720_v16 }
0x1985   :  { %v3470_v6 = vpop.f32.mrb[28].mxu1 }
0x1986   :  { %v3471_v3 = vadd.f32 %v3470_v6, %v5117_v29  ;;  %v4132_v22 = vpop.f32.mrb[29].mxu1 }
0x1988   :  { %v3474_v46 = vmax.f32 %v3471_v3, 0.0 }
0x198a   :  { %4142 = vmatmul.mubr.msk.f32.vlgmr.msra.gmra.mrb[30].mxu1 %vm216_vm5, %v3474_v46 }
0x1a5d   :  { %v3544_v20 = vpop.f32.mrb[30].mxu1 }
0x1a5e   :  { %v3545_v25 = vadd.f32 %v3544_v20, %v5135_v53  ;;  %v4143_v12 = vpop.f32.mrb[31].mxu1 }
0x1a60   :  { %3548 = vst.msk [vmem:[#allocation3 + $0x1] sm:$0x1] %vm1870_vm9, %v3545_v25 }
0x1a61   :  { %4534 = shalt.err (!%p4531_p4)
}
0x1a62   :  { %s4535_s1 = scalar_lea.hbm %s5354_s23, 32 }
0x1a63   :  { %p4536_p5 = scmp.ne.s32.totalorder %s5354_s23, %s4535_s1  ;;  %p4539_p6 = scmp.lt.u32.totalorder %s4535_s1, %s5354_s23 }
0x1a65   :  { %p4541_p7 = pnand %p4539_p6, %p4536_p5 }
0x1a67   :  { %4544 = shalt.err (!%p4541_p7)
}
0x1a68   :  { %3560 = dma.vmem_to_hbm [thread:$0]  %s3558_s0, 32, %s5354_s23, [#allocation4]  }
0x1a69   :  { %4545 = dma.done.wait [#allocation4], 32  }
0x1a6a   :  { %4546 = vsyncadd [#allocation4], 4294967264 }
0x1a6b   :  { %3566 = vsyncpa [#allocation4], 1 }

// kernel: vqa_forward.3
= control target key start
LH: loop header
LB: loop body
LE: loop exit
PB: predicated region body
PF: predicated region fallthrough
CT: control target
= control target key end

     0   :  { %s14350_s0 = inlined_call_operand.vmem [shape: f32[32,32], index: 0, kind: input, shape index: {}]   ;;  %s14351_s1 = inlined_call_operand.vmem [shape: f32[20,32], index: 1, kind: input, shape index: {}]   ;;  %s14352_s2 = inlined_call_operand.vmem [shape: f32[6,32], index: 2, kind: input, shape index: {}]   ;;  %s14353_s3 = inlined_call_operand.vmem [shape: f32[6,6], index: 3, kind: input, shape index: {}]   ;;  %s14354_s4 = inlined_call_operand.vmem [shape: f32[2,32,96], index: 4, kind: input, shape index: {}]   ;;  %s14355_s5 = inlined_call_operand.vmem [shape: f32[2,1,96], index: 5, kind: input, shape index: {}]   ;;  %s14356_s6 = inlined_call_operand.vmem [shape: f32[2,32,32], index: 6, kind: input, shape index: {}]   ;;  %s14357_s7 = inlined_call_operand.vmem [shape: f32[2,1,32], index: 7, kind: input, shape index: {}]   ;;  %s14358_s8 = inlined_call_operand.vmem [shape: f32[2,32,32], index: 8, kind: input, shape index: {}]   ;;  %s14359_s9 = inlined_call_operand.vmem [shape: f32[2,1,32], index: 9, kind: input, shape index: {}]   ;;  %s14360_s10 = inlined_call_operand.vmem [shape: f32[2,32,64], index: 10, kind: input, shape index: {}]   ;;  %s14361_s11 = inlined_call_operand.vmem [shape: f32[2,1,64], index: 11, kind: input, shape index: {}]   ;;  %s14362_s12 = inlined_call_operand.vmem [shape: f32[2,32,32], index: 12, kind: input, shape index: {}]   ;;  %s14363_s13 = inlined_call_operand.vmem [shape: f32[2,1,32], index: 13, kind: input, shape index: {}]   ;;  %s14364_s14 = inlined_call_operand.vmem [shape: f32[2,32,64], index: 14, kind: input, shape index: {}]   ;;  %s14365_s15 = inlined_call_operand.vmem [shape: f32[2,1,64], index: 15, kind: input, shape index: {}]   ;;  %s14366_s16 = inlined_call_operand.vmem [shape: f32[2,64,32], index: 16, kind: input, shape index: {}]   ;;  %s14367_s17 = inlined_call_operand.vmem [shape: f32[2,1,32], index: 17, kind: input, shape index: {}]   ;;  %s14368_s18 = inlined_call_operand.vmem [shape: f32[2,1,32], index: 18, kind: input, shape index: {}]   ;;  %s14369_s19 = inlined_call_operand.vmem [shape: f32[2,1,32], index: 19, kind: input, shape index: {}]   ;;  %s14370_s20 = inlined_call_operand.vmem [shape: f32[2,1,32], index: 20, kind: input, shape index: {}]   ;;  %s14371_s21 = inlined_call_operand.vmem [shape: f32[2,1,32], index: 21, kind: input, shape index: {}]   ;;  %s14372_s22 = inlined_call_operand.vmem [shape: f32[2,1,32], index: 22, kind: input, shape index: {}]   ;;  %s14373_s23 = inlined_call_operand.vmem [shape: f32[2,1,32], index: 23, kind: input, shape index: {}]   ;;  %s14374_s24 = inlined_call_operand.vmem [shape: f32[32,20], index: 24, kind: input, shape index: {}]   ;;  %s14375_s25 = inlined_call_operand.vmem [shape: f32[1,20], index: 25, kind: input, shape index: {}]   ;;  %s14376_s26 = inlined_call_operand.hbm [shape: s32[2,5], index: 26, kind: output, shape index: {}]  }
   0x1   :  { %14443 = sst [smem:[#allocation100_spill]] %s14350_s0 }
   0x2   :  { %14444 = sst [smem:[#allocation101_spill]] %s14351_s1 }
   0x3   :  { %14445 = sst [smem:[#allocation102_spill]] %s14352_s2 }
   0x4   :  { %14446 = sst [smem:[#allocation103_spill]] %s14353_s3 }
   0x5   :  { %14447 = sst [smem:[#allocation104_spill]] %s14354_s4 }
   0x6   :  { %14448 = sst [smem:[#allocation105_spill]] %s14355_s5 }
   0x7   :  { %14449 = sst [smem:[#allocation106_spill]] %s14356_s6 }
   0x8   :  { %14450 = sst [smem:[#allocation107_spill]] %s14357_s7 }
   0x9   :  { %14451 = sst [smem:[#allocation108_spill]] %s14358_s8 }
   0xa   :  { %14452 = sst [smem:[#allocation109_spill]] %s14359_s9 }
   0xb   :  { %14453 = sst [smem:[#allocation110_spill]] %s14360_s10 }
   0xc   :  { %31 = vsyncpa [#allocation3], 0  ;;  %s14454_s7 = sld [smem:[#allocation101_spill]]  ;;  %s14458_s30 = sld [smem:[#allocation102_spill]]  ;;  %v12630_v5 = vld [vmem:[%s14374_s24] sm:$0xff]  ;;  %v12635_v6 = vld [vmem:[%s14374_s24 + $0x8] sm:$0xff] }
   0xd   :  { %s14460_s10 = sld [smem:[#allocation103_spill]]  ;;  %14461 = vst [vmem:[#allocation9_spill] sm:$0xff] %v12630_v5  ;;  %14462 = vst [vmem:[#allocation10_spill] sm:$0xff] %v12635_v6  ;;  %v12640_v7 = vld [vmem:[%s14374_s24 + $0x10] sm:$0xff]  ;;  %v12645_v8 = vld [vmem:[%s14374_s24 + $0x18] sm:$0xff]  ;;  %s14466_s2 = sld [smem:[#allocation104_spill]] }
   0xe   :  { %14463 = vst [vmem:[#allocation11_spill] sm:$0xff] %v12640_v7  ;;  %14464 = vst [vmem:[#allocation12_spill] sm:$0xff] %v12645_v8  ;;  %v12650_v9 = vld [vmem:[%s14375_s25] sm:$0x1]  ;;  %s14473_s4 = sld [smem:[#allocation106_spill]]  ;;  %s14476_s24 = sld [smem:[#allocation107_spill]] }
   0xf   :  { %14465 = vst [vmem:[#allocation13_spill] sm:$0xff] %v12650_v9  ;;  %s14477_s3 = sld [smem:[#allocation108_spill]]  ;;  %s14482_s6 = sld [smem:[#allocation109_spill]]  ;;  %v12730_v25 = vld [vmem:[%s14362_s12] sm:$0xff]  ;;  %v12735_v26 = vld [vmem:[%s14362_s12 + $0x8] sm:$0xff]  ;;  %v12740_v27 = vld [vmem:[%s14362_s12 + $0x10] sm:$0xff] }
  0x10   :  { %14483 = vst [vmem:[#allocation25_spill] sm:$0xff] %v12735_v26  ;;  %v12745_v28 = vld [vmem:[%s14362_s12 + $0x18] sm:$0xff]  ;;  %v12750_v29 = vld [vmem:[%s14363_s13] ss:$0 sm:$0xff]  ;;  %v12760_v31 = vld [vmem:[%s14364_s14 + $0x8] sm:$0xff]  ;;  %vm205_vm0 = vcmask 261120  }
  0x11   :  { %v12755_v30 = vld [vmem:[%s14364_s14] sm:$0xff]  ;;  %14485 = vst [vmem:[#allocation27_spill] sm:$0xff] %v12760_v31  ;;  %v12765_v32 = vld [vmem:[%s14364_s14 + $0x10] sm:$0xff]  ;;  %v12770_v33 = vld [vmem:[%s14364_s14 + $0x18] sm:$0xff]  ;;  %s14537_s28 = sld [smem:[#allocation110_spill]]  ;;  %s14538_s0 = sld [smem:[#allocation100_spill]] }
  0x12   :  { %v12605_v0 = vld [vmem:[%s14454_s7] sm:$0xff]  ;;  %v12610_v1 = vld [vmem:[%s14454_s7 + $0x8] sm:$0xff]  ;;  %v12615_v2 = vld [vmem:[%s14454_s7 + $0x10] sm:$0xf]  ;;  %s14471_s7 = sld [smem:[#allocation105_spill]]  ;;  %14484 = vst [vmem:[#allocation26_spill] sm:$0xff] %v12755_v30 }
  0x13   :  { %14455 = vst [vmem:[#allocation5_spill] sm:$0xff] %v12605_v0  ;;  %14456 = vst [vmem:[#allocation6_spill] sm:$0xff] %v12610_v1  ;;  %v12620_v3 = vld [vmem:[%s14458_s30] sm:$0x3f]  ;;  %v12660_v11 = vld [vmem:[%s14466_s2 + $0x8] sm:$0xff] }
  0x14   :  { %14457 = vst [vmem:[#allocation7_spill] sm:$0xff] %v12615_v2  ;;  %14459 = vst [vmem:[#allocation8_spill] sm:$0xff] %v12620_v3  ;;  %v12625_v4 = vld [vmem:[%s14460_s10] sm:$0x3f]  ;;  %v12665_v12 = vld [vmem:[%s14466_s2 + $0x10] sm:$0xff] }
  0x15   :  { %v12655_v10 = vld [vmem:[%s14466_s2] sm:$0xff]  ;;  %14468 = vst [vmem:[#allocation15_spill] sm:$0xff] %v12660_v11  ;;  %14469 = vst [vmem:[#allocation16_spill] sm:$0xff] %v12665_v12  ;;  %v12670_v13 = vld [vmem:[%s14466_s2 + $0x18] sm:$0xff] }
  0x16   :  { %14467 = vst [vmem:[#allocation14_spill] sm:$0xff] %v12655_v10  ;;  %14470 = vst [vmem:[#allocation17_spill] sm:$0xff] %v12670_v13  ;;  %v12680_v15 = vld [vmem:[%s14473_s4] sm:$0xff]  ;;  %v12685_v16 = vld [vmem:[%s14473_s4 + $0x8] sm:$0xff] }
  0x17   :  { %14474 = vst [vmem:[#allocation19_spill] sm:$0xff] %v12685_v16  ;;  %v12690_v17 = vld [vmem:[%s14473_s4 + $0x10] sm:$0xff]  ;;  %v12695_v18 = vld [vmem:[%s14473_s4 + $0x18] sm:$0xff]  ;;  %v12700_v19 = vld [vmem:[%s14476_s24] ss:$0 sm:$0xff] }
  0x18   :  { %v12675_v14 = vld [vmem:[%s14471_s7] ss:$0 sm:$0xff]  ;;  %14475 = vst [vmem:[#allocation20_spill] sm:$0xff] %v12695_v18  ;;  %v12710_v21 = vld [vmem:[%s14477_s3 + $0x8] sm:$0xff]  ;;  %v12715_v22 = vld [vmem:[%s14477_s3 + $0x10] sm:$0xff] }
  0x19   :  { %14472 = vst [vmem:[#allocation18_spill] sm:$0xff] %v12675_v14  ;;  %v12705_v20 = vld [vmem:[%s14477_s3] sm:$0xff]  ;;  %14479 = vst [vmem:[#allocation22_spill] sm:$0xff] %v12710_v21  ;;  %v12720_v23 = vld [vmem:[%s14477_s3 + $0x18] sm:$0xff] }
  0x1a   :  { %14478 = vst [vmem:[#allocation21_spill] sm:$0xff] %v12705_v20  ;;  %14480 = vst [vmem:[#allocation23_spill] sm:$0xff] %v12715_v22  ;;  %v12725_v24 = vld [vmem:[%s14482_s6] ss:$0 sm:$0xff]  ;;  %v12785_v36 = vld [vmem:[%s14366_s16 + $0x8] sm:$0xff] }
  0x1b   :  { %14481 = vst [vmem:[#allocation24_spill] sm:$0xff] %v12720_v23  ;;  %14486 = vst [vmem:[#allocation28_spill] sm:$0xff] %v12765_v32  ;;  %v12775_v34 = vld [vmem:[%s14365_s15] ss:$0 sm:$0xff]  ;;  %v12790_v37 = vld [vmem:[%s14366_s16 + $0x10] sm:$0xff] }
  0x1c   :  { %14487 = vst [vmem:[#allocation29_spill] sm:$0xff] %v12770_v33  ;;  %v12780_v35 = vld [vmem:[%s14366_s16] sm:$0xff]  ;;  %14489 = vst [vmem:[#allocation31_spill] sm:$0xff] %v12785_v36  ;;  %v12795_v38 = vld [vmem:[%s14366_s16 + $0x18] sm:$0xff] }
  0x1d   :  { %14488 = vst [vmem:[#allocation30_spill] sm:$0xff] %v12780_v35  ;;  %14490 = vst [vmem:[#allocation32_spill] sm:$0xff] %v12790_v37  ;;  %v12800_v39 = vld [vmem:[%s14366_s16 + $0x20] sm:$0xff]  ;;  %v12805_v40 = vld [vmem:[%s14366_s16 + $0x28] sm:$0xff] }
  0x1e   :  { %14491 = vst [vmem:[#allocation33_spill] sm:$0xff] %v12795_v38  ;;  %14492 = vst [vmem:[#allocation34_spill] sm:$0xff] %v12800_v39  ;;  %v12810_v41 = vld [vmem:[%s14366_s16 + $0x30] sm:$0xff]  ;;  %v12815_v42 = vld [vmem:[%s14366_s16 + $0x38] sm:$0xff] }
  0x1f   :  { %14493 = vst [vmem:[#allocation35_spill] sm:$0xff] %v12805_v40  ;;  %14494 = vst [vmem:[#allocation36_spill] sm:$0xff] %v12810_v41  ;;  %v12820_v43 = vld [vmem:[%s14367_s17] ss:$0 sm:$0xff]  ;;  %v12860_v51 = vld [vmem:[%s14466_s2 + $0x28] sm:$0xff] }
  0x20   :  { %14495 = vst [vmem:[#allocation37_spill] sm:$0xff] %v12815_v42  ;;  %v12825_v44 = vld [vmem:[%s14368_s18] ss:$0 sm:$0xff]  ;;  %14498 = vst [vmem:[#allocation40_spill] sm:$0xff] %v12860_v51  ;;  %v12865_v52 = vld [vmem:[%s14466_s2 + $0x30] sm:$0xff] }
  0x21   :  { %v12830_v45 = vld [vmem:[%s14369_s19] ss:$0 sm:$0xff]  ;;  %14499 = vst [vmem:[#allocation41_spill] sm:$0xff] %v12865_v52  ;;  %v12870_v53 = vld [vmem:[%s14466_s2 + $0x38] sm:$0xff]  ;;  %v12875_v54 = vld [vmem:[%s14471_s7 + $0x1] ss:$0 sm:$0xff] }
  0x22   :  { %v12835_v46 = vld [vmem:[%s14370_s20] ss:$0 sm:$0xff]  ;;  %14500 = vst [vmem:[#allocation42_spill] sm:$0xff] %v12870_v53  ;;  %14501 = vst [vmem:[#allocation43_spill] sm:$0xff] %v12875_v54  ;;  %v12885_v56 = vld [vmem:[%s14473_s4 + $0x28] sm:$0xff] }
  0x23   :  { %v12840_v47 = vld [vmem:[%s14371_s21] ss:$0 sm:$0xff]  ;;  %14503 = vst [vmem:[#allocation45_spill] sm:$0xff] %v12885_v56  ;;  %v12890_v57 = vld [vmem:[%s14473_s4 + $0x30] sm:$0xff]  ;;  %v12895_v58 = vld [vmem:[%s14473_s4 + $0x38] sm:$0xff] }
  0x24   :  { %v12845_v48 = vld [vmem:[%s14372_s22] ss:$0 sm:$0xff]  ;;  %14504 = vst [vmem:[#allocation46_spill] sm:$0xff] %v12890_v57  ;;  %14505 = vst [vmem:[#allocation47_spill] sm:$0xff] %v12895_v58  ;;  %v12900_v59 = vld [vmem:[%s14476_s24 + $0x1] ss:$0 sm:$0xff] }
  0x25   :  { %v12850_v49 = vld [vmem:[%s14373_s23] ss:$0 sm:$0xff]  ;;  %14506 = vst [vmem:[#allocation48_spill] sm:$0xff] %v12900_v59  ;;  %v12910_v61 = vld [vmem:[%s14477_s3 + $0x28] sm:$0xff]  ;;  %v12915_v62 = vld [vmem:[%s14477_s3 + $0x30] sm:$0xff] }
  0x26   :  { %14496 = vst [vmem:[#allocation38_spill] sm:$0xff] %v12850_v49  ;;  %v12855_v50 = vld [vmem:[%s14466_s2 + $0x20] sm:$0xff]  ;;  %14508 = vst [vmem:[#allocation50_spill] sm:$0xff] %v12910_v61  ;;  %v12920_v63 = vld [vmem:[%s14477_s3 + $0x38] sm:$0xff] }
  0x27   :  { %14497 = vst [vmem:[#allocation39_spill] sm:$0xff] %v12855_v50  ;;  %v12880_v55 = vld [vmem:[%s14473_s4 + $0x20] sm:$0xff]  ;;  %14509 = vst [vmem:[#allocation51_spill] sm:$0xff] %v12915_v62  ;;  %v12935_v7 = vld [vmem:[%s14362_s12 + $0x28] sm:$0xff] }
  0x28   :  { %14502 = vst [vmem:[#allocation44_spill] sm:$0xff] %v12880_v55  ;;  %v12905_v60 = vld [vmem:[%s14477_s3 + $0x20] sm:$0xff]  ;;  %14510 = vst [vmem:[#allocation52_spill] sm:$0xff] %v12920_v63  ;;  %v12940_v6 = vld [vmem:[%s14362_s12 + $0x30] sm:$0xff] }
  0x29   :  { %14507 = vst [vmem:[#allocation49_spill] sm:$0xff] %v12905_v60  ;;  %v12925_v9 = vld [vmem:[%s14482_s6 + $0x1] ss:$0 sm:$0xff]  ;;  %14513 = vst [vmem:[#allocation55_spill] sm:$0xff] %v12935_v7  ;;  %v12945_v5 = vld [vmem:[%s14362_s12 + $0x38] sm:$0xff] }
  0x2a   :  { %14511 = vst [vmem:[#allocation53_spill] sm:$0xff] %v12925_v9  ;;  %v12930_v8 = vld [vmem:[%s14362_s12 + $0x20] sm:$0xff]  ;;  %14514 = vst [vmem:[#allocation56_spill] sm:$0xff] %v12940_v6  ;;  %v12960_v7 = vld [vmem:[%s14364_s14 + $0x28] sm:$0xff] }
  0x2b   :  { %14512 = vst [vmem:[#allocation54_spill] sm:$0xff] %v12930_v8  ;;  %14515 = vst [vmem:[#allocation57_spill] sm:$0xff] %v12945_v5  ;;  %v12950_v9 = vld [vmem:[%s14363_s13 + $0x1] ss:$0 sm:$0xff]  ;;  %v12965_v6 = vld [vmem:[%s14364_s14 + $0x30] sm:$0xff] }
  0x2c   :  { %14516 = vst [vmem:[#allocation58_spill] sm:$0xff] %v12950_v9  ;;  %v12955_v8 = vld [vmem:[%s14364_s14 + $0x20] sm:$0xff]  ;;  %14518 = vst [vmem:[#allocation60_spill] sm:$0xff] %v12960_v7  ;;  %v12970_v5 = vld [vmem:[%s14364_s14 + $0x38] sm:$0xff]  ;;  %s13137_s14 = smov 0  }
  0x2d   :  { %14517 = vst [vmem:[#allocation59_spill] sm:$0xff] %v12955_v8  ;;  %14519 = vst [vmem:[#allocation61_spill] sm:$0xff] %v12965_v6  ;;  %v12975_v9 = vld [vmem:[%s14365_s15 + $0x1] ss:$0 sm:$0xff]  ;;  %v12985_v7 = vld [vmem:[%s14366_s16 + $0x48] sm:$0xff] }
  0x2e   :  { %14520 = vst [vmem:[#allocation62_spill] sm:$0xff] %v12970_v5  ;;  %14521 = vst [vmem:[#allocation63_spill] sm:$0xff] %v12975_v9  ;;  %v12980_v8 = vld [vmem:[%s14366_s16 + $0x40] sm:$0xff]  ;;  %v12990_v6 = vld [vmem:[%s14366_s16 + $0x50] sm:$0xff] }
  0x2f   :  { %14522 = vst [vmem:[#allocation64_spill] sm:$0xff] %v12980_v8  ;;  %14523 = vst [vmem:[#allocation65_spill] sm:$0xff] %v12985_v7  ;;  %v12995_v5 = vld [vmem:[%s14366_s16 + $0x58] sm:$0xff]  ;;  %v13000_v9 = vld [vmem:[%s14366_s16 + $0x60] sm:$0xff] }
  0x30   :  { %14524 = vst [vmem:[#allocation66_spill] sm:$0xff] %v12990_v6  ;;  %14525 = vst [vmem:[#allocation67_spill] sm:$0xff] %v12995_v5  ;;  %v13005_v8 = vld [vmem:[%s14366_s16 + $0x68] sm:$0xff]  ;;  %v13010_v7 = vld [vmem:[%s14366_s16 + $0x70] sm:$0xff] }
  0x31   :  { %14526 = vst [vmem:[#allocation68_spill] sm:$0xff] %v13000_v9  ;;  %14527 = vst [vmem:[#allocation69_spill] sm:$0xff] %v13005_v8  ;;  %v13015_v6 = vld [vmem:[%s14366_s16 + $0x78] sm:$0xff]  ;;  %v13020_v9 = vld [vmem:[%s14367_s17 + $0x1] ss:$0 sm:$0xff] }
  0x32   :  { %14528 = vst [vmem:[#allocation70_spill] sm:$0xff] %v13010_v7  ;;  %14529 = vst [vmem:[#allocation71_spill] sm:$0xff] %v13015_v6  ;;  %v13025_v8 = vld [vmem:[%s14368_s18 + $0x1] ss:$0 sm:$0xff]  ;;  %v10347_v61 = vld [vmem:[%s14537_s28 + $0x28] sm:$0xff] }
  0x33   :  { %14530 = vst [vmem:[#allocation72_spill] sm:$0xff] %v13020_v9  ;;  %14531 = vst [vmem:[#allocation73_spill] sm:$0xff] %v13025_v8  ;;  %v13030_v7 = vld [vmem:[%s14369_s19 + $0x1] ss:$0 sm:$0xff]  ;;  %v10349_v60 = vld [vmem:[%s14537_s28 + $0x38] sm:$0xff] }
  0x34   :  { %14532 = vst [vmem:[#allocation74_spill] sm:$0xff] %v13030_v7  ;;  %v13035_v6 = vld [vmem:[%s14370_s20 + $0x1] ss:$0 sm:$0xff]  ;;  %v198_v59 = vld [vmem:[%s14538_s0 + $0x8] sm:$0xff] }
  0x35   :  { %14533 = vst [vmem:[#allocation75_spill] sm:$0xff] %v13035_v6  ;;  %v13040_v5 = vld [vmem:[%s14371_s21 + $0x1] ss:$0 sm:$0xff]  ;;  %v193_v6 = vld [vmem:[%s14537_s28 + $0x8] sm:$0xff] }
  0x36   :  { %14534 = vst [vmem:[#allocation76_spill] sm:$0xff] %v13040_v5  ;;  %v13045_v9 = vld [vmem:[%s14372_s22 + $0x1] ss:$0 sm:$0xff]  ;;  %v194_v5 = vld [vmem:[%s14537_s28 + $0x10] sm:$0xff] }
  0x37   :  { %14535 = vst [vmem:[#allocation77_spill] sm:$0xff] %v13045_v9  ;;  %v13050_v8 = vld [vmem:[%s14373_s23 + $0x1] ss:$0 sm:$0xff]  ;;  %v195_v9 = vld [vmem:[%s14537_s28 + $0x18] sm:$0xff] }
  0x38   :  { %14536 = vst [vmem:[#allocation78_spill] sm:$0xff] %v13050_v8  ;;  %v192_v7 = vld [vmem:[%s14537_s28] sm:$0xff]  ;;  %v11771_v62 = vpack.c.bf16 %v195_v9, %v194_v5  ;;  %v10348_v9 = vld [vmem:[%s14537_s28 + $0x30] sm:$0xff] }
  0x39   :  { %v11767_v63 = vpack.c.bf16 %v193_v6, %v192_v7  ;;  %v197_v8 = vld [vmem:[%s14538_s0] sm:$0xff]  ;;  %v287_v6 = vld [vmem:[%s14538_s0 + $0x10] sm:$0xff] }
  0x3a   :  { %10939 = vmatprep.mubr.msk.f32.mxu0 %vm205_vm0, %v197_v8  ;;  %v10346_v7 = vld [vmem:[%s14537_s28 + $0x20] sm:$0xff]  ;;  %10950 = vmatprep.mubr.msk.f32.mxu1 %vm205_vm0, %v287_v6 }
  0x3b   :  { %11768 = vmatprep.subr.bf16.mxu0 %v11767_v63  ;;  %11776 = vmatprep.subr.bf16.mxu1 %v11767_v63  ;;  %v11783_v5 = vpack.c.bf16 %v10347_v61, %v10346_v7  ;;  %v288_v61 = vld [vmem:[%s14538_s0 + $0x18] sm:$0xff] }
  0x3c   :  { %11770 = vmatpush3.bf16.msra.mxu0 %v11767_v63  ;;  %11778 = vmatpush3.bf16.msra.mxu1 %v11767_v63  ;;  %v11787_v63 = vpack.c.bf16 %v10349_v60, %v10348_v9 }
  0x3d   :  { %11772 = vmatprep.subr.bf16.mxu0 %v11771_v62  ;;  %11780 = vmatprep.subr.bf16.mxu1 %v11771_v62 }
  0x40   :  { %11774 = vmatpush3.bf16.msra.mxu0 %v11771_v62  ;;  %11782 = vmatpush3.bf16.msra.mxu1 %v11771_v62  ;;  %v533_v62 = vlaneseq }
  0x41   :  { %11784 = vmatprep.subr.bf16.mxu0 %v11783_v5  ;;  %11792 = vmatprep.subr.bf16.mxu1 %v11783_v5 }
  0x42   :  { %v13096_v60 = vshrl.u32 %v533_v62, 7  ;;  %v13098_v7 = vand.u32 127, %v533_v62 }
  0x43   :  { %10940 = vmatmul.mubr.msk.f32.vlgmr.msra.gmra.mrb[0].mxu0 %vm205_vm0, %v198_v59  ;;  %10951 = vmatmul.mubr.msk.f32.vlgmr.msra.gmra.mrb[0].mxu1 %vm205_vm0, %v288_v61 }
  0x44   :  { %11786 = vmatpush3.bf16.msra.mxu0 %v11783_v5  ;;  %11794 = vmatpush3.bf16.msra.mxu1 %v11783_v5  ;;  %14539 = vst [vmem:[#allocation79_spill] sm:$0xff] %v13096_v60  ;;  %14540 = vst [vmem:[#allocation80_spill] sm:$0xff] %v13098_v7  ;;  %vm14431_vm1 = vcmp.eq.s32.totalorder %v13096_v60, 0  ;;  %vm541_vm2 = vcmp.eq.s32.totalorder %v13098_v7, 1  ;;  %vm550_vm3 = vcmp.eq.s32.totalorder %v13096_v60, 6 }
  0x45   :  { %11788 = vmatprep.subr.bf16.mxu0 %v11787_v63  ;;  %11796 = vmatprep.subr.bf16.mxu1 %v11787_v63  ;;  %vm542_vm4 = vmand %vm14431_vm1, %vm541_vm2 }
  0x46   :  { %10961 = vmatprep.mubr.msk.f32.mxu0 %vm205_vm0, %v197_v8  ;;  %10972 = vmatprep.mubr.msk.f32.mxu1 %vm205_vm0, %v287_v6  ;;  %v12450_v8 = vmov 0.0   ;;  %vm552_vm5 = vmand %vm550_vm3, %vm541_vm2 }
  0x47   :  { %v10356_v6 = vsel %vm542_vm4, 1.0, %v12450_v8  ;;  %v10357_v9 = vsel %vm552_vm5, 1.0, %v12450_v8  ;;  %v10351_v8 = vld [vmem:[%s14361_s11 + $0x1] ss:$0 sm:$0xff] }
  0x48   :  { %11790 = vmatpush3.bf16.msra.mxu0 %v11787_v63  ;;  %11798 = vmatpush3.bf16.msra.mxu1 %v11787_v63  ;;  %v10341_v63 = vld [vmem:[%s14361_s11] ss:$0 sm:$0xff] }
  0x4b   :  { %10962 = vmatmul.mubr.msk.f32.vlgmr.msra.gmra.mrb[2].mxu0 %vm205_vm0, %v198_v59  ;;  %10973 = vmatmul.mubr.msk.f32.vlgmr.msra.gmra.mrb[2].mxu1 %vm205_vm0, %v288_v61  ;;  %v13106_v59 = vadd.s32 8, %v13096_v60  ;;  %v558_v61 = vadd.f32 %v10357_v9, %v10356_v6  }
  0x4d   :  { %14541 = vst [vmem:[#allocation81_spill] sm:$0xff] %v13106_v59 }
 0x116   :  { %v10941_v62 = vpop.f32.mrb[0].mxu0  ;;  %v10952_v58 = vpop.f32.mrb[0].mxu1 }
 0x117   :  { %v13112_v57 = vadd.f32 %v10941_v62, %v10341_v63  ;;  %v13114_v55 = vadd.f32 %v10952_v58, %v10341_v63  ;;  %v278_v56 = vpop.f32.mrb[1].mxu0  ;;  %v361_v54 = vpop.f32.mrb[1].mxu1 }
 0x118   :  { %v13116_v49 = vadd.f32 %v10341_v63, %v278_v56  ;;  %v13118_v60 = vadd.f32 %v10341_v63, %v361_v54  ;;  %v13131_v56 = vmov 0   ;;  %v13133_v54 = vmov 0.0  }
 0x119   :  { %14542 = vst [vmem:[#allocation82_spill] sm:$0xff] %v13112_v57  ;;  %14543 = vst [vmem:[#allocation83_spill] sm:$0xff] %v13114_v55 }
 0x11a   :  { %14544 = vst [vmem:[#allocation84_spill] sm:$0xff] %v13116_v49  ;;  %14545 = vst [vmem:[#allocation85_spill] sm:$0xff] %v13118_v60 }
 0x11e   :  { %v10963_v6 = vpop.f32.mrb[2].mxu0  ;;  %v10974_v9 = vpop.f32.mrb[2].mxu1 }
 0x11f   :  { %v13123_v5 = vadd.f32 %v10963_v6, %v10351_v8  ;;  %v13125_v59 = vadd.f32 %v10974_v9, %v10351_v8  ;;  %v449_v62 = vpop.f32.mrb[3].mxu0  ;;  %v524_v7 = vpop.f32.mrb[3].mxu1 }
 0x120   :  { %v13127_v58 = vadd.f32 %v10351_v8, %v449_v62  ;;  %v13129_v55 = vadd.f32 %v10351_v8, %v524_v7 }
 0x121   :  { %14546 = vst [vmem:[#allocation86_spill] sm:$0xff] %v13123_v5  ;;  %14547 = vst [vmem:[#allocation87_spill] sm:$0xff] %v13125_v59 }
 0x122   :  { %14548 = vst [vmem:[#allocation88_spill] sm:$0xff] %v13127_v58  ;;  %14549 = vst [vmem:[#allocation89_spill] sm:$0xff] %v13129_v55 }
 0x123 LB: > { %v14550_v2 = vld [vmem:[#allocation7_spill] sm:$0xff]  ;;  %v14553_v57 = vld [vmem:[#allocation82_spill] sm:$0xff]  ;;  %v14554_v49 = vld [vmem:[#allocation84_spill] sm:$0xff]  ;;  %14555 = vst [vmem:[#allocation90_spill] sm:$0xff] %v12436_v56  ;;  %v14414_v63 = vmov 0.0|0.0   ;;  %vm12452_vm6 = vmmov 0   ;;  %v12436_v56 = vphi %v13131_v56, %v14693_v56   ;;  %s12448_s14 = sphi %s13137_s14, %s14694_s14   ;;  %v12444_v61 = vphi %v558_v61, %v10264_v61   ;;  %v12440_v54 = vphi %v13133_v54, %v10265_v54  }
 0x124   : > { %v14556_v0 = vld [vmem:[#allocation5_spill] sm:$0xff]  ;;  %v14557_v1 = vld [vmem:[#allocation6_spill] sm:$0xff]  ;;  %11799 = vmatprep.subr.bf16.mxu0 %v14414_v63  ;;  %11802 = vmatprep.subr.bf16.mxu1 %v14414_v63  ;;  %v14559_v11 = vld [vmem:[#allocation15_spill] sm:$0xff]  ;;  %v14419_v6 = vmov 0.0   ;;  %vm573_vm7 = vcmask 1043456   ;;  %vm569_vm8 = vcmask 162816  }
 0x125   : > { %v13153_v7 = vpack.c.bf16 %v14557_v1, %v14556_v0  ;;  %v14558_v10 = vld [vmem:[#allocation14_spill] sm:$0xff]  ;;  %10981 = vmatprep.mubr.msk.f32.mxu0 %vm12452_vm6, %v14419_v6  ;;  %10992 = vmatprep.mubr.msk.f32.mxu1 %vm12452_vm6, %v14419_v6  ;;  %v14560_v12 = vld [vmem:[#allocation16_spill] sm:$0xff]  ;;  %v14561_v13 = vld [vmem:[#allocation17_spill] sm:$0xff]  ;;  %s12454_s11 = smov 120   ;;  %s12455_s28 = smov 96   ;;  %vm729_vm9 = vcmask 64512  }
 0x126   : > { %v13159_v8 = vpack.c.bf16 %v14559_v11, %v14558_v10  ;;  %v13178_v9 = vpack.c.bf16 %v14561_v13, %v14560_v12  ;;  %v14562_v3 = vld [vmem:[#allocation8_spill] sm:$0xff]  ;;  %v14563_v14 = vld [vmem:[#allocation18_spill] sm:$0xff]  ;;  %s12456_s20 = smov 88   ;;  %v14564_v16 = vld [vmem:[#allocation19_spill] sm:$0xff]  ;;  %vm806_vm10 = vcmask 46080   ;;  %s12457_s15 = smov 56  }
 0x127   : > { %11801 = vmatpush3.bf16.msra.mxu0 %v13153_v7  ;;  %s12458_s21 = smov 64   ;;  %s12459_s6 = smov 80   ;;  %vm824_vm11 = vcmask 1045504   ;;  %vm820_vm12 = vcmask 48128   ;;  %v14566_v18 = vld [vmem:[#allocation20_spill] sm:$0xff]  ;;  %vm1703_vm13 = vcmask 259072   ;;  %vm13311_vm14 = vmpackc.low %vm729_vm9, %vm729_vm9 }
 0x128   : > { %v14552_v5 = vld [vmem:[#allocation86_spill] sm:$0xff]  ;;  %10979 = vmatprep.subr.mxu0 %v14419_v6  ;;  %11804 = vmatpush3.bf16.msra.mxu1 %v13159_v8  ;;  %s12460_s22 = smov 112   ;;  %s12461_s8 = smov 72   ;;  %v14568_v20 = vld [vmem:[#allocation21_spill] sm:$0xff]  ;;  %v14570_v22 = vld [vmem:[#allocation23_spill] sm:$0xff]  ;;  %vm1891_vm15 = vcmask 128000  }
 0x129   : > { %v14551_v58 = vld [vmem:[#allocation88_spill] sm:$0xff]  ;;  %11805 = vmatprep.subr.bf16.mxu1 %v14414_v63  ;;  %s12462_s29 = smov 104   ;;  %s12463_s23 = smov 48   ;;  %v14569_v21 = vld [vmem:[#allocation22_spill] sm:$0xff]  ;;  %vm14434_vm2 = vcmask 130048   ;;  %v14574_v26 = vld [vmem:[#allocation25_spill] sm:$0xff] }
 0x12a   : > { %s12464_s0 = smov 40   ;;  %v14571_v23 = vld [vmem:[#allocation24_spill] sm:$0xff]  ;;  %v14575_v30 = vld [vmem:[#allocation26_spill] sm:$0xff]  ;;  %v14576_v31 = vld [vmem:[#allocation27_spill] sm:$0xff]  ;;  %vm14433_vm3 = vcmask 523264   ;;  %vm14432_vm5 = vcmask 155648  }
 0x12b   : > { %10980 = vmatpush3.msk.msra.mxu0 %vm573_vm7, %v14550_v2  ;;  %v14577_v32 = vld [vmem:[#allocation28_spill] sm:$0xff]  ;;  %v14578_v33 = vld [vmem:[#allocation29_spill] sm:$0xff]  ;;  %v14579_v35 = vld [vmem:[#allocation30_spill] sm:$0xff]  ;;  %s13788_s9 = sadd.s32 1, %s12448_s14   ;;  %s10249_s4 = sadd.s32 7, %s12448_s14 }
 0x12c   : > { %10982 = vmatmul.mubr.msk.f32.vlgmr.msra.gmra.mrb[0].mxu0 %vm569_vm8, %v12444_v61  ;;  %10995 = vmatprep.subr.mxu0 %v14419_v6  ;;  %v14580_v36 = vld [vmem:[#allocation31_spill] sm:$0xff]  ;;  %v14581_v37 = vld [vmem:[#allocation32_spill] sm:$0xff]  ;;  %v14582_v38 = vld [vmem:[#allocation33_spill] sm:$0xff]  ;;  %p562_p0 = scmp.ge.s32.totalorder %s13788_s9, 5  }
 0x12d   : > { %10997 = vmatprep.mubr.msk.f32.mxu0 %vm12452_vm6, %v14419_v6  ;;  %11807 = vmatpush3.bf16.msra.mxu1 %v13178_v9  ;;  %v14583_v39 = vld [vmem:[#allocation34_spill] sm:$0xff]  ;;  %v14584_v40 = vld [vmem:[#allocation35_spill] sm:$0xff]  ;;  %v14585_v41 = vld [vmem:[#allocation36_spill] sm:$0xff]  ;;  %s12466_s30 = smov (%p562_p0), [#allocation2]  }
 0x12e   : > { %11000 = vmatprep.subr.mxu1 %v14419_v6  ;;  %v14586_v42 = vld [vmem:[#allocation37_spill] sm:$0xff]  ;;  %v14587_v50 = vld [vmem:[#allocation39_spill] sm:$0xff]  ;;  %v14588_v51 = vld [vmem:[#allocation40_spill] sm:$0xff]  ;;  %s10279_s24 = sshll.u32 (%p562_p0), %s12466_s30, 4  ;;  %s10280_s24 = int_to_ptr.vmem [resolvable:$true] %s10279_s24 }
 0x12f   : > { %v14589_v52 = vld [vmem:[#allocation41_spill] sm:$0xff]  ;;  %v14590_v53 = vld [vmem:[#allocation42_spill] sm:$0xff]  ;;  %s12394_s12 = scalar_lea.vmem (%p562_p0), %s10280_s24, 32  ;;  %p12399_p2 = scmp.lt.s32.totalorder (%p562_p0), %s10280_s24, %s10280_s24 }
 0x130   :  { %p12395_p1 = scmp.ne.s32.totalorder (%p562_p0), %s10280_s24, %s12394_s12  ;;  %p12400_p3 = scmp.lt.s32.totalorder (%p562_p0), %s12394_s12, %s12394_s12 }
 0x132   :  { %p12401_p4 = por (%p562_p0), %p12400_p3, %p12399_p2 }
 0x134   :  { %p12402_p5 = pnand (%p562_p0), %p12401_p4, %p12395_p1 }
 0x1ff   : > { %v643_v62 = vpop.f32.mrb[0].mxu0 }
 0x200   : > { %v13183_v63 = vadd.f32 %v643_v62, %v14562_v3  ;;  %v10983_v0 = vpop.f32.mrb[1].mxu0 }
 0x202   : > { %10993 = vmatmul.mubr.msk.f32.vlgmr.msra.gmra.mrb[0].mxu1 %vm205_vm0, %v13183_v63 }
 0x203   : > { %11002 = vmatprep.mubr.msk.f32.mxu1 %vm12452_vm6, %v14419_v6 }
 0x2d5   : > { %v722_v1 = vpop.f32.mrb[0].mxu1 }
 0x2d6   : > { %v13190_v10 = vadd.f32 %v14563_v14, %v722_v1  ;;  %v10994_v11 = vpop.f32.mrb[1].mxu1 }
 0x2d8   : > { %897 = vrot.lane.b32.xlu1 %v13190_v10, %s12454_s11  ;;  %727 = vrot.lane.b32.xlu0 %v13190_v10, %s12455_s28 }
 0x2dc   : > { %899 = vrot.lane.b32.xlu0 %v13190_v10, %s12456_s20 }
 0x34a   : > { %v728_v0 = vpop.permute.xlu0 %727  ;;  %v898_v11 = vpop.permute.xlu1 %897 }
 0x34b   : > { %10996 = vmatpush3.xpose.msk.msra.mxu0 %vm729_vm9, %v728_v0 }
 0x34c   : > { %11005 = vmatprep.subr.mxu0 %v14419_v6 }
 0x34e   : > { %10998 = vmatmul.mubr.msk.f32.vlgmr.msra.gmra.mrb[2].mxu0 %vm729_vm9, %v13190_v10  ;;  %v900_v1 = vpop.permute.xlu0 %899 }
 0x34f   : > { %11006 = vmatpush3.xpose.msk.msra.mxu0 %vm729_vm9, %v900_v1  ;;  %11007 = vmatprep.mubr.msk.f32.mxu0 %vm12452_vm6, %v14419_v6 }
 0x350   : > { %11015 = vmatprep.subr.mxu0 %v14419_v6 }
 0x352   : > { %11008 = vmatmul.mubr.msk.f32.vlgmr.msra.gmra.mrb[4].mxu0 %vm729_vm9, %v898_v11 }
 0x353   : > { %11016 = vmatpush3.msra.mxu0 %v14564_v16  ;;  %11017 = vmatprep.mubr.msk.f32.mxu0 %vm12452_vm6, %v14419_v6 }
 0x354   : > { %11025 = vmatprep.subr.mxu0 %v14419_v6 }
 0x421   : > { %v800_v62 = vpop.f32.mrb[2].mxu0 }
 0x422   : > { %v804_v0 = vmul.f32 0.35355338, %v800_v62  ;;  %v10999_v12 = vpop.f32.mrb[3].mxu0 }
 0x424   : > { %v805_v1 = vadd.f32 %v804_v0, %v12625_v4 }
 0x425   : > { %v971_v13 = vpop.f32.mrb[4].mxu0 }
 0x426   : > { %v975_v56 = vmul.f32 0.35355338, %v971_v13  ;;  %v11009_v59 = vpop.f32.mrb[5].mxu0  ;;  %v807_v55 = vsel %vm806_vm10, %v805_v1, -inf }
 0x427   : > { %808 = vmax.xlane.f32.xlu1 %v807_v55 }
 0x428   : > { %v976_v11 = vadd.f32 %v975_v56, %v12625_v4 }
 0x42a   : > { %v977_v60 = vsel %vm806_vm10, %v976_v11, -inf }
 0x42b   : > { %978 = vmax.xlane.f32.xlu0 %v977_v60  ;;  %v14565_v60 = vmov 0.0  }
 0x4b4   : > { %v809_v16 = vpop.xlane.xlu1 %808 }
 0x4b5   : > { %v810_v14 = vsub.f32 %v805_v1, %v809_v16 }
 0x4b7   : > { %v811_v6 = vmul.f32 1.442695, %v810_v14 }
 0x4b8   : > { %v979_v3 = vpop.xlane.xlu0 %978 }
 0x4b9   : > { %12242 = vpow2.f32 %v811_v6  ;;  %v980_v12 = vsub.f32 %v976_v11, %v979_v3 }
 0x4bb   : > { %v981_v62 = vmul.f32 1.442695, %v980_v12 }
 0x4bd   : > { %12244 = vpow2.f32 %v981_v62 }
 0x4c3   : > { %v12243_v0 = vpop.eup %12242 }
 0x4c4   : > { %v813_v13 = vsel %vm806_vm10, %v12243_v0, 0.0 }
 0x4c5   : > { %814 = vadd.xlane.f32.xlu0 %v813_v13 }
 0x4c7   : > { %v12245_v59 = vpop.eup %12244 }
 0x4c8   : > { %v983_v55 = vsel %vm806_vm10, %v12245_v59, 0.0 }
 0x4c9   : > { %984 = vadd.xlane.f32.xlu1 %v983_v55 }
 0x4da   : > { %988 = vrot.lane.b32.xlu1 %v13190_v10, %s12457_s15 }
 0x4db   : > { %818 = vrot.lane.b32.xlu0 %v13190_v10, %s12458_s21 }
 0x4de   : > { %1213 = vrot.lane.b32.xlu1 %v13190_v10, %s12459_s6 }
 0x4df   : > { %1211 = vrot.lane.b32.xlu0 %v13190_v10, %s12460_s22 }
 0x552   : > { %v815_v3 = vpop.xlane.xlu0 %814 }
 0x553   : > { %12246 = vrcp.f32 %v815_v3 }
 0x556   : > { %v985_v14 = vpop.xlane.xlu1 %984  ;;  %v819_v16 = vpop.permute.xlu0 %818 }
 0x557   : > { %12248 = vrcp.f32 %v985_v14  ;;  %11001 = vmatpush3.msk.msra.mxu1 %vm824_vm11, %v819_v16 }
 0x558   : > { %11010 = vmatprep.subr.mxu1 %v14565_v60 }
 0x55a   : > { %v989_v1 = vpop.permute.xlu1 %988  ;;  %v1212_v3 = vpop.permute.xlu0 %1211 }
 0x55d   : > { %v12247_v56 = vpop.eup %12246 }
 0x55e   : > { %v817_v6 = vmul.f32 %v12247_v56, %v12243_v0 }
 0x560   : > { %11003 = vmatmul.mubr.msk.f32.vlgmr.msra.gmra.mrb[2].mxu1 %vm820_vm12, %v817_v6 }
 0x561   : > { %v12249_v11 = vpop.eup %12248  ;;  %11011 = vmatpush3.msk.msra.mxu1 %vm824_vm11, %v989_v1  ;;  %11012 = vmatprep.mubr.msk.f32.mxu1 %vm12452_vm6, %v14565_v60 }
 0x562   : > { %v987_v12 = vmul.f32 %v12249_v11, %v12245_v59  ;;  %11020 = vmatprep.subr.mxu1 %v14565_v60  ;;  %v1214_v59 = vpop.permute.xlu1 %1213 }
 0x564   : > { %11013 = vmatmul.mubr.msk.f32.vlgmr.msra.gmra.mrb[4].mxu1 %vm820_vm12, %v987_v12 }
 0x565   : > { %11021 = vmatpush3.msra.mxu1 %v12680_v15  ;;  %11022 = vmatprep.mubr.msk.f32.mxu1 %vm12452_vm6, %v14565_v60 }
 0x566   : > { %11030 = vmatprep.subr.mxu1 %v14565_v60 }
 0x633   : > { %v893_v62 = vpop.f32.mrb[2].mxu1 }
 0x634   : > { %v11004_v0 = vpop.f32.mrb[3].mxu1  ;;  %11023 = vmatmul.mubr.msk.f32.vlgmr.msra.gmra.mrb[6].mxu1 %vm729_vm9, %v893_v62 }
 0x635   : > { %11032 = vmatprep.mubr.msk.f32.mxu1 %vm12452_vm6, %v14565_v60 }
 0x637   : > { %v1061_v13 = vpop.f32.mrb[4].mxu1 }
 0x638   : > { %v11014_v55 = vpop.f32.mrb[5].mxu1  ;;  %11018 = vmatmul.mubr.msk.f32.vlgmr.msra.gmra.mrb[6].mxu0 %vm729_vm9, %v1061_v13 }
 0x639   : > { %11026 = vmatpush3.xpose.msk.msra.mxu0 %vm729_vm9, %v1214_v59  ;;  %11027 = vmatprep.mubr.msk.f32.mxu0 %vm12452_vm6, %v14565_v60 }
 0x63a   : > { %11035 = vmatprep.subr.mxu0 %v14565_v60 }
 0x63c   : > { %11028 = vmatmul.mubr.msk.f32.vlgmr.msra.gmra.mrb[8].mxu0 %vm729_vm9, %v1212_v3 }
 0x63d   : > { %11036 = vmatpush3.msra.mxu0 %v12690_v17  ;;  %11037 = vmatprep.mubr.msk.f32.mxu0 %vm12452_vm6, %v14565_v60 }
 0x63e   : > { %11045 = vmatprep.subr.mxu0 %v14565_v60 }
 0x707   : > { %v1207_v14 = vpop.f32.mrb[6].mxu1 }
 0x708   : > { %v11024_v16 = vpop.f32.mrb[7].mxu1 }
 0x70b   : > { %v1134_v56 = vpop.f32.mrb[6].mxu0 }
 0x70c   : > { %v1208_v6 = vadd.f32 %v1207_v14, %v1134_v56  ;;  %v11019_v1 = vpop.f32.mrb[7].mxu0 }
 0x70f   : > { %v1285_v11 = vpop.f32.mrb[8].mxu0 }
 0x710   : > { %v1289_v12 = vmul.f32 0.35355338, %v1285_v11  ;;  %v11029_v62 = vpop.f32.mrb[9].mxu0 }
 0x712   : > { %v1290_v0 = vadd.f32 %v1289_v12, %v12625_v4 }
 0x714   : > { %v1291_v13 = vsel %vm806_vm10, %v1290_v0, -inf }
 0x715   : > { %1292 = vmax.xlane.f32.xlu1 %v1291_v13  ;;  %v14567_v13 = vmov 0.0|0.0  }
 0x726   : > { %1455 = vrot.lane.b32.xlu1 %v13190_v10, %s12461_s8 }
 0x72a   : > { %1453 = vrot.lane.b32.xlu1 %v13190_v10, %s12462_s29 }
 0x7a2   : > { %v1293_v59 = vpop.xlane.xlu1 %1292 }
 0x7a3   : > { %v1294_v55 = vsub.f32 %v1290_v0, %v1293_v59 }
 0x7a5   : > { %v1295_v3 = vmul.f32 1.442695, %v1294_v55 }
 0x7a6   : > { %v1456_v12 = vpop.permute.xlu1 %1455 }
 0x7a7   : > { %12250 = vpow2.f32 %v1295_v3 }
 0x7aa   : > { %v1454_v0 = vpop.permute.xlu1 %1453 }
 0x7b1   : > { %v12251_v14 = vpop.eup %12250 }
 0x7b2   : > { %v1297_v16 = vsel %vm806_vm10, %v12251_v14, 0.0 }
 0x7b3   : > { %1298 = vadd.xlane.f32.xlu0 %v1297_v16 }
 0x7c9   : > { %1302 = vrot.lane.b32.xlu0 %v13190_v10, %s12463_s23 }
 0x840   : > { %v1299_v56 = vpop.xlane.xlu0 %1298 }
 0x841   : > { %12252 = vrcp.f32 %v1299_v56 }
 0x844   : > { %v1303_v1 = vpop.permute.xlu0 %1302 }
 0x845   : > { %11031 = vmatpush3.msk.msra.mxu1 %vm824_vm11, %v1303_v1 }
 0x846   : > { %11040 = vmatprep.subr.mxu1 %v14565_v60 }
 0x84b   : > { %v12253_v11 = vpop.eup %12252 }
 0x84c   : > { %v1301_v62 = vmul.f32 %v12253_v11, %v12251_v14 }
 0x84e   : > { %11033 = vmatmul.mubr.msk.f32.vlgmr.msra.gmra.mrb[8].mxu1 %vm820_vm12, %v1301_v62 }
 0x84f   : > { %11041 = vmatpush3.xpose.msk.msra.mxu1 %vm729_vm9, %v1456_v12  ;;  %11042 = vmatprep.mubr.msk.f32.mxu1 %vm12452_vm6, %v14565_v60 }
 0x850   : > { %11050 = vmatprep.subr.mxu1 %v14565_v60 }
 0x852   : > { %11043 = vmatmul.mubr.msk.f32.vlgmr.msra.gmra.mrb[10].mxu1 %vm729_vm9, %v1454_v0 }
 0x853   : > { %11051 = vmatpush3.msra.mxu1 %v14566_v18  ;;  %11052 = vmatprep.mubr.msk.f32.mxu1 %vm12452_vm6, %v14565_v60 }
 0x854   : > { %11814 = vmatprep.subr.bf16.mxu1 %v14567_v13 }
 0x921   : > { %v1375_v59 = vpop.f32.mrb[8].mxu1 }
 0x922   : > { %v11034_v55 = vpop.f32.mrb[9].mxu1  ;;  %11038 = vmatmul.mubr.msk.f32.vlgmr.msra.gmra.mrb[10].mxu0 %vm729_vm9, %v1375_v59 }
 0x923   : > { %11047 = vmatprep.mubr.msk.f32.mxu0 %vm12452_vm6, %v14565_v60 }
 0x925   : > { %v1527_v3 = vpop.f32.mrb[10].mxu1 }
 0x926   : > { %v1531_v14 = vmul.f32 0.35355338, %v1527_v3  ;;  %v11044_v16 = vpop.f32.mrb[11].mxu1 }
 0x928   : > { %v1532_v56 = vadd.f32 %v1531_v14, %v12625_v4 }
 0x92a   : > { %v1533_v1 = vsel %vm806_vm10, %v1532_v56, -inf }
 0x92b   : > { %1534 = vmax.xlane.f32.xlu0 %v1533_v1 }
 0x941   : > { %1544 = vrot.lane.b32.xlu0 %v13190_v10, %s12464_s0 }
 0x9b8   : > { %v1535_v11 = vpop.xlane.xlu0 %1534 }
 0x9b9   : > { %v1536_v12 = vsub.f32 %v1532_v56, %v1535_v11 }
 0x9bb   : > { %v1537_v62 = vmul.f32 1.442695, %v1536_v12 }
 0x9bc   : > { %v1545_v0 = vpop.permute.xlu0 %1544 }
 0x9bd   : > { %12254 = vpow2.f32 %v1537_v62  ;;  %11046 = vmatpush3.msk.msra.mxu0 %vm824_vm11, %v1545_v0 }
 0x9be   : > { %11808 = vmatprep.subr.bf16.mxu0 %v14567_v13 }
 0x9c7   : > { %v12255_v59 = vpop.eup %12254 }
 0x9c8   : > { %v1539_v55 = vsel %vm806_vm10, %v12255_v59, 0.0 }
 0x9c9   : > { %1540 = vadd.xlane.f32.xlu1 %v1539_v55 }
 0x9f5   : > { %v1448_v3 = vpop.f32.mrb[10].mxu0 }
 0x9f6   : > { %v1452_v14 = vadd.f32 %v1448_v3, %v1208_v6  ;;  %v11039_v16 = vpop.f32.mrb[11].mxu0 }
 0xa56   : > { %v1541_v1 = vpop.xlane.xlu1 %1540 }
 0xa57   : > { %12256 = vrcp.f32 %v1541_v1 }
 0xa61   : > { %v12257_v18 = vpop.eup %12256 }
 0xa62   : > { %v1543_v10 = vmul.f32 %v12257_v18, %v12255_v59 }
 0xa64   : > { %11048 = vmatmul.mubr.msk.f32.vlgmr.msra.gmra.mrb[12].mxu0 %vm820_vm12, %v1543_v10 }
 0xa65   : > { %11063 = vmatprep.mubr.msk.f32.mxu0 %vm12452_vm6, %v14565_v60 }
 0xb37   : > { %v1617_v56 = vpop.f32.mrb[12].mxu0 }
 0xb38   : > { %v11049_v11 = vpop.f32.mrb[13].mxu0  ;;  %11053 = vmatmul.mubr.msk.f32.vlgmr.msra.gmra.mrb[12].mxu1 %vm729_vm9, %v1617_v56  ;;  %v13293_v56 = vpack.c.bf16 %v14569_v21, %v14568_v20 }
 0xb39   : > { %11070 = vmatprep.mubr.msk.f32.mxu1 %vm12452_vm6, %v14565_v60  ;;  %v11815_v11 = vpack.c.bf16 %v14553_v57, %v14554_v49 }
 0xb3a   : > { %11810 = vmatpush3.bf16.msra.mxu0 %v13293_v56 }
 0xb3b   : > { %11811 = vmatprep.subr.bf16.mxu0 %v14567_v13  ;;  %11817 = vmatpush3.bf16.xpose.msk.msra.mxu1 %vm13311_vm14, %v11815_v11 }
 0xb3c   : > { %11821 = vmatprep.subr.bf16.mxu1 %v14567_v13 }
 0xc0b   : > { %v1690_v12 = vpop.f32.mrb[12].mxu1 }
 0xc0c   : > { %v1694_v62 = vadd.f32 %v1690_v12, %v1452_v14  ;;  %v11054_v6 = vpop.f32.mrb[13].mxu1  ;;  %v13298_v14 = vpack.c.bf16 %v14571_v23, %v14570_v22 }
 0xc0e   : > { %v1701_v0 = vadd.f32 %v12700_v19, %v1694_v62  ;;  %11813 = vmatpush3.bf16.msra.mxu0 %v13298_v14 }
 0xc0f   : > { %11818 = vmatprep.subr.bf16.mxu0 %v14567_v13 }
 0xc10   : > { %v1702_v18 = vadd.f32 %v1701_v0, %v13183_v63  ;;  %v13305_v63 = vpack.i.bf16 %v14553_v57, %v14554_v49 }
 0xc12   : > { %v1704_v59 = vsel %vm1703_vm13, %v1702_v18, 0.0 }
 0xc13   : > { %1705 = vadd.xlane.f32.xlu1 %v1704_v59 }
 0xca0   : > { %v1706_v55 = vpop.xlane.xlu1 %1705 }
 0xca1   : > { %v1708_v3 = vmul.f32 0.03125, %v1706_v55 }
 0xca3   : > { %v1709_v16 = vsub.f32 %v1702_v18, %v1708_v3 }
 0xca5   : > { %v1710_v1 = vmul.f32 %v1709_v16, %v1709_v16 }
 0xca7   : > { %v1711_v10 = vsel %vm1703_vm13, %v1710_v1, 0.0 }
 0xca8   : > { %1712 = vadd.xlane.f32.xlu1 %v1711_v10 }
 0xcb9   : > { %12103 = vrot.lane.b32.xlu1 %v13305_v63, %s12454_s11 }
 0xd35   : > { %v1713_v62 = vpop.xlane.xlu1 %1712 }
 0xd36   : > { %v1714_v6 = vmul.f32 0.03125, %v1713_v62 }
 0xd38   : > { %v1715_v0 = vadd.f32 1e-05, %v1714_v6 }
 0xd39   : > { %v12104_v1 = vpop.permute.xlu1 %12103 }
 0xd3a   : > { %12258 = vrsqrt.f32 %v1715_v0  ;;  %v12106_v10 = vunpack.i.h.bf16 %v12104_v1  ;;  %v12105_v11 = vunpack.i.l.bf16 %v12104_v1 }
 0xd3c   : > { %v11822_v62 = vpack.c.bf16 %v12106_v10, %v12105_v11 }
 0xd44   : > { %v12259_v18 = vpop.eup %12258 }
 0xd45   : > { %v1717_v59 = vmul.f32 %v12259_v18, %v1709_v16 }
 0xd47   : > { %v1724_v55 = vmul.f32 %v12825_v44, %v1717_v59 }
 0xd49   : > { %v13322_v3 = vadd.f32 %v12830_v45, %v1724_v55 }
 0xd4b   : > { %11064 = vmatmul.mubr.msk.f32.vlgmr.msra.gmra.mrb[14].mxu0 %vm205_vm0, %v13322_v3 }
 0xd4c   : > { %11077 = vmatprep.mubr.msk.f32.mxu0 %vm12452_vm6, %v14565_v60 }
 0xe1e   : > { %v1807_v20 = vpop.f32.mrb[14].mxu0 }
 0xe1f   : > { %v1808_v6 = vadd.f32 %v12725_v24, %v1807_v20  ;;  %v11065_v0 = vpop.f32.mrb[15].mxu0 }
 0xe21   : > { %1983 = vrot.lane.b32.xlu0 %v1808_v6, %s12454_s11  ;;  %11071 = vmatmul.mubr.msk.f32.vlgmr.msra.gmra.mrb[14].mxu1 %vm729_vm9, %v1808_v6 }
 0xe22   : > { %11824 = vmatpush3.bf16.xpose.msk.msra.mxu1 %vm13311_vm14, %v11822_v62  ;;  %11084 = vmatprep.mubr.msk.f32.mxu1 %vm12452_vm6, %v14565_v60 }
 0xe23   : > { %11099 = vmatprep.subr.mxu1 %v14565_v60 }
 0xe93   : > { %v1984_v16 = vpop.permute.xlu0 %1983 }
 0xe94   : > { %11085 = vmatmul.mubr.msk.f32.vlgmr.msra.gmra.mrb[16].mxu1 %vm729_vm9, %v1984_v16 }
 0xe95   : > { %11100 = vmatpush3.msra.mxu1 %v12730_v25  ;;  %11101 = vmatprep.mubr.msk.f32.mxu1 %vm12452_vm6, %v14565_v60 }
 0xe96   : > { %11832 = vmatprep.subr.bf16.mxu1 %v14567_v13 }
 0xef4   : > { %v1886_v20 = vpop.f32.mrb[14].mxu1 }
 0xef5   : > { %v1890_v18 = vmul.f32 0.35355338, %v1886_v20  ;;  %v11072_v59 = vpop.f32.mrb[15].mxu1 }
 0xef7   : > { %v1892_v55 = vsel %vm1891_vm15, %v1890_v18, -inf }
 0xef8   : > { %1893 = vmax.xlane.f32.xlu0 %v1892_v55 }
 0xf67   : > { %v2061_v1 = vpop.f32.mrb[16].mxu1 }
 0xf68   : > { %v2065_v10 = vmul.f32 0.35355338, %v2061_v1  ;;  %v11086_v11 = vpop.f32.mrb[17].mxu1 }
 0xf6a   : > { %v2066_v62 = vsel %vm1891_vm15, %v2065_v10, -inf }
 0xf6b   : > { %2067 = vmax.xlane.f32.xlu1 %v2066_v62 }
 0xf7c   : > { %12113 = vrot.lane.b32.xlu1 %v13305_v63, %s12456_s20 }
 0xf80   : > { %12118 = vrot.lane.b32.xlu1 %v13305_v63, %s12460_s22 }
 0xf84   : > { %12123 = vrot.lane.b32.xlu1 %v13305_v63, %s12462_s29 }
 0xf85   : > { %v1894_v0 = vpop.xlane.xlu0 %1893 }
 0xf86   : > { %v1895_v16 = vsub.f32 %v1890_v18, %v1894_v0 }
 0xf88   : > { %v1896_v21 = vmul.f32 1.442695, %v1895_v16 }
 0xf8a   : > { %12260 = vpow2.f32 %v1896_v21 }
 0xf94   : > { %v12261_v22 = vpop.eup %12260 }
 0xf95   : > { %v1898_v23 = vsel %vm1891_vm15, %v12261_v22, 0.0 }
 0xf96   : > { %1899 = vadd.xlane.f32.xlu0 %v1898_v23 }
 0xff8   : > { %v2068_v20 = vpop.xlane.xlu1 %2067 }
 0xff9   : > { %v2069_v59 = vsub.f32 %v2065_v10, %v2068_v20 }
 0xffb   : > { %v2070_v55 = vmul.f32 1.442695, %v2069_v59 }
 0xffc   : > { %v12114_v18 = vpop.permute.xlu1 %12113 }
 0xffd   : > { %12262 = vpow2.f32 %v2070_v55  ;;  %v12116_v16 = vunpack.i.h.bf16 %v12114_v18  ;;  %v12115_v20 = vunpack.i.l.bf16 %v12114_v18 }
0x1007   : > { %v12263_v1 = vpop.eup %12262 }
0x1008   : > { %v2072_v11 = vsel %vm1891_vm15, %v12263_v1, 0.0 }
0x1009   : > { %2073 = vadd.xlane.f32.xlu0 %v2072_v11  ;;  %v11826_v11 = vpack.c.bf16 %v12116_v16, %v12115_v20 }
0x101f   : > { %12108 = vrot.lane.b32.xlu0 %v13305_v63, %s12455_s28 }
0x1023   : > { %2302 = vrot.lane.b32.xlu0 %v1808_v6, %s12460_s22  ;;  %v1900_v21 = vpop.xlane.xlu0 %1899 }
0x1024   : > { %12264 = vrcp.f32 %v1900_v21 }
0x1027   : > { %2549 = vrot.lane.b32.xlu0 %v1808_v6, %s12462_s29 }
0x102e   : > { %v12265_v59 = vpop.eup %12264 }
0x102f   : > { %v1902_v6 = vmul.f32 %v12265_v59, %v12261_v22  ;;  %v12119_v22 = vpop.permute.xlu1 %12118 }
0x1030   : > { %v12120_v18 = vunpack.i.l.bf16 %v12119_v22 }
0x1096   : > { %v2074_v23 = vpop.xlane.xlu0 %2073 }
0x1097   : > { %12266 = vrcp.f32 %v2074_v23  ;;  %v12121_v23 = vunpack.i.h.bf16 %v12119_v22 }
0x109a   : > { %v12109_v10 = vpop.permute.xlu0 %12108 }
0x109b   : > { %v12111_v62 = vunpack.i.h.bf16 %v12109_v10  ;;  %v12110_v0 = vunpack.i.l.bf16 %v12109_v10 }
0x109d   : > { %v11819_v55 = vpack.c.bf16 %v12111_v62, %v12110_v0  ;;  %v11829_v0 = vpack.c.bf16 %v12121_v23, %v12120_v18 }
0x109f   : > { %11820 = vmatpush3.bf16.msra.mxu0 %v11819_v55 }
0x10a0   : > { %11825 = vmatprep.subr.bf16.mxu0 %v14567_v13 }
0x10a1   : > { %v12267_v49 = vpop.eup %12266 }
0x10a2   : > { %11078 = vmatmul.mubr.msk.f32.vlgmr.msra.gmra.mrb[16].mxu0 %vm14434_vm2, %v1902_v6  ;;  %v2076_v21 = vmul.f32 %v12267_v49, %v12263_v1  ;;  %v12124_v49 = vpop.permute.xlu1 %12123 }
0x10a3   : > { %11827 = vmatpush3.bf16.msra.mxu0 %v11826_v11  ;;  %11091 = vmatprep.mubr.msk.f32.mxu0 %vm12452_vm6, %v14565_v60  ;;  %v12126_v20 = vunpack.i.h.bf16 %v12124_v49  ;;  %v12125_v59 = vunpack.i.l.bf16 %v12124_v49  ;;  %v2303_v11 = vpop.permute.xlu0 %2302 }
0x10a4   : > { %11094 = vmatprep.subr.mxu0 %v14565_v60 }
0x10a5   : > { %v11836_v55 = vpack.c.bf16 %v12126_v20, %v12125_v59 }
0x10a6   : > { %11092 = vmatmul.mubr.msk.f32.vlgmr.msra.gmra.mrb[18].mxu0 %vm14434_vm2, %v2076_v21 }
0x10a7   : > { %11095 = vmatpush3.msra.mxu0 %v14574_v26  ;;  %11096 = vmatprep.mubr.msk.f32.mxu0 %vm12452_vm6, %v14565_v60  ;;  %v2550_v6 = vpop.permute.xlu0 %2549 }
0x10a8   : > { %11828 = vmatprep.subr.bf16.mxu0 %v14567_v13 }
0x1175   : > { %v1979_v10 = vpop.f32.mrb[16].mxu0 }
0x1176   : > { %v11079_v62 = vpop.f32.mrb[17].mxu0  ;;  %11102 = vmatmul.mubr.msk.f32.vlgmr.msra.gmra.mrb[18].mxu1 %vm729_vm9, %v1979_v10 }
0x1177   : > { %11115 = vmatprep.mubr.msk.f32.mxu1 %vm12452_vm6, %v14565_v60 }
0x1179   : > { %v2152_v1 = vpop.f32.mrb[18].mxu0 }
0x117a   : > { %v11093_v16 = vpop.f32.mrb[19].mxu0  ;;  %11097 = vmatmul.mubr.msk.f32.vlgmr.msra.gmra.mrb[20].mxu0 %vm729_vm9, %v2152_v1 }
0x117b   : > { %11831 = vmatpush3.bf16.xpose.msk.msra.mxu0 %vm13311_vm14, %v11829_v0  ;;  %11108 = vmatprep.mubr.msk.f32.mxu0 %vm12452_vm6, %v14565_v60 }
0x117c   : > { %11835 = vmatprep.subr.bf16.mxu0 %v14567_v13 }
0x1182   : > { %11109 = vmatmul.mubr.msk.f32.vlgmr.msra.gmra.mrb[22].mxu0 %vm729_vm9, %v2303_v11 }
0x1183   : > { %11838 = vmatpush3.bf16.xpose.msk.msra.mxu0 %vm13311_vm14, %v11836_v55  ;;  %11127 = vmatprep.mubr.msk.f32.mxu0 %vm12452_vm6, %v14565_v60 }
0x1184   : > { %11842 = vmatprep.subr.bf16.mxu0 %v14567_v13 }
0x118a   : > { %11128 = vmatmul.mubr.msk.f32.vlgmr.msra.gmra.mrb[24].mxu0 %vm729_vm9, %v2550_v6 }
0x118b   : > { %11150 = vmatprep.mubr.msk.f32.mxu0 %vm12452_vm6, %v14565_v60 }
0x1249   : > { %v2298_v21 = vpop.f32.mrb[18].mxu1 }
0x124a   : > { %v11103_v22 = vpop.f32.mrb[19].mxu1 }
0x124d   : > { %v2225_v23 = vpop.f32.mrb[20].mxu0 }
0x124e   : > { %v2299_v18 = vadd.f32 %v2298_v21, %v2225_v23  ;;  %v11098_v10 = vpop.f32.mrb[21].mxu0 }
0x1255   : > { %v2380_v62 = vpop.f32.mrb[22].mxu0 }
0x1256   : > { %v2384_v0 = vmul.f32 0.35355338, %v2380_v62  ;;  %v11110_v49 = vpop.f32.mrb[23].mxu0 }
0x1258   : > { %v2385_v1 = vsel %vm1891_vm15, %v2384_v0, -inf }
0x1259   : > { %2386 = vmax.xlane.f32.xlu1 %v2385_v1 }
0x125d   : > { %v2627_v16 = vpop.f32.mrb[24].mxu0 }
0x125e   : > { %v2631_v20 = vmul.f32 0.35355338, %v2627_v16  ;;  %v11129_v59 = vpop.f32.mrb[25].mxu0 }
0x1260   : > { %v2632_v55 = vsel %vm1891_vm15, %v2631_v20, -inf }
0x1261   : > { %2633 = vmax.xlane.f32.xlu1 %v2632_v55 }
0x12e6   : > { %v2387_v11 = vpop.xlane.xlu1 %2386 }
0x12e7   : > { %v2388_v6 = vsub.f32 %v2384_v0, %v2387_v11 }
0x12e9   : > { %v2389_v57 = vmul.f32 1.442695, %v2388_v6 }
0x12eb   : > { %12268 = vpow2.f32 %v2389_v57 }
0x12ee   : > { %v2634_v22 = vpop.xlane.xlu1 %2633 }
0x12ef   : > { %v2635_v26 = vsub.f32 %v2631_v20, %v2634_v22 }
0x12f1   : > { %v2636_v21 = vmul.f32 1.442695, %v2635_v26 }
0x12f3   : > { %12270 = vpow2.f32 %v2636_v21 }
0x12f5   : > { %v12269_v23 = vpop.eup %12268 }
0x12f6   : > { %v2391_v10 = vsel %vm1891_vm15, %v12269_v23, 0.0 }
0x12f7   : > { %2392 = vadd.xlane.f32.xlu0 %v2391_v10 }
0x12fd   : > { %v12271_v62 = vpop.eup %12270 }
0x12fe   : > { %v2638_v49 = vsel %vm1891_vm15, %v12271_v62, 0.0 }
0x12ff   : > { %2639 = vadd.xlane.f32.xlu1 %v2638_v49 }
0x130d   : > { %12128 = vrot.lane.b32.xlu0 %v13305_v63, %s12459_s6 }
0x1310   : > { %12133 = vrot.lane.b32.xlu1 %v13305_v63, %s12461_s8 }
0x1384   : > { %v2393_v0 = vpop.xlane.xlu0 %2392 }
0x1385   : > { %12272 = vrcp.f32 %v2393_v0 }
0x1388   : > { %v12129_v57 = vpop.permute.xlu0 %12128 }
0x1389   : > { %v12131_v1 = vunpack.i.h.bf16 %v12129_v57  ;;  %v12130_v26 = vunpack.i.l.bf16 %v12129_v57 }
0x138b   : > { %v11833_v16 = vpack.c.bf16 %v12131_v1, %v12130_v26 }
0x138c   : > { %v2640_v63 = vpop.xlane.xlu1 %2639 }
0x138d   : > { %11834 = vmatpush3.bf16.msra.mxu1 %v11833_v16  ;;  %12274 = vrcp.f32 %v2640_v63 }
0x138e   : > { %11118 = vmatprep.subr.mxu1 %v14565_v60 }
0x138f   : > { %v12273_v20 = vpop.eup %12272 }
0x1390   : > { %v2395_v59 = vmul.f32 %v12273_v20, %v12269_v23  ;;  %v12134_v55 = vpop.permute.xlu1 %12133 }
0x1391   : > { %v12136_v11 = vunpack.i.h.bf16 %v12134_v55  ;;  %v12135_v6 = vunpack.i.l.bf16 %v12134_v55 }
0x1392   : > { %11116 = vmatmul.mubr.msk.f32.vlgmr.msra.gmra.mrb[20].mxu1 %vm14434_vm2, %v2395_v59 }
0x1393   : > { %11119 = vmatpush3.msra.mxu1 %v12740_v27  ;;  %11120 = vmatprep.mubr.msk.f32.mxu1 %vm12452_vm6, %v14565_v60  ;;  %v11840_v22 = vpack.c.bf16 %v12136_v11, %v12135_v6 }
0x1394   : > { %11839 = vmatprep.subr.bf16.mxu1 %v14567_v13 }
0x1397   : > { %v12275_v21 = vpop.eup %12274 }
0x1398   : > { %v2642_v23 = vmul.f32 %v12275_v21, %v12271_v62 }
0x1465   : > { %v2471_v10 = vpop.f32.mrb[20].mxu1 }
0x1466   : > { %v11117_v49 = vpop.f32.mrb[21].mxu1  ;;  %11121 = vmatmul.mubr.msk.f32.vlgmr.msra.gmra.mrb[22].mxu1 %vm729_vm9, %v2471_v10 }
0x1467   : > { %11841 = vmatpush3.bf16.msra.mxu1 %v11840_v22  ;;  %11134 = vmatprep.mubr.msk.f32.mxu1 %vm12452_vm6, %v14565_v60  ;;  %v13415_v49 = vpack.c.bf16 %v14576_v31, %v14575_v30 }
0x1468   : > { %11137 = vmatprep.subr.mxu1 %v14565_v60 }
0x1469   : > { %11844 = vmatpush3.bf16.msra.mxu0 %v13415_v49 }
0x146a   : > { %11135 = vmatmul.mubr.msk.f32.vlgmr.msra.gmra.mrb[24].mxu1 %vm14434_vm2, %v2642_v23  ;;  %v13420_v23 = vpack.c.bf16 %v14578_v33, %v14577_v32  ;;  %11845 = vmatprep.subr.bf16.mxu0 %v14567_v13 }
0x146b   : > { %11138 = vmatpush3.msra.mxu1 %v12745_v28  ;;  %11139 = vmatprep.mubr.msk.f32.mxu1 %vm12452_vm6, %v14565_v60 }
0x146c   : > { %11848 = vmatprep.subr.bf16.mxu1 %v14567_v13 }
0x146d   : > { %11847 = vmatpush3.bf16.msra.mxu0 %v13420_v23 }
0x146e   : > { %11860 = vmatprep.subr.bf16.mxu0 %v14567_v13 }
0x1539   : > { %v2544_v0 = vpop.f32.mrb[22].mxu1 }
0x153a   : > { %v2548_v57 = vadd.f32 %v2544_v0, %v2299_v18  ;;  %v11122_v1 = vpop.f32.mrb[23].mxu1  ;;  %v13432_v0 = vpack.c.bf16 %v14582_v38, %v14581_v37 }
0x153d   : > { %v2718_v26 = vpop.f32.mrb[24].mxu1 }
0x153e   : > { %v11136_v16 = vpop.f32.mrb[25].mxu1  ;;  %11140 = vmatmul.mubr.msk.f32.vlgmr.msra.gmra.mrb[26].mxu1 %vm729_vm9, %v2718_v26 }
0x153f   : > { %11169 = vmatprep.mubr.msk.f32.mxu1 %vm12452_vm6, %v14565_v60 }
0x1611   : > { %v2791_v62 = vpop.f32.mrb[26].mxu1 }
0x1612   : > { %v2795_v20 = vadd.f32 %v2791_v62, %v2548_v57  ;;  %v11141_v59 = vpop.f32.mrb[27].mxu1  ;;  %v13438_v57 = vpack.c.bf16 %v14584_v40, %v14583_v39 }
0x1614   : > { %v2802_v63 = vadd.f32 %v12750_v29, %v2795_v20 }
0x1616   : > { %v2803_v55 = vadd.f32 %v2802_v63, %v13322_v3  ;;  %v13427_v3 = vpack.c.bf16 %v14580_v36, %v14579_v35 }
0x1618   : > { %v2804_v11 = vsel %vm1703_vm13, %v2803_v55, 0.0  ;;  %11850 = vmatpush3.bf16.msra.mxu1 %v13427_v3 }
0x1619   : > { %2805 = vadd.xlane.f32.xlu0 %v2804_v11  ;;  %11851 = vmatprep.subr.bf16.mxu1 %v14567_v13 }
0x161c   : > { %11853 = vmatpush3.bf16.msra.mxu1 %v13432_v0 }
0x161d   : > { %11854 = vmatprep.subr.bf16.mxu1 %v14567_v13 }
0x1620   : > { %11856 = vmatpush3.bf16.msra.mxu1 %v13438_v57 }
0x1621   : > { %11857 = vmatprep.subr.bf16.mxu1 %v14567_v13 }
0x16a6   : > { %v2806_v6 = vpop.xlane.xlu0 %2805 }
0x16a7   : > { %v2807_v18 = vmul.f32 0.03125, %v2806_v6 }
0x16a9   : > { %v2808_v22 = vsub.f32 %v2803_v55, %v2807_v18  ;;  %v13450_v55 = vpack.c.bf16 %v14586_v42, %v14585_v41  ;;  %v14599_v41 = vld [vmem:[#allocation50_spill] sm:$0xff] }
0x16ab   : > { %v2809_v21 = vmul.f32 %v2808_v22, %v2808_v22  ;;  %11859 = vmatpush3.bf16.msra.mxu1 %v13450_v55 }
0x16ac   : > { %11188 = vmatprep.subr.mxu1 %v14565_v60 }
0x16ad   : > { %v2810_v10 = vsel %vm1703_vm13, %v2809_v21, 0.0 }
0x16ae   : > { %2811 = vadd.xlane.f32.xlu1 %v2810_v10 }
0x173b   : > { %v2812_v1 = vpop.xlane.xlu1 %2811 }
0x173c   : > { %v2813_v26 = vmul.f32 0.03125, %v2812_v1 }
0x173e   : > { %v2814_v16 = vadd.f32 1e-05, %v2813_v26 }
0x1740   : > { %12276 = vrsqrt.f32 %v2814_v16 }
0x174a   : > { %v12277_v62 = vpop.eup %12276 }
0x174b   : > { %v2816_v20 = vmul.f32 %v12277_v62, %v2808_v22 }
0x174d   : > { %v2823_v59 = vmul.f32 %v12835_v46, %v2816_v20 }
0x174f   : > { %v2830_v63 = vadd.f32 %v12840_v47, %v2823_v59 }
0x1751   : > { %11151 = vmatmul.mubr.msk.f32.vlgmr.msra.gmra.mrb[26].mxu0 %vm205_vm0, %v2830_v63 }
0x1752   : > { %11180 = vmatprep.mubr.msk.f32.mxu0 %vm12452_vm6, %v14565_v60 }
0x1824   : > { %v2906_v11 = vpop.f32.mrb[26].mxu0 }
0x1825   : > { %v2907_v6 = vadd.f32 %v12775_v34, %v2906_v11  ;;  %v11152_v18 = vpop.f32.mrb[27].mxu0 }
0x1827   : > { %v2910_v22 = vmax.f32 %v2907_v6, 0.0  ;;  %v13463_v6 = vpack.c.bf16 %v14588_v51, %v14587_v50 }
0x1829   : > { %11170 = vmatmul.mubr.msk.f32.vlgmr.msra.gmra.mrb[28].mxu1 %vm14433_vm3, %v2910_v22  ;;  %11862 = vmatpush3.bf16.msra.mxu0 %v13463_v6  ;;  %v13468_v22 = vpack.c.bf16 %v14590_v53, %v14589_v52 }
0x182a   : > { %11190 = vmatprep.mubr.msk.f32.mxu1 %vm12452_vm6, %v14565_v60  ;;  %11863 = vmatprep.subr.bf16.mxu0 %v14567_v13 }
0x182d   : > { %11865 = vmatpush3.bf16.msra.mxu0 %v13468_v22 }
0x182e   : > { %11183 = vmatprep.subr.mxu0 %v14565_v60 }
0x18fc   : > { %v2987_v21 = vpop.f32.mrb[28].mxu1 }
0x18fd   : > { %v2988_v10 = vadd.f32 %v12820_v43, %v2987_v21  ;;  %v11171_v1 = vpop.f32.mrb[29].mxu1 }
0x18ff   : > { %v2991_v26 = vadd.f32 %v2988_v10, %v2830_v63 }
0x1901   : > { %v2992_v16 = vsel %vm1703_vm13, %v2991_v26, 0.0 }
0x1902   : > { %2993 = vadd.xlane.f32.xlu0 %v2992_v16 }
0x198f   : > { %v2994_v62 = vpop.xlane.xlu0 %2993 }
0x1990   : > { %v2995_v20 = vmul.f32 0.03125, %v2994_v62  ;;  %v14591_v62 = vld [vmem:[#allocation38_spill] sm:$0xff] }
0x1992   : > { %v2996_v59 = vsub.f32 %v2991_v26, %v2995_v20 }
0x1994   : > { %v2997_v11 = vmul.f32 %v2996_v59, %v2996_v59 }
0x1996   : > { %v2998_v18 = vsel %vm1703_vm13, %v2997_v11, 0.0 }
0x1997   : > { %2999 = vadd.xlane.f32.xlu0 %v2998_v18  ;;  %v14592_v18 = vld [vmem:[#allocation43_spill] sm:$0xff] }
0x1a24   : > { %v3000_v63 = vpop.xlane.xlu0 %2999 }
0x1a25   : > { %v3001_v21 = vmul.f32 0.03125, %v3000_v63 }
0x1a27   : > { %v3002_v10 = vadd.f32 1e-05, %v3001_v21 }
0x1a29   : > { %12278 = vrsqrt.f32 %v3002_v10 }
0x1a33   : > { %v12279_v1 = vpop.eup %12278 }
0x1a34   : > { %v3004_v26 = vmul.f32 %v12279_v1, %v2996_v59  ;;  %v14593_v1 = vld [vmem:[#allocation45_spill] sm:$0xff] }
0x1a36   : > { %v3011_v16 = vmul.f32 %v12845_v48, %v3004_v26 }
0x1a38   : > { %v13475_v20 = vadd.f32 %v14591_v62, %v3011_v16 }
0x1a3a   : > { %11181 = vmatmul.mubr.msk.f32.vlgmr.msra.gmra.mrb[28].mxu0 %vm205_vm0, %v13475_v20 }
0x1a3b   : > { %11185 = vmatprep.mubr.msk.f32.mxu0 %vm12452_vm6, %v14565_v60 }
0x1b0d   : > { %v3094_v11 = vpop.f32.mrb[28].mxu0 }
0x1b0e   : > { %v13482_v30 = vadd.f32 %v14592_v18, %v3094_v11  ;;  %v11182_v63 = vpop.f32.mrb[29].mxu0 }
0x1b10   : > { %3267 = vrot.lane.b32.xlu1 %v13482_v30, %s12456_s20  ;;  %3099 = vrot.lane.b32.xlu0 %v13482_v30, %s12455_s28 }
0x1b14   : > { %3265 = vrot.lane.b32.xlu1 %v13482_v30, %s12454_s11 }
0x1b82   : > { %v3100_v59 = vpop.permute.xlu0 %3099  ;;  %v3268_v21 = vpop.permute.xlu1 %3267 }
0x1b83   : > { %11184 = vmatpush3.xpose.msk.msra.mxu0 %vm729_vm9, %v3100_v59 }
0x1b84   : > { %11193 = vmatprep.subr.mxu0 %v14565_v60 }
0x1b86   : > { %11186 = vmatmul.mubr.msk.f32.vlgmr.msra.gmra.mrb[30].mxu0 %vm729_vm9, %v13482_v30  ;;  %v3266_v10 = vpop.permute.xlu1 %3265 }
0x1b87   : > { %11194 = vmatpush3.xpose.msk.msra.mxu0 %vm729_vm9, %v3268_v21  ;;  %11195 = vmatprep.mubr.msk.f32.mxu0 %vm12452_vm6, %v14565_v60 }
0x1b88   : > { %11203 = vmatprep.subr.mxu0 %v14565_v60 }
0x1b8a   : > { %11196 = vmatmul.mubr.msk.f32.vlgmr.msra.gmra.mrb[32].mxu0 %vm729_vm9, %v3266_v10 }
0x1b8b   : > { %11204 = vmatpush3.msra.mxu0 %v14593_v1  ;;  %11205 = vmatprep.mubr.msk.f32.mxu0 %vm12452_vm6, %v14565_v60 }
0x1b8c   : > { %11213 = vmatprep.subr.mxu0 %v14565_v60 }
0x1c59   : > { %v3171_v26 = vpop.f32.mrb[30].mxu0 }
0x1c5a   : > { %v3175_v16 = vmul.f32 0.35355338, %v3171_v26  ;;  %v11187_v11 = vpop.f32.mrb[31].mxu0 }
0x1c5c   : > { %v3176_v63 = vadd.f32 %v3175_v16, %v12625_v4 }
0x1c5d   : > { %v3339_v59 = vpop.f32.mrb[32].mxu0 }
0x1c5e   : > { %v3343_v21 = vmul.f32 0.35355338, %v3339_v59  ;;  %v11197_v31 = vpop.f32.mrb[33].mxu0  ;;  %v3177_v32 = vsel %vm806_vm10, %v3176_v63, -inf }
0x1c5f   : > { %3178 = vmax.xlane.f32.xlu0 %v3177_v32 }
0x1c60   : > { %v3344_v10 = vadd.f32 %v3343_v21, %v12625_v4 }
0x1c62   : > { %v3345_v33 = vsel %vm806_vm10, %v3344_v10, -inf }
0x1c63   : > { %3346 = vmax.xlane.f32.xlu1 %v3345_v33 }
0x1c74   : > { %3188 = vrot.lane.b32.xlu1 %v13482_v30, %s12458_s21 }
0x1c78   : > { %3581 = vrot.lane.b32.xlu1 %v13482_v30, %s12459_s6 }
0x1c7c   : > { %3579 = vrot.lane.b32.xlu1 %v13482_v30, %s12460_s22 }
0x1cec   : > { %v3179_v26 = vpop.xlane.xlu0 %3178 }
0x1ced   : > { %v3180_v16 = vsub.f32 %v3176_v63, %v3179_v26 }
0x1cef   : > { %v3181_v31 = vmul.f32 1.442695, %v3180_v16 }
0x1cf0   : > { %v3347_v11 = vpop.xlane.xlu1 %3346 }
0x1cf1   : > { %12280 = vpow2.f32 %v3181_v31  ;;  %v3348_v32 = vsub.f32 %v3344_v10, %v3347_v11 }
0x1cf3   : > { %v3349_v59 = vmul.f32 1.442695, %v3348_v32 }
0x1cf4   : > { %v3189_v21 = vpop.permute.xlu1 %3188 }
0x1cf5   : > { %12282 = vpow2.f32 %v3349_v59  ;;  %11189 = vmatpush3.msk.msra.mxu1 %vm824_vm11, %v3189_v21 }
0x1cf6   : > { %11198 = vmatprep.subr.mxu1 %v14565_v60 }
0x1cf8   : > { %v3582_v21 = vpop.permute.xlu1 %3581 }
0x1cfb   : > { %v12281_v33 = vpop.eup %12280 }
0x1cfc   : > { %v3183_v35 = vsel %vm806_vm10, %v12281_v33, 0.0 }
0x1cfd   : > { %3184 = vadd.xlane.f32.xlu0 %v3183_v35 }
0x1cff   : > { %v12283_v36 = vpop.eup %12282 }
0x1d00   : > { %v3351_v37 = vsel %vm806_vm10, %v12283_v36, 0.0 }
0x1d01   : > { %3352 = vadd.xlane.f32.xlu0 %v3351_v37  ;;  %v14594_v37 = vld [vmem:[#allocation44_spill] sm:$0xff] }
0x1d17   : > { %3356 = vrot.lane.b32.xlu0 %v13482_v30, %s12457_s15 }
0x1d8a   : > { %v3185_v63 = vpop.xlane.xlu0 %3184 }
0x1d8b   : > { %12284 = vrcp.f32 %v3185_v63  ;;  %v3580_v63 = vpop.permute.xlu1 %3579 }
0x1d8e   : > { %v3353_v10 = vpop.xlane.xlu0 %3352 }
0x1d8f   : > { %12286 = vrcp.f32 %v3353_v10  ;;  %v14595_v10 = vld [vmem:[#allocation46_spill] sm:$0xff] }
0x1d92   : > { %v3357_v31 = vpop.permute.xlu0 %3356 }
0x1d95   : > { %v12285_v26 = vpop.eup %12284 }
0x1d96   : > { %v3187_v16 = vmul.f32 %v12285_v26, %v12281_v33 }
0x1d98   : > { %11191 = vmatmul.mubr.msk.f32.vlgmr.msra.gmra.mrb[30].mxu1 %vm820_vm12, %v3187_v16 }
0x1d99   : > { %v12287_v11 = vpop.eup %12286  ;;  %11199 = vmatpush3.msk.msra.mxu1 %vm824_vm11, %v3357_v31  ;;  %11200 = vmatprep.mubr.msk.f32.mxu1 %vm12452_vm6, %v14565_v60 }
0x1d9a   : > { %v3355_v35 = vmul.f32 %v12287_v11, %v12283_v36  ;;  %11208 = vmatprep.subr.mxu1 %v14565_v60 }
0x1d9c   : > { %11201 = vmatmul.mubr.msk.f32.vlgmr.msra.gmra.mrb[32].mxu1 %vm820_vm12, %v3355_v35 }
0x1d9d   : > { %11209 = vmatpush3.msra.mxu1 %v14594_v37  ;;  %11210 = vmatprep.mubr.msk.f32.mxu1 %vm12452_vm6, %v14565_v60 }
0x1d9e   : > { %11218 = vmatprep.subr.mxu1 %v14565_v60 }
0x1e6b   : > { %v3261_v32 = vpop.f32.mrb[30].mxu1 }
0x1e6c   : > { %v11192_v59 = vpop.f32.mrb[31].mxu1  ;;  %11211 = vmatmul.mubr.msk.f32.vlgmr.msra.gmra.mrb[34].mxu1 %vm729_vm9, %v3261_v32 }
0x1e6d   : > { %11220 = vmatprep.mubr.msk.f32.mxu1 %vm12452_vm6, %v14565_v60 }
0x1e6f   : > { %v3429_v36 = vpop.f32.mrb[32].mxu1 }
0x1e70   : > { %v11202_v33 = vpop.f32.mrb[33].mxu1  ;;  %11206 = vmatmul.mubr.msk.f32.vlgmr.msra.gmra.mrb[34].mxu0 %vm729_vm9, %v3429_v36 }
0x1e71   : > { %11214 = vmatpush3.xpose.msk.msra.mxu0 %vm729_vm9, %v3582_v21  ;;  %11215 = vmatprep.mubr.msk.f32.mxu0 %vm12452_vm6, %v14565_v60 }
0x1e72   : > { %11223 = vmatprep.subr.mxu0 %v14565_v60 }
0x1e74   : > { %11216 = vmatmul.mubr.msk.f32.vlgmr.msra.gmra.mrb[36].mxu0 %vm729_vm9, %v3580_v63 }
0x1e75   : > { %11224 = vmatpush3.msra.mxu0 %v14595_v10  ;;  %11225 = vmatprep.mubr.msk.f32.mxu0 %vm12452_vm6, %v14565_v60 }
0x1e76   : > { %11233 = vmatprep.subr.mxu0 %v14565_v60 }
0x1f3f   : > { %v3575_v26 = vpop.f32.mrb[34].mxu1 }
0x1f40   : > { %v11212_v16 = vpop.f32.mrb[35].mxu1 }
0x1f43   : > { %v3502_v31 = vpop.f32.mrb[34].mxu0 }
0x1f44   : > { %v3576_v11 = vadd.f32 %v3575_v26, %v3502_v31  ;;  %v11207_v35 = vpop.f32.mrb[35].mxu0 }
0x1f47   : > { %v3653_v32 = vpop.f32.mrb[36].mxu0 }
0x1f48   : > { %v3657_v59 = vmul.f32 0.35355338, %v3653_v32  ;;  %v11217_v21 = vpop.f32.mrb[37].mxu0 }
0x1f4a   : > { %v3658_v36 = vadd.f32 %v3657_v59, %v12625_v4 }
0x1f4c   : > { %v3659_v33 = vsel %vm806_vm10, %v3658_v36, -inf }
0x1f4d   : > { %3660 = vmax.xlane.f32.xlu0 %v3659_v33 }
0x1f63   : > { %3670 = vrot.lane.b32.xlu0 %v13482_v30, %s12463_s23 }
0x1f67   : > { %3821 = vrot.lane.b32.xlu0 %v13482_v30, %s12462_s29 }
0x1fda   : > { %v3661_v63 = vpop.xlane.xlu0 %3660 }
0x1fdb   : > { %v3662_v38 = vsub.f32 %v3658_v36, %v3661_v63 }
0x1fdd   : > { %v3663_v16 = vmul.f32 1.442695, %v3662_v38 }
0x1fde   : > { %v3671_v39 = vpop.permute.xlu0 %3670 }
0x1fdf   : > { %12288 = vpow2.f32 %v3663_v16  ;;  %11219 = vmatpush3.msk.msra.mxu1 %vm824_vm11, %v3671_v39  ;;  %v14596_v39 = vld [vmem:[#allocation47_spill] sm:$0xff] }
0x1fe0   : > { %11228 = vmatprep.subr.mxu1 %v14565_v60 }
0x1fe2   : > { %v3822_v38 = vpop.permute.xlu0 %3821 }
0x1fe9   : > { %v12289_v26 = vpop.eup %12288 }
0x1fea   : > { %v3665_v31 = vsel %vm806_vm10, %v12289_v26, 0.0 }
0x1feb   : > { %3666 = vadd.xlane.f32.xlu1 %v3665_v31 }
0x1ffc   : > { %3823 = vrot.lane.b32.xlu1 %v13482_v30, %s12461_s8 }
0x2078   : > { %v3667_v35 = vpop.xlane.xlu1 %3666 }
0x2079   : > { %12290 = vrcp.f32 %v3667_v35 }
0x207c   : > { %v3824_v21 = vpop.permute.xlu1 %3823 }
0x2083   : > { %v12291_v32 = vpop.eup %12290 }
0x2084   : > { %v3669_v59 = vmul.f32 %v12291_v32, %v12289_v26 }
0x2086   : > { %11221 = vmatmul.mubr.msk.f32.vlgmr.msra.gmra.mrb[36].mxu1 %vm820_vm12, %v3669_v59 }
0x2087   : > { %11229 = vmatpush3.xpose.msk.msra.mxu1 %vm729_vm9, %v3824_v21  ;;  %11230 = vmatprep.mubr.msk.f32.mxu1 %vm12452_vm6, %v14565_v60 }
0x2088   : > { %11238 = vmatprep.subr.mxu1 %v14565_v60 }
0x208a   : > { %11231 = vmatmul.mubr.msk.f32.vlgmr.msra.gmra.mrb[38].mxu1 %vm729_vm9, %v3822_v38 }
0x208b   : > { %11239 = vmatpush3.msra.mxu1 %v14596_v39  ;;  %11240 = vmatprep.mubr.msk.f32.mxu1 %vm12452_vm6, %v14565_v60 }
0x208c   : > { %11872 = vmatprep.subr.bf16.mxu1 %v14567_v13 }
0x2159   : > { %v3743_v36 = vpop.f32.mrb[36].mxu1 }
0x215a   : > { %v11222_v33 = vpop.f32.mrb[37].mxu1  ;;  %11226 = vmatmul.mubr.msk.f32.vlgmr.msra.gmra.mrb[38].mxu0 %vm729_vm9, %v3743_v36 }
0x215b   : > { %11235 = vmatprep.mubr.msk.f32.mxu0 %vm12452_vm6, %v14565_v60 }
0x215d   : > { %v3895_v63 = vpop.f32.mrb[38].mxu1 }
0x215e   : > { %v3899_v16 = vmul.f32 0.35355338, %v3895_v63  ;;  %v11232_v26 = vpop.f32.mrb[39].mxu1 }
0x2160   : > { %v3900_v31 = vadd.f32 %v3899_v16, %v12625_v4 }
0x2162   : > { %v3901_v35 = vsel %vm806_vm10, %v3900_v31, -inf }
0x2163   : > { %3902 = vmax.xlane.f32.xlu1 %v3901_v35 }
0x21f0   : > { %v3903_v32 = vpop.xlane.xlu1 %3902 }
0x21f1   : > { %v3904_v59 = vsub.f32 %v3900_v31, %v3903_v32 }
0x21f3   : > { %v3905_v21 = vmul.f32 1.442695, %v3904_v59 }
0x21f5   : > { %12292 = vpow2.f32 %v3905_v21 }
0x21ff   : > { %v12293_v38 = vpop.eup %12292 }
0x2200   : > { %v3907_v33 = vsel %vm806_vm10, %v12293_v38, 0.0 }
0x2201   : > { %3908 = vadd.xlane.f32.xlu0 %v3907_v33  ;;  %v14597_v33 = vld [vmem:[#allocation48_spill] sm:$0xff] }
0x2217   : > { %3912 = vrot.lane.b32.xlu0 %v13482_v30, %s12464_s0 }
0x222d   : > { %v3816_v36 = vpop.f32.mrb[38].mxu0 }
0x222e   : > { %v3820_v40 = vadd.f32 %v3816_v36, %v3576_v11  ;;  %v11227_v63 = vpop.f32.mrb[39].mxu0 }
0x228e   : > { %v3909_v26 = vpop.xlane.xlu0 %3908 }
0x228f   : > { %12294 = vrcp.f32 %v3909_v26 }
0x2292   : > { %v3913_v16 = vpop.permute.xlu0 %3912 }
0x2293   : > { %11234 = vmatpush3.msk.msra.mxu0 %vm824_vm11, %v3913_v16 }
0x2294   : > { %11866 = vmatprep.subr.bf16.mxu0 %v14567_v13 }
0x2299   : > { %v12295_v31 = vpop.eup %12294 }
0x229a   : > { %v3911_v35 = vmul.f32 %v12295_v31, %v12293_v38 }
0x229c   : > { %11236 = vmatmul.mubr.msk.f32.vlgmr.msra.gmra.mrb[40].mxu0 %vm820_vm12, %v3911_v35 }
0x229d   : > { %11251 = vmatprep.mubr.msk.f32.mxu0 %vm12452_vm6, %v14565_v60 }
0x236f   : > { %v3985_v32 = vpop.f32.mrb[40].mxu0 }
0x2370   : > { %v11237_v59 = vpop.f32.mrb[41].mxu0  ;;  %11241 = vmatmul.mubr.msk.f32.vlgmr.msra.gmra.mrb[40].mxu1 %vm729_vm9, %v3985_v32  ;;  %v14598_v32 = vld [vmem:[#allocation49_spill] sm:$0xff] }
0x2371   : > { %11258 = vmatprep.mubr.msk.f32.mxu1 %vm12452_vm6, %v14565_v60  ;;  %v13585_v42 = vpack.c.bf16 %v14599_v41, %v14598_v32  ;;  %v11873_v41 = vpack.c.bf16 %v14552_v5, %v14551_v58 }
0x2373   : > { %11868 = vmatpush3.bf16.msra.mxu0 %v13585_v42  ;;  %11875 = vmatpush3.bf16.xpose.msk.msra.mxu1 %vm13311_vm14, %v11873_v41 }
0x2374   : > { %11869 = vmatprep.subr.bf16.mxu0 %v14567_v13  ;;  %11879 = vmatprep.subr.bf16.mxu1 %v14567_v13 }
0x2443   : > { %v4058_v30 = vpop.f32.mrb[40].mxu1 }
0x2444   : > { %v4062_v11 = vadd.f32 %v4058_v30, %v3820_v40  ;;  %v11242_v21 = vpop.f32.mrb[41].mxu1  ;;  %v14600_v40 = vld [vmem:[#allocation51_spill] sm:$0xff]  ;;  %v14601_v30 = vld [vmem:[#allocation52_spill] sm:$0xff] }
0x2446   : > { %v4069_v36 = vadd.f32 %v14597_v33, %v4062_v11  ;;  %v13590_v11 = vpack.c.bf16 %v14601_v30, %v14600_v40 }
0x2448   : > { %v4070_v63 = vadd.f32 %v4069_v36, %v13475_v20  ;;  %11871 = vmatpush3.bf16.msra.mxu0 %v13590_v11  ;;  %v13597_v20 = vpack.i.bf16 %v14552_v5, %v14551_v58 }
0x2449   : > { %11876 = vmatprep.subr.bf16.mxu0 %v14567_v13 }
0x244a   : > { %v4071_v38 = vsel %vm1703_vm13, %v4070_v63, 0.0 }
0x244b   : > { %4072 = vadd.xlane.f32.xlu1 %v4071_v38 }
0x24d8   : > { %v4073_v26 = vpop.xlane.xlu1 %4072 }
0x24d9   : > { %v4074_v16 = vmul.f32 0.03125, %v4073_v26 }
0x24db   : > { %v4075_v31 = vsub.f32 %v4070_v63, %v4074_v16  ;;  %v14602_v16 = vld [vmem:[#allocation73_spill] sm:$0xff] }
0x24dd   : > { %v4076_v35 = vmul.f32 %v4075_v31, %v4075_v31 }
0x24df   : > { %v4077_v59 = vsel %vm1703_vm13, %v4076_v35, 0.0 }
0x24e0   : > { %4078 = vadd.xlane.f32.xlu1 %v4077_v59  ;;  %v14603_v59 = vld [vmem:[#allocation74_spill] sm:$0xff] }
0x24f1   : > { %12138 = vrot.lane.b32.xlu1 %v13597_v20, %s12454_s11 }
0x256d   : > { %v4079_v21 = vpop.xlane.xlu1 %4078 }
0x256e   : > { %v4080_v36 = vmul.f32 0.03125, %v4079_v21 }
0x2570   : > { %v4081_v63 = vadd.f32 1e-05, %v4080_v36  ;;  %v14604_v36 = vld [vmem:[#allocation53_spill] sm:$0xff] }
0x2571   : > { %v12139_v40 = vpop.permute.xlu1 %12138 }
0x2572   : > { %12296 = vrsqrt.f32 %v4081_v63  ;;  %v12141_v30 = vunpack.i.h.bf16 %v12139_v40  ;;  %v12140_v41 = vunpack.i.l.bf16 %v12139_v40 }
0x2574   : > { %v11880_v21 = vpack.c.bf16 %v12141_v30, %v12140_v41 }
0x257c   : > { %v12297_v38 = vpop.eup %12296 }
0x257d   : > { %v4083_v26 = vmul.f32 %v12297_v38, %v4075_v31  ;;  %v14605_v38 = vld [vmem:[#allocation54_spill] sm:$0xff] }
0x257f   : > { %v4090_v35 = vmul.f32 %v14602_v16, %v4083_v26 }
0x2581   : > { %v13608_v32 = vadd.f32 %v14603_v59, %v4090_v35 }
0x2583   : > { %11252 = vmatmul.mubr.msk.f32.vlgmr.msra.gmra.mrb[42].mxu0 %vm205_vm0, %v13608_v32 }
0x2584   : > { %11265 = vmatprep.mubr.msk.f32.mxu0 %vm12452_vm6, %v14565_v60 }
0x2656   : > { %v4173_v5 = vpop.f32.mrb[42].mxu0 }
0x2657   : > { %v4174_v63 = vadd.f32 %v14604_v36, %v4173_v5  ;;  %v11253_v50 = vpop.f32.mrb[43].mxu0 }
0x2659   : > { %4347 = vrot.lane.b32.xlu0 %v4174_v63, %s12454_s11  ;;  %11259 = vmatmul.mubr.msk.f32.vlgmr.msra.gmra.mrb[42].mxu1 %vm729_vm9, %v4174_v63 }
0x265a   : > { %11882 = vmatpush3.bf16.xpose.msk.msra.mxu1 %vm13311_vm14, %v11880_v21  ;;  %11272 = vmatprep.mubr.msk.f32.mxu1 %vm12452_vm6, %v14565_v60 }
0x265b   : > { %11287 = vmatprep.subr.mxu1 %v14565_v60 }
0x26cb   : > { %v4348_v31 = vpop.permute.xlu0 %4347 }
0x26cc   : > { %11273 = vmatmul.mubr.msk.f32.vlgmr.msra.gmra.mrb[44].mxu1 %vm729_vm9, %v4348_v31 }
0x26cd   : > { %11288 = vmatpush3.msra.mxu1 %v14605_v38  ;;  %11289 = vmatprep.mubr.msk.f32.mxu1 %vm12452_vm6, %v14565_v60 }
0x26ce   : > { %11890 = vmatprep.subr.bf16.mxu1 %v14567_v13 }
0x272c   : > { %v4252_v50 = vpop.f32.mrb[42].mxu1 }
0x272d   : > { %v4256_v5 = vmul.f32 0.35355338, %v4252_v50  ;;  %v11260_v26 = vpop.f32.mrb[43].mxu1 }
0x272f   : > { %v4257_v35 = vsel %vm1891_vm15, %v4256_v5, -inf }
0x2730   : > { %4258 = vmax.xlane.f32.xlu0 %v4257_v35 }
0x279f   : > { %v4425_v40 = vpop.f32.mrb[44].mxu1 }
0x27a0   : > { %v4429_v30 = vmul.f32 0.35355338, %v4425_v40  ;;  %v11274_v41 = vpop.f32.mrb[45].mxu1 }
0x27a2   : > { %v4430_v21 = vsel %vm1891_vm15, %v4429_v30, -inf }
0x27a3   : > { %4431 = vmax.xlane.f32.xlu1 %v4430_v21 }
0x27b4   : > { %12143 = vrot.lane.b32.xlu1 %v13597_v20, %s12455_s28 }
0x27b8   : > { %12153 = vrot.lane.b32.xlu1 %v13597_v20, %s12460_s22 }
0x27bc   : > { %4666 = vrot.lane.b32.xlu1 %v4174_v63, %s12460_s22 }
0x27bd   : > { %v4259_v31 = vpop.xlane.xlu0 %4258 }
0x27be   : > { %v4260_v50 = vsub.f32 %v4256_v5, %v4259_v31 }
0x27c0   : > { %v4261_v26 = vmul.f32 1.442695, %v4260_v50  ;;  %4913 = vrot.lane.b32.xlu1 %v4174_v63, %s12462_s29 }
0x27c2   : > { %12298 = vpow2.f32 %v4261_v26 }
0x27cc   : > { %v12299_v35 = vpop.eup %12298 }
0x27cd   : > { %v4263_v40 = vsel %vm1891_vm15, %v12299_v35, 0.0 }
0x27ce   : > { %4264 = vadd.xlane.f32.xlu0 %v4263_v40 }
0x2830   : > { %v4432_v41 = vpop.xlane.xlu1 %4431 }
0x2831   : > { %v4433_v21 = vsub.f32 %v4429_v30, %v4432_v41 }
0x2833   : > { %v4434_v51 = vmul.f32 1.442695, %v4433_v21 }
0x2834   : > { %v12144_v52 = vpop.permute.xlu1 %12143 }
0x2835   : > { %12300 = vpow2.f32 %v4434_v51  ;;  %v12146_v53 = vunpack.i.h.bf16 %v12144_v52  ;;  %v12145_v58 = vunpack.i.l.bf16 %v12144_v52 }
0x2837   : > { %v11877_v38 = vpack.c.bf16 %v12146_v53, %v12145_v58 }
0x2839   : > { %11878 = vmatpush3.bf16.msra.mxu0 %v11877_v38 }
0x283a   : > { %11883 = vmatprep.subr.bf16.mxu0 %v14567_v13 }
0x283f   : > { %v12301_v5 = vpop.eup %12300 }
0x2840   : > { %v4436_v31 = vsel %vm1891_vm15, %v12301_v5, 0.0 }
0x2841   : > { %4437 = vadd.xlane.f32.xlu0 %v4436_v31  ;;  %v12154_v31 = vpop.permute.xlu1 %12153 }
0x2857   : > { %12148 = vrot.lane.b32.xlu0 %v13597_v20, %s12456_s20 }
0x285b   : > { %v4265_v63 = vpop.xlane.xlu0 %4264  ;;  %12158 = vrot.lane.b32.xlu0 %v13597_v20, %s12462_s29 }
0x285c   : > { %12302 = vrcp.f32 %v4265_v63  ;;  %v12156_v63 = vunpack.i.h.bf16 %v12154_v31 }
0x2866   : > { %v12303_v50 = vpop.eup %12302 }
0x2867   : > { %v4267_v30 = vmul.f32 %v12303_v50, %v12299_v35  ;;  %v14606_v35 = vld [vmem:[#allocation55_spill] sm:$0xff]  ;;  %v12155_v50 = vunpack.i.l.bf16 %v12154_v31 }
0x2869   : > { %11266 = vmatmul.mubr.msk.f32.vlgmr.msra.gmra.mrb[44].mxu0 %vm14434_vm2, %v4267_v30 }
0x286a   : > { %11279 = vmatprep.mubr.msk.f32.mxu0 %vm12452_vm6, %v14565_v60 }
0x28ce   : > { %v4438_v51 = vpop.xlane.xlu0 %4437 }
0x28cf   : > { %12304 = vrcp.f32 %v4438_v51 }
0x28d2   : > { %v12149_v52 = vpop.permute.xlu0 %12148 }
0x28d3   : > { %v12151_v53 = vunpack.i.h.bf16 %v12149_v52  ;;  %v12150_v58 = vunpack.i.l.bf16 %v12149_v52 }
0x28d5   : > { %v11884_v38 = vpack.c.bf16 %v12151_v53, %v12150_v58 }
0x28d6   : > { %v12159_v30 = vpop.permute.xlu0 %12158 }
0x28d7   : > { %11885 = vmatpush3.bf16.msra.mxu0 %v11884_v38  ;;  %v12161_v53 = vunpack.i.h.bf16 %v12159_v30  ;;  %v12160_v58 = vunpack.i.l.bf16 %v12159_v30 }
0x28d8   : > { %11282 = vmatprep.subr.mxu0 %v14565_v60 }
0x28d9   : > { %v12305_v26 = vpop.eup %12304  ;;  %v11894_v38 = vpack.c.bf16 %v12161_v53, %v12160_v58 }
0x28da   : > { %v4440_v40 = vmul.f32 %v12305_v26, %v12301_v5  ;;  %v11887_v5 = vpack.c.bf16 %v12156_v63, %v12155_v50  ;;  %v4667_v26 = vpop.permute.xlu1 %4666 }
0x28dc   : > { %11280 = vmatmul.mubr.msk.f32.vlgmr.msra.gmra.mrb[46].mxu0 %vm14434_vm2, %v4440_v40 }
0x28dd   : > { %11283 = vmatpush3.msra.mxu0 %v14606_v35  ;;  %11284 = vmatprep.mubr.msk.f32.mxu0 %vm12452_vm6, %v14565_v60 }
0x28de   : > { %11886 = vmatprep.subr.bf16.mxu0 %v14567_v13  ;;  %v4914_v40 = vpop.permute.xlu1 %4913 }
0x293c   : > { %v4343_v41 = vpop.f32.mrb[44].mxu0 }
0x293d   : > { %v11267_v21 = vpop.f32.mrb[45].mxu0  ;;  %11290 = vmatmul.mubr.msk.f32.vlgmr.msra.gmra.mrb[46].mxu1 %vm729_vm9, %v4343_v41 }
0x293e   : > { %11303 = vmatprep.mubr.msk.f32.mxu1 %vm12452_vm6, %v14565_v60 }
0x29af   : > { %v4516_v51 = vpop.f32.mrb[46].mxu0 }
0x29b0   : > { %v11281_v52 = vpop.f32.mrb[47].mxu0  ;;  %11285 = vmatmul.mubr.msk.f32.vlgmr.msra.gmra.mrb[48].mxu0 %vm729_vm9, %v4516_v51 }
0x29b1   : > { %11889 = vmatpush3.bf16.xpose.msk.msra.mxu0 %vm13311_vm14, %v11887_v5  ;;  %11296 = vmatprep.mubr.msk.f32.mxu0 %vm12452_vm6, %v14565_v60 }
0x29b2   : > { %11893 = vmatprep.subr.bf16.mxu0 %v14567_v13 }
0x29b8   : > { %11297 = vmatmul.mubr.msk.f32.vlgmr.msra.gmra.mrb[50].mxu0 %vm729_vm9, %v4667_v26 }
0x29b9   : > { %11896 = vmatpush3.bf16.xpose.msk.msra.mxu0 %vm13311_vm14, %v11894_v38  ;;  %11315 = vmatprep.mubr.msk.f32.mxu0 %vm12452_vm6, %v14565_v60 }
0x29ba   : > { %11900 = vmatprep.subr.bf16.mxu0 %v14567_v13 }
0x29c0   : > { %11316 = vmatmul.mubr.msk.f32.vlgmr.msra.gmra.mrb[52].mxu0 %vm729_vm9, %v4914_v40 }
0x29c1   : > { %11338 = vmatprep.mubr.msk.f32.mxu0 %vm12452_vm6, %v14565_v60 }
0x2a10   : > { %v4662_v41 = vpop.f32.mrb[46].mxu1 }
0x2a11   : > { %v11291_v21 = vpop.f32.mrb[47].mxu1 }
0x2a83   : > { %v4589_v31 = vpop.f32.mrb[48].mxu0 }
0x2a84   : > { %v4663_v63 = vadd.f32 %v4662_v41, %v4589_v31  ;;  %v11286_v50 = vpop.f32.mrb[49].mxu0 }
0x2a8b   : > { %v4744_v5 = vpop.f32.mrb[50].mxu0 }
0x2a8c   : > { %v4748_v30 = vmul.f32 0.35355338, %v4744_v5  ;;  %v11298_v51 = vpop.f32.mrb[51].mxu0 }
0x2a8e   : > { %v4749_v52 = vsel %vm1891_vm15, %v4748_v30, -inf }
0x2a8f   : > { %4750 = vmax.xlane.f32.xlu0 %v4749_v52 }
0x2a93   : > { %v4991_v53 = vpop.f32.mrb[52].mxu0 }
0x2a94   : > { %v11317_v58 = vpop.f32.mrb[53].mxu0  ;;  %v4995_v21 = vmul.f32 0.35355338, %v4991_v53 }
0x2a96   : > { %v4996_v31 = vsel %vm1891_vm15, %v4995_v21, -inf }
0x2aa5   : > { %12163 = vrot.lane.b32.xlu0 %v13597_v20, %s12459_s6 }
0x2b1c   : > { %v4751_v38 = vpop.xlane.xlu0 %4750 }
0x2b1d   : > { %v4752_v26 = vsub.f32 %v4748_v30, %v4751_v38 }
0x2b1f   : > { %v4753_v40 = vmul.f32 1.442695, %v4752_v26 }
0x2b20   : > { %v12164_v50 = vpop.permute.xlu0 %12163 }
0x2b21   : > { %12306 = vpow2.f32 %v4753_v40  ;;  %v12166_v5 = vunpack.i.h.bf16 %v12164_v50  ;;  %v12165_v51 = vunpack.i.l.bf16 %v12164_v50 }
0x2b23   : > { %v11891_v52 = vpack.c.bf16 %v12166_v5, %v12165_v51 }
0x2b25   : > { %11892 = vmatpush3.bf16.msra.mxu1 %v11891_v52 }
0x2b26   : > { %11306 = vmatprep.subr.mxu1 %v14565_v60 }
0x2b2b   : > { %v12307_v35 = vpop.eup %12306 }
0x2b2c   : > { %v4755_v41 = vsel %vm1891_vm15, %v12307_v35, 0.0 }
0x2b2d   : > { %4756 = vadd.xlane.f32.xlu1 %v4755_v41  ;;  %v14607_v41 = vld [vmem:[#allocation56_spill] sm:$0xff] }
0x2b31   : > { %4997 = vmax.xlane.f32.xlu1 %v4996_v31 }
0x2bba   : > { %v4757_v58 = vpop.xlane.xlu1 %4756 }
0x2bbb   : > { %12308 = vrcp.f32 %v4757_v58 }
0x2bbe   : > { %v4998_v30 = vpop.xlane.xlu1 %4997 }
0x2bbf   : > { %v4999_v38 = vsub.f32 %v4995_v21, %v4998_v30 }
0x2bc1   : > { %v5000_v26 = vmul.f32 1.442695, %v4999_v38 }
0x2bc3   : > { %12310 = vpow2.f32 %v5000_v26 }
0x2bc5   : > { %v12309_v53 = vpop.eup %12308 }
0x2bc6   : > { %v4759_v40 = vmul.f32 %v12309_v53, %v12307_v35 }
0x2bc8   : > { %11304 = vmatmul.mubr.msk.f32.vlgmr.msra.gmra.mrb[48].mxu1 %vm14434_vm2, %v4759_v40 }
0x2bc9   : > { %11307 = vmatpush3.msra.mxu1 %v14607_v41  ;;  %11308 = vmatprep.mubr.msk.f32.mxu1 %vm12452_vm6, %v14565_v60 }
0x2bca   : > { %11897 = vmatprep.subr.bf16.mxu1 %v14567_v13 }
0x2bcd   : > { %v12311_v31 = vpop.eup %12310 }
0x2bce   : > { %v5002_v50 = vsel %vm1891_vm15, %v12311_v31, 0.0 }
0x2bcf   : > { %5003 = vadd.xlane.f32.xlu1 %v5002_v50 }
0x2be0   : > { %12168 = vrot.lane.b32.xlu1 %v13597_v20, %s12461_s8  ;;  %v14608_v20 = vld [vmem:[#allocation57_spill] sm:$0xff] }
0x2c5c   : > { %v5004_v21 = vpop.xlane.xlu1 %5003 }
0x2c5d   : > { %12312 = vrcp.f32 %v5004_v21 }
0x2c60   : > { %v12169_v5 = vpop.permute.xlu1 %12168 }
0x2c61   : > { %v12171_v35 = vunpack.i.h.bf16 %v12169_v5  ;;  %v12170_v51 = vunpack.i.l.bf16 %v12169_v5 }
0x2c63   : > { %v11898_v52 = vpack.c.bf16 %v12171_v35, %v12170_v51 }
0x2c67   : > { %v12313_v58 = vpop.eup %12312 }
0x2c68   : > { %v5006_v26 = vmul.f32 %v12313_v58, %v12311_v31 }
0x2c9b   : > { %v4835_v30 = vpop.f32.mrb[48].mxu1 }
0x2c9c   : > { %v11305_v38 = vpop.f32.mrb[49].mxu1  ;;  %11309 = vmatmul.mubr.msk.f32.vlgmr.msra.gmra.mrb[50].mxu1 %vm729_vm9, %v4835_v30 }
0x2c9d   : > { %11899 = vmatpush3.bf16.msra.mxu1 %v11898_v52  ;;  %11322 = vmatprep.mubr.msk.f32.mxu1 %vm12452_vm6, %v14565_v60  ;;  %v14609_v52 = vld [vmem:[#allocation58_spill] sm:$0xff] }
0x2c9e   : > { %11325 = vmatprep.subr.mxu1 %v14565_v60 }
0x2ca0   : > { %11323 = vmatmul.mubr.msk.f32.vlgmr.msra.gmra.mrb[52].mxu1 %vm14434_vm2, %v5006_v26  ;;  %vm5501_vm2 = vcmask 1041408  }
0x2ca1   : > { %11326 = vmatpush3.msra.mxu1 %v14608_v20  ;;  %11327 = vmatprep.mubr.msk.f32.mxu1 %vm12452_vm6, %v14565_v60  ;;  %v14611_v20 = vld [vmem:[#allocation60_spill] sm:$0xff] }
0x2ca2   : > { %11906 = vmatprep.subr.bf16.mxu1 %v14567_v13 }
0x2d6f   : > { %v4908_v53 = vpop.f32.mrb[50].mxu1 }
0x2d70   : > { %v4912_v40 = vadd.f32 %v4908_v53, %v4663_v63  ;;  %v11310_v50 = vpop.f32.mrb[51].mxu1 }
0x2d73   : > { %v5082_v21 = vpop.f32.mrb[52].mxu1 }
0x2d74   : > { %v11324_v5 = vpop.f32.mrb[53].mxu1  ;;  %11328 = vmatmul.mubr.msk.f32.vlgmr.msra.gmra.mrb[54].mxu1 %vm729_vm9, %v5082_v21  ;;  %v14610_v21 = vld [vmem:[#allocation59_spill] sm:$0xff] }
0x2d75   : > { %11357 = vmatprep.mubr.msk.f32.mxu1 %vm12452_vm6, %v14565_v60  ;;  %v13701_v41 = vpack.c.bf16 %v14611_v20, %v14610_v21  ;;  %v14617_v20 = vld [vmem:[#allocation66_spill] sm:$0xff] }
0x2d77   : > { %11902 = vmatpush3.bf16.msra.mxu0 %v13701_v41 }
0x2d78   : > { %11903 = vmatprep.subr.bf16.mxu0 %v14567_v13 }
0x2e47   : > { %v5155_v31 = vpop.f32.mrb[54].mxu1 }
0x2e48   : > { %v5159_v35 = vadd.f32 %v5155_v31, %v4912_v40  ;;  %v11329_v51 = vpop.f32.mrb[55].mxu1  ;;  %v14612_v40 = vld [vmem:[#allocation61_spill] sm:$0xff]  ;;  %v14613_v31 = vld [vmem:[#allocation62_spill] sm:$0xff] }
0x2e49   : > { %v14615_v51 = vld [vmem:[#allocation65_spill] sm:$0xff] }
0x2e4a   : > { %v5166_v58 = vadd.f32 %v14609_v52, %v5159_v35  ;;  %v13706_v35 = vpack.c.bf16 %v14613_v31, %v14612_v40 }
0x2e4c   : > { %v5167_v30 = vadd.f32 %v5166_v58, %v13608_v32  ;;  %11905 = vmatpush3.bf16.msra.mxu0 %v13706_v35  ;;  %v14614_v32 = vld [vmem:[#allocation64_spill] sm:$0xff] }
0x2e4d   : > { %11918 = vmatprep.subr.bf16.mxu0 %v14567_v13  ;;  %v13713_v58 = vpack.c.bf16 %v14615_v51, %v14614_v32  ;;  %v14623_v51 = vld [vmem:[#allocation75_spill] sm:$0xff] }
0x2e4e   : > { %v5168_v38 = vsel %vm1703_vm13, %v5167_v30, 0.0 }
0x2e4f   : > { %5169 = vadd.xlane.f32.xlu0 %v5168_v38  ;;  %14616 = vst [vmem:[#allocation91_spill] sm:$0xff] %v13713_v58  ;;  %11908 = vmatpush3.bf16.msra.mxu1 %v13713_v58 }
0x2e50   : > { %11909 = vmatprep.subr.bf16.mxu1 %v14567_v13 }
0x2edc   : > { %v5170_v26 = vpop.xlane.xlu0 %5169 }
0x2edd   : > { %v5171_v63 = vmul.f32 0.03125, %v5170_v26  ;;  %v14620_v26 = vld [vmem:[#allocation68_spill] sm:$0xff] }
0x2edf   : > { %v5172_v53 = vsub.f32 %v5167_v30, %v5171_v63  ;;  %v14618_v30 = vld [vmem:[#allocation67_spill] sm:$0xff]  ;;  %v14621_v63 = vld [vmem:[#allocation69_spill] sm:$0xff] }
0x2ee0   : > { %v13718_v38 = vpack.c.bf16 %v14618_v30, %v14617_v20  ;;  %v14624_v30 = vld [vmem:[#allocation76_spill] sm:$0xff] }
0x2ee1   : > { %v5173_v50 = vmul.f32 %v5172_v53, %v5172_v53 }
0x2ee2   : > { %14619 = vst [vmem:[#allocation92_spill] sm:$0xff] %v13718_v38  ;;  %11911 = vmatpush3.bf16.msra.mxu1 %v13718_v38 }
0x2ee3   : > { %v5174_v5 = vsel %vm1703_vm13, %v5173_v50, 0.0  ;;  %v13724_v50 = vpack.c.bf16 %v14621_v63, %v14620_v26  ;;  %11912 = vmatprep.subr.bf16.mxu1 %v14567_v13  ;;  %v14625_v26 = vld [vmem:[#allocation70_spill] sm:$0xff]  ;;  %v14626_v63 = vld [vmem:[#allocation71_spill] sm:$0xff] }
0x2ee4   : > { %5175 = vadd.xlane.f32.xlu1 %v5174_v5 }
0x2ee5   : > { %14622 = vst [vmem:[#allocation93_spill] sm:$0xff] %v13724_v50 }
0x2ee6   : > { %11914 = vmatpush3.bf16.msra.mxu1 %v13724_v50  ;;  %v13736_v50 = vpack.c.bf16 %v14626_v63, %v14625_v26 }
0x2ee7   : > { %11915 = vmatprep.subr.bf16.mxu1 %v14567_v13 }
0x2ee8   : > { %14627 = vst [vmem:[#allocation94_spill] sm:$0xff] %v13736_v50 }
0x2eea   : > { %11917 = vmatpush3.bf16.msra.mxu1 %v13736_v50 }
0x2eeb   : > { %11927 = vmatprep.subr.bf16.mxu1 %v14567_v13 }
0x2f71   : > { %v5176_v5 = vpop.xlane.xlu1 %5175 }
0x2f72   : > { %v5177_v21 = vmul.f32 0.03125, %v5176_v5 }
0x2f74   : > { %v5178_v40 = vadd.f32 1e-05, %v5177_v21  ;;  %v14628_v21 = vld [vmem:[#allocation63_spill] sm:$0xff] }
0x2f76   : > { %12314 = vrsqrt.f32 %v5178_v40 }
0x2f80   : > { %v12315_v31 = vpop.eup %12314 }
0x2f81   : > { %v5180_v32 = vmul.f32 %v12315_v31, %v5172_v53 }
0x2f83   : > { %v5187_v20 = vmul.f32 %v14623_v51, %v5180_v32  ;;  %v14631_v51 = vld [vmem:[#allocation10_spill] sm:$0xff] }
0x2f85   : > { %v5194_v52 = vadd.f32 %v14624_v30, %v5187_v20  ;;  %v14629_v20 = vld [vmem:[#allocation72_spill] sm:$0xff] }
0x2f87   : > { %11339 = vmatmul.mubr.msk.f32.vlgmr.msra.gmra.mrb[54].mxu0 %vm205_vm0, %v5194_v52 }
0x2f88   : > { %11368 = vmatprep.mubr.msk.f32.mxu0 %vm12452_vm6, %v14565_v60 }
0x305a   : > { %v5270_v5 = vpop.f32.mrb[54].mxu0 }
0x305b   : > { %v5271_v53 = vadd.f32 %v14628_v21, %v5270_v5  ;;  %v11340_v40 = vpop.f32.mrb[55].mxu0 }
0x305d   : > { %v5274_v31 = vmax.f32 %v5271_v53, 0.0 }
0x305f   : > { %11358 = vmatmul.mubr.msk.f32.vlgmr.msra.gmra.mrb[56].mxu1 %vm14433_vm3, %v5274_v31 }
0x3060   : > { %11929 = vmatpush3.bf16.msra.mxu1 %v13159_v8  ;;  %11388 = vmatprep.mubr.msk.f32.mxu1 %vm12452_vm6, %v14565_v60 }
0x3061   : > { %11930 = vmatprep.subr.bf16.mxu1 %v14567_v13 }
0x3064   : > { %11932 = vmatpush3.bf16.msra.mxu1 %v13178_v9  ;;  %v14630_v9 = vld [vmem:[#allocation9_spill] sm:$0xff] }
0x3065   : > { %11401 = vmatprep.subr.mxu1 %v14565_v60  ;;  %v13753_v50 = vpack.c.bf16 %v14631_v51, %v14630_v9 }
0x3067   : > { %14632 = vst [vmem:[#allocation95_spill] sm:$0xff] %v13753_v50  ;;  %11920 = vmatpush3.bf16.msra.mxu0 %v13753_v50 }
0x3068   : > { %11921 = vmatprep.subr.bf16.mxu0 %v14567_v13 }
0x3132   : > { %v5350_v32 = vpop.f32.mrb[56].mxu1 }
0x3133   : > { %v5351_v26 = vadd.f32 %v14629_v20, %v5350_v32  ;;  %v11359_v63 = vpop.f32.mrb[57].mxu1  ;;  %v14633_v32 = vld [vmem:[#allocation11_spill] sm:$0xff] }
0x3135   : > { %v5354_v5 = vadd.f32 %v5351_v26, %v5194_v52  ;;  %v14634_v52 = vld [vmem:[#allocation12_spill] sm:$0xff] }
0x3136   : > { %v13758_v26 = vpack.c.bf16 %v14634_v52, %v14633_v32  ;;  %v14638_v52 = vld [vmem:[#allocation78_spill] sm:$0xff] }
0x3137   : > { %v5355_v53 = vsel %vm1703_vm13, %v5354_v5, 0.0 }
0x3138   : > { %5356 = vadd.xlane.f32.xlu0 %v5355_v53  ;;  %14635 = vst [vmem:[#allocation96_spill] sm:$0xff] %v13758_v26  ;;  %11923 = vmatpush3.bf16.msra.mxu0 %v13758_v26 }
0x3139   : > { %11924 = vmatprep.subr.bf16.mxu0 %v14567_v13 }
0x31c5   : > { %v5357_v40 = vpop.xlane.xlu0 %5356 }
0x31c6   : > { %v5358_v8 = vmul.f32 0.03125, %v5357_v40  ;;  %v14636_v40 = vld [vmem:[#allocation79_spill] sm:$0xff] }
0x31c8   : > { %v5359_v31 = vsub.f32 %v5354_v5, %v5358_v8  ;;  %v14637_v8 = vld [vmem:[#allocation77_spill] sm:$0xff] }
0x31ca   : > { %v5360_v21 = vmul.f32 %v5359_v31, %v5359_v31 }
0x31cc   : > { %v5361_v30 = vsel %vm1703_vm13, %v5360_v21, 0.0 }
0x31cd   : > { %5362 = vadd.xlane.f32.xlu0 %v5361_v30  ;;  %v14436_v30 = vstv %s12448_s14 }
0x31ce   : > { %vm5383_vm4 = vcmp.eq.s32.totalorder %v14636_v40, %v14436_v30 }
0x31cf   : > { %v13769_v32 = vsel %vm5383_vm4, 1.0, %v14565_v60 }
0x325a   : > { %v5363_v63 = vpop.xlane.xlu0 %5362 }
0x325b   : > { %v5364_v5 = vmul.f32 0.03125, %v5363_v63 }
0x325d   : > { %v5365_v21 = vadd.f32 1e-05, %v5364_v5 }
0x325f   : > { %12316 = vrsqrt.f32 %v5365_v21 }
0x3269   : > { %v12317_v53 = vpop.eup %12316 }
0x326a   : > { %v5367_v51 = vmul.f32 %v12317_v53, %v5359_v31  ;;  %v14640_v53 = vld [vmem:[#allocation80_spill] sm:$0xff] }
0x326c   : > { %v5374_v9 = vmul.f32 %v14637_v8, %v5367_v51  ;;  %v14641_v51 = vcvt.s32.f32 %v14640_v53 }
0x326e   : > { %v5381_v20 = vadd.f32 %v14638_v52, %v5374_v9 }
0x3270   : > { %v5386_v26 = vmul.f32 %v13769_v32, %v5381_v20  ;;  %v14639_v20 = vld [vmem:[#allocation13_spill] sm:$0xff] }
0x3272   : > { %v5387_v50 = vsel %vm1703_vm13, %v5386_v26, 0.0 }
0x3273   : > { %v5388_v63 = vrot.slane %v5387_v50, 4 }
0x3275   : > { %v5389_v5 = vadd.f32 %v5388_v63, %v5387_v50 }
0x3277   : > { %v5390_v21 = vrot.slane %v5389_v5, 2 }
0x3279   : > { %v5391_v38 = vadd.f32 %v5390_v21, %v5389_v5  ;;  %v14435_v21 = vsub.s32 0, %v14636_v40 }
0x327b   : > { %v5392_v58 = vrot.slane %v5391_v38, 1 }
0x327d   : > { %v5393_v31 = vadd.f32 %v5392_v58, %v5391_v38 }
0x327f   : > { %11369 = vmatmul.mubr.msk.f32.vlgmr.msra.gmra.mrb[56].mxu0 %vm205_vm0, %v5393_v31 }
0x3280   : > { %11926 = vmatpush3.bf16.msra.mxu0 %v13153_v7  ;;  %11377 = vmatprep.mubr.msk.f32.mxu0 %vm12452_vm6, %v14565_v60 }
0x3281   : > { %11375 = vmatprep.subr.mxu0 %v14565_v60 }
0x3284   : > { %11376 = vmatpush3.msk.msra.mxu0 %vm573_vm7, %v14550_v2 }
0x3285   : > { %11391 = vmatprep.subr.mxu0 %v14565_v60 }
0x3352   : > { %v5463_v50 = vpop.f32.mrb[56].mxu0 }
0x3353   : > { %v5464_v26 = vadd.f32 %v5463_v50, %v14639_v20  ;;  %v11370_v58 = vpop.f32.mrb[57].mxu0  ;;  %v5478_v50 = vstv %s13788_s9 }
0x3354   : > { %vm5479_vm7 = vcmp.eq.s32.totalorder %v14636_v40, %v5478_v50 }
0x3355   : > { %v5468_v38 = vsel %vm14432_vm5, %v5464_v26, -inf }
0x3356   : > { %5469 = vmax.xlane.f32.xlu0 %v5468_v38  ;;  %v14643_v38 = vld [vmem:[#allocation81_spill] sm:$0xff] }
0x33e3   : > { %v5470_v7 = vpop.xlane.xlu0 %5469 }
0x33e4   : > { %vm5471_vm4 = vcmp.eq.f32.partialorder %v5464_v26, %v5470_v7 }
0x33e5   : > { %v5472_v9 = vsel %vm5471_vm4, %v14641_v51, 20.0  ;;  %vm5480_vm4 = vcmp.eq.s32.totalorder %v14643_v38, %v5478_v50 }
0x33e6   : > { %v5473_v63 = vsel %vm14432_vm5, %v5472_v9, inf }
0x33e7   : > { %5474 = vmin.xlane.f32.xlu0 %v5473_v63 }
0x3474   : > { %v5475_v5 = vpop.xlane.xlu0 %5474 }
0x3475   : > { %v12049_v31 = vtrunc.f32 %v5475_v5 }
0x3477   : > { %v12050_v58 = vcvt.f32.s32 %v12049_v31 }
0x3479   : > { %v13795_v26 = vrot.slane %v12050_v58, %v14435_v21  ;;  %v14646_v21 = vld [vmem:[#allocation8_spill] sm:$0xff] }
0x347b   : > { %14642 = vst [vmem:[#allocation97_spill] sm:$0xff] %v13795_v26  ;;  %vm5485_vm1 = vcmp.eq.s32.totalorder %v14640_v53, %v13795_v26 }
0x347c   : > { %vm5486_vm5 = vmand %vm5479_vm7, %vm5485_vm1 }
0x347d   : > { %vm5487_vm3 = vmand %vm5480_vm4, %vm5485_vm1  ;;  %v10474_v7 = vsel %vm5486_vm5, 1.0, %v14565_v60  ;;  %vm14652_vm1 = vcmask 130048   ;;  %vm14657_vm5 = vcmask 523264  }
0x347e   : > { %v10475_v51 = vsel %vm5487_vm3, 1.0, %v14565_v60  ;;  %v13803_v9 = vadd.f32 %v12444_v61, %v10474_v7  ;;  %v14647_v7 = vld [vmem:[#allocation18_spill] sm:$0xff]  ;;  %vm14656_vm3 = vmmov %vm14652_vm1 }
0x347f   : > { %v13806_v63 = vadd.f32 %v12440_v54, %v10475_v51 }
0x3480   : > { %14644 = vst [vmem:[#allocation98_spill] sm:$0xff] %v13803_v9  ;;  %v5502_v5 = vrot.slane %v13803_v9, 6 }
0x3481   : > { %14645 = vst [vmem:[#allocation99_spill] sm:$0xff] %v13806_v63  ;;  %v5503_v31 = vrot.slane %v13806_v63, 6 }
0x3483   : > { %v5504_v50 = vsel %vm5501_vm2, %v5502_v5, %v5503_v31  ;;  %vm14655_vm2 = vmmov %vm14652_vm1 }
0x3484   : > { %11378 = vmatmul.mubr.msk.f32.vlgmr.msra.gmra.mrb[58].mxu0 %vm569_vm8, %v5504_v50  ;;  %vm14653_vm8 = vmmov %vm14652_vm1 }
0x3485   : > { %11393 = vmatprep.mubr.msk.f32.mxu0 %vm12452_vm6, %v14565_v60 }
0x3557   : > { %v5573_v58 = vpop.f32.mrb[58].mxu0 }
0x3558   : > { %v13814_v30 = vadd.f32 %v5573_v58, %v14646_v21  ;;  %v11379_v61 = vpop.f32.mrb[59].mxu0  ;;  %v14648_v58 = vld [vmem:[#allocation19_spill] sm:$0xff] }
0x355a   : > { %11389 = vmatmul.mubr.msk.f32.vlgmr.msra.gmra.mrb[58].mxu1 %vm205_vm0, %v13814_v30 }
0x355b   : > { %11403 = vmatprep.mubr.msk.f32.mxu1 %vm12452_vm6, %v14565_v60 }
0x362d   : > { %v5646_v54 = vpop.f32.mrb[58].mxu1 }
0x362e   : > { %v13821_v51 = vadd.f32 %v14647_v7, %v5646_v54  ;;  %v11390_v5 = vpop.f32.mrb[59].mxu1 }
0x3630   : > { %5819 = vrot.lane.b32.xlu0 %v13821_v51, %s12456_s20  ;;  %5651 = vrot.lane.b32.xlu1 %v13821_v51, %s12455_s28 }
0x3634   : > { %5817 = vrot.lane.b32.xlu1 %v13821_v51, %s12454_s11 }
0x36a2   : > { %v5820_v21 = vpop.permute.xlu0 %5819  ;;  %v5652_v31 = vpop.permute.xlu1 %5651 }
0x36a3   : > { %11392 = vmatpush3.xpose.msk.msra.mxu0 %vm729_vm9, %v5652_v31  ;;  %11402 = vmatpush3.xpose.msk.msra.mxu1 %vm729_vm9, %v5820_v21 }
0x36a4   : > { %11396 = vmatprep.subr.mxu0 %v14565_v60  ;;  %11411 = vmatprep.subr.mxu1 %v14565_v60 }
0x36a6   : > { %11394 = vmatmul.mubr.msk.f32.vlgmr.msra.gmra.mrb[60].mxu0 %vm729_vm9, %v13821_v51  ;;  %v5818_v50 = vpop.permute.xlu1 %5817 }
0x36a7   : > { %11404 = vmatmul.mubr.msk.f32.vlgmr.msra.gmra.mrb[60].mxu1 %vm729_vm9, %v5818_v50  ;;  %11398 = vmatprep.mubr.msk.f32.mxu0 %vm12452_vm6, %v14565_v60 }
0x36a8   : > { %11412 = vmatpush3.msra.mxu1 %v14648_v58  ;;  %11413 = vmatprep.mubr.msk.f32.mxu1 %vm12452_vm6, %v14565_v60 }
0x36a9   : > { %11421 = vmatprep.subr.mxu1 %v14565_v60 }
0x3779   : > { %v5723_v61 = vpop.f32.mrb[60].mxu0 }
0x377a   : > { %v5727_v54 = vmul.f32 0.35355338, %v5723_v61  ;;  %v11395_v7 = vpop.f32.mrb[61].mxu0  ;;  %v5891_v5 = vpop.f32.mrb[60].mxu1 }
0x377b   : > { %v5895_v21 = vmul.f32 0.35355338, %v5891_v5  ;;  %v11405_v31 = vpop.f32.mrb[61].mxu1 }
0x377c   : > { %v5728_v2 = vadd.f32 %v5727_v54, %v12625_v4 }
0x377d   : > { %v5896_v50 = vadd.f32 %v5895_v21, %v12625_v4 }
0x377e   : > { %v5729_v63 = vsel %vm806_vm10, %v5728_v2, -inf }
0x377f   : > { %5730 = vmax.xlane.f32.xlu1 %v5729_v63  ;;  %v5897_v58 = vsel %vm806_vm10, %v5896_v50, -inf }
0x3780   : > { %5898 = vmax.xlane.f32.xlu0 %v5897_v58 }
0x380c   : > { %v5731_v9 = vpop.xlane.xlu1 %5730 }
0x380d   : > { %v5732_v38 = vsub.f32 %v5728_v2, %v5731_v9  ;;  %v5899_v26 = vpop.xlane.xlu0 %5898 }
0x380e   : > { %v5900_v40 = vsub.f32 %v5896_v50, %v5899_v26 }
0x380f   : > { %v5733_v53 = vmul.f32 1.442695, %v5732_v38 }
0x3810   : > { %v5901_v61 = vmul.f32 1.442695, %v5900_v40 }
0x3811   : > { %12318 = vpow2.f32 %v5733_v53 }
0x3812   : > { %12320 = vpow2.f32 %v5901_v61 }
0x381b   : > { %v12319_v7 = vpop.eup %12318 }
0x381c   : > { %v12321_v5 = vpop.eup %12320  ;;  %v5735_v54 = vsel %vm806_vm10, %v12319_v7, 0.0 }
0x381d   : > { %5736 = vadd.xlane.f32.xlu0 %v5735_v54  ;;  %v5903_v21 = vsel %vm806_vm10, %v12321_v5, 0.0 }
0x381e   : > { %5904 = vadd.xlane.f32.xlu1 %v5903_v21 }
0x382f   : > { %5908 = vrot.lane.b32.xlu1 %v13821_v51, %s12457_s15 }
0x3833   : > { %6133 = vrot.lane.b32.xlu1 %v13821_v51, %s12459_s6  ;;  %5740 = vrot.lane.b32.xlu0 %v13821_v51, %s12458_s21 }
0x3837   : > { %6131 = vrot.lane.b32.xlu0 %v13821_v51, %s12460_s22 }
0x38aa   : > { %v5737_v2 = vpop.xlane.xlu0 %5736 }
0x38ab   : > { %12322 = vrcp.f32 %v5737_v2  ;;  %v5905_v40 = vpop.xlane.xlu1 %5904 }
0x38ac   : > { %12324 = vrcp.f32 %v5905_v40 }
0x38ae   : > { %v5741_v53 = vpop.permute.xlu0 %5740 }
0x38af   : > { %11397 = vmatpush3.msk.msra.mxu0 %vm824_vm11, %v5741_v53  ;;  %v5909_v63 = vpop.permute.xlu1 %5908 }
0x38b0   : > { %11406 = vmatprep.subr.mxu0 %v14565_v60 }
0x38b2   : > { %v6132_v54 = vpop.permute.xlu0 %6131 }
0x38b5   : > { %v12323_v26 = vpop.eup %12322 }
0x38b6   : > { %v5739_v38 = vmul.f32 %v12323_v26, %v12319_v7  ;;  %v12325_v9 = vpop.eup %12324  ;;  %v6134_v7 = vpop.permute.xlu1 %6133 }
0x38b7   : > { %v5907_v31 = vmul.f32 %v12325_v9, %v12321_v5 }
0x38b8   : > { %11399 = vmatmul.mubr.msk.f32.vlgmr.msra.gmra.mrb[62].mxu0 %vm820_vm12, %v5739_v38 }
0x38b9   : > { %11407 = vmatpush3.msk.msra.mxu0 %vm824_vm11, %v5909_v63  ;;  %11408 = vmatprep.mubr.msk.f32.mxu0 %vm12452_vm6, %v14565_v60 }
0x38ba   : > { %11416 = vmatprep.subr.mxu0 %v14565_v60 }
0x38bc   : > { %11409 = vmatmul.mubr.msk.f32.vlgmr.msra.gmra.mrb[64].mxu0 %vm820_vm12, %v5907_v31 }
0x38bd   : > { %11417 = vmatpush3.msra.mxu0 %v12680_v15  ;;  %11418 = vmatprep.mubr.msk.f32.mxu0 %vm12452_vm6, %v14565_v60 }
0x38be   : > { %11426 = vmatprep.subr.mxu0 %v14565_v60 }
0x398b   : > { %v5813_v50 = vpop.f32.mrb[62].mxu0 }
0x398c   : > { %v11400_v58 = vpop.f32.mrb[63].mxu0  ;;  %11419 = vmatmul.mubr.msk.f32.vlgmr.msra.gmra.mrb[66].mxu0 %vm729_vm9, %v5813_v50 }
0x398d   : > { %11428 = vmatprep.mubr.msk.f32.mxu0 %vm12452_vm6, %v14565_v60 }
0x398f   : > { %v5981_v61 = vpop.f32.mrb[64].mxu0 }
0x3990   : > { %v11410_v5 = vpop.f32.mrb[65].mxu0  ;;  %11414 = vmatmul.mubr.msk.f32.vlgmr.msra.gmra.mrb[62].mxu1 %vm729_vm9, %v5981_v61 }
0x3991   : > { %11422 = vmatpush3.xpose.msk.msra.mxu1 %vm729_vm9, %v6134_v7  ;;  %11423 = vmatprep.mubr.msk.f32.mxu1 %vm12452_vm6, %v14565_v60 }
0x3992   : > { %11431 = vmatprep.subr.mxu1 %v14565_v60 }
0x3994   : > { %11424 = vmatmul.mubr.msk.f32.vlgmr.msra.gmra.mrb[64].mxu1 %vm729_vm9, %v6132_v54 }
0x3995   : > { %11432 = vmatpush3.msra.mxu1 %v12690_v17  ;;  %11433 = vmatprep.mubr.msk.f32.mxu1 %vm12452_vm6, %v14565_v60 }
0x3996   : > { %11441 = vmatprep.subr.mxu1 %v14565_v60 }
0x3a5f   : > { %v6127_v21 = vpop.f32.mrb[66].mxu0 }
0x3a60   : > { %v11420_v2 = vpop.f32.mrb[67].mxu0 }
0x3a63   : > { %v6054_v40 = vpop.f32.mrb[62].mxu1 }
0x3a64   : > { %v6128_v53 = vadd.f32 %v6127_v21, %v6054_v40  ;;  %v11415_v26 = vpop.f32.mrb[63].mxu1 }
0x3a67   : > { %v6205_v38 = vpop.f32.mrb[64].mxu1 }
0x3a68   : > { %v6209_v9 = vmul.f32 0.35355338, %v6205_v38  ;;  %v11425_v63 = vpop.f32.mrb[65].mxu1 }
0x3a69   : > { %v14649_v63 = vld [vmem:[#allocation20_spill] sm:$0xff] }
0x3a6a   : > { %v6210_v31 = vadd.f32 %v6209_v9, %v12625_v4 }
0x3a6c   : > { %v6211_v50 = vsel %vm806_vm10, %v6210_v31, -inf }
0x3a6d   : > { %6212 = vmax.xlane.f32.xlu1 %v6211_v50 }
0x3a7e   : > { %6375 = vrot.lane.b32.xlu1 %v13821_v51, %s12461_s8 }
0x3a82   : > { %6373 = vrot.lane.b32.xlu1 %v13821_v51, %s12462_s29 }
0x3afa   : > { %v6213_v58 = vpop.xlane.xlu1 %6212 }
0x3afb   : > { %v6214_v61 = vsub.f32 %v6210_v31, %v6213_v58 }
0x3afd   : > { %v6215_v7 = vmul.f32 1.442695, %v6214_v61 }
0x3afe   : > { %v6376_v26 = vpop.permute.xlu1 %6375 }
0x3aff   : > { %12326 = vpow2.f32 %v6215_v7 }
0x3b02   : > { %v6374_v9 = vpop.permute.xlu1 %6373 }
0x3b09   : > { %v12327_v5 = vpop.eup %12326 }
0x3b0a   : > { %v6217_v54 = vsel %vm806_vm10, %v12327_v5, 0.0 }
0x3b0b   : > { %6218 = vadd.xlane.f32.xlu0 %v6217_v54 }
0x3b21   : > { %6222 = vrot.lane.b32.xlu0 %v13821_v51, %s12463_s23 }
0x3b98   : > { %v6219_v21 = vpop.xlane.xlu0 %6218 }
0x3b99   : > { %12328 = vrcp.f32 %v6219_v21 }
0x3b9c   : > { %v6223_v2 = vpop.permute.xlu0 %6222 }
0x3b9d   : > { %11427 = vmatpush3.msk.msra.mxu0 %vm824_vm11, %v6223_v2 }
0x3b9e   : > { %11436 = vmatprep.subr.mxu0 %v14565_v60 }
0x3ba3   : > { %v12329_v40 = vpop.eup %12328 }
0x3ba4   : > { %v6221_v38 = vmul.f32 %v12329_v40, %v12327_v5 }
0x3ba6   : > { %11429 = vmatmul.mubr.msk.f32.vlgmr.msra.gmra.mrb[68].mxu0 %vm820_vm12, %v6221_v38 }
0x3ba7   : > { %11437 = vmatpush3.xpose.msk.msra.mxu0 %vm729_vm9, %v6376_v26  ;;  %11438 = vmatprep.mubr.msk.f32.mxu0 %vm12452_vm6, %v14565_v60 }
0x3ba8   : > { %11446 = vmatprep.subr.mxu0 %v14565_v60 }
0x3baa   : > { %11439 = vmatmul.mubr.msk.f32.vlgmr.msra.gmra.mrb[70].mxu0 %vm729_vm9, %v6374_v9 }
0x3bab   : > { %11447 = vmatpush3.msra.mxu0 %v14649_v63  ;;  %11448 = vmatprep.mubr.msk.f32.mxu0 %vm12452_vm6, %v14565_v60 }
0x3bac   : > { %11939 = vmatprep.subr.bf16.mxu0 %v14567_v13 }
0x3c79   : > { %v6295_v31 = vpop.f32.mrb[68].mxu0 }
0x3c7a   : > { %v11430_v50 = vpop.f32.mrb[69].mxu0  ;;  %11434 = vmatmul.mubr.msk.f32.vlgmr.msra.gmra.mrb[66].mxu1 %vm729_vm9, %v6295_v31 }
0x3c7b   : > { %11443 = vmatprep.mubr.msk.f32.mxu1 %vm12452_vm6, %v14565_v60 }
0x3c7d   : > { %v6447_v58 = vpop.f32.mrb[70].mxu0 }
0x3c7e   : > { %v6451_v61 = vmul.f32 0.35355338, %v6447_v58  ;;  %v11440_v7 = vpop.f32.mrb[71].mxu0 }
0x3c80   : > { %v6452_v5 = vadd.f32 %v6451_v61, %v12625_v4 }
0x3c82   : > { %v6453_v54 = vsel %vm806_vm10, %v6452_v5, -inf }
0x3c83   : > { %6454 = vmax.xlane.f32.xlu0 %v6453_v54 }
0x3c99   : > { %6464 = vrot.lane.b32.xlu0 %v13821_v51, %s12464_s0 }
0x3d10   : > { %v6455_v21 = vpop.xlane.xlu0 %6454 }
0x3d11   : > { %v6456_v2 = vsub.f32 %v6452_v5, %v6455_v21 }
0x3d13   : > { %v6457_v40 = vmul.f32 1.442695, %v6456_v2 }
0x3d14   : > { %v6465_v26 = vpop.permute.xlu0 %6464 }
0x3d15   : > { %12330 = vpow2.f32 %v6457_v40  ;;  %11442 = vmatpush3.msk.msra.mxu1 %vm824_vm11, %v6465_v26 }
0x3d16   : > { %11933 = vmatprep.subr.bf16.mxu1 %v14567_v13 }
0x3d1f   : > { %v12331_v38 = vpop.eup %12330 }
0x3d20   : > { %v6459_v9 = vsel %vm806_vm10, %v12331_v38, 0.0 }
0x3d21   : > { %6460 = vadd.xlane.f32.xlu1 %v6459_v9 }
0x3d4d   : > { %v6368_v63 = vpop.f32.mrb[66].mxu1 }
0x3d4e   : > { %v6372_v31 = vadd.f32 %v6368_v63, %v6128_v53  ;;  %v11435_v50 = vpop.f32.mrb[67].mxu1 }
0x3d4f   : > { %v14650_v50 = vld [vmem:[#allocation85_spill] sm:$0xff] }
0x3dae   : > { %v6461_v58 = vpop.xlane.xlu1 %6460 }
0x3daf   : > { %12332 = vrcp.f32 %v6461_v58  ;;  %v14651_v58 = vld [vmem:[#allocation83_spill] sm:$0xff] }
0x3db9   : > { %v12333_v61 = vpop.eup %12332 }
0x3dba   : > { %v6463_v51 = vmul.f32 %v12333_v61, %v12331_v38  ;;  %v13928_v61 = vpack.i.bf16 %v14651_v58, %v14650_v50 }
0x3dbc   : > { %11444 = vmatmul.mubr.msk.f32.vlgmr.msra.gmra.mrb[68].mxu1 %vm820_vm12, %v6463_v51 }
0x3dbd   : > { %11935 = vmatpush3.bf16.msra.mxu1 %v13293_v56  ;;  %11459 = vmatprep.mubr.msk.f32.mxu1 %vm12452_vm6, %v14565_v60 }
0x3dbe   : > { %11936 = vmatprep.subr.bf16.mxu1 %v14567_v13 }
0x3dc1   : > { %11938 = vmatpush3.bf16.msra.mxu1 %v13298_v14 }
0x3dc2   : > { %11943 = vmatprep.subr.bf16.mxu1 %v14567_v13 }
0x3e8f   : > { %v6537_v7 = vpop.f32.mrb[68].mxu1 }
0x3e90   : > { %v11445_v53 = vpop.f32.mrb[69].mxu1  ;;  %11449 = vmatmul.mubr.msk.f32.vlgmr.msra.gmra.mrb[72].mxu0 %vm729_vm9, %v6537_v7 }
0x3e91   : > { %11466 = vmatprep.mubr.msk.f32.mxu0 %vm12452_vm6, %v14565_v60 }
0x3f63   : > { %v6610_v5 = vpop.f32.mrb[72].mxu0 }
0x3f64   : > { %v6614_v54 = vadd.f32 %v6610_v5, %v6372_v31  ;;  %v11450_v21 = vpop.f32.mrb[73].mxu0  ;;  %v11940_v31 = vpack.c.bf16 %v14651_v58, %v14650_v50 }
0x3f66   : > { %v6615_v56 = vadd.f32 %v12700_v19, %v6614_v54  ;;  %11942 = vmatpush3.bf16.xpose.msk.msra.mxu0 %vm13311_vm14, %v11940_v31 }
0x3f67   : > { %11946 = vmatprep.subr.bf16.mxu0 %v14567_v13 }
0x3f68   : > { %v6616_v2 = vadd.f32 %v6615_v56, %v13814_v30 }
0x3f6a   : > { %v6617_v40 = vsel %vm1703_vm13, %v6616_v2, 0.0 }
0x3f6b   : > { %6618 = vadd.xlane.f32.xlu1 %v6617_v40 }
0x3ff8   : > { %v6619_v14 = vpop.xlane.xlu1 %6618 }
0x3ff9   : > { %v6620_v26 = vmul.f32 0.03125, %v6619_v14 }
0x3ffb   : > { %v6621_v38 = vsub.f32 %v6616_v2, %v6620_v26 }
0x3ffd   : > { %v6622_v9 = vmul.f32 %v6621_v38, %v6621_v38 }
0x3fff   : > { %v6623_v63 = vsel %vm1703_vm13, %v6622_v9, 0.0 }
0x4000   : > { %6624 = vadd.xlane.f32.xlu1 %v6623_v63 }
0x4011   : > { %12173 = vrot.lane.b32.xlu1 %v13928_v61, %s12454_s11 }
0x408d   : > { %v6625_v30 = vpop.xlane.xlu1 %6624 }
0x408e   : > { %v6626_v51 = vmul.f32 0.03125, %v6625_v30 }
0x4090   : > { %v6627_v7 = vadd.f32 1e-05, %v6626_v51 }
0x4091   : > { %v12174_v56 = vpop.permute.xlu1 %12173 }
0x4092   : > { %12334 = vrsqrt.f32 %v6627_v7  ;;  %v12176_v2 = vunpack.i.h.bf16 %v12174_v56  ;;  %v12175_v40 = vunpack.i.l.bf16 %v12174_v56 }
0x4094   : > { %v11947_v26 = vpack.c.bf16 %v12176_v2, %v12175_v40 }
0x409c   : > { %v12335_v53 = vpop.eup %12334 }
0x409d   : > { %v6629_v5 = vmul.f32 %v12335_v53, %v6621_v38 }
0x409f   : > { %v6630_v54 = vmul.f32 %v12825_v44, %v6629_v5 }
0x40a1   : > { %v13939_v21 = vadd.f32 %v12830_v45, %v6630_v54 }
0x40a3   : > { %11460 = vmatmul.mubr.msk.f32.vlgmr.msra.gmra.mrb[70].mxu1 %vm205_vm0, %v13939_v21 }
0x40a4   : > { %11473 = vmatprep.mubr.msk.f32.mxu1 %vm12452_vm6, %v14565_v60 }
0x4176   : > { %v6701_v14 = vpop.f32.mrb[70].mxu1 }
0x4177   : > { %v6702_v9 = vadd.f32 %v12725_v24, %v6701_v14  ;;  %v11461_v63 = vpop.f32.mrb[71].mxu1 }
0x4179   : > { %6875 = vrot.lane.b32.xlu0 %v6702_v9, %s12454_s11  ;;  %11467 = vmatmul.mubr.msk.f32.vlgmr.msra.gmra.mrb[74].mxu0 %vm729_vm9, %v6702_v9 }
0x417a   : > { %11949 = vmatpush3.bf16.xpose.msk.msra.mxu0 %vm13311_vm14, %v11947_v26  ;;  %11480 = vmatprep.mubr.msk.f32.mxu0 %vm12452_vm6, %v14565_v60 }
0x417b   : > { %11495 = vmatprep.subr.mxu0 %v14565_v60 }
0x41eb   : > { %v6876_v38 = vpop.permute.xlu0 %6875 }
0x41ec   : > { %11481 = vmatmul.mubr.msk.f32.vlgmr.msra.gmra.mrb[76].mxu0 %vm729_vm9, %v6876_v38 }
0x41ed   : > { %11496 = vmatpush3.msra.mxu0 %v12730_v25  ;;  %11497 = vmatprep.mubr.msk.f32.mxu0 %vm12452_vm6, %v14565_v60 }
0x41ee   : > { %11957 = vmatprep.subr.bf16.mxu0 %v14567_v13 }
0x424c   : > { %v6780_v31 = vpop.f32.mrb[74].mxu0 }
0x424d   : > { %v6784_v30 = vmul.f32 0.35355338, %v6780_v31  ;;  %v11468_v51 = vpop.f32.mrb[75].mxu0 }
0x424f   : > { %v6785_v7 = vsel %vm1891_vm15, %v6784_v30, -inf }
0x4250   : > { %6786 = vmax.xlane.f32.xlu0 %v6785_v7 }
0x42bf   : > { %v6953_v53 = vpop.f32.mrb[76].mxu0 }
0x42c0   : > { %v6957_v5 = vmul.f32 0.35355338, %v6953_v53  ;;  %v11482_v54 = vpop.f32.mrb[77].mxu0 }
0x42c2   : > { %v6958_v56 = vsel %vm1891_vm15, %v6957_v5, -inf }
0x42c3   : > { %6959 = vmax.xlane.f32.xlu1 %v6958_v56 }
0x42d4   : > { %12183 = vrot.lane.b32.xlu1 %v13928_v61, %s12456_s20 }
0x42d8   : > { %12188 = vrot.lane.b32.xlu1 %v13928_v61, %s12460_s22 }
0x42dc   : > { %12193 = vrot.lane.b32.xlu1 %v13928_v61, %s12462_s29 }
0x42dd   : > { %v6787_v2 = vpop.xlane.xlu0 %6786 }
0x42de   : > { %v6788_v40 = vsub.f32 %v6784_v30, %v6787_v2 }
0x42e0   : > { %v6789_v14 = vmul.f32 1.442695, %v6788_v40 }
0x42e2   : > { %12336 = vpow2.f32 %v6789_v14 }
0x42ec   : > { %v12337_v26 = vpop.eup %12336 }
0x42ed   : > { %v6791_v63 = vsel %vm1891_vm15, %v12337_v26, 0.0 }
0x42ee   : > { %6792 = vadd.xlane.f32.xlu0 %v6791_v63 }
0x4350   : > { %v6960_v38 = vpop.xlane.xlu1 %6959 }
0x4351   : > { %v6961_v31 = vsub.f32 %v6957_v5, %v6960_v38 }
0x4353   : > { %v6962_v51 = vmul.f32 1.442695, %v6961_v31 }
0x4354   : > { %v12184_v54 = vpop.permute.xlu1 %12183 }
0x4355   : > { %12338 = vpow2.f32 %v6962_v51  ;;  %v12186_v14 = vunpack.i.h.bf16 %v12184_v54  ;;  %v12185_v63 = vunpack.i.l.bf16 %v12184_v54 }
0x4357   : > { %v11951_v51 = vpack.c.bf16 %v12186_v14, %v12185_v63 }
0x435f   : > { %v12339_v7 = vpop.eup %12338 }
0x4360   : > { %v6964_v53 = vsel %vm1891_vm15, %v12339_v7, 0.0 }
0x4361   : > { %6965 = vadd.xlane.f32.xlu0 %v6964_v53 }
0x4377   : > { %12178 = vrot.lane.b32.xlu0 %v13928_v61, %s12455_s28 }
0x437b   : > { %7194 = vrot.lane.b32.xlu0 %v6702_v9, %s12460_s22  ;;  %v6793_v30 = vpop.xlane.xlu0 %6792 }
0x437c   : > { %12340 = vrcp.f32 %v6793_v30 }
0x437f   : > { %7441 = vrot.lane.b32.xlu0 %v6702_v9, %s12462_s29 }
0x4386   : > { %v12341_v38 = vpop.eup %12340 }
0x4387   : > { %v6795_v9 = vmul.f32 %v12341_v38, %v12337_v26  ;;  %v12189_v26 = vpop.permute.xlu1 %12188 }
0x4388   : > { %v12191_v54 = vunpack.i.h.bf16 %v12189_v26 }
0x43ee   : > { %v6966_v5 = vpop.xlane.xlu0 %6965 }
0x43ef   : > { %12342 = vrcp.f32 %v6966_v5  ;;  %v14654_v5 = vld [vmem:[#allocation25_spill] sm:$0xff] }
0x43f2   : > { %v12179_v56 = vpop.permute.xlu0 %12178 }
0x43f3   : > { %v12181_v2 = vunpack.i.h.bf16 %v12179_v56  ;;  %v12180_v40 = vunpack.i.l.bf16 %v12179_v56  ;;  %v12190_v56 = vunpack.i.l.bf16 %v12189_v26 }
0x43f5   : > { %v11944_v31 = vpack.c.bf16 %v12181_v2, %v12180_v40  ;;  %v11954_v14 = vpack.c.bf16 %v12191_v54, %v12190_v56 }
0x43f7   : > { %11945 = vmatpush3.bf16.msra.mxu1 %v11944_v31 }
0x43f8   : > { %11950 = vmatprep.subr.bf16.mxu1 %v14567_v13 }
0x43f9   : > { %v12343_v53 = vpop.eup %12342 }
0x43fa   : > { %11474 = vmatmul.mubr.msk.f32.vlgmr.msra.gmra.mrb[72].mxu1 %vm14652_vm1, %v6795_v9  ;;  %v6968_v30 = vmul.f32 %v12343_v53, %v12339_v7  ;;  %v12194_v7 = vpop.permute.xlu1 %12193  ;;  %v7195_v53 = vpop.permute.xlu0 %7194 }
0x43fb   : > { %11952 = vmatpush3.bf16.msra.mxu1 %v11951_v51  ;;  %11487 = vmatprep.mubr.msk.f32.mxu1 %vm12452_vm6, %v14565_v60  ;;  %v12196_v31 = vunpack.i.h.bf16 %v12194_v7  ;;  %v12195_v51 = vunpack.i.l.bf16 %v12194_v7 }
0x43fc   : > { %11490 = vmatprep.subr.mxu1 %v14565_v60 }
0x43fd   : > { %v11961_v9 = vpack.c.bf16 %v12196_v31, %v12195_v51 }
0x43fe   : > { %11488 = vmatmul.mubr.msk.f32.vlgmr.msra.gmra.mrb[74].mxu1 %vm14653_vm8, %v6968_v30  ;;  %v7442_v30 = vpop.permute.xlu0 %7441 }
0x43ff   : > { %11491 = vmatpush3.msra.mxu1 %v14654_v5  ;;  %11492 = vmatprep.mubr.msk.f32.mxu1 %vm12452_vm6, %v14565_v60 }
0x4400   : > { %11953 = vmatprep.subr.bf16.mxu1 %v14567_v13 }
0x44cd   : > { %v6871_v2 = vpop.f32.mrb[72].mxu1 }
0x44ce   : > { %v11475_v40 = vpop.f32.mrb[73].mxu1  ;;  %11498 = vmatmul.mubr.msk.f32.vlgmr.msra.gmra.mrb[78].mxu0 %vm729_vm9, %v6871_v2 }
0x44cf   : > { %11511 = vmatprep.mubr.msk.f32.mxu0 %vm12452_vm6, %v14565_v60 }
0x44d1   : > { %v7044_v63 = vpop.f32.mrb[74].mxu1 }
0x44d2   : > { %v11489_v38 = vpop.f32.mrb[75].mxu1  ;;  %11493 = vmatmul.mubr.msk.f32.vlgmr.msra.gmra.mrb[76].mxu1 %vm729_vm9, %v7044_v63 }
0x44d3   : > { %11956 = vmatpush3.bf16.xpose.msk.msra.mxu1 %vm13311_vm14, %v11954_v14  ;;  %11504 = vmatprep.mubr.msk.f32.mxu1 %vm12452_vm6, %v14565_v60 }
0x44d4   : > { %11960 = vmatprep.subr.bf16.mxu1 %v14567_v13 }
0x44da   : > { %11505 = vmatmul.mubr.msk.f32.vlgmr.msra.gmra.mrb[78].mxu1 %vm729_vm9, %v7195_v53 }
0x44db   : > { %11963 = vmatpush3.bf16.xpose.msk.msra.mxu1 %vm13311_vm14, %v11961_v9  ;;  %11523 = vmatprep.mubr.msk.f32.mxu1 %vm12452_vm6, %v14565_v60 }
0x44dc   : > { %11967 = vmatprep.subr.bf16.mxu1 %v14567_v13 }
0x44e2   : > { %11524 = vmatmul.mubr.msk.f32.vlgmr.msra.gmra.mrb[80].mxu1 %vm729_vm9, %v7442_v30 }
0x44e3   : > { %11969 = vmatpush3.bf16.msra.mxu1 %v13415_v49  ;;  %11546 = vmatprep.mubr.msk.f32.mxu1 %vm12452_vm6, %v14565_v60 }
0x44e4   : > { %11970 = vmatprep.subr.bf16.mxu1 %v14567_v13 }
0x44e7   : > { %11972 = vmatpush3.bf16.msra.mxu1 %v13420_v23 }
0x44e8   : > { %11985 = vmatprep.subr.bf16.mxu1 %v14567_v13 }
0x45a1   : > { %v7190_v5 = vpop.f32.mrb[78].mxu0 }
0x45a2   : > { %v11499_v26 = vpop.f32.mrb[79].mxu0 }
0x45a5   : > { %v7117_v54 = vpop.f32.mrb[76].mxu1 }
0x45a6   : > { %v7191_v56 = vadd.f32 %v7190_v5, %v7117_v54  ;;  %v11494_v2 = vpop.f32.mrb[77].mxu1 }
0x45ad   : > { %v7272_v40 = vpop.f32.mrb[78].mxu1 }
0x45ae   : > { %v7276_v14 = vmul.f32 0.35355338, %v7272_v40  ;;  %v11506_v7 = vpop.f32.mrb[79].mxu1 }
0x45b0   : > { %v7277_v63 = vsel %vm1891_vm15, %v7276_v14, -inf }
0x45b1   : > { %7278 = vmax.xlane.f32.xlu1 %v7277_v63 }
0x45b5   : > { %v7519_v49 = vpop.f32.mrb[80].mxu1 }
0x45b6   : > { %v7523_v38 = vmul.f32 0.35355338, %v7519_v49  ;;  %v11525_v31 = vpop.f32.mrb[81].mxu1 }
0x45b8   : > { %v7524_v51 = vsel %vm1891_vm15, %v7523_v38, -inf }
0x45b9   : > { %7525 = vmax.xlane.f32.xlu1 %v7524_v51 }
0x463e   : > { %v7279_v23 = vpop.xlane.xlu1 %7278 }
0x463f   : > { %v7280_v9 = vsub.f32 %v7276_v14, %v7279_v23 }
0x4641   : > { %v7281_v53 = vmul.f32 1.442695, %v7280_v9 }
0x4643   : > { %12344 = vpow2.f32 %v7281_v53 }
0x4646   : > { %v7526_v30 = vpop.xlane.xlu1 %7525 }
0x4647   : > { %v7527_v26 = vsub.f32 %v7523_v38, %v7526_v30 }
0x4649   : > { %v7528_v5 = vmul.f32 1.442695, %v7527_v26 }
0x464b   : > { %12346 = vpow2.f32 %v7528_v5 }
0x464d   : > { %v12345_v54 = vpop.eup %12344 }
0x464e   : > { %v7283_v2 = vsel %vm1891_vm15, %v12345_v54, 0.0 }
0x464f   : > { %7284 = vadd.xlane.f32.xlu0 %v7283_v2 }
0x4655   : > { %v12347_v40 = vpop.eup %12346 }
0x4656   : > { %v7530_v7 = vsel %vm1891_vm15, %v12347_v40, 0.0 }
0x4657   : > { %7531 = vadd.xlane.f32.xlu1 %v7530_v7 }
0x4665   : > { %12198 = vrot.lane.b32.xlu0 %v13928_v61, %s12459_s6 }
0x4668   : > { %12203 = vrot.lane.b32.xlu1 %v13928_v61, %s12461_s8 }
0x46dc   : > { %v7285_v14 = vpop.xlane.xlu0 %7284 }
0x46dd   : > { %12348 = vrcp.f32 %v7285_v14 }
0x46e0   : > { %v12199_v63 = vpop.permute.xlu0 %12198 }
0x46e1   : > { %v12201_v49 = vunpack.i.h.bf16 %v12199_v63  ;;  %v12200_v38 = vunpack.i.l.bf16 %v12199_v63 }
0x46e3   : > { %v11958_v31 = vpack.c.bf16 %v12201_v49, %v12200_v38 }
0x46e4   : > { %v7532_v61 = vpop.xlane.xlu1 %7531 }
0x46e5   : > { %11959 = vmatpush3.bf16.msra.mxu0 %v11958_v31  ;;  %12350 = vrcp.f32 %v7532_v61 }
0x46e6   : > { %11514 = vmatprep.subr.mxu0 %v14565_v60 }
0x46e7   : > { %v12349_v51 = vpop.eup %12348 }
0x46e8   : > { %v7287_v23 = vmul.f32 %v12349_v51, %v12345_v54  ;;  %v12204_v9 = vpop.permute.xlu1 %12203 }
0x46e9   : > { %v12206_v53 = vunpack.i.h.bf16 %v12204_v9  ;;  %v12205_v30 = vunpack.i.l.bf16 %v12204_v9 }
0x46ea   : > { %11512 = vmatmul.mubr.msk.f32.vlgmr.msra.gmra.mrb[80].mxu0 %vm14655_vm2, %v7287_v23 }
0x46eb   : > { %11515 = vmatpush3.msra.mxu0 %v12740_v27  ;;  %11516 = vmatprep.mubr.msk.f32.mxu0 %vm12452_vm6, %v14565_v60  ;;  %v11965_v26 = vpack.c.bf16 %v12206_v53, %v12205_v30 }
0x46ec   : > { %11964 = vmatprep.subr.bf16.mxu0 %v14567_v13 }
0x46ef   : > { %v12351_v5 = vpop.eup %12350 }
0x46f0   : > { %v7534_v54 = vmul.f32 %v12351_v5, %v12347_v40 }
0x47bd   : > { %v7363_v2 = vpop.f32.mrb[80].mxu0 }
0x47be   : > { %v11513_v7 = vpop.f32.mrb[81].mxu0  ;;  %11517 = vmatmul.mubr.msk.f32.vlgmr.msra.gmra.mrb[82].mxu0 %vm729_vm9, %v7363_v2 }
0x47bf   : > { %11966 = vmatpush3.bf16.msra.mxu0 %v11965_v26  ;;  %11530 = vmatprep.mubr.msk.f32.mxu0 %vm12452_vm6, %v14565_v60 }
0x47c0   : > { %11533 = vmatprep.subr.mxu0 %v14565_v60 }
0x47c2   : > { %11531 = vmatmul.mubr.msk.f32.vlgmr.msra.gmra.mrb[84].mxu0 %vm14656_vm3, %v7534_v54 }
0x47c3   : > { %11534 = vmatpush3.msra.mxu0 %v12745_v28  ;;  %11535 = vmatprep.mubr.msk.f32.mxu0 %vm12452_vm6, %v14565_v60 }
0x47c4   : > { %11973 = vmatprep.subr.bf16.mxu0 %v14567_v13 }
0x4891   : > { %v7436_v14 = vpop.f32.mrb[82].mxu0 }
0x4892   : > { %v7440_v63 = vadd.f32 %v7436_v14, %v7191_v56  ;;  %v11518_v49 = vpop.f32.mrb[83].mxu0 }
0x4895   : > { %v7610_v38 = vpop.f32.mrb[84].mxu0 }
0x4896   : > { %v11532_v31 = vpop.f32.mrb[85].mxu0  ;;  %11536 = vmatmul.mubr.msk.f32.vlgmr.msra.gmra.mrb[86].mxu0 %vm729_vm9, %v7610_v38 }
0x4897   : > { %11975 = vmatpush3.bf16.msra.mxu0 %v13427_v3  ;;  %11565 = vmatprep.mubr.msk.f32.mxu0 %vm12452_vm6, %v14565_v60 }
0x4898   : > { %11976 = vmatprep.subr.bf16.mxu0 %v14567_v13 }
0x489b   : > { %11978 = vmatpush3.bf16.msra.mxu0 %v13432_v0 }
0x489c   : > { %11979 = vmatprep.subr.bf16.mxu0 %v14567_v13 }
0x489f   : > { %11981 = vmatpush3.bf16.msra.mxu0 %v13438_v57 }
0x48a0   : > { %11982 = vmatprep.subr.bf16.mxu0 %v14567_v13 }
0x48a3   : > { %11984 = vmatpush3.bf16.msra.mxu0 %v13450_v55 }
0x48a4   : > { %11584 = vmatprep.subr.mxu0 %v14565_v60 }
0x4969   : > { %v7683_v56 = vpop.f32.mrb[86].mxu0 }
0x496a   : > { %v7687_v40 = vadd.f32 %v7683_v56, %v7440_v63  ;;  %v11537_v3 = vpop.f32.mrb[87].mxu0 }
0x496c   : > { %v7688_v51 = vadd.f32 %v12750_v29, %v7687_v40 }
0x496e   : > { %v7689_v23 = vadd.f32 %v7688_v51, %v13939_v21 }
0x4970   : > { %v7690_v61 = vsel %vm1703_vm13, %v7689_v23, 0.0 }
0x4971   : > { %7691 = vadd.xlane.f32.xlu0 %v7690_v61 }
0x49fe   : > { %v7692_v0 = vpop.xlane.xlu0 %7691 }
0x49ff   : > { %v7693_v9 = vmul.f32 0.03125, %v7692_v0 }
0x4a01   : > { %v7694_v53 = vsub.f32 %v7689_v23, %v7693_v9 }
0x4a03   : > { %v7695_v57 = vmul.f32 %v7694_v53, %v7694_v53 }
0x4a05   : > { %v7696_v30 = vsel %vm1703_vm13, %v7695_v57, 0.0 }
0x4a06   : > { %7697 = vadd.xlane.f32.xlu1 %v7696_v30 }
0x4a93   : > { %v7698_v55 = vpop.xlane.xlu1 %7697 }
0x4a94   : > { %v7699_v26 = vmul.f32 0.03125, %v7698_v55 }
0x4a96   : > { %v7700_v5 = vadd.f32 1e-05, %v7699_v26 }
0x4a98   : > { %12352 = vrsqrt.f32 %v7700_v5 }
0x4aa2   : > { %v12353_v2 = vpop.eup %12352 }
0x4aa3   : > { %v7702_v7 = vmul.f32 %v12353_v2, %v7694_v53 }
0x4aa5   : > { %v7703_v54 = vmul.f32 %v12835_v46, %v7702_v7 }
0x4aa7   : > { %v7704_v21 = vadd.f32 %v12840_v47, %v7703_v54 }
0x4aa9   : > { %11547 = vmatmul.mubr.msk.f32.vlgmr.msra.gmra.mrb[82].mxu1 %vm205_vm0, %v7704_v21 }
0x4aaa   : > { %11987 = vmatpush3.bf16.msra.mxu1 %v13463_v6  ;;  %11576 = vmatprep.mubr.msk.f32.mxu1 %vm12452_vm6, %v14565_v60 }
0x4aab   : > { %11988 = vmatprep.subr.bf16.mxu1 %v14567_v13 }
0x4aae   : > { %11990 = vmatpush3.bf16.msra.mxu1 %v13468_v22 }
0x4aaf   : > { %11579 = vmatprep.subr.mxu1 %v14565_v60 }
0x4b7c   : > { %v7774_v14 = vpop.f32.mrb[82].mxu1 }
0x4b7d   : > { %v7775_v63 = vadd.f32 %v12775_v34, %v7774_v14  ;;  %v11548_v49 = vpop.f32.mrb[83].mxu1 }
0x4b7f   : > { %v7778_v38 = vmax.f32 %v7775_v63, 0.0 }
0x4b81   : > { %11566 = vmatmul.mubr.msk.f32.vlgmr.msra.gmra.mrb[88].mxu0 %vm14657_vm5, %v7778_v38 }
0x4b82   : > { %11586 = vmatprep.mubr.msk.f32.mxu0 %vm12452_vm6, %v14565_v60 }
0x4c54   : > { %v7848_v6 = vpop.f32.mrb[88].mxu0 }
0x4c55   : > { %v7849_v31 = vadd.f32 %v12820_v43, %v7848_v6  ;;  %v11567_v56 = vpop.f32.mrb[89].mxu0 }
0x4c57   : > { %v7852_v40 = vadd.f32 %v7849_v31, %v7704_v21 }
0x4c59   : > { %v7853_v3 = vsel %vm1703_vm13, %v7852_v40, 0.0 }
0x4c5a   : > { %7854 = vadd.xlane.f32.xlu0 %v7853_v3 }
0x4ce7   : > { %v7855_v22 = vpop.xlane.xlu0 %7854 }
0x4ce8   : > { %v7856_v51 = vmul.f32 0.03125, %v7855_v22 }
0x4cea   : > { %v7857_v23 = vsub.f32 %v7852_v40, %v7856_v51 }
0x4cec   : > { %v7858_v61 = vmul.f32 %v7857_v23, %v7857_v23 }
0x4cee   : > { %v7859_v0 = vsel %vm1703_vm13, %v7858_v61, 0.0 }
0x4cef   : > { %7860 = vadd.xlane.f32.xlu0 %v7859_v0 }
0x4d7c   : > { %v7861_v9 = vpop.xlane.xlu0 %7860 }
0x4d7d   : > { %v7862_v53 = vmul.f32 0.03125, %v7861_v9 }
0x4d7f   : > { %v7863_v57 = vadd.f32 1e-05, %v7862_v53 }
0x4d81   : > { %12354 = vrsqrt.f32 %v7863_v57 }
0x4d8b   : > { %v12355_v30 = vpop.eup %12354 }
0x4d8c   : > { %v7865_v55 = vmul.f32 %v12355_v30, %v7857_v23 }
0x4d8e   : > { %v7866_v26 = vmul.f32 %v12845_v48, %v7865_v55 }
0x4d90   : > { %v14060_v5 = vadd.f32 %v14591_v62, %v7866_v26 }
0x4d92   : > { %11577 = vmatmul.mubr.msk.f32.vlgmr.msra.gmra.mrb[84].mxu1 %vm205_vm0, %v14060_v5 }
0x4d93   : > { %11581 = vmatprep.mubr.msk.f32.mxu1 %vm12452_vm6, %v14565_v60 }
0x4e65   : > { %v7937_v2 = vpop.f32.mrb[84].mxu1 }
0x4e66   : > { %v14067_v7 = vadd.f32 %v14592_v18, %v7937_v2  ;;  %v11578_v54 = vpop.f32.mrb[85].mxu1 }
0x4e68   : > { %8110 = vrot.lane.b32.xlu1 %v14067_v7, %s12456_s20  ;;  %7942 = vrot.lane.b32.xlu0 %v14067_v7, %s12455_s28 }
0x4e6c   : > { %8108 = vrot.lane.b32.xlu1 %v14067_v7, %s12454_s11 }
0x4eda   : > { %v7943_v21 = vpop.permute.xlu0 %7942  ;;  %v8111_v14 = vpop.permute.xlu1 %8110 }
0x4edb   : > { %11580 = vmatpush3.xpose.msk.msra.mxu1 %vm729_vm9, %v7943_v21 }
0x4edc   : > { %11589 = vmatprep.subr.mxu1 %v14565_v60 }
0x4ede   : > { %11582 = vmatmul.mubr.msk.f32.vlgmr.msra.gmra.mrb[86].mxu1 %vm729_vm9, %v14067_v7  ;;  %v8109_v63 = vpop.permute.xlu1 %8108 }
0x4edf   : > { %11590 = vmatpush3.xpose.msk.msra.mxu1 %vm729_vm9, %v8111_v14  ;;  %11591 = vmatprep.mubr.msk.f32.mxu1 %vm12452_vm6, %v14565_v60 }
0x4ee0   : > { %11599 = vmatprep.subr.mxu1 %v14565_v60 }
0x4ee2   : > { %11592 = vmatmul.mubr.msk.f32.vlgmr.msra.gmra.mrb[88].mxu1 %vm729_vm9, %v8109_v63 }
0x4ee3   : > { %11600 = vmatpush3.msra.mxu1 %v14593_v1  ;;  %11601 = vmatprep.mubr.msk.f32.mxu1 %vm12452_vm6, %v14565_v60 }
0x4ee4   : > { %11609 = vmatprep.subr.mxu1 %v14565_v60 }
0x4fb1   : > { %v8014_v49 = vpop.f32.mrb[86].mxu1 }
0x4fb2   : > { %v8018_v38 = vmul.f32 0.35355338, %v8014_v49  ;;  %v11583_v6 = vpop.f32.mrb[87].mxu1 }
0x4fb4   : > { %v8019_v31 = vadd.f32 %v8018_v38, %v12625_v4 }
0x4fb5   : > { %v8182_v56 = vpop.f32.mrb[88].mxu1 }
0x4fb6   : > { %v8186_v40 = vmul.f32 0.35355338, %v8182_v56  ;;  %v11593_v3 = vpop.f32.mrb[89].mxu1  ;;  %v8020_v22 = vsel %vm806_vm10, %v8019_v31, -inf }
0x4fb7   : > { %8021 = vmax.xlane.f32.xlu0 %v8020_v22 }
0x4fb8   : > { %v8187_v51 = vadd.f32 %v8186_v40, %v12625_v4 }
0x4fba   : > { %v8188_v23 = vsel %vm806_vm10, %v8187_v51, -inf }
0x4fbb   : > { %8189 = vmax.xlane.f32.xlu1 %v8188_v23 }
0x4fcc   : > { %8031 = vrot.lane.b32.xlu1 %v14067_v7, %s12458_s21 }
0x4fd0   : > { %8424 = vrot.lane.b32.xlu1 %v14067_v7, %s12459_s6 }
0x4fd4   : > { %8422 = vrot.lane.b32.xlu1 %v14067_v7, %s12460_s22 }
0x5044   : > { %v8022_v61 = vpop.xlane.xlu0 %8021 }
0x5045   : > { %v8023_v0 = vsub.f32 %v8019_v31, %v8022_v61 }
0x5047   : > { %v8024_v9 = vmul.f32 1.442695, %v8023_v0 }
0x5048   : > { %v8190_v53 = vpop.xlane.xlu1 %8189 }
0x5049   : > { %12356 = vpow2.f32 %v8024_v9  ;;  %v8191_v57 = vsub.f32 %v8187_v51, %v8190_v53 }
0x504b   : > { %v8192_v30 = vmul.f32 1.442695, %v8191_v57 }
0x504c   : > { %v8032_v55 = vpop.permute.xlu1 %8031 }
0x504d   : > { %12358 = vpow2.f32 %v8192_v30  ;;  %11585 = vmatpush3.msk.msra.mxu0 %vm824_vm11, %v8032_v55 }
0x504e   : > { %11594 = vmatprep.subr.mxu0 %v14565_v60 }
0x5050   : > { %v8425_v22 = vpop.permute.xlu1 %8424 }
0x5053   : > { %v12357_v26 = vpop.eup %12356 }
0x5054   : > { %v8026_v2 = vsel %vm806_vm10, %v12357_v26, 0.0  ;;  %v8423_v61 = vpop.permute.xlu1 %8422 }
0x5055   : > { %8027 = vadd.xlane.f32.xlu0 %v8026_v2 }
0x5057   : > { %v12359_v54 = vpop.eup %12358 }
0x5058   : > { %v8194_v21 = vsel %vm806_vm10, %v12359_v54, 0.0 }
0x5059   : > { %8195 = vadd.xlane.f32.xlu0 %v8194_v21 }
0x506f   : > { %8199 = vrot.lane.b32.xlu0 %v14067_v7, %s12457_s15 }
0x50e2   : > { %v8028_v14 = vpop.xlane.xlu0 %8027 }
0x50e3   : > { %12360 = vrcp.f32 %v8028_v14 }
0x50e6   : > { %v8196_v63 = vpop.xlane.xlu0 %8195 }
0x50e7   : > { %12362 = vrcp.f32 %v8196_v63 }
0x50ea   : > { %v8200_v6 = vpop.permute.xlu0 %8199 }
0x50ed   : > { %v12361_v49 = vpop.eup %12360 }
0x50ee   : > { %v8030_v38 = vmul.f32 %v12361_v49, %v12357_v26 }
0x50f0   : > { %11587 = vmatmul.mubr.msk.f32.vlgmr.msra.gmra.mrb[90].mxu0 %vm820_vm12, %v8030_v38 }
0x50f1   : > { %v12363_v31 = vpop.eup %12362  ;;  %11595 = vmatpush3.msk.msra.mxu0 %vm824_vm11, %v8200_v6  ;;  %11596 = vmatprep.mubr.msk.f32.mxu0 %vm12452_vm6, %v14565_v60 }
0x50f2   : > { %v8198_v56 = vmul.f32 %v12363_v31, %v12359_v54  ;;  %11604 = vmatprep.subr.mxu0 %v14565_v60 }
0x50f4   : > { %11597 = vmatmul.mubr.msk.f32.vlgmr.msra.gmra.mrb[92].mxu0 %vm820_vm12, %v8198_v56 }
0x50f5   : > { %11605 = vmatpush3.msra.mxu0 %v14594_v37  ;;  %11606 = vmatprep.mubr.msk.f32.mxu0 %vm12452_vm6, %v14565_v60 }
0x50f6   : > { %11614 = vmatprep.subr.mxu0 %v14565_v60 }
0x51c3   : > { %v8104_v40 = vpop.f32.mrb[90].mxu0 }
0x51c4   : > { %v11588_v3 = vpop.f32.mrb[91].mxu0  ;;  %11607 = vmatmul.mubr.msk.f32.vlgmr.msra.gmra.mrb[94].mxu0 %vm729_vm9, %v8104_v40 }
0x51c5   : > { %11616 = vmatprep.mubr.msk.f32.mxu0 %vm12452_vm6, %v14565_v60 }
0x51c7   : > { %v8272_v51 = vpop.f32.mrb[92].mxu0 }
0x51c8   : > { %v11598_v23 = vpop.f32.mrb[93].mxu0  ;;  %11602 = vmatmul.mubr.msk.f32.vlgmr.msra.gmra.mrb[90].mxu1 %vm729_vm9, %v8272_v51 }
0x51c9   : > { %11610 = vmatpush3.xpose.msk.msra.mxu1 %vm729_vm9, %v8425_v22  ;;  %11611 = vmatprep.mubr.msk.f32.mxu1 %vm12452_vm6, %v14565_v60 }
0x51ca   : > { %11619 = vmatprep.subr.mxu1 %v14565_v60 }
0x51cc   : > { %11612 = vmatmul.mubr.msk.f32.vlgmr.msra.gmra.mrb[92].mxu1 %vm729_vm9, %v8423_v61 }
0x51cd   : > { %11620 = vmatpush3.msra.mxu1 %v14595_v10  ;;  %11621 = vmatprep.mubr.msk.f32.mxu1 %vm12452_vm6, %v14565_v60 }
0x51ce   : > { %11629 = vmatprep.subr.mxu1 %v14565_v60 }
0x5297   : > { %v8418_v0 = vpop.f32.mrb[94].mxu0 }
0x5298   : > { %v11608_v9 = vpop.f32.mrb[95].mxu0 }
0x529b   : > { %v8345_v53 = vpop.f32.mrb[90].mxu1 }
0x529c   : > { %v8419_v57 = vadd.f32 %v8418_v0, %v8345_v53  ;;  %v11603_v30 = vpop.f32.mrb[91].mxu1 }
0x529f   : > { %v8496_v55 = vpop.f32.mrb[92].mxu1 }
0x52a0   : > { %v8500_v26 = vmul.f32 0.35355338, %v8496_v55  ;;  %v11613_v2 = vpop.f32.mrb[93].mxu1 }
0x52a2   : > { %v8501_v54 = vadd.f32 %v8500_v26, %v12625_v4 }
0x52a4   : > { %v8502_v21 = vsel %vm806_vm10, %v8501_v54, -inf }
0x52a5   : > { %8503 = vmax.xlane.f32.xlu0 %v8502_v21 }
0x52bb   : > { %8513 = vrot.lane.b32.xlu0 %v14067_v7, %s12463_s23 }
0x52bf   : > { %8664 = vrot.lane.b32.xlu0 %v14067_v7, %s12462_s29 }
0x5332   : > { %v8504_v14 = vpop.xlane.xlu0 %8503 }
0x5333   : > { %v8505_v63 = vsub.f32 %v8501_v54, %v8504_v14 }
0x5335   : > { %v8506_v49 = vmul.f32 1.442695, %v8505_v63 }
0x5336   : > { %v8514_v38 = vpop.permute.xlu0 %8513 }
0x5337   : > { %12364 = vpow2.f32 %v8506_v49  ;;  %11615 = vmatpush3.msk.msra.mxu0 %vm824_vm11, %v8514_v38 }
0x5338   : > { %11624 = vmatprep.subr.mxu0 %v14565_v60 }
0x533a   : > { %v8665_v51 = vpop.permute.xlu0 %8664 }
0x5341   : > { %v12365_v6 = vpop.eup %12364 }
0x5342   : > { %v8508_v31 = vsel %vm806_vm10, %v12365_v6, 0.0 }
0x5343   : > { %8509 = vadd.xlane.f32.xlu1 %v8508_v31 }
0x5354   : > { %8666 = vrot.lane.b32.xlu1 %v14067_v7, %s12461_s8 }
0x53d0   : > { %v8510_v56 = vpop.xlane.xlu1 %8509 }
0x53d1   : > { %12366 = vrcp.f32 %v8510_v56 }
0x53d4   : > { %v8667_v22 = vpop.permute.xlu1 %8666 }
0x53db   : > { %v12367_v40 = vpop.eup %12366 }
0x53dc   : > { %v8512_v3 = vmul.f32 %v12367_v40, %v12365_v6 }
0x53de   : > { %11617 = vmatmul.mubr.msk.f32.vlgmr.msra.gmra.mrb[96].mxu0 %vm820_vm12, %v8512_v3 }
0x53df   : > { %11625 = vmatpush3.xpose.msk.msra.mxu0 %vm729_vm9, %v8667_v22  ;;  %11626 = vmatprep.mubr.msk.f32.mxu0 %vm12452_vm6, %v14565_v60 }
0x53e0   : > { %11634 = vmatprep.subr.mxu0 %v14565_v60 }
0x53e2   : > { %11627 = vmatmul.mubr.msk.f32.vlgmr.msra.gmra.mrb[98].mxu0 %vm729_vm9, %v8665_v51 }
0x53e3   : > { %11635 = vmatpush3.msra.mxu0 %v14596_v39  ;;  %11636 = vmatprep.mubr.msk.f32.mxu0 %vm12452_vm6, %v14565_v60 }
0x53e4   : > { %11997 = vmatprep.subr.bf16.mxu0 %v14567_v13 }
0x54b1   : > { %v8586_v23 = vpop.f32.mrb[96].mxu0 }
0x54b2   : > { %v11618_v61 = vpop.f32.mrb[97].mxu0  ;;  %11622 = vmatmul.mubr.msk.f32.vlgmr.msra.gmra.mrb[94].mxu1 %vm729_vm9, %v8586_v23 }
0x54b3   : > { %11631 = vmatprep.mubr.msk.f32.mxu1 %vm12452_vm6, %v14565_v60 }
0x54b5   : > { %v8738_v0 = vpop.f32.mrb[98].mxu0 }
0x54b6   : > { %v8742_v9 = vmul.f32 0.35355338, %v8738_v0  ;;  %v11628_v53 = vpop.f32.mrb[99].mxu0 }
0x54b8   : > { %v8743_v30 = vadd.f32 %v8742_v9, %v12625_v4 }
0x54ba   : > { %v8744_v55 = vsel %vm806_vm10, %v8743_v30, -inf }
0x54bb   : > { %8745 = vmax.xlane.f32.xlu1 %v8744_v55  ;;  %v14658_v55 = vld [vmem:[#allocation89_spill] sm:$0xff] }
0x5548   : > { %v8746_v26 = vpop.xlane.xlu1 %8745 }
0x5549   : > { %v8747_v2 = vsub.f32 %v8743_v30, %v8746_v26  ;;  %v14659_v26 = vld [vmem:[#allocation87_spill] sm:$0xff] }
0x554b   : > { %v8748_v54 = vmul.f32 1.442695, %v8747_v2  ;;  %v14174_v2 = vpack.i.bf16 %v14659_v26, %v14658_v55 }
0x554d   : > { %12368 = vpow2.f32 %v8748_v54  ;;  %v11998_v54 = vpack.c.bf16 %v14659_v26, %v14658_v55 }
0x5557   : > { %v12369_v21 = vpop.eup %12368 }
0x5558   : > { %v8750_v14 = vsel %vm806_vm10, %v12369_v21, 0.0  ;;  %vm14661_vm10 = vmmov %vm14652_vm1 }
0x5559   : > { %8751 = vadd.xlane.f32.xlu0 %v8750_v14 }
0x556f   : > { %8755 = vrot.lane.b32.xlu0 %v14067_v7, %s12464_s0 }
0x5585   : > { %v8659_v63 = vpop.f32.mrb[94].mxu1 }
0x5586   : > { %v8663_v49 = vadd.f32 %v8659_v63, %v8419_v57  ;;  %v11623_v38 = vpop.f32.mrb[95].mxu1 }
0x55e6   : > { %v8752_v6 = vpop.xlane.xlu0 %8751 }
0x55e7   : > { %12370 = vrcp.f32 %v8752_v6 }
0x55ea   : > { %v8756_v31 = vpop.permute.xlu0 %8755 }
0x55eb   : > { %11630 = vmatpush3.msk.msra.mxu1 %vm824_vm11, %v8756_v31  ;;  %vm14662_vm11 = vmmov %vm14652_vm1 }
0x55ec   : > { %11991 = vmatprep.subr.bf16.mxu1 %v14567_v13 }
0x55f1   : > { %v12371_v56 = vpop.eup %12370 }
0x55f2   : > { %v8754_v40 = vmul.f32 %v12371_v56, %v12369_v21 }
0x55f4   : > { %11632 = vmatmul.mubr.msk.f32.vlgmr.msra.gmra.mrb[96].mxu1 %vm820_vm12, %v8754_v40  ;;  %vm14664_vm12 = vmmov %vm14652_vm1 }
0x55f5   : > { %11993 = vmatpush3.bf16.msra.mxu1 %v13585_v42  ;;  %11647 = vmatprep.mubr.msk.f32.mxu1 %vm12452_vm6, %v14565_v60 }
0x55f6   : > { %11994 = vmatprep.subr.bf16.mxu1 %v14567_v13 }
0x55f9   : > { %11996 = vmatpush3.bf16.msra.mxu1 %v13590_v11 }
0x55fa   : > { %12001 = vmatprep.subr.bf16.mxu1 %v14567_v13 }
0x56c7   : > { %v8828_v7 = vpop.f32.mrb[96].mxu1 }
0x56c8   : > { %v11633_v57 = vpop.f32.mrb[97].mxu1  ;;  %11637 = vmatmul.mubr.msk.f32.vlgmr.msra.gmra.mrb[100].mxu0 %vm729_vm9, %v8828_v7 }
0x56c9   : > { %11654 = vmatprep.mubr.msk.f32.mxu0 %vm12452_vm6, %v14565_v60  ;;  %12000 = vmatpush3.bf16.xpose.msk.msra.mxu0 %vm13311_vm14, %v11998_v54 }
0x56ca   : > { %12004 = vmatprep.subr.bf16.mxu0 %v14567_v13 }
0x579b   : > { %v8901_v3 = vpop.f32.mrb[100].mxu0 }
0x579c   : > { %v8905_v22 = vadd.f32 %v8901_v3, %v8663_v49  ;;  %v11638_v51 = vpop.f32.mrb[101].mxu0 }
0x579e   : > { %v8906_v42 = vadd.f32 %v14597_v33, %v8905_v22 }
0x57a0   : > { %v8907_v23 = vadd.f32 %v8906_v42, %v14060_v5  ;;  %v14660_v42 = vld [vmem:[#allocation54_spill] sm:$0xff] }
0x57a2   : > { %v8908_v61 = vsel %vm1703_vm13, %v8907_v23, 0.0 }
0x57a3   : > { %8909 = vadd.xlane.f32.xlu1 %v8908_v61 }
0x5830   : > { %v8910_v11 = vpop.xlane.xlu1 %8909 }
0x5831   : > { %v8911_v0 = vmul.f32 0.03125, %v8910_v11 }
0x5833   : > { %v8912_v9 = vsub.f32 %v8907_v23, %v8911_v0 }
0x5835   : > { %v8913_v53 = vmul.f32 %v8912_v9, %v8912_v9 }
0x5837   : > { %v8914_v30 = vsel %vm1703_vm13, %v8913_v53, 0.0 }
0x5838   : > { %8915 = vadd.xlane.f32.xlu1 %v8914_v30 }
0x5849   : > { %12208 = vrot.lane.b32.xlu1 %v14174_v2, %s12454_s11 }
0x58c5   : > { %v8916_v5 = vpop.xlane.xlu1 %8915 }
0x58c6   : > { %v8917_v21 = vmul.f32 0.03125, %v8916_v5 }
0x58c8   : > { %v8918_v14 = vadd.f32 1e-05, %v8917_v21 }
0x58c9   : > { %v12209_v31 = vpop.permute.xlu1 %12208 }
0x58ca   : > { %12372 = vrsqrt.f32 %v8918_v14  ;;  %v12211_v56 = vunpack.i.h.bf16 %v12209_v31  ;;  %v12210_v40 = vunpack.i.l.bf16 %v12209_v31 }
0x58cc   : > { %v12005_v57 = vpack.c.bf16 %v12211_v56, %v12210_v40 }
0x58d4   : > { %v12373_v63 = vpop.eup %12372 }
0x58d5   : > { %v8920_v49 = vmul.f32 %v12373_v63, %v8912_v9 }
0x58d7   : > { %v8921_v38 = vmul.f32 %v14602_v16, %v8920_v49 }
0x58d9   : > { %v14185_v6 = vadd.f32 %v14603_v59, %v8921_v38 }
0x58db   : > { %11648 = vmatmul.mubr.msk.f32.vlgmr.msra.gmra.mrb[98].mxu1 %vm205_vm0, %v14185_v6 }
0x58dc   : > { %11661 = vmatprep.mubr.msk.f32.mxu1 %vm12452_vm6, %v14565_v60 }
0x59ae   : > { %v8992_v7 = vpop.f32.mrb[98].mxu1 }
0x59af   : > { %v8993_v3 = vadd.f32 %v14604_v36, %v8992_v7  ;;  %v11649_v22 = vpop.f32.mrb[99].mxu1 }
0x59b1   : > { %9166 = vrot.lane.b32.xlu0 %v8993_v3, %s12454_s11  ;;  %11655 = vmatmul.mubr.msk.f32.vlgmr.msra.gmra.mrb[102].mxu0 %vm729_vm9, %v8993_v3 }
0x59b2   : > { %12007 = vmatpush3.bf16.xpose.msk.msra.mxu0 %vm13311_vm14, %v12005_v57  ;;  %11668 = vmatprep.mubr.msk.f32.mxu0 %vm12452_vm6, %v14565_v60 }
0x59b3   : > { %11683 = vmatprep.subr.mxu0 %v14565_v60 }
0x5a23   : > { %v9167_v51 = vpop.permute.xlu0 %9166 }
0x5a24   : > { %11669 = vmatmul.mubr.msk.f32.vlgmr.msra.gmra.mrb[104].mxu0 %vm729_vm9, %v9167_v51 }
0x5a25   : > { %11684 = vmatpush3.msra.mxu0 %v14660_v42  ;;  %11685 = vmatprep.mubr.msk.f32.mxu0 %vm12452_vm6, %v14565_v60 }
0x5a26   : > { %12015 = vmatprep.subr.bf16.mxu0 %v14567_v13 }
0x5a84   : > { %v9071_v23 = vpop.f32.mrb[102].mxu0 }
0x5a85   : > { %v9075_v61 = vmul.f32 0.35355338, %v9071_v23  ;;  %v11656_v11 = vpop.f32.mrb[103].mxu0 }
0x5a87   : > { %v9076_v0 = vsel %vm1891_vm15, %v9075_v61, -inf }
0x5a88   : > { %9077 = vmax.xlane.f32.xlu0 %v9076_v0 }
0x5af7   : > { %v9244_v9 = vpop.f32.mrb[104].mxu0 }
0x5af8   : > { %v9248_v53 = vmul.f32 0.35355338, %v9244_v9  ;;  %v11670_v30 = vpop.f32.mrb[105].mxu0 }
0x5afa   : > { %v9249_v54 = vsel %vm1891_vm15, %v9248_v53, -inf }
0x5afb   : > { %9250 = vmax.xlane.f32.xlu1 %v9249_v54 }
0x5b0c   : > { %12213 = vrot.lane.b32.xlu1 %v14174_v2, %s12455_s28 }
0x5b10   : > { %12223 = vrot.lane.b32.xlu1 %v14174_v2, %s12460_s22 }
0x5b14   : > { %9485 = vrot.lane.b32.xlu1 %v8993_v3, %s12460_s22 }
0x5b15   : > { %v9078_v5 = vpop.xlane.xlu0 %9077 }
0x5b16   : > { %v9079_v21 = vsub.f32 %v9075_v61, %v9078_v5 }
0x5b18   : > { %v9080_v14 = vmul.f32 1.442695, %v9079_v21  ;;  %9732 = vrot.lane.b32.xlu1 %v8993_v3, %s12462_s29  ;;  %v14663_v21 = vld [vmem:[#allocation55_spill] sm:$0xff] }
0x5b1a   : > { %12374 = vpow2.f32 %v9080_v14 }
0x5b24   : > { %v12375_v63 = vpop.eup %12374 }
0x5b25   : > { %v9082_v49 = vsel %vm1891_vm15, %v12375_v63, 0.0 }
0x5b26   : > { %9083 = vadd.xlane.f32.xlu0 %v9082_v49 }
0x5b88   : > { %v9251_v38 = vpop.xlane.xlu1 %9250 }
0x5b89   : > { %v9252_v31 = vsub.f32 %v9248_v53, %v9251_v38 }
0x5b8b   : > { %v9253_v56 = vmul.f32 1.442695, %v9252_v31 }
0x5b8c   : > { %v12214_v40 = vpop.permute.xlu1 %12213 }
0x5b8d   : > { %12376 = vpow2.f32 %v9253_v56  ;;  %v12216_v7 = vunpack.i.h.bf16 %v12214_v40  ;;  %v12215_v57 = vunpack.i.l.bf16 %v12214_v40 }
0x5b8f   : > { %v12002_v22 = vpack.c.bf16 %v12216_v7, %v12215_v57 }
0x5b90   : > { %v12224_v49 = vpop.permute.xlu1 %12223 }
0x5b91   : > { %12003 = vmatpush3.bf16.msra.mxu1 %v12002_v22  ;;  %v12226_v38 = vunpack.i.h.bf16 %v12224_v49  ;;  %v12225_v31 = vunpack.i.l.bf16 %v12224_v49 }
0x5b92   : > { %12008 = vmatprep.subr.bf16.mxu1 %v14567_v13 }
0x5b93   : > { %v12012_v56 = vpack.c.bf16 %v12226_v38, %v12225_v31 }
0x5b97   : > { %v12377_v51 = vpop.eup %12376 }
0x5b98   : > { %v9255_v42 = vsel %vm1891_vm15, %v12377_v51, 0.0 }
0x5b99   : > { %9256 = vadd.xlane.f32.xlu0 %v9255_v42 }
0x5baf   : > { %12218 = vrot.lane.b32.xlu0 %v14174_v2, %s12456_s20 }
0x5bb3   : > { %v9084_v3 = vpop.xlane.xlu0 %9083  ;;  %12228 = vrot.lane.b32.xlu0 %v14174_v2, %s12462_s29 }
0x5bb4   : > { %12378 = vrcp.f32 %v9084_v3  ;;  %v9486_v3 = vpop.permute.xlu1 %9485 }
0x5bbe   : > { %v12379_v23 = vpop.eup %12378 }
0x5bbf   : > { %v9086_v61 = vmul.f32 %v12379_v23, %v12375_v63  ;;  %v9733_v23 = vpop.permute.xlu1 %9732 }
0x5bc1   : > { %11662 = vmatmul.mubr.msk.f32.vlgmr.msra.gmra.mrb[100].mxu1 %vm14661_vm10, %v9086_v61 }
0x5bc2   : > { %11675 = vmatprep.mubr.msk.f32.mxu1 %vm12452_vm6, %v14565_v60 }
0x5c26   : > { %v9257_v11 = vpop.xlane.xlu0 %9256 }
0x5c27   : > { %12380 = vrcp.f32 %v9257_v11 }
0x5c2a   : > { %v12219_v0 = vpop.permute.xlu0 %12218 }
0x5c2b   : > { %v12221_v9 = vunpack.i.h.bf16 %v12219_v0  ;;  %v12220_v53 = vunpack.i.l.bf16 %v12219_v0 }
0x5c2d   : > { %v12009_v30 = vpack.c.bf16 %v12221_v9, %v12220_v53 }
0x5c2e   : > { %v12229_v40 = vpop.permute.xlu0 %12228 }
0x5c2f   : > { %12010 = vmatpush3.bf16.msra.mxu1 %v12009_v30  ;;  %v12231_v22 = vunpack.i.h.bf16 %v12229_v40 }
0x5c30   : > { %11678 = vmatprep.subr.mxu1 %v14565_v60 }
0x5c31   : > { %v12381_v54 = vpop.eup %12380 }
0x5c32   : > { %v9259_v5 = vmul.f32 %v12381_v54, %v12377_v51  ;;  %v12230_v51 = vunpack.i.l.bf16 %v12229_v40 }
0x5c34   : > { %11676 = vmatmul.mubr.msk.f32.vlgmr.msra.gmra.mrb[102].mxu1 %vm14662_vm11, %v9259_v5  ;;  %v12019_v42 = vpack.c.bf16 %v12231_v22, %v12230_v51 }
0x5c35   : > { %11679 = vmatpush3.msra.mxu1 %v14663_v21  ;;  %11680 = vmatprep.mubr.msk.f32.mxu1 %vm12452_vm6, %v14565_v60 }
0x5c36   : > { %12011 = vmatprep.subr.bf16.mxu1 %v14567_v13 }
0x5c94   : > { %v9162_v14 = vpop.f32.mrb[100].mxu1 }
0x5c95   : > { %v11663_v63 = vpop.f32.mrb[101].mxu1  ;;  %11686 = vmatmul.mubr.msk.f32.vlgmr.msra.gmra.mrb[106].mxu0 %vm729_vm9, %v9162_v14 }
0x5c96   : > { %11699 = vmatprep.mubr.msk.f32.mxu0 %vm12452_vm6, %v14565_v60 }
0x5d07   : > { %v9335_v7 = vpop.f32.mrb[102].mxu1 }
0x5d08   : > { %v11677_v57 = vpop.f32.mrb[103].mxu1  ;;  %11681 = vmatmul.mubr.msk.f32.vlgmr.msra.gmra.mrb[104].mxu1 %vm729_vm9, %v9335_v7 }
0x5d09   : > { %12014 = vmatpush3.bf16.xpose.msk.msra.mxu1 %vm13311_vm14, %v12012_v56  ;;  %11692 = vmatprep.mubr.msk.f32.mxu1 %vm12452_vm6, %v14565_v60 }
0x5d0a   : > { %12018 = vmatprep.subr.bf16.mxu1 %v14567_v13 }
0x5d10   : > { %11693 = vmatmul.mubr.msk.f32.vlgmr.msra.gmra.mrb[106].mxu1 %vm729_vm9, %v9486_v3 }
0x5d11   : > { %12021 = vmatpush3.bf16.xpose.msk.msra.mxu1 %vm13311_vm14, %v12019_v42  ;;  %11711 = vmatprep.mubr.msk.f32.mxu1 %vm12452_vm6, %v14565_v60  ;;  %vm14666_vm14 = vmmov %vm14652_vm1 }
0x5d12   : > { %12025 = vmatprep.subr.bf16.mxu1 %v14567_v13 }
0x5d18   : > { %11712 = vmatmul.mubr.msk.f32.vlgmr.msra.gmra.mrb[108].mxu1 %vm729_vm9, %v9733_v23 }
0x5d19   : > { %12027 = vmatpush3.bf16.msra.mxu1 %v13701_v41  ;;  %11734 = vmatprep.mubr.msk.f32.mxu1 %vm12452_vm6, %v14565_v60 }
0x5d1a   : > { %12028 = vmatprep.subr.bf16.mxu1 %v14567_v13 }
0x5d1d   : > { %12030 = vmatpush3.bf16.msra.mxu1 %v13706_v35 }
0x5d1e   : > { %12043 = vmatprep.subr.bf16.mxu1 %v14567_v13 }
0x5d68   : > { %v9481_v12 = vpop.f32.mrb[106].mxu0 }
0x5d69   : > { %v11687_v61 = vpop.f32.mrb[107].mxu0 }
0x5ddb   : > { %v9408_v11 = vpop.f32.mrb[104].mxu1 }
0x5ddc   : > { %v9482_v0 = vadd.f32 %v9481_v12, %v9408_v11  ;;  %v11682_v9 = vpop.f32.mrb[105].mxu1  ;;  %v14665_v11 = vld [vmem:[#allocation56_spill] sm:$0xff] }
0x5de3   : > { %v9563_v53 = vpop.f32.mrb[106].mxu1 }
0x5de4   : > { %v9567_v30 = vmul.f32 0.35355338, %v9563_v53  ;;  %v11694_v54 = vpop.f32.mrb[107].mxu1 }
0x5de6   : > { %v9568_v5 = vsel %vm1891_vm15, %v9567_v30, -inf }
0x5de7   : > { %9569 = vmax.xlane.f32.xlu0 %v9568_v5 }
0x5deb   : > { %v9810_v41 = vpop.f32.mrb[108].mxu1 }
0x5dec   : > { %v11713_v21 = vpop.f32.mrb[109].mxu1  ;;  %v9814_v38 = vmul.f32 0.35355338, %v9810_v41 }
0x5dee   : > { %v9815_v56 = vsel %vm1891_vm15, %v9814_v38, -inf }
0x5dfd   : > { %12233 = vrot.lane.b32.xlu0 %v14174_v2, %s12459_s6 }
0x5e74   : > { %v9570_v14 = vpop.xlane.xlu0 %9569 }
0x5e75   : > { %v9571_v35 = vsub.f32 %v9567_v30, %v9570_v14 }
0x5e77   : > { %v9572_v63 = vmul.f32 1.442695, %v9571_v35 }
0x5e78   : > { %v12234_v40 = vpop.permute.xlu0 %12233 }
0x5e79   : > { %12382 = vpow2.f32 %v9572_v63  ;;  %v12236_v7 = vunpack.i.h.bf16 %v12234_v40  ;;  %v12235_v57 = vunpack.i.l.bf16 %v12234_v40 }
0x5e7b   : > { %v12016_v22 = vpack.c.bf16 %v12236_v7, %v12235_v57  ;;  %v14668_v57 = vld [vmem:[#allocation91_spill] sm:$0xff] }
0x5e7d   : > { %12017 = vmatpush3.bf16.msra.mxu0 %v12016_v22  ;;  %v14669_v22 = vld [vmem:[#allocation92_spill] sm:$0xff] }
0x5e7e   : > { %11702 = vmatprep.subr.mxu0 %v14565_v60 }
0x5e83   : > { %v12383_v49 = vpop.eup %12382 }
0x5e84   : > { %v9574_v31 = vsel %vm1891_vm15, %v12383_v49, 0.0 }
0x5e85   : > { %9575 = vadd.xlane.f32.xlu1 %v9574_v31 }
0x5e89   : > { %9816 = vmax.xlane.f32.xlu1 %v9815_v56 }
0x5f12   : > { %v9576_v51 = vpop.xlane.xlu1 %9575 }
0x5f13   : > { %12384 = vrcp.f32 %v9576_v51  ;;  %v14670_v51 = vld [vmem:[#allocation93_spill] sm:$0xff] }
0x5f16   : > { %v9817_v42 = vpop.xlane.xlu1 %9816 }
0x5f17   : > { %v9818_v3 = vsub.f32 %v9814_v38, %v9817_v42 }
0x5f19   : > { %v9819_v23 = vmul.f32 1.442695, %v9818_v3 }
0x5f1b   : > { %12386 = vpow2.f32 %v9819_v23 }
0x5f1d   : > { %v12385_v12 = vpop.eup %12384 }
0x5f1e   : > { %v9578_v61 = vmul.f32 %v12385_v12, %v12383_v49  ;;  %v14672_v12 = vld [vmem:[#allocation58_spill] sm:$0xff] }
0x5f20   : > { %11700 = vmatmul.mubr.msk.f32.vlgmr.msra.gmra.mrb[108].mxu0 %vm14664_vm12, %v9578_v61 }
0x5f21   : > { %11703 = vmatpush3.msra.mxu0 %v14665_v11  ;;  %11704 = vmatprep.mubr.msk.f32.mxu0 %vm12452_vm6, %v14565_v60 }
0x5f22   : > { %12022 = vmatprep.subr.bf16.mxu0 %v14567_v13 }
0x5f25   : > { %v12387_v9 = vpop.eup %12386 }
0x5f26   : > { %v9821_v53 = vsel %vm1891_vm15, %v12387_v9, 0.0 }
0x5f27   : > { %9822 = vadd.xlane.f32.xlu1 %v9821_v53 }
0x5f38   : > { %12238 = vrot.lane.b32.xlu1 %v14174_v2, %s12461_s8  ;;  %v14667_v2 = vld [vmem:[#allocation57_spill] sm:$0xff] }
0x5fb4   : > { %v9823_v30 = vpop.xlane.xlu1 %9822 }
0x5fb5   : > { %12388 = vrcp.f32 %v9823_v30 }
0x5fb8   : > { %v12239_v54 = vpop.permute.xlu1 %12238 }
0x5fb9   : > { %v12241_v5 = vunpack.i.h.bf16 %v12239_v54  ;;  %v12240_v41 = vunpack.i.l.bf16 %v12239_v54 }
0x5fbb   : > { %v12023_v21 = vpack.c.bf16 %v12241_v5, %v12240_v41 }
0x5fbf   : > { %v12389_v14 = vpop.eup %12388 }
0x5fc0   : > { %v9825_v49 = vmul.f32 %v12389_v14, %v12387_v9 }
0x5ff3   : > { %v9654_v35 = vpop.f32.mrb[108].mxu0 }
0x5ff4   : > { %v11701_v63 = vpop.f32.mrb[109].mxu0  ;;  %11705 = vmatmul.mubr.msk.f32.vlgmr.msra.gmra.mrb[110].mxu0 %vm729_vm9, %v9654_v35 }
0x5ff5   : > { %12024 = vmatpush3.bf16.msra.mxu0 %v12023_v21  ;;  %11718 = vmatprep.mubr.msk.f32.mxu0 %vm12452_vm6, %v14565_v60 }
0x5ff6   : > { %11721 = vmatprep.subr.mxu0 %v14565_v60 }
0x5ff8   : > { %11719 = vmatmul.mubr.msk.f32.vlgmr.msra.gmra.mrb[112].mxu0 %vm14666_vm14, %v9825_v49  ;;  %vm10271_vm14 = vcmask (%p562_p0), 33792  }
0x5ff9   : > { %11722 = vmatpush3.msra.mxu0 %v14667_v2  ;;  %11723 = vmatprep.mubr.msk.f32.mxu0 %vm12452_vm6, %v14565_v60  ;;  %v14673_v2 = vld [vmem:[#allocation75_spill] sm:$0xff] }
0x5ffa   : > { %12031 = vmatprep.subr.bf16.mxu0 %v14567_v13 }
0x60c7   : > { %v9727_v38 = vpop.f32.mrb[110].mxu0 }
0x60c8   : > { %v9731_v31 = vadd.f32 %v9727_v38, %v9482_v0  ;;  %v11706_v56 = vpop.f32.mrb[111].mxu0  ;;  %v14671_v0 = vld [vmem:[#allocation94_spill] sm:$0xff] }
0x60c9   : > { %v14675_v56 = vld [vmem:[#allocation95_spill] sm:$0xff] }
0x60cb   : > { %v9901_v40 = vpop.f32.mrb[112].mxu0 }
0x60cc   : > { %v11720_v7 = vpop.f32.mrb[113].mxu0  ;;  %11724 = vmatmul.mubr.msk.f32.vlgmr.msra.gmra.mrb[114].mxu0 %vm729_vm9, %v9901_v40  ;;  %v14676_v40 = vld [vmem:[#allocation96_spill] sm:$0xff]  ;;  %vm14678_vm9 = vmmov %vm14657_vm5 }
0x60cd   : > { %12033 = vmatpush3.bf16.msra.mxu0 %v14668_v57  ;;  %11753 = vmatprep.mubr.msk.f32.mxu0 %vm12452_vm6, %v14565_v60  ;;  %v14677_v57 = vld [vmem:[#allocation63_spill] sm:$0xff] }
0x60ce   : > { %12034 = vmatprep.subr.bf16.mxu0 %v14567_v13 }
0x60d1   : > { %12036 = vmatpush3.bf16.msra.mxu0 %v14669_v22 }
0x60d2   : > { %12037 = vmatprep.subr.bf16.mxu0 %v14567_v13 }
0x60d5   : > { %12039 = vmatpush3.bf16.msra.mxu0 %v14670_v51 }
0x60d6   : > { %12040 = vmatprep.subr.bf16.mxu0 %v14567_v13 }
0x60d9   : > { %12042 = vmatpush3.bf16.msra.mxu0 %v14671_v0 }
0x619f   : > { %v9974_v42 = vpop.f32.mrb[114].mxu0 }
0x61a0   : > { %v9978_v3 = vadd.f32 %v9974_v42, %v9731_v31  ;;  %v11725_v23 = vpop.f32.mrb[115].mxu0  ;;  %v14674_v31 = vld [vmem:[#allocation76_spill] sm:$0xff] }
0x61a2   : > { %v9979_v61 = vadd.f32 %v14672_v12, %v9978_v3  ;;  %v14679_v3 = vld [vmem:[#allocation72_spill] sm:$0xff] }
0x61a4   : > { %v9980_v11 = vadd.f32 %v9979_v61, %v14185_v6 }
0x61a6   : > { %v9981_v9 = vsel %vm1703_vm13, %v9980_v11, 0.0 }
0x61a7   : > { %9982 = vadd.xlane.f32.xlu0 %v9981_v9 }
0x6234   : > { %v9983_v53 = vpop.xlane.xlu0 %9982 }
0x6235   : > { %v9984_v30 = vmul.f32 0.03125, %v9983_v53 }
0x6237   : > { %v9985_v54 = vsub.f32 %v9980_v11, %v9984_v30 }
0x6239   : > { %v9986_v5 = vmul.f32 %v9985_v54, %v9985_v54 }
0x623b   : > { %v9987_v41 = vsel %vm1703_vm13, %v9986_v5, 0.0 }
0x623c   : > { %9988 = vadd.xlane.f32.xlu1 %v9987_v41 }
0x62c9   : > { %v9989_v21 = vpop.xlane.xlu1 %9988 }
0x62ca   : > { %v9990_v14 = vmul.f32 0.03125, %v9989_v21 }
0x62cc   : > { %v9991_v35 = vadd.f32 1e-05, %v9990_v14 }
0x62ce   : > { %12390 = vrsqrt.f32 %v9991_v35 }
0x62d8   : > { %v12391_v63 = vpop.eup %12390 }
0x62d9   : > { %v9993_v49 = vmul.f32 %v12391_v63, %v9985_v54 }
0x62db   : > { %v9994_v38 = vmul.f32 %v14673_v2, %v9993_v49 }
0x62dd   : > { %v9995_v6 = vadd.f32 %v14674_v31, %v9994_v38 }
0x62df   : > { %11735 = vmatmul.mubr.msk.f32.vlgmr.msra.gmra.mrb[110].mxu1 %vm205_vm0, %v9995_v6 }
0x62e0   : > { %12045 = vmatpush3.bf16.msra.mxu1 %v14675_v56  ;;  %11764 = vmatprep.mubr.msk.f32.mxu1 %vm12452_vm6, %v14565_v60  ;;  %vm14680_vm6 = vcmask 155648  }
0x62e1   : > { %12046 = vmatprep.subr.bf16.mxu1 %v14567_v13 }
0x62e4   : > { %12048 = vmatpush3.bf16.msra.mxu1 %v14676_v40 }
0x63b2   : > { %v10065_v7 = vpop.f32.mrb[110].mxu1 }
0x63b3   : > { %v10066_v22 = vadd.f32 %v14677_v57, %v10065_v7  ;;  %v11736_v51 = vpop.f32.mrb[111].mxu1 }
0x63b5   : > { %v10069_v0 = vmax.f32 %v10066_v22, 0.0 }
0x63b7   : > { %11754 = vmatmul.mubr.msk.f32.vlgmr.msra.gmra.mrb[116].mxu0 %vm14678_vm9, %v10069_v0 }
0x648a   : > { %v10139_v42 = vpop.f32.mrb[116].mxu0 }
0x648b   : > { %v10140_v23 = vadd.f32 %v14679_v3, %v10139_v42  ;;  %v11755_v12 = vpop.f32.mrb[117].mxu0  ;;  %v14681_v3 = vld [vmem:[#allocation80_spill] sm:$0xff] }
0x648d   : > { %v10143_v61 = vadd.f32 %v10140_v23, %v9995_v6  ;;  %v14682_v23 = vcvt.s32.f32 %v14681_v3 }
0x648f   : > { %v10144_v11 = vsel %vm1703_vm13, %v10143_v61, 0.0 }
0x6490   : > { %10145 = vadd.xlane.f32.xlu0 %v10144_v11  ;;  %v14684_v11 = vstv %s12448_s14  ;;  %s14694_s14 = smov %s13788_s9 }
0x6491   : > { %vm5494_vm7 = vcmp.eq.s32.totalorder %v14681_v3, %v14684_v11 }
0x651d   : > { %v10146_v9 = vpop.xlane.xlu0 %10145 }
0x651e   : > { %v10147_v53 = vmul.f32 0.03125, %v10146_v9  ;;  %v14685_v9 = vld [vmem:[#allocation79_spill] sm:$0xff] }
0x651f   : > { %vm14686_vm4 = vcmp.eq.s32.totalorder %v14685_v9, 0  ;;  %vm10266_vm8 = vcmp.eq.s32.totalorder %v14685_v9, 1 }
0x6520   : > { %v10148_v13 = vsub.f32 %v10143_v61, %v10147_v53  ;;  %vm5495_vm1 = vmand %vm14686_vm4, %vm5494_vm7  ;;  %v12465_v53 = vmov 0  }
0x6521   : > { %vm10267_vm2 = vmand %vm10266_vm8, %vm5494_vm7 }
0x6522   : > { %v10149_v30 = vmul.f32 %v10148_v13, %v10148_v13 }
0x6524   : > { %v10150_v54 = vsel %vm1703_vm13, %v10149_v30, 0.0 }
0x6525   : > { %10151 = vadd.xlane.f32.xlu0 %v10150_v54 }
0x65b2   : > { %v10152_v5 = vpop.xlane.xlu0 %10151 }
0x65b3   : > { %v10153_v41 = vmul.f32 0.03125, %v10152_v5  ;;  %v10250_v5 = vstv %s10249_s4 }
0x65b4   : > { %vm10251_vm3 = vcmp.eq.s32.totalorder %v14685_v9, %v10250_v5 }
0x65b5   : > { %v10154_v21 = vadd.f32 1e-05, %v10153_v41  ;;  %v14687_v41 = vld [vmem:[#allocation97_spill] sm:$0xff] }
0x65b7   : > { %12392 = vrsqrt.f32 %v10154_v21 }
0x65c1   : > { %v12393_v14 = vpop.eup %12392 }
0x65c2   : > { %v10156_v35 = vmul.f32 %v12393_v14, %v10148_v13  ;;  %v5496_v13 = vsel %vm5495_vm1, 1, %v12465_v53 }
0x65c3   : > { %v5497_v21 = vmul.u32 %v5496_v13, %v14687_v41 }
0x65c4   : > { %v10157_v63 = vmul.f32 %v14637_v8, %v10156_v35  ;;  %v10268_v35 = vsel %vm10267_vm2, 1, %v12465_v53 }
0x65c6   : > { %v10158_v49 = vadd.f32 %v14638_v52, %v10157_v63  ;;  %v14688_v63 = vsub.s32 0, %v14685_v9 }
0x65c8   : > { %v10159_v2 = vmul.f32 %v13769_v32, %v10158_v49 }
0x65ca   : > { %v10160_v38 = vsel %vm1703_vm13, %v10159_v2, 0.0  ;;  %vm14683_vm13 = vmmov %vm14680_vm6  ;;  %v14689_v2 = vld [vmem:[#allocation81_spill] sm:$0xff] }
0x65cb   : > { %v10161_v31 = vrot.slane %v10160_v38, 4  ;;  %vm10252_vm5 = vcmp.eq.s32.totalorder %v14689_v2, %v10250_v5 }
0x65cd   : > { %v10162_v6 = vadd.f32 %v10161_v31, %v10160_v38  ;;  %v14690_v38 = vld [vmem:[#allocation90_spill] sm:$0xff] }
0x65ce   : > { %v5498_v31 = vadd.s32 %v14690_v38, %v5497_v21 }
0x65cf   : > { %v10163_v56 = vrot.slane %v10162_v6, 2 }
0x65d1   : > { %v10164_v40 = vadd.f32 %v10163_v56, %v10162_v6 }
0x65d3   : > { %v10165_v7 = vrot.slane %v10164_v40, 1 }
0x65d5   : > { %v10166_v57 = vadd.f32 %v10165_v7, %v10164_v40 }
0x65d7   : > { %11765 = vmatmul.mubr.msk.f32.vlgmr.msra.gmra.mrb[112].mxu1 %vm205_vm0, %v10166_v57  ;;  %v14691_v57 = vld [vmem:[#allocation98_spill] sm:$0xff] }
0x66aa   : > { %v10236_v22 = vpop.f32.mrb[112].mxu1 }
0x66ab   : > { %v10237_v51 = vadd.f32 %v10236_v22, %v14639_v20  ;;  %v11766_v0 = vpop.f32.mrb[113].mxu1  ;;  %v14692_v22 = vld [vmem:[#allocation99_spill] sm:$0xff] }
0x66ad   : > { %v10240_v42 = vsel %vm14680_vm6, %v10237_v51, -inf }
0x66ae   : > { %10241 = vmax.xlane.f32.xlu0 %v10240_v42 }
0x673b   : > { %v10242_v32 = vpop.xlane.xlu0 %10241 }
0x673c   : > { %vm10243_vm15 = vcmp.eq.f32.partialorder %v10237_v51, %v10242_v32 }
0x673d   : > { %v10244_v12 = vsel %vm10243_vm15, %v14682_v23, 20.0 }
0x673e   : > { %v10245_v61 = vsel %vm14683_vm13, %v10244_v12, inf }
0x673f   : > { %10246 = vmin.xlane.f32.xlu0 %v10245_v61 }
0x67cc   : > { %v10247_v30 = vpop.xlane.xlu0 %10246 }
0x67cd   : > { %v12051_v54 = vtrunc.f32 %v10247_v30 }
0x67cf   : > { %v12052_v14 = vcvt.f32.s32 %v12051_v54 }
0x67d1   : > { %v10256_v49 = vrot.slane %v12052_v14, %v14688_v63  ;;  %564 = sbr.rel (!%p562_p0) target bundleno = 291 (0x123), region = 151 }
0x67d3   : > { %vm10257_vm10 = vcmp.eq.s32.totalorder %v14681_v3, %v10256_v49  ;;  %v10269_v6 = vmul.u32 %v10268_v35, %v10256_v49 }
0x67d4   : > { %vm10258_vm11 = vmand %vm10251_vm3, %vm10257_vm10 }
0x67d5   : > { %vm10259_vm12 = vmand %vm10252_vm5, %vm10257_vm10  ;;  %v10567_v56 = vsel %vm10258_vm11, 1.0, %v14565_v60  ;;  %v10270_v40 = vadd.s32 %v10269_v6, %v5498_v31  }
0x67d6   : > { %v10568_v7 = vsel %vm10259_vm12, 1.0, %v14565_v60  ;;  %v10264_v61 = vadd.f32 %v10567_v56, %v14691_v57  }
0x67d7   : > { %v10265_v54 = vadd.f32 %v10568_v7, %v14692_v22   ;;  %v14693_v56 = vmov %v10270_v40  ;;  %10272 = vst.msk [vmem:[#allocation2] sm:$0x3] (%p562_p0), %vm10271_vm14, %v10270_v40 }
0x67d8   :  { %12405 = shalt.err (!%p12402_p5)
}
0x67d9   :  { %s12406_s10 = scalar_lea.hbm %s14376_s26, 32 }
0x67da   :  { %p12407_p6 = scmp.ne.s32.totalorder %s14376_s26, %s12406_s10  ;;  %p12410_p7 = scmp.lt.u32.totalorder %s12406_s10, %s14376_s26 }
0x67dc   :  { %p12412_p8 = pnand %p12410_p7, %p12407_p6 }
0x67de   :  { %12415 = shalt.err (!%p12412_p8)
}
0x67df   :  { %10282 = dma.vmem_to_hbm [thread:$0]  %s10280_s24, 32, %s14376_s26, [#allocation3]  }
0x67e0   :  { %12432 = dma.done.wait [#allocation3], 32  }
0x67e1   :  { %12433 = vsyncadd [#allocation3], 4294967264 }
0x67e2   :  { %10286 = vsyncpa [#allocation3], 1 }

</bundles_post_ra>
